<compile_context>
chip_gen: v7x
topology: tpu7x:2x2x1
jax: 0.10.0
libtpu: 0.0.40
codegen_flags: <defaults>
</compile_context>

<pallas_src>
import functools

import jax
import jax.numpy as jnp
from jax.experimental import pallas as pl
from jax.experimental.pallas import tpu as pltpu

LANE = 128                      # lane width: pad all Cout dims to this


def _round_up(x, m):
    return (x + m - 1) // m * m


@functools.lru_cache(maxsize=None)
def _vmem_limit():
    """Generation-aware VMEM budget (~75% of physical: 48 MiB on v7x,
    96 MiB on v5e/v6e)."""
    try:
        cap = pltpu.get_tpu_info().vmem_capacity_bytes
        return int(cap * 3 // 4)
    except Exception:  # pragma: no cover - conservative fallback
        return 48 * 1024 * 1024


def _pick_h_tile(h, w, target_m):
    """Largest divisor of h whose row-tile keeps th*w <= target_m.

    Keeps the grid exact while making the per-tile matmul M dim as large as
    allowed (fills the 256-wide MXU on v6e/v7x when target_m >= 256)."""
    limit = max(1, target_m // max(w, 1))
    best = 1
    for t in range(1, h + 1):
        if h % t == 0 and t <= limit:
            best = t
    return best


# ----------------------------------------------------------------------------
# Kernel 1: fused 1x1 convs (= one channel matmul) + bias + ReLU on an
# (N, H-tile) grid, emitting one lane-dense NHWC buffer per branch *group*.
# ----------------------------------------------------------------------------
def _pointwise_groups_kernel(x_ref, w_ref, b_ref, *out_refs, widths):
    # x_ref: (th, W, Cin)   w_ref: (Cin, sum(widths))   b_ref: (1, 1, sum(widths))
    # out_refs[g]: (th, W, widths[g])  -- 128-aligned lane slices of y.
    y = jax.lax.dot_general(
        x_ref[...], w_ref[...],
        dimension_numbers=(((2,), (0,)), ((), ())),
        preferred_element_type=jnp.float32)
    y = jnp.maximum(y + b_ref[...], 0.0)
    off = 0
    for ref, wd in zip(out_refs, widths):
        ref[...] = y[..., off:off + wd].astype(ref.dtype)
        off += wd


def fused_pointwise_conv_relu(x_nhwc, groups, out_dtype):
    """x: (N,H,W,Cin).  groups: list of lists of (w (Cin,ck), b (ck,)).

    Returns (list of (N,H,W,round_up(sum ck, 128)) arrays, widths).  Inside a
    group the branch channels are packed contiguously starting at offset 0."""
    N, H, W, Cin = x_nhwc.shape
    mats, biases, widths = [], [], []
    for g in groups:
        wc = jnp.concatenate([w for w, _ in g], axis=1)
        bc = jnp.concatenate([b for _, b in g])
        wd = _round_up(wc.shape[1], LANE)
        mats.append(jnp.pad(wc, ((0, 0), (0, wd - wc.shape[1]))))
        biases.append(jnp.pad(bc, (0, wd - bc.shape[0])))
        widths.append(wd)
    w_all = jnp.concatenate(mats, axis=1).astype(x_nhwc.dtype)
    b_all = jnp.concatenate(biases).astype(jnp.float32).reshape(1, 1, -1)
    tot = sum(widths)

    th = _pick_h_tile(H, W, target_m=2048)   # HBM-bound: big row tiles
    kern = functools.partial(_pointwise_groups_kernel, widths=tuple(widths))
    outs = pl.pallas_call(
        kern,
        out_shape=tuple(jax.ShapeDtypeStruct((N, H, W, wd), out_dtype)
                        for wd in widths),
        grid=(N, H // th),
        in_specs=[
            pl.BlockSpec((None, th, W, Cin), lambda n, i: (n, i, 0, 0)),
            pl.BlockSpec((Cin, tot), lambda n, i: (0, 0)),
            pl.BlockSpec((1, 1, tot), lambda n, i: (0, 0, 0)),
        ],
        out_specs=tuple(
            pl.BlockSpec((None, th, W, wd), lambda n, i: (n, i, 0, 0))
            for wd in widths),
        compiler_params=pltpu.CompilerParams(
            dimension_semantics=("parallel", "parallel"),
            vmem_limit_bytes=_vmem_limit()),
    )(x_nhwc, w_all, b_all)
    return list(outs), widths


# ----------------------------------------------------------------------------
# Kernel 2: 3x3 (optionally dilated) conv + bias + ReLU, "same" output size.
# Grid = (N, H//th).  The per-batch input stays resident in VMEM (fetched once
# per n); the zero halo is built in-kernel in a VMEM scratch (no jnp.pad pass).
# The 9 taps accumulate directly via dot_generals (no concat buffer).
# ----------------------------------------------------------------------------
def _dilated_conv3_relu_kernel(x_ref, w_ref, b_ref, o_ref, xpad_ref, *,
                               dil, th, H, W):
    # x_ref   : (H, W, Cb)        per-batch input, resident across H tiles
    # w_ref   : (3, 3, Cb, Cop)   zero-extended (block-diagonal) weight
    # b_ref   : (1, 1, Cop)
    # o_ref   : (th, W, Cop)
    # xpad_ref: VMEM scratch (H+2*dil, W+2*dil, Cb)  zero halo, built per batch
    i = pl.program_id(1)

    @pl.when(i == 0)
    def _():
        # Build the zero-padded copy once per batch element (halo pad fused
        # in-kernel: the separate jnp.pad HBM round trip is gone).
        xpad_ref[...] = jnp.zeros_like(xpad_ref)
        xpad_ref[dil:dil + H, dil:dil + W, :] = x_ref[...]

    row0 = pl.multiple_of(i * th, th)
    acc = jnp.zeros(o_ref.shape, jnp.float32)
    for kh in range(3):
        # H is outside the (8,128)-tiled dims -> dynamic row slice is cheap.
        slab = xpad_ref[pl.ds(row0 + kh * dil, th), :, :]      # (th, Wp, Cb)
        for kw in range(3):
            xs = slab[:, kw * dil:kw * dil + W, :]             # (th, W, Cb)
            acc = acc + jax.lax.dot_general(
                xs, w_ref[kh, kw],
                dimension_numbers=(((2,), (0,)), ((), ())),
                preferred_element_type=jnp.float32)
    o_ref[...] = jnp.maximum(acc + b_ref[...], 0.0).astype(o_ref.dtype)


def dilated_conv3_relu(x_nhwc, w, b, dilation, ch_offset,
                       out_dtype=jnp.float32):
    """x: (N,H,W,Cb) lane-dense buffer; the conv reads channels
    [ch_offset, ch_offset+Cin) of it (block-diagonal weight trick lets several
    branches share one packed buffer).  w: (3,3,Cin,Cout), b: (Cout,).
    padding == dilation -> "same".  Returns (N,H,W,round_up(Cout,128));
    real channels are the first Cout."""
    N, H, W, Cb = x_nhwc.shape
    Cin, Cout = w.shape[2], w.shape[3]
    Cop = _round_up(Cout, LANE)

    wext = jnp.zeros((3, 3, Cb, Cop), x_nhwc.dtype)
    wext = wext.at[:, :, ch_offset:ch_offset + Cin, :Cout].set(
        w.astype(x_nhwc.dtype))
    bpad = jnp.pad(b, (0, Cop - Cout)).astype(jnp.float32).reshape(1, 1, Cop)

    p = dilation
    th = _pick_h_tile(H, W, target_m=512)   # th*W >= ~256 fills the MXU M dim
    kern = functools.partial(_dilated_conv3_relu_kernel,
                             dil=p, th=th, H=H, W=W)
    return pl.pallas_call(
        kern,
        out_shape=jax.ShapeDtypeStruct((N, H, W, Cop), out_dtype),
        grid=(N, H // th),
        in_specs=[
            # Per-batch input: constant block index across the H axis, so
            # Pallas DMAs it once per batch element and keeps it resident.
            pl.BlockSpec((None, H, W, Cb), lambda n, i: (n, 0, 0, 0)),
            pl.BlockSpec((3, 3, Cb, Cop), lambda n, i: (0, 0, 0, 0)),
            pl.BlockSpec((1, 1, Cop), lambda n, i: (0, 0, 0)),
        ],
        out_specs=pl.BlockSpec((None, th, W, Cop), lambda n, i: (n, i, 0, 0)),
        scratch_shapes=[pltpu.VMEM((H + 2 * p, W + 2 * p, Cb), x_nhwc.dtype)],
        compiler_params=pltpu.CompilerParams(
            # N 'parallel', H 'arbitrary': on v7x the two TensorCores shard
            # the batch axis so the resident input isn't DMA'd twice.
            dimension_semantics=("parallel", "arbitrary"),
            vmem_limit_bytes=_vmem_limit()),
    )(x_nhwc, wext, bpad)


# ----------------------------------------------------------------------------
# Inception forward (NCHW in / NCHW out, matching the PyTorch module)
# ----------------------------------------------------------------------------
def inception_forward(x_nchw, params, compute_dtype=jnp.float32):
    cd = compute_dtype
    a = params["wa"].shape[1]
    b = params["wb1"].shape[1]
    c = params["wc1"].shape[1]
    d = params["wd1"].shape[1]

    x = jnp.transpose(x_nchw, (0, 2, 3, 1)).astype(cd)    # NCHW -> NHWC

    # Pack branches b/c/d into ONE lane-dense intermediate when they fit in a
    # single 128-lane group: the pointwise kernel then writes 1 buffer instead
    # of 3 (each of which would have been zero-padded to 128 channels anyway).
    pack = (b + c + d) <= LANE
    cast = lambda w: w.astype(cd)
    if pack:
        groups = [[(cast(params["wa"]), params["ba"])],
                  [(cast(params["wb1"]), params["bb1"]),
                   (cast(params["wc1"]), params["bc1"]),
                   (cast(params["wd1"]), params["bd1"])]]
    else:
        groups = [[(cast(params["wa"]), params["ba"])],
                  [(cast(params["wb1"]), params["bb1"])],
                  [(cast(params["wc1"]), params["bc1"])],
                  [(cast(params["wd1"]), params["bd1"])]]

    outs, _ = fused_pointwise_conv_relu(x, groups, out_dtype=cd)
    ya = outs[0]
    if pack:
        buf = outs[1]
        srcs = [(buf, 0), (buf, b), (buf, b + c)]
    else:
        srcs = [(outs[1], 0), (outs[2], 0), (outs[3], 0)]

    zb = dilated_conv3_relu(srcs[0][0], params["wb3"], params["bb3"], 1,
                            srcs[0][1])
    zc = dilated_conv3_relu(srcs[1][0], params["wc3"], params["bc3"], 2,
                            srcs[1][1])
    zd = dilated_conv3_relu(srcs[2][0], params["wd3"], params["bd3"], 3,
                            srcs[2][1])

    y = jnp.concatenate([ya[..., :a].astype(jnp.float32),
                         zb[..., :b], zc[..., :c], zd[..., :d]], axis=-1)
    return jnp.transpose(y, (0, 3, 1, 2))                  # NHWC -> NCHW


# ----------------------------------------------------------------------------
# Pure-JAX reference (lax conv) for correctness check
# ----------------------------------------------------------------------------
def _conv_ref(x_nhwc, w_hwio, bias, dilation, padding):
    y = jax.lax.conv_general_dilated(
        x_nhwc, w_hwio, window_strides=(1, 1),
        padding=((padding, padding), (padding, padding)),
        rhs_dilation=(dilation, dilation),
        dimension_numbers=("NHWC", "HWIO", "NHWC"))
    return y + bias.reshape(1, 1, 1, -1)


def inception_ref(x_nchw, p):
    x = jnp.transpose(x_nchw, (0, 2, 3, 1))
    relu = lambda t: jnp.maximum(t, 0.0)
    to1x1 = lambda w: w.reshape(1, 1, *w.shape)

    x1 = relu(_conv_ref(x, to1x1(p["wa"]), p["ba"], 1, 0))
    x2 = relu(_conv_ref(x, to1x1(p["wb1"]), p["bb1"], 1, 0))
    x2 = relu(_conv_ref(x2, p["wb3"], p["bb3"], 1, 1))
    x3 = relu(_conv_ref(x, to1x1(p["wc1"]), p["bc1"], 1, 0))
    x3 = relu(_conv_ref(x3, p["wc3"], p["bc3"], 2, 2))
    x4 = relu(_conv_ref(x, to1x1(p["wd1"]), p["bd1"], 1, 0))
    x4 = relu(_conv_ref(x4, p["wd3"], p["bd3"], 3, 3))
    y = jnp.concatenate([x1, x2, x3, x4], axis=-1)
    return jnp.transpose(y, (0, 3, 1, 2))


# ----------------------------------------------------------------------------
# Deterministic parameter init + run
# ----------------------------------------------------------------------------
def init_params(key, c_dim, a, b, c, d):
    ks = jax.random.split(key, 14)
    f = lambda k, shape, s: (s * jax.random.normal(k, shape)).astype(jnp.float32)
    return {
        # 1x1 weights stored as (Cin, Cout); 3x3 weights as (3, 3, Cin, Cout)
        "wa":  f(ks[0],  (c_dim, a), 0.2), "ba":  f(ks[1],  (a,), 0.1),
        "wb1": f(ks[2],  (c_dim, b), 0.2), "bb1": f(ks[3],  (b,), 0.1),
        "wb3": f(ks[4],  (3, 3, b, b), 0.2), "bb3": f(ks[5],  (b,), 0.1),
        "wc1": f(ks[6],  (c_dim, c), 0.2), "bc1": f(ks[7],  (c,), 0.1),
        "wc3": f(ks[8],  (3, 3, c, c), 0.2), "bc3": f(ks[9],  (c,), 0.1),
        "wd1": f(ks[10], (c_dim, d), 0.2), "bd1": f(ks[11], (d,), 0.1),
        "wd3": f(ks[12], (3, 3, d, d), 0.2), "bd3": f(ks[13], (d,), 0.1),
    }


if __name__ == "__main__":
    N, c_dim, H, W = 2, 4, 16, 16
    a = b = c = d = 4

    key = jax.random.PRNGKey(0)
    kx, kp = jax.random.split(key)
    x = jax.random.normal(kx, (N, c_dim, H, W), dtype=jnp.float32)  # NCHW
    params = init_params(kp, c_dim, a, b, c, d)

    ref = jax.block_until_ready(inception_ref(x, params))

    # fp32 matmul path: exact PyTorch semantics.
    fwd_f32 = jax.jit(functools.partial(inception_forward,
                                        compute_dtype=jnp.float32))
    out = jax.block_until_ready(fwd_f32(x, params))
    assert out.shape == (N, a + b + c + d, H, W), out.shape
    err = float(jnp.max(jnp.abs(out - ref)))
    assert jnp.allclose(out, ref, atol=1e-4, rtol=1e-4), err

    # bf16 matmul path (fp32 accumulation): halves intermediate HBM/VMEM
    # traffic and hits the bf16 MXU.  Tolerance tightened vs. previous rev.
    fwd_bf16 = jax.jit(functools.partial(inception_forward,
                                         compute_dtype=jnp.bfloat16))
    out_bf = jax.block_until_ready(fwd_bf16(x, params))
    assert out_bf.shape == out.shape
    err_bf = float(jnp.max(jnp.abs(out_bf - ref)))
    assert jnp.allclose(out_bf, ref, atol=5e-2, rtol=5e-2), err_bf

    print("KERNEL_OK")
</pallas_src>

<mosaic_0001>
module attributes {stable_mosaic.version = 11 : i64} {
  func.func @_pointwise_groups_kernel(%arg0: i32, %arg1: i32, %arg2: memref<1x16x16x4xf32, #tpu.memory_space<vmem>>, %arg3: memref<4x256xf32, #tpu.memory_space<vmem>>, %arg4: memref<1x1x256xf32, #tpu.memory_space<vmem>>, %arg5: memref<1x16x16x128xf32, #tpu.memory_space<vmem>>, %arg6: memref<1x16x16x128xf32, #tpu.memory_space<vmem>>) attributes {dimension_semantics = [#tpu.dimension_semantics<parallel>, #tpu.dimension_semantics<parallel>], iteration_bounds = array<i64: 2, 1>, scalar_prefetch = 0 : i64, scratch_operands = 0 : i64, tpu.core_type = #tpu.core_type<tc>, window_params = [{transform_indices = @transform_0, window_bounds = array<i64: 1, 16, 16, 4>}, {pipeline_mode = #tpu.pipeline_mode<synchronous>, transform_indices = @transform_1, window_bounds = array<i64: 4, 256>}, {pipeline_mode = #tpu.pipeline_mode<synchronous>, transform_indices = @transform_2, window_bounds = array<i64: 1, 1, 256>}, {transform_indices = @transform_3, window_bounds = array<i64: 1, 16, 16, 128>}, {transform_indices = @transform_4, window_bounds = array<i64: 1, 16, 16, 128>}]} {
    %c0 = arith.constant 0 : index
    %c0_0 = arith.constant 0 : index
    %c0_1 = arith.constant 0 : index
    %c0_2 = arith.constant 0 : index
    %0 = vector.load %arg2[%c0, %c0_0, %c0_1, %c0_2] : memref<1x16x16x4xf32, #tpu.memory_space<vmem>>, vector<1x16x16x4xf32>
    %1 = vector.shape_cast %0 : vector<1x16x16x4xf32> to vector<16x16x4xf32>
    %c0_3 = arith.constant 0 : index
    %c0_4 = arith.constant 0 : index
    %2 = vector.load %arg3[%c0_3, %c0_4] : memref<4x256xf32, #tpu.memory_space<vmem>>, vector<4x256xf32>
    %cst = arith.constant dense<0.000000e+00> : vector<16x16x256xf32>
    %3 = tpu.matmul %1, %2, %cst {dimension_numbers = #tpu.dot_dimension_numbers<[2], [0], [0, 1], [1], [0, 0, 0, 1, 1, 1], [], []>} : vector<16x16x4xf32>, vector<4x256xf32>, vector<16x16x256xf32> -> vector<16x16x256xf32>
    %c0_5 = arith.constant 0 : index
    %c0_6 = arith.constant 0 : index
    %c0_7 = arith.constant 0 : index
    %4 = vector.load %arg4[%c0_5, %c0_6, %c0_7] : memref<1x1x256xf32, #tpu.memory_space<vmem>>, vector<1x1x256xf32>
    %5 = vector.broadcast %4 : vector<1x1x256xf32> to vector<16x16x256xf32>
    %6 = arith.addf %3, %5 : vector<16x16x256xf32>
    %cst_8 = arith.constant 0.000000e+00 : f32
    %7 = vector.broadcast %cst_8 : f32 to vector<16x16x256xf32>
    %8 = arith.maximumf %6, %7 : vector<16x16x256xf32>
    %9 = vector.extract_strided_slice %8 {offsets = [0, 0, 0], sizes = [16, 16, 128], strides = [1, 1, 1]} : vector<16x16x256xf32> to vector<16x16x128xf32>
    %c0_9 = arith.constant 0 : index
    %c0_10 = arith.constant 0 : index
    %c0_11 = arith.constant 0 : index
    %c0_12 = arith.constant 0 : index
    %10 = vector.load %arg5[%c0_9, %c0_10, %c0_11, %c0_12] : memref<1x16x16x128xf32, #tpu.memory_space<vmem>>, vector<1x16x16x128xf32>
    %11 = vector.shape_cast %10 : vector<1x16x16x128xf32> to vector<16x16x128xf32>
    %12 = vector.shape_cast %9 : vector<16x16x128xf32> to vector<1x16x16x128xf32>
    tpu.vector_store %arg5[%c0_9, %c0_10, %c0_11, %c0_12], %12 {strides = array<i32>} : memref<1x16x16x128xf32, #tpu.memory_space<vmem>>, vector<1x16x16x128xf32>,
    %13 = vector.extract_strided_slice %8 {offsets = [0, 0, 128], sizes = [16, 16, 128], strides = [1, 1, 1]} : vector<16x16x256xf32> to vector<16x16x128xf32>
    %c0_13 = arith.constant 0 : index
    %c0_14 = arith.constant 0 : index
    %c0_15 = arith.constant 0 : index
    %c0_16 = arith.constant 0 : index
    %14 = vector.load %arg6[%c0_13, %c0_14, %c0_15, %c0_16] : memref<1x16x16x128xf32, #tpu.memory_space<vmem>>, vector<1x16x16x128xf32>
    %15 = vector.shape_cast %14 : vector<1x16x16x128xf32> to vector<16x16x128xf32>
    %16 = vector.shape_cast %13 : vector<16x16x128xf32> to vector<1x16x16x128xf32>
    tpu.vector_store %arg6[%c0_13, %c0_14, %c0_15, %c0_16], %16 {strides = array<i32>} : memref<1x16x16x128xf32, #tpu.memory_space<vmem>>, vector<1x16x16x128xf32>,
    return
  }
  func.func @transform_0(%arg0: i32, %arg1: i32) -> (i32, i32, i32, i32) {
    %c0_i32 = arith.constant 0 : i32
    %c0_i32_0 = arith.constant 0 : i32
    %c0_i32_1 = arith.constant 0 : i32
    return %arg0, %arg1, %c0_i32, %c0_i32_0 : i32, i32, i32, i32
  }
  func.func @transform_1(%arg0: i32, %arg1: i32) -> (i32, i32) {
    %c0_i32 = arith.constant 0 : i32
    %c0_i32_0 = arith.constant 0 : i32
    %c0_i32_1 = arith.constant 0 : i32
    return %c0_i32, %c0_i32_0 : i32, i32
  }
  func.func @transform_2(%arg0: i32, %arg1: i32) -> (i32, i32, i32) {
    %c0_i32 = arith.constant 0 : i32
    %c0_i32_0 = arith.constant 0 : i32
    %c0_i32_1 = arith.constant 0 : i32
    %c0_i32_2 = arith.constant 0 : i32
    return %c0_i32, %c0_i32_0, %c0_i32_1 : i32, i32, i32
  }
  func.func @transform_3(%arg0: i32, %arg1: i32) -> (i32, i32, i32, i32) {
    %c0_i32 = arith.constant 0 : i32
    %c0_i32_0 = arith.constant 0 : i32
    %c0_i32_1 = arith.constant 0 : i32
    return %arg0, %arg1, %c0_i32, %c0_i32_0 : i32, i32, i32, i32
  }
  func.func @transform_4(%arg0: i32, %arg1: i32) -> (i32, i32, i32, i32) {
    %c0_i32 = arith.constant 0 : i32
    %c0_i32_0 = arith.constant 0 : i32
    %c0_i32_1 = arith.constant 0 : i32
    return %arg0, %arg1, %c0_i32, %c0_i32_0 : i32, i32, i32, i32
  }
}

module attributes {stable_mosaic.version = 11 : i64} {
  func.func @_dilated_conv3_relu_kernel(%arg0: i32, %arg1: i32, %arg2: memref<1x16x16x128xf32, #tpu.memory_space<vmem>>, %arg3: memref<3x3x128x128xf32, #tpu.memory_space<vmem>>, %arg4: memref<1x1x128xf32, #tpu.memory_space<vmem>>, %arg5: memref<1x16x16x128xf32, #tpu.memory_space<vmem>>, %arg6: memref<18x18x128xf32, #tpu.memory_space<vmem>>) attributes {dimension_semantics = [#tpu.dimension_semantics<parallel>, #tpu.dimension_semantics<arbitrary>], iteration_bounds = array<i64: 2, 1>, scalar_prefetch = 0 : i64, scratch_operands = 1 : i64, tpu.core_type = #tpu.core_type<tc>, window_params = [{transform_indices = @transform_0, window_bounds = array<i64: 1, 16, 16, 128>}, {pipeline_mode = #tpu.pipeline_mode<synchronous>, transform_indices = @transform_1, window_bounds = array<i64: 3, 3, 128, 128>}, {pipeline_mode = #tpu.pipeline_mode<synchronous>, transform_indices = @transform_2, window_bounds = array<i64: 1, 1, 128>}, {transform_indices = @transform_3, window_bounds = array<i64: 1, 16, 16, 128>}]} {
    %c0_i32 = arith.constant 0 : i32
    %0 = arith.cmpi eq, %arg1, %c0_i32 : i32
    %1 = arith.extui %0 : i1 to i32
    %c0_i32_0 = arith.constant 0 : i32
    %2 = arith.cmpi ne, %1, %c0_i32_0 : i32
    scf.if %2 {
      %cst_58 = arith.constant 0.000000e+00 : f32
      %68 = vector.broadcast %cst_58 : f32 to vector<18x18x128xf32>
      %c0_59 = arith.constant 0 : index
      %c0_60 = arith.constant 0 : index
      %c0_61 = arith.constant 0 : index
      %69 = vector.load %arg6[%c0_59, %c0_60, %c0_61] : memref<18x18x128xf32, #tpu.memory_space<vmem>>, vector<18x18x128xf32>
      tpu.vector_store %arg6[%c0_59, %c0_60, %c0_61], %68 {strides = array<i32>} : memref<18x18x128xf32, #tpu.memory_space<vmem>>, vector<18x18x128xf32>,
      %c0_62 = arith.constant 0 : index
      %c0_63 = arith.constant 0 : index
      %c0_64 = arith.constant 0 : index
      %c0_65 = arith.constant 0 : index
      %70 = vector.load %arg2[%c0_62, %c0_63, %c0_64, %c0_65] : memref<1x16x16x128xf32, #tpu.memory_space<vmem>>, vector<1x16x16x128xf32>
      %71 = vector.shape_cast %70 : vector<1x16x16x128xf32> to vector<16x16x128xf32>
      %c1_66 = arith.constant 1 : index
      %c1_67 = arith.constant 1 : index
      %c0_68 = arith.constant 0 : index
      %72 = vector.load %arg6[%c1_66, %c1_67, %c0_68] : memref<18x18x128xf32, #tpu.memory_space<vmem>>, vector<16x16x128xf32>
      tpu.vector_store %arg6[%c1_66, %c1_67, %c0_68], %71 {strides = array<i32>} : memref<18x18x128xf32, #tpu.memory_space<vmem>>, vector<16x16x128xf32>,
    } else {
    }
    %c16_i32 = arith.constant 16 : i32
    %3 = arith.muli %arg1, %c16_i32 : i32
    %4 = tpu.assume_multiple %3, 16 : i32
    %cst = arith.constant 0.000000e+00 : f32
    %5 = vector.broadcast %cst : f32 to vector<16x16x128xf32>
    %c0_i32_1 = arith.constant 0 : i32
    %6 = arith.addi %4, %c0_i32_1 : i32
    %7 = arith.index_cast %6 : i32 to index
    %c0 = arith.constant 0 : index
    %c0_2 = arith.constant 0 : index
    %8 = vector.load %arg6[%7, %c0, %c0_2] : memref<18x18x128xf32, #tpu.memory_space<vmem>>, vector<16x18x128xf32>
    %9 = vector.extract_strided_slice %8 {offsets = [0, 0, 0], sizes = [16, 16, 128], strides = [1, 1, 1]} : vector<16x18x128xf32> to vector<16x16x128xf32>
    %c0_3 = arith.constant 0 : index
    %c0_4 = arith.constant 0 : index
    %c0_5 = arith.constant 0 : index
    %c0_6 = arith.constant 0 : index
    %10 = vector.load %arg3[%c0_3, %c0_4, %c0_5, %c0_6] : memref<3x3x128x128xf32, #tpu.memory_space<vmem>>, vector<1x1x128x128xf32>
    %11 = vector.shape_cast %10 : vector<1x1x128x128xf32> to vector<128x128xf32>
    %cst_7 = arith.constant dense<0.000000e+00> : vector<16x16x128xf32>
    %12 = tpu.matmul %9, %11, %cst_7 {dimension_numbers = #tpu.dot_dimension_numbers<[2], [0], [0, 1], [1], [0, 0, 0, 1, 1, 1], [], []>} : vector<16x16x128xf32>, vector<128x128xf32>, vector<16x16x128xf32> -> vector<16x16x128xf32>
    %13 = arith.addf %5, %12 : vector<16x16x128xf32>
    %14 = vector.extract_strided_slice %8 {offsets = [0, 1, 0], sizes = [16, 16, 128], strides = [1, 1, 1]} : vector<16x18x128xf32> to vector<16x16x128xf32>
    %c0_8 = arith.constant 0 : index
    %c1 = arith.constant 1 : index
    %c0_9 = arith.constant 0 : index
    %c0_10 = arith.constant 0 : index
    %15 = vector.load %arg3[%c0_8, %c1, %c0_9, %c0_10] : memref<3x3x128x128xf32, #tpu.memory_space<vmem>>, vector<1x1x128x128xf32>
    %16 = vector.shape_cast %15 : vector<1x1x128x128xf32> to vector<128x128xf32>
    %cst_11 = arith.constant dense<0.000000e+00> : vector<16x16x128xf32>
    %17 = tpu.matmul %14, %16, %cst_11 {dimension_numbers = #tpu.dot_dimension_numbers<[2], [0], [0, 1], [1], [0, 0, 0, 1, 1, 1], [], []>} : vector<16x16x128xf32>, vector<128x128xf32>, vector<16x16x128xf32> -> vector<16x16x128xf32>
    %18 = arith.addf %13, %17 : vector<16x16x128xf32>
    %19 = vector.extract_strided_slice %8 {offsets = [0, 2, 0], sizes = [16, 16, 128], strides = [1, 1, 1]} : vector<16x18x128xf32> to vector<16x16x128xf32>
    %c0_12 = arith.constant 0 : index
    %c2 = arith.constant 2 : index
    %c0_13 = arith.constant 0 : index
    %c0_14 = arith.constant 0 : index
    %20 = vector.load %arg3[%c0_12, %c2, %c0_13, %c0_14] : memref<3x3x128x128xf32, #tpu.memory_space<vmem>>, vector<1x1x128x128xf32>
    %21 = vector.shape_cast %20 : vector<1x1x128x128xf32> to vector<128x128xf32>
    %cst_15 = arith.constant dense<0.000000e+00> : vector<16x16x128xf32>
    %22 = tpu.matmul %19, %21, %cst_15 {dimension_numbers = #tpu.dot_dimension_numbers<[2], [0], [0, 1], [1], [0, 0, 0, 1, 1, 1], [], []>} : vector<16x16x128xf32>, vector<128x128xf32>, vector<16x16x128xf32> -> vector<16x16x128xf32>
    %23 = arith.addf %18, %22 : vector<16x16x128xf32>
    %c1_i32 = arith.constant 1 : i32
    %24 = arith.addi %4, %c1_i32 : i32
    %25 = arith.index_cast %24 : i32 to index
    %c0_16 = arith.constant 0 : index
    %c0_17 = arith.constant 0 : index
    %26 = vector.load %arg6[%25, %c0_16, %c0_17] : memref<18x18x128xf32, #tpu.memory_space<vmem>>, vector<16x18x128xf32>
    %27 = vector.extract_strided_slice %26 {offsets = [0, 0, 0], sizes = [16, 16, 128], strides = [1, 1, 1]} : vector<16x18x128xf32> to vector<16x16x128xf32>
    %c1_18 = arith.constant 1 : index
    %c0_19 = arith.constant 0 : index
    %c0_20 = arith.constant 0 : index
    %c0_21 = arith.constant 0 : index
    %28 = vector.load %arg3[%c1_18, %c0_19, %c0_20, %c0_21] : memref<3x3x128x128xf32, #tpu.memory_space<vmem>>, vector<1x1x128x128xf32>
    %29 = vector.shape_cast %28 : vector<1x1x128x128xf32> to vector<128x128xf32>
    %cst_22 = arith.constant dense<0.000000e+00> : vector<16x16x128xf32>
    %30 = tpu.matmul %27, %29, %cst_22 {dimension_numbers = #tpu.dot_dimension_numbers<[2], [0], [0, 1], [1], [0, 0, 0, 1, 1, 1], [], []>} : vector<16x16x128xf32>, vector<128x128xf32>, vector<16x16x128xf32> -> vector<16x16x128xf32>
    %31 = arith.addf %23, %30 : vector<16x16x128xf32>
    %32 = vector.extract_strided_slice %26 {offsets = [0, 1, 0], sizes = [16, 16, 128], strides = [1, 1, 1]} : vector<16x18x128xf32> to vector<16x16x128xf32>
    %c1_23 = arith.constant 1 : index
    %c1_24 = arith.constant 1 : index
    %c0_25 = arith.constant 0 : index
    %c0_26 = arith.constant 0 : index
    %33 = vector.load %arg3[%c1_23, %c1_24, %c0_25, %c0_26] : memref<3x3x128x128xf32, #tpu.memory_space<vmem>>, vector<1x1x128x128xf32>
    %34 = vector.shape_cast %33 : vector<1x1x128x128xf32> to vector<128x128xf32>
    %cst_27 = arith.constant dense<0.000000e+00> : vector<16x16x128xf32>
    %35 = tpu.matmul %32, %34, %cst_27 {dimension_numbers = #tpu.dot_dimension_numbers<[2], [0], [0, 1], [1], [0, 0, 0, 1, 1, 1], [], []>} : vector<16x16x128xf32>, vector<128x128xf32>, vector<16x16x128xf32> -> vector<16x16x128xf32>
    %36 = arith.addf %31, %35 : vector<16x16x128xf32>
    %37 = vector.extract_strided_slice %26 {offsets = [0, 2, 0], sizes = [16, 16, 128], strides = [1, 1, 1]} : vector<16x18x128xf32> to vector<16x16x128xf32>
    %c1_28 = arith.constant 1 : index
    %c2_29 = arith.constant 2 : index
    %c0_30 = arith.constant 0 : index
    %c0_31 = arith.constant 0 : index
    %38 = vector.load %arg3[%c1_28, %c2_29, %c0_30, %c0_31] : memref<3x3x128x128xf32, #tpu.memory_space<vmem>>, vector<1x1x128x128xf32>
    %39 = vector.shape_cast %38 : vector<1x1x128x128xf32> to vector<128x128xf32>
    %cst_32 = arith.constant dense<0.000000e+00> : vector<16x16x128xf32>
    %40 = tpu.matmul %37, %39, %cst_32 {dimension_numbers = #tpu.dot_dimension_numbers<[2], [0], [0, 1], [1], [0, 0, 0, 1, 1, 1], [], []>} : vector<16x16x128xf32>, vector<128x128xf32>, vector<16x16x128xf32> -> vector<16x16x128xf32>
    %41 = arith.addf %36, %40 : vector<16x16x128xf32>
    %c2_i32 = arith.constant 2 : i32
    %42 = arith.addi %4, %c2_i32 : i32
    %43 = arith.index_cast %42 : i32 to index
    %c0_33 = arith.constant 0 : index
    %c0_34 = arith.constant 0 : index
    %44 = vector.load %arg6[%43, %c0_33, %c0_34] : memref<18x18x128xf32, #tpu.memory_space<vmem>>, vector<16x18x128xf32>
    %45 = vector.extract_strided_slice %44 {offsets = [0, 0, 0], sizes = [16, 16, 128], strides = [1, 1, 1]} : vector<16x18x128xf32> to vector<16x16x128xf32>
    %c2_35 = arith.constant 2 : index
    %c0_36 = arith.constant 0 : index
    %c0_37 = arith.constant 0 : index
    %c0_38 = arith.constant 0 : index
    %46 = vector.load %arg3[%c2_35, %c0_36, %c0_37, %c0_38] : memref<3x3x128x128xf32, #tpu.memory_space<vmem>>, vector<1x1x128x128xf32>
    %47 = vector.shape_cast %46 : vector<1x1x128x128xf32> to vector<128x128xf32>
    %cst_39 = arith.constant dense<0.000000e+00> : vector<16x16x128xf32>
    %48 = tpu.matmul %45, %47, %cst_39 {dimension_numbers = #tpu.dot_dimension_numbers<[2], [0], [0, 1], [1], [0, 0, 0, 1, 1, 1], [], []>} : vector<16x16x128xf32>, vector<128x128xf32>, vector<16x16x128xf32> -> vector<16x16x128xf32>
    %49 = arith.addf %41, %48 : vector<16x16x128xf32>
    %50 = vector.extract_strided_slice %44 {offsets = [0, 1, 0], sizes = [16, 16, 128], strides = [1, 1, 1]} : vector<16x18x128xf32> to vector<16x16x128xf32>
    %c2_40 = arith.constant 2 : index
    %c1_41 = arith.constant 1 : index
    %c0_42 = arith.constant 0 : index
    %c0_43 = arith.constant 0 : index
    %51 = vector.load %arg3[%c2_40, %c1_41, %c0_42, %c0_43] : memref<3x3x128x128xf32, #tpu.memory_space<vmem>>, vector<1x1x128x128xf32>
    %52 = vector.shape_cast %51 : vector<1x1x128x128xf32> to vector<128x128xf32>
    %cst_44 = arith.constant dense<0.000000e+00> : vector<16x16x128xf32>
    %53 = tpu.matmul %50, %52, %cst_44 {dimension_numbers = #tpu.dot_dimension_numbers<[2], [0], [0, 1], [1], [0, 0, 0, 1, 1, 1], [], []>} : vector<16x16x128xf32>, vector<128x128xf32>, vector<16x16x128xf32> -> vector<16x16x128xf32>
    %54 = arith.addf %49, %53 : vector<16x16x128xf32>
    %55 = vector.extract_strided_slice %44 {offsets = [0, 2, 0], sizes = [16, 16, 128], strides = [1, 1, 1]} : vector<16x18x128xf32> to vector<16x16x128xf32>
    %c2_45 = arith.constant 2 : index
    %c2_46 = arith.constant 2 : index
    %c0_47 = arith.constant 0 : index
    %c0_48 = arith.constant 0 : index
    %56 = vector.load %arg3[%c2_45, %c2_46, %c0_47, %c0_48] : memref<3x3x128x128xf32, #tpu.memory_space<vmem>>, vector<1x1x128x128xf32>
    %57 = vector.shape_cast %56 : vector<1x1x128x128xf32> to vector<128x128xf32>
    %cst_49 = arith.constant dense<0.000000e+00> : vector<16x16x128xf32>
    %58 = tpu.matmul %55, %57, %cst_49 {dimension_numbers = #tpu.dot_dimension_numbers<[2], [0], [0, 1], [1], [0, 0, 0, 1, 1, 1], [], []>} : vector<16x16x128xf32>, vector<128x128xf32>, vector<16x16x128xf32> -> vector<16x16x128xf32>
    %59 = arith.addf %54, %58 : vector<16x16x128xf32>
    %c0_50 = arith.constant 0 : index
    %c0_51 = arith.constant 0 : index
    %c0_52 = arith.constant 0 : index
    %60 = vector.load %arg4[%c0_50, %c0_51, %c0_52] : memref<1x1x128xf32, #tpu.memory_space<vmem>>, vector<1x1x128xf32>
    %61 = vector.broadcast %60 : vector<1x1x128xf32> to vector<16x16x128xf32>
    %62 = arith.addf %59, %61 : vector<16x16x128xf32>
    %cst_53 = arith.constant 0.000000e+00 : f32
    %63 = vector.broadcast %cst_53 : f32 to vector<16x16x128xf32>
    %64 = arith.maximumf %62, %63 : vector<16x16x128xf32>
    %c0_54 = arith.constant 0 : index
    %c0_55 = arith.constant 0 : index
    %c0_56 = arith.constant 0 : index
    %c0_57 = arith.constant 0 : index
    %65 = vector.load %arg5[%c0_54, %c0_55, %c0_56, %c0_57] : memref<1x16x16x128xf32, #tpu.memory_space<vmem>>, vector<1x16x16x128xf32>
    %66 = vector.shape_cast %65 : vector<1x16x16x128xf32> to vector<16x16x128xf32>
    %67 = vector.shape_cast %64 : vector<16x16x128xf32> to vector<1x16x16x128xf32>
    tpu.vector_store %arg5[%c0_54, %c0_55, %c0_56, %c0_57], %67 {strides = array<i32>} : memref<1x16x16x128xf32, #tpu.memory_space<vmem>>, vector<1x16x16x128xf32>,
    return
  }
  func.func @transform_0(%arg0: i32, %arg1: i32) -> (i32, i32, i32, i32) {
    %c0_i32 = arith.constant 0 : i32
    %c0_i32_0 = arith.constant 0 : i32
    %c0_i32_1 = arith.constant 0 : i32
    %c0_i32_2 = arith.constant 0 : i32
    return %arg0, %c0_i32, %c0_i32_0, %c0_i32_1 : i32, i32, i32, i32
  }
  func.func @transform_1(%arg0: i32, %arg1: i32) -> (i32, i32, i32, i32) {
    %c0_i32 = arith.constant 0 : i32
    %c0_i32_0 = arith.constant 0 : i32
    %c0_i32_1 = arith.constant 0 : i32
    %c0_i32_2 = arith.constant 0 : i32
    %c0_i32_3 = arith.constant 0 : i32
    return %c0_i32, %c0_i32_0, %c0_i32_1, %c0_i32_2 : i32, i32, i32, i32
  }
  func.func @transform_2(%arg0: i32, %arg1: i32) -> (i32, i32, i32) {
    %c0_i32 = arith.constant 0 : i32
    %c0_i32_0 = arith.constant 0 : i32
    %c0_i32_1 = arith.constant 0 : i32
    %c0_i32_2 = arith.constant 0 : i32
    return %c0_i32, %c0_i32_0, %c0_i32_1 : i32, i32, i32
  }
  func.func @transform_3(%arg0: i32, %arg1: i32) -> (i32, i32, i32, i32) {
    %c0_i32 = arith.constant 0 : i32
    %c0_i32_0 = arith.constant 0 : i32
    %c0_i32_1 = arith.constant 0 : i32
    return %arg0, %arg1, %c0_i32, %c0_i32_0 : i32, i32, i32, i32
  }
}

module attributes {stable_mosaic.version = 11 : i64} {
  func.func @_dilated_conv3_relu_kernel(%arg0: i32, %arg1: i32, %arg2: memref<1x16x16x128xf32, #tpu.memory_space<vmem>>, %arg3: memref<3x3x128x128xf32, #tpu.memory_space<vmem>>, %arg4: memref<1x1x128xf32, #tpu.memory_space<vmem>>, %arg5: memref<1x16x16x128xf32, #tpu.memory_space<vmem>>, %arg6: memref<20x20x128xf32, #tpu.memory_space<vmem>>) attributes {dimension_semantics = [#tpu.dimension_semantics<parallel>, #tpu.dimension_semantics<arbitrary>], iteration_bounds = array<i64: 2, 1>, scalar_prefetch = 0 : i64, scratch_operands = 1 : i64, tpu.core_type = #tpu.core_type<tc>, window_params = [{transform_indices = @transform_0, window_bounds = array<i64: 1, 16, 16, 128>}, {pipeline_mode = #tpu.pipeline_mode<synchronous>, transform_indices = @transform_1, window_bounds = array<i64: 3, 3, 128, 128>}, {pipeline_mode = #tpu.pipeline_mode<synchronous>, transform_indices = @transform_2, window_bounds = array<i64: 1, 1, 128>}, {transform_indices = @transform_3, window_bounds = array<i64: 1, 16, 16, 128>}]} {
    %c0_i32 = arith.constant 0 : i32
    %0 = arith.cmpi eq, %arg1, %c0_i32 : i32
    %1 = arith.extui %0 : i1 to i32
    %c0_i32_0 = arith.constant 0 : i32
    %2 = arith.cmpi ne, %1, %c0_i32_0 : i32
    scf.if %2 {
      %cst_58 = arith.constant 0.000000e+00 : f32
      %68 = vector.broadcast %cst_58 : f32 to vector<20x20x128xf32>
      %c0_59 = arith.constant 0 : index
      %c0_60 = arith.constant 0 : index
      %c0_61 = arith.constant 0 : index
      %69 = vector.load %arg6[%c0_59, %c0_60, %c0_61] : memref<20x20x128xf32, #tpu.memory_space<vmem>>, vector<20x20x128xf32>
      tpu.vector_store %arg6[%c0_59, %c0_60, %c0_61], %68 {strides = array<i32>} : memref<20x20x128xf32, #tpu.memory_space<vmem>>, vector<20x20x128xf32>,
      %c0_62 = arith.constant 0 : index
      %c0_63 = arith.constant 0 : index
      %c0_64 = arith.constant 0 : index
      %c0_65 = arith.constant 0 : index
      %70 = vector.load %arg2[%c0_62, %c0_63, %c0_64, %c0_65] : memref<1x16x16x128xf32, #tpu.memory_space<vmem>>, vector<1x16x16x128xf32>
      %71 = vector.shape_cast %70 : vector<1x16x16x128xf32> to vector<16x16x128xf32>
      %c2_66 = arith.constant 2 : index
      %c2_67 = arith.constant 2 : index
      %c0_68 = arith.constant 0 : index
      %72 = vector.load %arg6[%c2_66, %c2_67, %c0_68] : memref<20x20x128xf32, #tpu.memory_space<vmem>>, vector<16x16x128xf32>
      tpu.vector_store %arg6[%c2_66, %c2_67, %c0_68], %71 {strides = array<i32>} : memref<20x20x128xf32, #tpu.memory_space<vmem>>, vector<16x16x128xf32>,
    } else {
    }
    %c16_i32 = arith.constant 16 : i32
    %3 = arith.muli %arg1, %c16_i32 : i32
    %4 = tpu.assume_multiple %3, 16 : i32
    %cst = arith.constant 0.000000e+00 : f32
    %5 = vector.broadcast %cst : f32 to vector<16x16x128xf32>
    %c0_i32_1 = arith.constant 0 : i32
    %6 = arith.addi %4, %c0_i32_1 : i32
    %7 = arith.index_cast %6 : i32 to index
    %c0 = arith.constant 0 : index
    %c0_2 = arith.constant 0 : index
    %8 = vector.load %arg6[%7, %c0, %c0_2] : memref<20x20x128xf32, #tpu.memory_space<vmem>>, vector<16x20x128xf32>
    %9 = vector.extract_strided_slice %8 {offsets = [0, 0, 0], sizes = [16, 16, 128], strides = [1, 1, 1]} : vector<16x20x128xf32> to vector<16x16x128xf32>
    %c0_3 = arith.constant 0 : index
    %c0_4 = arith.constant 0 : index
    %c0_5 = arith.constant 0 : index
    %c0_6 = arith.constant 0 : index
    %10 = vector.load %arg3[%c0_3, %c0_4, %c0_5, %c0_6] : memref<3x3x128x128xf32, #tpu.memory_space<vmem>>, vector<1x1x128x128xf32>
    %11 = vector.shape_cast %10 : vector<1x1x128x128xf32> to vector<128x128xf32>
    %cst_7 = arith.constant dense<0.000000e+00> : vector<16x16x128xf32>
    %12 = tpu.matmul %9, %11, %cst_7 {dimension_numbers = #tpu.dot_dimension_numbers<[2], [0], [0, 1], [1], [0, 0, 0, 1, 1, 1], [], []>} : vector<16x16x128xf32>, vector<128x128xf32>, vector<16x16x128xf32> -> vector<16x16x128xf32>
    %13 = arith.addf %5, %12 : vector<16x16x128xf32>
    %14 = vector.extract_strided_slice %8 {offsets = [0, 2, 0], sizes = [16, 16, 128], strides = [1, 1, 1]} : vector<16x20x128xf32> to vector<16x16x128xf32>
    %c0_8 = arith.constant 0 : index
    %c1 = arith.constant 1 : index
    %c0_9 = arith.constant 0 : index
    %c0_10 = arith.constant 0 : index
    %15 = vector.load %arg3[%c0_8, %c1, %c0_9, %c0_10] : memref<3x3x128x128xf32, #tpu.memory_space<vmem>>, vector<1x1x128x128xf32>
    %16 = vector.shape_cast %15 : vector<1x1x128x128xf32> to vector<128x128xf32>
    %cst_11 = arith.constant dense<0.000000e+00> : vector<16x16x128xf32>
    %17 = tpu.matmul %14, %16, %cst_11 {dimension_numbers = #tpu.dot_dimension_numbers<[2], [0], [0, 1], [1], [0, 0, 0, 1, 1, 1], [], []>} : vector<16x16x128xf32>, vector<128x128xf32>, vector<16x16x128xf32> -> vector<16x16x128xf32>
    %18 = arith.addf %13, %17 : vector<16x16x128xf32>
    %19 = vector.extract_strided_slice %8 {offsets = [0, 4, 0], sizes = [16, 16, 128], strides = [1, 1, 1]} : vector<16x20x128xf32> to vector<16x16x128xf32>
    %c0_12 = arith.constant 0 : index
    %c2 = arith.constant 2 : index
    %c0_13 = arith.constant 0 : index
    %c0_14 = arith.constant 0 : index
    %20 = vector.load %arg3[%c0_12, %c2, %c0_13, %c0_14] : memref<3x3x128x128xf32, #tpu.memory_space<vmem>>, vector<1x1x128x128xf32>
    %21 = vector.shape_cast %20 : vector<1x1x128x128xf32> to vector<128x128xf32>
    %cst_15 = arith.constant dense<0.000000e+00> : vector<16x16x128xf32>
    %22 = tpu.matmul %19, %21, %cst_15 {dimension_numbers = #tpu.dot_dimension_numbers<[2], [0], [0, 1], [1], [0, 0, 0, 1, 1, 1], [], []>} : vector<16x16x128xf32>, vector<128x128xf32>, vector<16x16x128xf32> -> vector<16x16x128xf32>
    %23 = arith.addf %18, %22 : vector<16x16x128xf32>
    %c2_i32 = arith.constant 2 : i32
    %24 = arith.addi %4, %c2_i32 : i32
    %25 = arith.index_cast %24 : i32 to index
    %c0_16 = arith.constant 0 : index
    %c0_17 = arith.constant 0 : index
    %26 = vector.load %arg6[%25, %c0_16, %c0_17] : memref<20x20x128xf32, #tpu.memory_space<vmem>>, vector<16x20x128xf32>
    %27 = vector.extract_strided_slice %26 {offsets = [0, 0, 0], sizes = [16, 16, 128], strides = [1, 1, 1]} : vector<16x20x128xf32> to vector<16x16x128xf32>
    %c1_18 = arith.constant 1 : index
    %c0_19 = arith.constant 0 : index
    %c0_20 = arith.constant 0 : index
    %c0_21 = arith.constant 0 : index
    %28 = vector.load %arg3[%c1_18, %c0_19, %c0_20, %c0_21] : memref<3x3x128x128xf32, #tpu.memory_space<vmem>>, vector<1x1x128x128xf32>
    %29 = vector.shape_cast %28 : vector<1x1x128x128xf32> to vector<128x128xf32>
    %cst_22 = arith.constant dense<0.000000e+00> : vector<16x16x128xf32>
    %30 = tpu.matmul %27, %29, %cst_22 {dimension_numbers = #tpu.dot_dimension_numbers<[2], [0], [0, 1], [1], [0, 0, 0, 1, 1, 1], [], []>} : vector<16x16x128xf32>, vector<128x128xf32>, vector<16x16x128xf32> -> vector<16x16x128xf32>
    %31 = arith.addf %23, %30 : vector<16x16x128xf32>
    %32 = vector.extract_strided_slice %26 {offsets = [0, 2, 0], sizes = [16, 16, 128], strides = [1, 1, 1]} : vector<16x20x128xf32> to vector<16x16x128xf32>
    %c1_23 = arith.constant 1 : index
    %c1_24 = arith.constant 1 : index
    %c0_25 = arith.constant 0 : index
    %c0_26 = arith.constant 0 : index
    %33 = vector.load %arg3[%c1_23, %c1_24, %c0_25, %c0_26] : memref<3x3x128x128xf32, #tpu.memory_space<vmem>>, vector<1x1x128x128xf32>
    %34 = vector.shape_cast %33 : vector<1x1x128x128xf32> to vector<128x128xf32>
    %cst_27 = arith.constant dense<0.000000e+00> : vector<16x16x128xf32>
    %35 = tpu.matmul %32, %34, %cst_27 {dimension_numbers = #tpu.dot_dimension_numbers<[2], [0], [0, 1], [1], [0, 0, 0, 1, 1, 1], [], []>} : vector<16x16x128xf32>, vector<128x128xf32>, vector<16x16x128xf32> -> vector<16x16x128xf32>
    %36 = arith.addf %31, %35 : vector<16x16x128xf32>
    %37 = vector.extract_strided_slice %26 {offsets = [0, 4, 0], sizes = [16, 16, 128], strides = [1, 1, 1]} : vector<16x20x128xf32> to vector<16x16x128xf32>
    %c1_28 = arith.constant 1 : index
    %c2_29 = arith.constant 2 : index
    %c0_30 = arith.constant 0 : index
    %c0_31 = arith.constant 0 : index
    %38 = vector.load %arg3[%c1_28, %c2_29, %c0_30, %c0_31] : memref<3x3x128x128xf32, #tpu.memory_space<vmem>>, vector<1x1x128x128xf32>
    %39 = vector.shape_cast %38 : vector<1x1x128x128xf32> to vector<128x128xf32>
    %cst_32 = arith.constant dense<0.000000e+00> : vector<16x16x128xf32>
    %40 = tpu.matmul %37, %39, %cst_32 {dimension_numbers = #tpu.dot_dimension_numbers<[2], [0], [0, 1], [1], [0, 0, 0, 1, 1, 1], [], []>} : vector<16x16x128xf32>, vector<128x128xf32>, vector<16x16x128xf32> -> vector<16x16x128xf32>
    %41 = arith.addf %36, %40 : vector<16x16x128xf32>
    %c4_i32 = arith.constant 4 : i32
    %42 = arith.addi %4, %c4_i32 : i32
    %43 = arith.index_cast %42 : i32 to index
    %c0_33 = arith.constant 0 : index
    %c0_34 = arith.constant 0 : index
    %44 = vector.load %arg6[%43, %c0_33, %c0_34] : memref<20x20x128xf32, #tpu.memory_space<vmem>>, vector<16x20x128xf32>
    %45 = vector.extract_strided_slice %44 {offsets = [0, 0, 0], sizes = [16, 16, 128], strides = [1, 1, 1]} : vector<16x20x128xf32> to vector<16x16x128xf32>
    %c2_35 = arith.constant 2 : index
    %c0_36 = arith.constant 0 : index
    %c0_37 = arith.constant 0 : index
    %c0_38 = arith.constant 0 : index
    %46 = vector.load %arg3[%c2_35, %c0_36, %c0_37, %c0_38] : memref<3x3x128x128xf32, #tpu.memory_space<vmem>>, vector<1x1x128x128xf32>
    %47 = vector.shape_cast %46 : vector<1x1x128x128xf32> to vector<128x128xf32>
    %cst_39 = arith.constant dense<0.000000e+00> : vector<16x16x128xf32>
    %48 = tpu.matmul %45, %47, %cst_39 {dimension_numbers = #tpu.dot_dimension_numbers<[2], [0], [0, 1], [1], [0, 0, 0, 1, 1, 1], [], []>} : vector<16x16x128xf32>, vector<128x128xf32>, vector<16x16x128xf32> -> vector<16x16x128xf32>
    %49 = arith.addf %41, %48 : vector<16x16x128xf32>
    %50 = vector.extract_strided_slice %44 {offsets = [0, 2, 0], sizes = [16, 16, 128], strides = [1, 1, 1]} : vector<16x20x128xf32> to vector<16x16x128xf32>
    %c2_40 = arith.constant 2 : index
    %c1_41 = arith.constant 1 : index
    %c0_42 = arith.constant 0 : index
    %c0_43 = arith.constant 0 : index
    %51 = vector.load %arg3[%c2_40, %c1_41, %c0_42, %c0_43] : memref<3x3x128x128xf32, #tpu.memory_space<vmem>>, vector<1x1x128x128xf32>
    %52 = vector.shape_cast %51 : vector<1x1x128x128xf32> to vector<128x128xf32>
    %cst_44 = arith.constant dense<0.000000e+00> : vector<16x16x128xf32>
    %53 = tpu.matmul %50, %52, %cst_44 {dimension_numbers = #tpu.dot_dimension_numbers<[2], [0], [0, 1], [1], [0, 0, 0, 1, 1, 1], [], []>} : vector<16x16x128xf32>, vector<128x128xf32>, vector<16x16x128xf32> -> vector<16x16x128xf32>
    %54 = arith.addf %49, %53 : vector<16x16x128xf32>
    %55 = vector.extract_strided_slice %44 {offsets = [0, 4, 0], sizes = [16, 16, 128], strides = [1, 1, 1]} : vector<16x20x128xf32> to vector<16x16x128xf32>
    %c2_45 = arith.constant 2 : index
    %c2_46 = arith.constant 2 : index
    %c0_47 = arith.constant 0 : index
    %c0_48 = arith.constant 0 : index
    %56 = vector.load %arg3[%c2_45, %c2_46, %c0_47, %c0_48] : memref<3x3x128x128xf32, #tpu.memory_space<vmem>>, vector<1x1x128x128xf32>
    %57 = vector.shape_cast %56 : vector<1x1x128x128xf32> to vector<128x128xf32>
    %cst_49 = arith.constant dense<0.000000e+00> : vector<16x16x128xf32>
    %58 = tpu.matmul %55, %57, %cst_49 {dimension_numbers = #tpu.dot_dimension_numbers<[2], [0], [0, 1], [1], [0, 0, 0, 1, 1, 1], [], []>} : vector<16x16x128xf32>, vector<128x128xf32>, vector<16x16x128xf32> -> vector<16x16x128xf32>
    %59 = arith.addf %54, %58 : vector<16x16x128xf32>
    %c0_50 = arith.constant 0 : index
    %c0_51 = arith.constant 0 : index
    %c0_52 = arith.constant 0 : index
    %60 = vector.load %arg4[%c0_50, %c0_51, %c0_52] : memref<1x1x128xf32, #tpu.memory_space<vmem>>, vector<1x1x128xf32>
    %61 = vector.broadcast %60 : vector<1x1x128xf32> to vector<16x16x128xf32>
    %62 = arith.addf %59, %61 : vector<16x16x128xf32>
    %cst_53 = arith.constant 0.000000e+00 : f32
    %63 = vector.broadcast %cst_53 : f32 to vector<16x16x128xf32>
    %64 = arith.maximumf %62, %63 : vector<16x16x128xf32>
    %c0_54 = arith.constant 0 : index
    %c0_55 = arith.constant 0 : index
    %c0_56 = arith.constant 0 : index
    %c0_57 = arith.constant 0 : index
    %65 = vector.load %arg5[%c0_54, %c0_55, %c0_56, %c0_57] : memref<1x16x16x128xf32, #tpu.memory_space<vmem>>, vector<1x16x16x128xf32>
    %66 = vector.shape_cast %65 : vector<1x16x16x128xf32> to vector<16x16x128xf32>
    %67 = vector.shape_cast %64 : vector<16x16x128xf32> to vector<1x16x16x128xf32>
    tpu.vector_store %arg5[%c0_54, %c0_55, %c0_56, %c0_57], %67 {strides = array<i32>} : memref<1x16x16x128xf32, #tpu.memory_space<vmem>>, vector<1x16x16x128xf32>,
    return
  }
  func.func @transform_0(%arg0: i32, %arg1: i32) -> (i32, i32, i32, i32) {
    %c0_i32 = arith.constant 0 : i32
    %c0_i32_0 = arith.constant 0 : i32
    %c0_i32_1 = arith.constant 0 : i32
    %c0_i32_2 = arith.constant 0 : i32
    return %arg0, %c0_i32, %c0_i32_0, %c0_i32_1 : i32, i32, i32, i32
  }
  func.func @transform_1(%arg0: i32, %arg1: i32) -> (i32, i32, i32, i32) {
    %c0_i32 = arith.constant 0 : i32
    %c0_i32_0 = arith.constant 0 : i32
    %c0_i32_1 = arith.constant 0 : i32
    %c0_i32_2 = arith.constant 0 : i32
    %c0_i32_3 = arith.constant 0 : i32
    return %c0_i32, %c0_i32_0, %c0_i32_1, %c0_i32_2 : i32, i32, i32, i32
  }
  func.func @transform_2(%arg0: i32, %arg1: i32) -> (i32, i32, i32) {
    %c0_i32 = arith.constant 0 : i32
    %c0_i32_0 = arith.constant 0 : i32
    %c0_i32_1 = arith.constant 0 : i32
    %c0_i32_2 = arith.constant 0 : i32
    return %c0_i32, %c0_i32_0, %c0_i32_1 : i32, i32, i32
  }
  func.func @transform_3(%arg0: i32, %arg1: i32) -> (i32, i32, i32, i32) {
    %c0_i32 = arith.constant 0 : i32
    %c0_i32_0 = arith.constant 0 : i32
    %c0_i32_1 = arith.constant 0 : i32
    return %arg0, %arg1, %c0_i32, %c0_i32_0 : i32, i32, i32, i32
  }
}

module attributes {stable_mosaic.version = 11 : i64} {
  func.func @_dilated_conv3_relu_kernel(%arg0: i32, %arg1: i32, %arg2: memref<1x16x16x128xf32, #tpu.memory_space<vmem>>, %arg3: memref<3x3x128x128xf32, #tpu.memory_space<vmem>>, %arg4: memref<1x1x128xf32, #tpu.memory_space<vmem>>, %arg5: memref<1x16x16x128xf32, #tpu.memory_space<vmem>>, %arg6: memref<22x22x128xf32, #tpu.memory_space<vmem>>) attributes {dimension_semantics = [#tpu.dimension_semantics<parallel>, #tpu.dimension_semantics<arbitrary>], iteration_bounds = array<i64: 2, 1>, scalar_prefetch = 0 : i64, scratch_operands = 1 : i64, tpu.core_type = #tpu.core_type<tc>, window_params = [{transform_indices = @transform_0, window_bounds = array<i64: 1, 16, 16, 128>}, {pipeline_mode = #tpu.pipeline_mode<synchronous>, transform_indices = @transform_1, window_bounds = array<i64: 3, 3, 128, 128>}, {pipeline_mode = #tpu.pipeline_mode<synchronous>, transform_indices = @transform_2, window_bounds = array<i64: 1, 1, 128>}, {transform_indices = @transform_3, window_bounds = array<i64: 1, 16, 16, 128>}]} {
    %c0_i32 = arith.constant 0 : i32
    %0 = arith.cmpi eq, %arg1, %c0_i32 : i32
    %1 = arith.extui %0 : i1 to i32
    %c0_i32_0 = arith.constant 0 : i32
    %2 = arith.cmpi ne, %1, %c0_i32_0 : i32
    scf.if %2 {
      %cst_58 = arith.constant 0.000000e+00 : f32
      %68 = vector.broadcast %cst_58 : f32 to vector<22x22x128xf32>
      %c0_59 = arith.constant 0 : index
      %c0_60 = arith.constant 0 : index
      %c0_61 = arith.constant 0 : index
      %69 = vector.load %arg6[%c0_59, %c0_60, %c0_61] : memref<22x22x128xf32, #tpu.memory_space<vmem>>, vector<22x22x128xf32>
      tpu.vector_store %arg6[%c0_59, %c0_60, %c0_61], %68 {strides = array<i32>} : memref<22x22x128xf32, #tpu.memory_space<vmem>>, vector<22x22x128xf32>,
      %c0_62 = arith.constant 0 : index
      %c0_63 = arith.constant 0 : index
      %c0_64 = arith.constant 0 : index
      %c0_65 = arith.constant 0 : index
      %70 = vector.load %arg2[%c0_62, %c0_63, %c0_64, %c0_65] : memref<1x16x16x128xf32, #tpu.memory_space<vmem>>, vector<1x16x16x128xf32>
      %71 = vector.shape_cast %70 : vector<1x16x16x128xf32> to vector<16x16x128xf32>
      %c3 = arith.constant 3 : index
      %c3_66 = arith.constant 3 : index
      %c0_67 = arith.constant 0 : index
      %72 = vector.load %arg6[%c3, %c3_66, %c0_67] : memref<22x22x128xf32, #tpu.memory_space<vmem>>, vector<16x16x128xf32>
      tpu.vector_store %arg6[%c3, %c3_66, %c0_67], %71 {strides = array<i32>} : memref<22x22x128xf32, #tpu.memory_space<vmem>>, vector<16x16x128xf32>,
    } else {
    }
    %c16_i32 = arith.constant 16 : i32
    %3 = arith.muli %arg1, %c16_i32 : i32
    %4 = tpu.assume_multiple %3, 16 : i32
    %cst = arith.constant 0.000000e+00 : f32
    %5 = vector.broadcast %cst : f32 to vector<16x16x128xf32>
    %c0_i32_1 = arith.constant 0 : i32
    %6 = arith.addi %4, %c0_i32_1 : i32
    %7 = arith.index_cast %6 : i32 to index
    %c0 = arith.constant 0 : index
    %c0_2 = arith.constant 0 : index
    %8 = vector.load %arg6[%7, %c0, %c0_2] : memref<22x22x128xf32, #tpu.memory_space<vmem>>, vector<16x22x128xf32>
    %9 = vector.extract_strided_slice %8 {offsets = [0, 0, 0], sizes = [16, 16, 128], strides = [1, 1, 1]} : vector<16x22x128xf32> to vector<16x16x128xf32>
    %c0_3 = arith.constant 0 : index
    %c0_4 = arith.constant 0 : index
    %c0_5 = arith.constant 0 : index
    %c0_6 = arith.constant 0 : index
    %10 = vector.load %arg3[%c0_3, %c0_4, %c0_5, %c0_6] : memref<3x3x128x128xf32, #tpu.memory_space<vmem>>, vector<1x1x128x128xf32>
    %11 = vector.shape_cast %10 : vector<1x1x128x128xf32> to vector<128x128xf32>
    %cst_7 = arith.constant dense<0.000000e+00> : vector<16x16x128xf32>
    %12 = tpu.matmul %9, %11, %cst_7 {dimension_numbers = #tpu.dot_dimension_numbers<[2], [0], [0, 1], [1], [0, 0, 0, 1, 1, 1], [], []>} : vector<16x16x128xf32>, vector<128x128xf32>, vector<16x16x128xf32> -> vector<16x16x128xf32>
    %13 = arith.addf %5, %12 : vector<16x16x128xf32>
    %14 = vector.extract_strided_slice %8 {offsets = [0, 3, 0], sizes = [16, 16, 128], strides = [1, 1, 1]} : vector<16x22x128xf32> to vector<16x16x128xf32>
    %c0_8 = arith.constant 0 : index
    %c1 = arith.constant 1 : index
    %c0_9 = arith.constant 0 : index
    %c0_10 = arith.constant 0 : index
    %15 = vector.load %arg3[%c0_8, %c1, %c0_9, %c0_10] : memref<3x3x128x128xf32, #tpu.memory_space<vmem>>, vector<1x1x128x128xf32>
    %16 = vector.shape_cast %15 : vector<1x1x128x128xf32> to vector<128x128xf32>
    %cst_11 = arith.constant dense<0.000000e+00> : vector<16x16x128xf32>
    %17 = tpu.matmul %14, %16, %cst_11 {dimension_numbers = #tpu.dot_dimension_numbers<[2], [0], [0, 1], [1], [0, 0, 0, 1, 1, 1], [], []>} : vector<16x16x128xf32>, vector<128x128xf32>, vector<16x16x128xf32> -> vector<16x16x128xf32>
    %18 = arith.addf %13, %17 : vector<16x16x128xf32>
    %19 = vector.extract_strided_slice %8 {offsets = [0, 6, 0], sizes = [16, 16, 128], strides = [1, 1, 1]} : vector<16x22x128xf32> to vector<16x16x128xf32>
    %c0_12 = arith.constant 0 : index
    %c2 = arith.constant 2 : index
    %c0_13 = arith.constant 0 : index
    %c0_14 = arith.constant 0 : index
    %20 = vector.load %arg3[%c0_12, %c2, %c0_13, %c0_14] : memref<3x3x128x128xf32, #tpu.memory_space<vmem>>, vector<1x1x128x128xf32>
    %21 = vector.shape_cast %20 : vector<1x1x128x128xf32> to vector<128x128xf32>
    %cst_15 = arith.constant dense<0.000000e+00> : vector<16x16x128xf32>
    %22 = tpu.matmul %19, %21, %cst_15 {dimension_numbers = #tpu.dot_dimension_numbers<[2], [0], [0, 1], [1], [0, 0, 0, 1, 1, 1], [], []>} : vector<16x16x128xf32>, vector<128x128xf32>, vector<16x16x128xf32> -> vector<16x16x128xf32>
    %23 = arith.addf %18, %22 : vector<16x16x128xf32>
    %c3_i32 = arith.constant 3 : i32
    %24 = arith.addi %4, %c3_i32 : i32
    %25 = arith.index_cast %24 : i32 to index
    %c0_16 = arith.constant 0 : index
    %c0_17 = arith.constant 0 : index
    %26 = vector.load %arg6[%25, %c0_16, %c0_17] : memref<22x22x128xf32, #tpu.memory_space<vmem>>, vector<16x22x128xf32>
    %27 = vector.extract_strided_slice %26 {offsets = [0, 0, 0], sizes = [16, 16, 128], strides = [1, 1, 1]} : vector<16x22x128xf32> to vector<16x16x128xf32>
    %c1_18 = arith.constant 1 : index
    %c0_19 = arith.constant 0 : index
    %c0_20 = arith.constant 0 : index
    %c0_21 = arith.constant 0 : index
    %28 = vector.load %arg3[%c1_18, %c0_19, %c0_20, %c0_21] : memref<3x3x128x128xf32, #tpu.memory_space<vmem>>, vector<1x1x128x128xf32>
    %29 = vector.shape_cast %28 : vector<1x1x128x128xf32> to vector<128x128xf32>
    %cst_22 = arith.constant dense<0.000000e+00> : vector<16x16x128xf32>
    %30 = tpu.matmul %27, %29, %cst_22 {dimension_numbers = #tpu.dot_dimension_numbers<[2], [0], [0, 1], [1], [0, 0, 0, 1, 1, 1], [], []>} : vector<16x16x128xf32>, vector<128x128xf32>, vector<16x16x128xf32> -> vector<16x16x128xf32>
    %31 = arith.addf %23, %30 : vector<16x16x128xf32>
    %32 = vector.extract_strided_slice %26 {offsets = [0, 3, 0], sizes = [16, 16, 128], strides = [1, 1, 1]} : vector<16x22x128xf32> to vector<16x16x128xf32>
    %c1_23 = arith.constant 1 : index
    %c1_24 = arith.constant 1 : index
    %c0_25 = arith.constant 0 : index
    %c0_26 = arith.constant 0 : index
    %33 = vector.load %arg3[%c1_23, %c1_24, %c0_25, %c0_26] : memref<3x3x128x128xf32, #tpu.memory_space<vmem>>, vector<1x1x128x128xf32>
    %34 = vector.shape_cast %33 : vector<1x1x128x128xf32> to vector<128x128xf32>
    %cst_27 = arith.constant dense<0.000000e+00> : vector<16x16x128xf32>
    %35 = tpu.matmul %32, %34, %cst_27 {dimension_numbers = #tpu.dot_dimension_numbers<[2], [0], [0, 1], [1], [0, 0, 0, 1, 1, 1], [], []>} : vector<16x16x128xf32>, vector<128x128xf32>, vector<16x16x128xf32> -> vector<16x16x128xf32>
    %36 = arith.addf %31, %35 : vector<16x16x128xf32>
    %37 = vector.extract_strided_slice %26 {offsets = [0, 6, 0], sizes = [16, 16, 128], strides = [1, 1, 1]} : vector<16x22x128xf32> to vector<16x16x128xf32>
    %c1_28 = arith.constant 1 : index
    %c2_29 = arith.constant 2 : index
    %c0_30 = arith.constant 0 : index
    %c0_31 = arith.constant 0 : index
    %38 = vector.load %arg3[%c1_28, %c2_29, %c0_30, %c0_31] : memref<3x3x128x128xf32, #tpu.memory_space<vmem>>, vector<1x1x128x128xf32>
    %39 = vector.shape_cast %38 : vector<1x1x128x128xf32> to vector<128x128xf32>
    %cst_32 = arith.constant dense<0.000000e+00> : vector<16x16x128xf32>
    %40 = tpu.matmul %37, %39, %cst_32 {dimension_numbers = #tpu.dot_dimension_numbers<[2], [0], [0, 1], [1], [0, 0, 0, 1, 1, 1], [], []>} : vector<16x16x128xf32>, vector<128x128xf32>, vector<16x16x128xf32> -> vector<16x16x128xf32>
    %41 = arith.addf %36, %40 : vector<16x16x128xf32>
    %c6_i32 = arith.constant 6 : i32
    %42 = arith.addi %4, %c6_i32 : i32
    %43 = arith.index_cast %42 : i32 to index
    %c0_33 = arith.constant 0 : index
    %c0_34 = arith.constant 0 : index
    %44 = vector.load %arg6[%43, %c0_33, %c0_34] : memref<22x22x128xf32, #tpu.memory_space<vmem>>, vector<16x22x128xf32>
    %45 = vector.extract_strided_slice %44 {offsets = [0, 0, 0], sizes = [16, 16, 128], strides = [1, 1, 1]} : vector<16x22x128xf32> to vector<16x16x128xf32>
    %c2_35 = arith.constant 2 : index
    %c0_36 = arith.constant 0 : index
    %c0_37 = arith.constant 0 : index
    %c0_38 = arith.constant 0 : index
    %46 = vector.load %arg3[%c2_35, %c0_36, %c0_37, %c0_38] : memref<3x3x128x128xf32, #tpu.memory_space<vmem>>, vector<1x1x128x128xf32>
    %47 = vector.shape_cast %46 : vector<1x1x128x128xf32> to vector<128x128xf32>
    %cst_39 = arith.constant dense<0.000000e+00> : vector<16x16x128xf32>
    %48 = tpu.matmul %45, %47, %cst_39 {dimension_numbers = #tpu.dot_dimension_numbers<[2], [0], [0, 1], [1], [0, 0, 0, 1, 1, 1], [], []>} : vector<16x16x128xf32>, vector<128x128xf32>, vector<16x16x128xf32> -> vector<16x16x128xf32>
    %49 = arith.addf %41, %48 : vector<16x16x128xf32>
    %50 = vector.extract_strided_slice %44 {offsets = [0, 3, 0], sizes = [16, 16, 128], strides = [1, 1, 1]} : vector<16x22x128xf32> to vector<16x16x128xf32>
    %c2_40 = arith.constant 2 : index
    %c1_41 = arith.constant 1 : index
    %c0_42 = arith.constant 0 : index
    %c0_43 = arith.constant 0 : index
    %51 = vector.load %arg3[%c2_40, %c1_41, %c0_42, %c0_43] : memref<3x3x128x128xf32, #tpu.memory_space<vmem>>, vector<1x1x128x128xf32>
    %52 = vector.shape_cast %51 : vector<1x1x128x128xf32> to vector<128x128xf32>
    %cst_44 = arith.constant dense<0.000000e+00> : vector<16x16x128xf32>
    %53 = tpu.matmul %50, %52, %cst_44 {dimension_numbers = #tpu.dot_dimension_numbers<[2], [0], [0, 1], [1], [0, 0, 0, 1, 1, 1], [], []>} : vector<16x16x128xf32>, vector<128x128xf32>, vector<16x16x128xf32> -> vector<16x16x128xf32>
    %54 = arith.addf %49, %53 : vector<16x16x128xf32>
    %55 = vector.extract_strided_slice %44 {offsets = [0, 6, 0], sizes = [16, 16, 128], strides = [1, 1, 1]} : vector<16x22x128xf32> to vector<16x16x128xf32>
    %c2_45 = arith.constant 2 : index
    %c2_46 = arith.constant 2 : index
    %c0_47 = arith.constant 0 : index
    %c0_48 = arith.constant 0 : index
    %56 = vector.load %arg3[%c2_45, %c2_46, %c0_47, %c0_48] : memref<3x3x128x128xf32, #tpu.memory_space<vmem>>, vector<1x1x128x128xf32>
    %57 = vector.shape_cast %56 : vector<1x1x128x128xf32> to vector<128x128xf32>
    %cst_49 = arith.constant dense<0.000000e+00> : vector<16x16x128xf32>
    %58 = tpu.matmul %55, %57, %cst_49 {dimension_numbers = #tpu.dot_dimension_numbers<[2], [0], [0, 1], [1], [0, 0, 0, 1, 1, 1], [], []>} : vector<16x16x128xf32>, vector<128x128xf32>, vector<16x16x128xf32> -> vector<16x16x128xf32>
    %59 = arith.addf %54, %58 : vector<16x16x128xf32>
    %c0_50 = arith.constant 0 : index
    %c0_51 = arith.constant 0 : index
    %c0_52 = arith.constant 0 : index
    %60 = vector.load %arg4[%c0_50, %c0_51, %c0_52] : memref<1x1x128xf32, #tpu.memory_space<vmem>>, vector<1x1x128xf32>
    %61 = vector.broadcast %60 : vector<1x1x128xf32> to vector<16x16x128xf32>
    %62 = arith.addf %59, %61 : vector<16x16x128xf32>
    %cst_53 = arith.constant 0.000000e+00 : f32
    %63 = vector.broadcast %cst_53 : f32 to vector<16x16x128xf32>
    %64 = arith.maximumf %62, %63 : vector<16x16x128xf32>
    %c0_54 = arith.constant 0 : index
    %c0_55 = arith.constant 0 : index
    %c0_56 = arith.constant 0 : index
    %c0_57 = arith.constant 0 : index
    %65 = vector.load %arg5[%c0_54, %c0_55, %c0_56, %c0_57] : memref<1x16x16x128xf32, #tpu.memory_space<vmem>>, vector<1x16x16x128xf32>
    %66 = vector.shape_cast %65 : vector<1x16x16x128xf32> to vector<16x16x128xf32>
    %67 = vector.shape_cast %64 : vector<16x16x128xf32> to vector<1x16x16x128xf32>
    tpu.vector_store %arg5[%c0_54, %c0_55, %c0_56, %c0_57], %67 {strides = array<i32>} : memref<1x16x16x128xf32, #tpu.memory_space<vmem>>, vector<1x16x16x128xf32>,
    return
  }
  func.func @transform_0(%arg0: i32, %arg1: i32) -> (i32, i32, i32, i32) {
    %c0_i32 = arith.constant 0 : i32
    %c0_i32_0 = arith.constant 0 : i32
    %c0_i32_1 = arith.constant 0 : i32
    %c0_i32_2 = arith.constant 0 : i32
    return %arg0, %c0_i32, %c0_i32_0, %c0_i32_1 : i32, i32, i32, i32
  }
  func.func @transform_1(%arg0: i32, %arg1: i32) -> (i32, i32, i32, i32) {
    %c0_i32 = arith.constant 0 : i32
    %c0_i32_0 = arith.constant 0 : i32
    %c0_i32_1 = arith.constant 0 : i32
    %c0_i32_2 = arith.constant 0 : i32
    %c0_i32_3 = arith.constant 0 : i32
    return %c0_i32, %c0_i32_0, %c0_i32_1, %c0_i32_2 : i32, i32, i32, i32
  }
  func.func @transform_2(%arg0: i32, %arg1: i32) -> (i32, i32, i32) {
    %c0_i32 = arith.constant 0 : i32
    %c0_i32_0 = arith.constant 0 : i32
    %c0_i32_1 = arith.constant 0 : i32
    %c0_i32_2 = arith.constant 0 : i32
    return %c0_i32, %c0_i32_0, %c0_i32_1 : i32, i32, i32
  }
  func.func @transform_3(%arg0: i32, %arg1: i32) -> (i32, i32, i32, i32) {
    %c0_i32 = arith.constant 0 : i32
    %c0_i32_0 = arith.constant 0 : i32
    %c0_i32_1 = arith.constant 0 : i32
    return %arg0, %arg1, %c0_i32, %c0_i32_0 : i32, i32, i32, i32
  }
}

</mosaic_0001>

<bundles_post_ra>
// kernel: inception_forward.4
= control target key start
LH: loop header
LB: loop body
LE: loop exit
PB: predicated region body
PF: predicated region fallthrough
CT: control target
= control target key end

     0   :  { %s1082_s15 = smov 0   ;;  %s1084_s16 = smov 0   ;;  %s1363_s0 = inlined_call_operand.vmem [shape: f32[2,16,16,4], index: 0, kind: input, shape index: {}]   ;;  %s1364_s1 = inlined_call_operand.vmem [shape: f32[4,256], index: 1, kind: input, shape index: {}]   ;;  %s1365_s2 = inlined_call_operand.vmem [shape: f32[1,1,256], index: 2, kind: input, shape index: {}]   ;;  %s1366_s3 = inlined_call_operand.vmem [shape: f32[2,16,16,128], index: 3, kind: output, shape index: {0}]   ;;  %s1367_s4 = inlined_call_operand.vmem [shape: f32[2,16,16,128], index: 4, kind: output, shape index: {1}]  }
   0x1   :  { %s1086_s17 = smov 0  }
   0x2 LB: > { %s27_s18 = sadd.s32 1, %s1050_s16  ;;  %p958_p0 = scmp.ge.s32.totalorder %s1054_s17, 1  ;;  %s1054_s17 = sphi %s1086_s17, %s15_s17   ;;  %s1050_s16 = sphi %s1084_s16, %s1369_s16   ;;  %s1046_s15 = sphi %s1082_s15, %s1368_s15  }
   0x3   : > { %p29_p1 = scmp.ge.s32.totalorder %s27_s18, 2  ;;  %p189_p2 = scmp.lt.s32.totalorder %s1054_s17, 3 }
   0x5   : > { %s1371_s18 = smov (%p29_p1, %s27_s18), 0  ;;  %p190_p3 = pnand %p958_p0, %p189_p2 }
   0x6   : > { %v300_v0 = vld [vmem:[%s1364_s1] sm:$0xff] (!%p190_p3)  ;;  %vm412_vm0 = vcmask (!%p190_p3), 1043456   ;;  %p236_p4 = scmp.lt.s32.totalorder (!%p190_p3), %s1046_s15, 1  ;;  %v1056_v2 = vmov (!%p190_p3), 0.0   ;;  %vm315_vm1 = vcmask (!%p190_p3), 31744   ;;  %v303_v35 = vlaneseq (!%p190_p3) }
   0x7   : > { %193 = sbr.rel (%p190_p3) target bundleno = 297 (0x129), region = 32  ;;  %v314_v1 = vcombine.high (!%p190_p3), %v300_v0, %v300_v0  ;;  %481 = vmatprep.mubr.f32.mxu0 (!%p190_p3), %v1056_v2  ;;  %577 = vmatprep.mubr.f32.mxu1 (!%p190_p3), %v1056_v2  ;;  %v301_v38 = vld [vmem:[%s1365_s2] sm:$0x3] (!%p190_p3) }
   0x8   : > { %v304_v36 = vshrl.u32 (!%p190_p3), %v303_v35, 7 }
   0x9   : > { %965 = vmatprep.subr.msk.mxu0 (!%p190_p3), %vm412_vm0, %v314_v1  ;;  %1004 = vmatprep.subr.msk.mxu1 (!%p190_p3), %vm412_vm0, %v314_v1 }
   0xa   : > { %966 = vmatpush1.msk.msra.mxu0 (!%p190_p3), %vm412_vm0, %v300_v0  ;;  %1005 = vmatpush1.msk.msra.mxu1 (!%p190_p3), %vm412_vm0, %v300_v0  ;;  %v305_v37 = vsub.s32 (!%p190_p3), 0, %v304_v36  ;;  %v309_v39 = vsub.s32 (!%p190_p3), 1, %v304_v36 }
   0xc   : > { %v1210_v40 = vrot.slane (!%p190_p3), %v301_v38, %v305_v37  ;;  %v1212_v41 = vrot.slane (!%p190_p3), %v301_v38, %v309_v39 }
   0xe   : > { %s1373_s15 = smov (!%p236_p4, %s1046_s15), 1 }
   0xf   : > { %s1105_s21 = sshll.u32 %s1373_s15, 8 }
  0x10   : > { %s1111_s24 = scalar_lea.vmem %s1363_s0, %s1105_s21  ;;  %s1220_s29 = scalar_lea.vmem %s1366_s3, %s1105_s21 }
  0x11   : > { %v268_v3 = vld [vmem:[%s1111_s24] sm:$0xff]  ;;  %v269_v5 = vld [vmem:[%s1111_s24 + $0x8] sm:$0xff]  ;;  %v270_v7 = vld [vmem:[%s1111_s24 + $0x10] sm:$0xff]  ;;  %s1228_s6 = scalar_lea.vmem %s1367_s4, %s1105_s21 }
  0x12   : > { %v284_v4 = vld [vmem:[%s1111_s24 + $0x80] sm:$0xff]  ;;  %967 = vmatmul.mubr.msk.f32.vlgmr.msra.gmra.mrb[0].mxu0 %vm315_vm1, %v268_v3  ;;  %v285_v6 = vld [vmem:[%s1111_s24 + $0x88] sm:$0xff]  ;;  %v286_v8 = vld [vmem:[%s1111_s24 + $0x90] sm:$0xff] }
  0x13   : > { %983 = vmatmul.mubr.msk.f32.vlgmr.msra.gmra.mrb[0].mxu1 %vm315_vm1, %v284_v4  ;;  %487 = vmatprep.mubr.f32.mxu0 %v1056_v2  ;;  %v271_v9 = vld [vmem:[%s1111_s24 + $0x18] sm:$0xff]  ;;  %v272_v11 = vld [vmem:[%s1111_s24 + $0x20] sm:$0xff]  ;;  %v273_v13 = vld [vmem:[%s1111_s24 + $0x28] sm:$0xff] }
  0x14   : > { %583 = vmatprep.mubr.f32.mxu1 %v1056_v2  ;;  %v287_v10 = vld [vmem:[%s1111_s24 + $0x98] sm:$0xff]  ;;  %v288_v12 = vld [vmem:[%s1111_s24 + $0xa0] sm:$0xff]  ;;  %v289_v14 = vld [vmem:[%s1111_s24 + $0xa8] sm:$0xff] }
  0x15   : > { %v274_v15 = vld [vmem:[%s1111_s24 + $0x30] sm:$0xff]  ;;  %v275_v17 = vld [vmem:[%s1111_s24 + $0x38] sm:$0xff]  ;;  %v276_v19 = vld [vmem:[%s1111_s24 + $0x40] sm:$0xff] }
  0x16   : > { %968 = vmatmul.mubr.msk.f32.gmra.mrb[2].mxu0 %vm315_vm1, %v269_v5  ;;  %v290_v16 = vld [vmem:[%s1111_s24 + $0xb0] sm:$0xff]  ;;  %v291_v18 = vld [vmem:[%s1111_s24 + $0xb8] sm:$0xff]  ;;  %v292_v20 = vld [vmem:[%s1111_s24 + $0xc0] sm:$0xff] }
  0x17   : > { %984 = vmatmul.mubr.msk.f32.gmra.mrb[2].mxu1 %vm315_vm1, %v285_v6  ;;  %493 = vmatprep.mubr.f32.mxu0 %v1056_v2  ;;  %v277_v21 = vld [vmem:[%s1111_s24 + $0x48] sm:$0xff]  ;;  %v278_v23 = vld [vmem:[%s1111_s24 + $0x50] sm:$0xff]  ;;  %v279_v25 = vld [vmem:[%s1111_s24 + $0x58] sm:$0xff] }
  0x18   : > { %589 = vmatprep.mubr.f32.mxu1 %v1056_v2  ;;  %v293_v22 = vld [vmem:[%s1111_s24 + $0xc8] sm:$0xff]  ;;  %v294_v24 = vld [vmem:[%s1111_s24 + $0xd0] sm:$0xff]  ;;  %v295_v26 = vld [vmem:[%s1111_s24 + $0xd8] sm:$0xff] }
  0x19   : > { %v280_v27 = vld [vmem:[%s1111_s24 + $0x60] sm:$0xff]  ;;  %v281_v29 = vld [vmem:[%s1111_s24 + $0x68] sm:$0xff]  ;;  %v282_v31 = vld [vmem:[%s1111_s24 + $0x70] sm:$0xff] }
  0x1a   : > { %969 = vmatmul.mubr.msk.f32.gmra.mrb[4].mxu0 %vm315_vm1, %v270_v7  ;;  %v296_v28 = vld [vmem:[%s1111_s24 + $0xe0] sm:$0xff]  ;;  %v297_v30 = vld [vmem:[%s1111_s24 + $0xe8] sm:$0xff]  ;;  %v298_v32 = vld [vmem:[%s1111_s24 + $0xf0] sm:$0xff] }
  0x1b   : > { %985 = vmatmul.mubr.msk.f32.gmra.mrb[4].mxu1 %vm315_vm1, %v286_v8  ;;  %499 = vmatprep.mubr.f32.mxu0 %v1056_v2  ;;  %v283_v33 = vld [vmem:[%s1111_s24 + $0x78] sm:$0xff] }
  0x1c   : > { %595 = vmatprep.mubr.f32.mxu1 %v1056_v2  ;;  %v299_v34 = vld [vmem:[%s1111_s24 + $0xf8] sm:$0xff] }
  0x1e   : > { %970 = vmatmul.mubr.msk.f32.gmra.mrb[6].mxu0 %vm315_vm1, %v271_v9 }
  0x1f   : > { %986 = vmatmul.mubr.msk.f32.gmra.mrb[6].mxu1 %vm315_vm1, %v287_v10  ;;  %505 = vmatprep.mubr.f32.mxu0 %v1056_v2 }
  0x20   : > { %601 = vmatprep.mubr.f32.mxu1 %v1056_v2 }
  0x22   : > { %971 = vmatmul.mubr.msk.f32.gmra.mrb[8].mxu0 %vm315_vm1, %v272_v11 }
  0x23   : > { %987 = vmatmul.mubr.msk.f32.gmra.mrb[8].mxu1 %vm315_vm1, %v288_v12  ;;  %511 = vmatprep.mubr.f32.mxu0 %v1056_v2 }
  0x24   : > { %607 = vmatprep.mubr.f32.mxu1 %v1056_v2 }
  0x26   : > { %972 = vmatmul.mubr.msk.f32.gmra.mrb[10].mxu0 %vm315_vm1, %v273_v13 }
  0x27   : > { %988 = vmatmul.mubr.msk.f32.gmra.mrb[10].mxu1 %vm315_vm1, %v289_v14  ;;  %517 = vmatprep.mubr.f32.mxu0 %v1056_v2 }
  0x28   : > { %613 = vmatprep.mubr.f32.mxu1 %v1056_v2 }
  0x2a   : > { %973 = vmatmul.mubr.msk.f32.gmra.mrb[12].mxu0 %vm315_vm1, %v274_v15 }
  0x2b   : > { %989 = vmatmul.mubr.msk.f32.gmra.mrb[12].mxu1 %vm315_vm1, %v290_v16  ;;  %523 = vmatprep.mubr.f32.mxu0 %v1056_v2 }
  0x2c   : > { %619 = vmatprep.mubr.f32.mxu1 %v1056_v2 }
  0x2e   : > { %974 = vmatmul.mubr.msk.f32.gmra.mrb[14].mxu0 %vm315_vm1, %v275_v17 }
  0x2f   : > { %990 = vmatmul.mubr.msk.f32.gmra.mrb[14].mxu1 %vm315_vm1, %v291_v18  ;;  %529 = vmatprep.mubr.f32.mxu0 %v1056_v2 }
  0x30   : > { %625 = vmatprep.mubr.f32.mxu1 %v1056_v2 }
  0x32   : > { %975 = vmatmul.mubr.msk.f32.gmra.mrb[16].mxu0 %vm315_vm1, %v276_v19 }
  0x33   : > { %991 = vmatmul.mubr.msk.f32.gmra.mrb[16].mxu1 %vm315_vm1, %v292_v20  ;;  %535 = vmatprep.mubr.f32.mxu0 %v1056_v2 }
  0x34   : > { %631 = vmatprep.mubr.f32.mxu1 %v1056_v2 }
  0x36   : > { %976 = vmatmul.mubr.msk.f32.gmra.mrb[18].mxu0 %vm315_vm1, %v277_v21 }
  0x37   : > { %992 = vmatmul.mubr.msk.f32.gmra.mrb[18].mxu1 %vm315_vm1, %v293_v22  ;;  %541 = vmatprep.mubr.f32.mxu0 %v1056_v2 }
  0x38   : > { %637 = vmatprep.mubr.f32.mxu1 %v1056_v2 }
  0x3a   : > { %977 = vmatmul.mubr.msk.f32.gmra.mrb[20].mxu0 %vm315_vm1, %v278_v23 }
  0x3b   : > { %993 = vmatmul.mubr.msk.f32.gmra.mrb[20].mxu1 %vm315_vm1, %v294_v24  ;;  %547 = vmatprep.mubr.f32.mxu0 %v1056_v2 }
  0x3c   : > { %643 = vmatprep.mubr.f32.mxu1 %v1056_v2 }
  0x3e   : > { %978 = vmatmul.mubr.msk.f32.gmra.mrb[22].mxu0 %vm315_vm1, %v279_v25 }
  0x3f   : > { %994 = vmatmul.mubr.msk.f32.gmra.mrb[22].mxu1 %vm315_vm1, %v295_v26  ;;  %553 = vmatprep.mubr.f32.mxu0 %v1056_v2 }
  0x40   : > { %649 = vmatprep.mubr.f32.mxu1 %v1056_v2 }
  0x42   : > { %979 = vmatmul.mubr.msk.f32.gmra.mrb[24].mxu0 %vm315_vm1, %v280_v27 }
  0x43   : > { %995 = vmatmul.mubr.msk.f32.gmra.mrb[24].mxu1 %vm315_vm1, %v296_v28  ;;  %559 = vmatprep.mubr.f32.mxu0 %v1056_v2 }
  0x44   : > { %655 = vmatprep.mubr.f32.mxu1 %v1056_v2 }
  0x46   : > { %980 = vmatmul.mubr.msk.f32.gmra.mrb[26].mxu0 %vm315_vm1, %v281_v29 }
  0x47   : > { %996 = vmatmul.mubr.msk.f32.gmra.mrb[26].mxu1 %vm315_vm1, %v297_v30  ;;  %565 = vmatprep.mubr.f32.mxu0 %v1056_v2 }
  0x48   : > { %661 = vmatprep.mubr.f32.mxu1 %v1056_v2 }
  0x4a   : > { %981 = vmatmul.mubr.msk.f32.gmra.mrb[28].mxu0 %vm315_vm1, %v282_v31 }
  0x4b   : > { %997 = vmatmul.mubr.msk.f32.gmra.mrb[28].mxu1 %vm315_vm1, %v298_v32  ;;  %571 = vmatprep.mubr.f32.mxu0 %v1056_v2 }
  0x4c   : > { %667 = vmatprep.mubr.f32.mxu1 %v1056_v2 }
  0x4e   : > { %982 = vmatmul.mubr.msk.f32.gmra.mrb[30].mxu0 %vm315_vm1, %v283_v33 }
  0x4f   : > { %998 = vmatmul.mubr.msk.f32.gmra.mrb[30].mxu1 %vm315_vm1, %v299_v34 }
  0xe5   : > { %v483_v42 = vpop.f32.mrb[0].mxu0 }
  0xe6   : > { %v579_v43 = vpop.f32.mrb[0].mxu1  ;;  %v484_v44 = vadd.f32 %v483_v42, %v1210_v40  ;;  %v485_v46 = vpop.f32.mrb[1].mxu0 }
  0xe7   : > { %v580_v45 = vadd.f32 %v579_v43, %v1210_v40  ;;  %v581_v47 = vpop.f32.mrb[1].mxu1  ;;  %v486_v48 = vadd.f32 %v485_v46, %v1212_v41 }
  0xe8   : > { %v582_v49 = vadd.f32 %v581_v47, %v1212_v41  ;;  %v674_v50 = vmax.f32 %v484_v44, 0.0 }
  0xe9   : > { %v706_v51 = vmax.f32 %v580_v45, 0.0  ;;  %v675_v52 = vmax.f32 %v486_v48, 0.0  ;;  %v489_v54 = vpop.f32.mrb[2].mxu0 }
  0xea   : > { %v707_v53 = vmax.f32 %v582_v49, 0.0  ;;  %v585_v55 = vpop.f32.mrb[2].mxu1  ;;  %738 = vst [vmem:[%s1220_s29] sm:$0xff] %v674_v50  ;;  %v490_v56 = vadd.f32 %v489_v54, %v1210_v40  ;;  %v491_v58 = vpop.f32.mrb[3].mxu0 }
  0xeb   : > { %754 = vst [vmem:[%s1220_s29 + $0x80] sm:$0xff] %v706_v51  ;;  %v586_v57 = vadd.f32 %v585_v55, %v1210_v40  ;;  %v587_v59 = vpop.f32.mrb[3].mxu1  ;;  %770 = vst [vmem:[%s1228_s6] sm:$0xff] %v675_v52  ;;  %v492_v60 = vadd.f32 %v491_v58, %v1212_v41 }
  0xec   : > { %786 = vst [vmem:[%s1228_s6 + $0x80] sm:$0xff] %v707_v53  ;;  %v588_v61 = vadd.f32 %v587_v59, %v1212_v41  ;;  %v676_v62 = vmax.f32 %v490_v56, 0.0 }
  0xed   : > { %v708_v63 = vmax.f32 %v586_v57, 0.0  ;;  %v677_v0 = vmax.f32 %v492_v60, 0.0  ;;  %v495_v2 = vpop.f32.mrb[4].mxu0 }
  0xee   : > { %v709_v1 = vmax.f32 %v588_v61, 0.0  ;;  %v591_v3 = vpop.f32.mrb[4].mxu1  ;;  %739 = vst [vmem:[%s1220_s29 + $0x8] sm:$0xff] %v676_v62  ;;  %v496_v4 = vadd.f32 %v495_v2, %v1210_v40  ;;  %v497_v6 = vpop.f32.mrb[5].mxu0 }
  0xef   : > { %755 = vst [vmem:[%s1220_s29 + $0x88] sm:$0xff] %v708_v63  ;;  %v592_v5 = vadd.f32 %v591_v3, %v1210_v40  ;;  %v593_v7 = vpop.f32.mrb[5].mxu1  ;;  %771 = vst [vmem:[%s1228_s6 + $0x8] sm:$0xff] %v677_v0  ;;  %v498_v8 = vadd.f32 %v497_v6, %v1212_v41 }
  0xf0   : > { %787 = vst [vmem:[%s1228_s6 + $0x88] sm:$0xff] %v709_v1  ;;  %v594_v9 = vadd.f32 %v593_v7, %v1212_v41  ;;  %v678_v10 = vmax.f32 %v496_v4, 0.0 }
  0xf1   : > { %v710_v11 = vmax.f32 %v592_v5, 0.0  ;;  %v679_v12 = vmax.f32 %v498_v8, 0.0  ;;  %v501_v14 = vpop.f32.mrb[6].mxu0 }
  0xf2   : > { %v711_v13 = vmax.f32 %v594_v9, 0.0  ;;  %v597_v15 = vpop.f32.mrb[6].mxu1  ;;  %740 = vst [vmem:[%s1220_s29 + $0x10] sm:$0xff] %v678_v10  ;;  %v502_v16 = vadd.f32 %v501_v14, %v1210_v40  ;;  %v503_v18 = vpop.f32.mrb[7].mxu0 }
  0xf3   : > { %756 = vst [vmem:[%s1220_s29 + $0x90] sm:$0xff] %v710_v11  ;;  %v598_v17 = vadd.f32 %v597_v15, %v1210_v40  ;;  %v599_v19 = vpop.f32.mrb[7].mxu1  ;;  %772 = vst [vmem:[%s1228_s6 + $0x10] sm:$0xff] %v679_v12  ;;  %v504_v20 = vadd.f32 %v503_v18, %v1212_v41 }
  0xf4   : > { %788 = vst [vmem:[%s1228_s6 + $0x90] sm:$0xff] %v711_v13  ;;  %v600_v21 = vadd.f32 %v599_v19, %v1212_v41  ;;  %v680_v22 = vmax.f32 %v502_v16, 0.0 }
  0xf5   : > { %v712_v23 = vmax.f32 %v598_v17, 0.0  ;;  %v681_v24 = vmax.f32 %v504_v20, 0.0  ;;  %v507_v26 = vpop.f32.mrb[8].mxu0 }
  0xf6   : > { %v713_v25 = vmax.f32 %v600_v21, 0.0  ;;  %v603_v27 = vpop.f32.mrb[8].mxu1  ;;  %741 = vst [vmem:[%s1220_s29 + $0x18] sm:$0xff] %v680_v22  ;;  %v508_v28 = vadd.f32 %v507_v26, %v1210_v40  ;;  %v509_v30 = vpop.f32.mrb[9].mxu0 }
  0xf7   : > { %757 = vst [vmem:[%s1220_s29 + $0x98] sm:$0xff] %v712_v23  ;;  %v604_v29 = vadd.f32 %v603_v27, %v1210_v40  ;;  %v605_v31 = vpop.f32.mrb[9].mxu1  ;;  %773 = vst [vmem:[%s1228_s6 + $0x18] sm:$0xff] %v681_v24  ;;  %v510_v32 = vadd.f32 %v509_v30, %v1212_v41 }
  0xf8   : > { %789 = vst [vmem:[%s1228_s6 + $0x98] sm:$0xff] %v713_v25  ;;  %v606_v33 = vadd.f32 %v605_v31, %v1212_v41  ;;  %v682_v34 = vmax.f32 %v508_v28, 0.0 }
  0xf9   : > { %v714_v35 = vmax.f32 %v604_v29, 0.0  ;;  %v683_v36 = vmax.f32 %v510_v32, 0.0  ;;  %v513_v38 = vpop.f32.mrb[10].mxu0 }
  0xfa   : > { %v715_v37 = vmax.f32 %v606_v33, 0.0  ;;  %v609_v39 = vpop.f32.mrb[10].mxu1  ;;  %742 = vst [vmem:[%s1220_s29 + $0x20] sm:$0xff] %v682_v34  ;;  %v514_v42 = vadd.f32 %v513_v38, %v1210_v40  ;;  %v515_v44 = vpop.f32.mrb[11].mxu0 }
  0xfb   : > { %758 = vst [vmem:[%s1220_s29 + $0xa0] sm:$0xff] %v714_v35  ;;  %v610_v43 = vadd.f32 %v609_v39, %v1210_v40  ;;  %v611_v45 = vpop.f32.mrb[11].mxu1  ;;  %774 = vst [vmem:[%s1228_s6 + $0x20] sm:$0xff] %v683_v36  ;;  %v516_v46 = vadd.f32 %v515_v44, %v1212_v41 }
  0xfc   : > { %790 = vst [vmem:[%s1228_s6 + $0xa0] sm:$0xff] %v715_v37  ;;  %v612_v47 = vadd.f32 %v611_v45, %v1212_v41  ;;  %v684_v48 = vmax.f32 %v514_v42, 0.0 }
  0xfd   : > { %v716_v49 = vmax.f32 %v610_v43, 0.0  ;;  %v685_v50 = vmax.f32 %v516_v46, 0.0  ;;  %v519_v52 = vpop.f32.mrb[12].mxu0 }
  0xfe   : > { %v717_v51 = vmax.f32 %v612_v47, 0.0  ;;  %v615_v53 = vpop.f32.mrb[12].mxu1  ;;  %743 = vst [vmem:[%s1220_s29 + $0x28] sm:$0xff] %v684_v48  ;;  %v520_v54 = vadd.f32 %v519_v52, %v1210_v40  ;;  %v521_v56 = vpop.f32.mrb[13].mxu0 }
  0xff   : > { %759 = vst [vmem:[%s1220_s29 + $0xa8] sm:$0xff] %v716_v49  ;;  %v616_v55 = vadd.f32 %v615_v53, %v1210_v40  ;;  %v617_v57 = vpop.f32.mrb[13].mxu1  ;;  %775 = vst [vmem:[%s1228_s6 + $0x28] sm:$0xff] %v685_v50  ;;  %v522_v58 = vadd.f32 %v521_v56, %v1212_v41 }
 0x100   : > { %791 = vst [vmem:[%s1228_s6 + $0xa8] sm:$0xff] %v717_v51  ;;  %v618_v59 = vadd.f32 %v617_v57, %v1212_v41  ;;  %v686_v60 = vmax.f32 %v520_v54, 0.0 }
 0x101   : > { %v718_v61 = vmax.f32 %v616_v55, 0.0  ;;  %v687_v62 = vmax.f32 %v522_v58, 0.0  ;;  %v525_v0 = vpop.f32.mrb[14].mxu0 }
 0x102   : > { %v719_v63 = vmax.f32 %v618_v59, 0.0  ;;  %v621_v1 = vpop.f32.mrb[14].mxu1  ;;  %744 = vst [vmem:[%s1220_s29 + $0x30] sm:$0xff] %v686_v60  ;;  %v526_v2 = vadd.f32 %v525_v0, %v1210_v40  ;;  %v527_v4 = vpop.f32.mrb[15].mxu0 }
 0x103   : > { %760 = vst [vmem:[%s1220_s29 + $0xb0] sm:$0xff] %v718_v61  ;;  %v622_v3 = vadd.f32 %v621_v1, %v1210_v40  ;;  %v623_v5 = vpop.f32.mrb[15].mxu1  ;;  %776 = vst [vmem:[%s1228_s6 + $0x30] sm:$0xff] %v687_v62  ;;  %v528_v6 = vadd.f32 %v527_v4, %v1212_v41 }
 0x104   : > { %792 = vst [vmem:[%s1228_s6 + $0xb0] sm:$0xff] %v719_v63  ;;  %v624_v7 = vadd.f32 %v623_v5, %v1212_v41  ;;  %v688_v8 = vmax.f32 %v526_v2, 0.0 }
 0x105   : > { %v720_v9 = vmax.f32 %v622_v3, 0.0  ;;  %v689_v10 = vmax.f32 %v528_v6, 0.0  ;;  %v531_v12 = vpop.f32.mrb[16].mxu0 }
 0x106   : > { %v721_v11 = vmax.f32 %v624_v7, 0.0  ;;  %v627_v13 = vpop.f32.mrb[16].mxu1  ;;  %745 = vst [vmem:[%s1220_s29 + $0x38] sm:$0xff] %v688_v8  ;;  %v532_v14 = vadd.f32 %v531_v12, %v1210_v40  ;;  %v533_v16 = vpop.f32.mrb[17].mxu0 }
 0x107   : > { %761 = vst [vmem:[%s1220_s29 + $0xb8] sm:$0xff] %v720_v9  ;;  %v628_v15 = vadd.f32 %v627_v13, %v1210_v40  ;;  %v629_v17 = vpop.f32.mrb[17].mxu1  ;;  %777 = vst [vmem:[%s1228_s6 + $0x38] sm:$0xff] %v689_v10  ;;  %v534_v18 = vadd.f32 %v533_v16, %v1212_v41 }
 0x108   : > { %793 = vst [vmem:[%s1228_s6 + $0xb8] sm:$0xff] %v721_v11  ;;  %v630_v19 = vadd.f32 %v629_v17, %v1212_v41  ;;  %v690_v20 = vmax.f32 %v532_v14, 0.0 }
 0x109   : > { %v722_v21 = vmax.f32 %v628_v15, 0.0  ;;  %v691_v22 = vmax.f32 %v534_v18, 0.0  ;;  %v537_v24 = vpop.f32.mrb[18].mxu0 }
 0x10a   : > { %v723_v23 = vmax.f32 %v630_v19, 0.0  ;;  %v633_v25 = vpop.f32.mrb[18].mxu1  ;;  %746 = vst [vmem:[%s1220_s29 + $0x40] sm:$0xff] %v690_v20  ;;  %v538_v26 = vadd.f32 %v537_v24, %v1210_v40  ;;  %v539_v28 = vpop.f32.mrb[19].mxu0 }
 0x10b   : > { %762 = vst [vmem:[%s1220_s29 + $0xc0] sm:$0xff] %v722_v21  ;;  %v634_v27 = vadd.f32 %v633_v25, %v1210_v40  ;;  %v635_v29 = vpop.f32.mrb[19].mxu1  ;;  %778 = vst [vmem:[%s1228_s6 + $0x40] sm:$0xff] %v691_v22  ;;  %v540_v30 = vadd.f32 %v539_v28, %v1212_v41 }
 0x10c   : > { %794 = vst [vmem:[%s1228_s6 + $0xc0] sm:$0xff] %v723_v23  ;;  %v636_v31 = vadd.f32 %v635_v29, %v1212_v41  ;;  %v692_v32 = vmax.f32 %v538_v26, 0.0 }
 0x10d   : > { %v724_v33 = vmax.f32 %v634_v27, 0.0  ;;  %v693_v34 = vmax.f32 %v540_v30, 0.0  ;;  %v543_v36 = vpop.f32.mrb[20].mxu0 }
 0x10e   : > { %v725_v35 = vmax.f32 %v636_v31, 0.0  ;;  %v639_v37 = vpop.f32.mrb[20].mxu1  ;;  %747 = vst [vmem:[%s1220_s29 + $0x48] sm:$0xff] %v692_v32  ;;  %v544_v38 = vadd.f32 %v543_v36, %v1210_v40  ;;  %v545_v42 = vpop.f32.mrb[21].mxu0 }
 0x10f   : > { %763 = vst [vmem:[%s1220_s29 + $0xc8] sm:$0xff] %v724_v33  ;;  %v640_v39 = vadd.f32 %v639_v37, %v1210_v40  ;;  %v641_v43 = vpop.f32.mrb[21].mxu1  ;;  %779 = vst [vmem:[%s1228_s6 + $0x48] sm:$0xff] %v693_v34  ;;  %v546_v44 = vadd.f32 %v545_v42, %v1212_v41 }
 0x110   : > { %795 = vst [vmem:[%s1228_s6 + $0xc8] sm:$0xff] %v725_v35  ;;  %v642_v45 = vadd.f32 %v641_v43, %v1212_v41  ;;  %v694_v46 = vmax.f32 %v544_v38, 0.0 }
 0x111   : > { %v726_v47 = vmax.f32 %v640_v39, 0.0  ;;  %v695_v48 = vmax.f32 %v546_v44, 0.0  ;;  %v549_v50 = vpop.f32.mrb[22].mxu0 }
 0x112   : > { %v727_v49 = vmax.f32 %v642_v45, 0.0  ;;  %v645_v51 = vpop.f32.mrb[22].mxu1  ;;  %748 = vst [vmem:[%s1220_s29 + $0x50] sm:$0xff] %v694_v46  ;;  %v550_v52 = vadd.f32 %v549_v50, %v1210_v40  ;;  %v551_v54 = vpop.f32.mrb[23].mxu0 }
 0x113   : > { %764 = vst [vmem:[%s1220_s29 + $0xd0] sm:$0xff] %v726_v47  ;;  %v646_v53 = vadd.f32 %v645_v51, %v1210_v40  ;;  %v647_v55 = vpop.f32.mrb[23].mxu1  ;;  %780 = vst [vmem:[%s1228_s6 + $0x50] sm:$0xff] %v695_v48  ;;  %v552_v56 = vadd.f32 %v551_v54, %v1212_v41 }
 0x114   : > { %796 = vst [vmem:[%s1228_s6 + $0xd0] sm:$0xff] %v727_v49  ;;  %v648_v57 = vadd.f32 %v647_v55, %v1212_v41  ;;  %v696_v58 = vmax.f32 %v550_v52, 0.0 }
 0x115   : > { %v728_v59 = vmax.f32 %v646_v53, 0.0  ;;  %v697_v60 = vmax.f32 %v552_v56, 0.0  ;;  %v555_v62 = vpop.f32.mrb[24].mxu0 }
 0x116   : > { %v729_v61 = vmax.f32 %v648_v57, 0.0  ;;  %v651_v63 = vpop.f32.mrb[24].mxu1  ;;  %749 = vst [vmem:[%s1220_s29 + $0x58] sm:$0xff] %v696_v58  ;;  %v556_v0 = vadd.f32 %v555_v62, %v1210_v40  ;;  %v557_v2 = vpop.f32.mrb[25].mxu0 }
 0x117   : > { %765 = vst [vmem:[%s1220_s29 + $0xd8] sm:$0xff] %v728_v59  ;;  %v652_v1 = vadd.f32 %v651_v63, %v1210_v40  ;;  %v653_v3 = vpop.f32.mrb[25].mxu1  ;;  %781 = vst [vmem:[%s1228_s6 + $0x58] sm:$0xff] %v697_v60  ;;  %v558_v4 = vadd.f32 %v557_v2, %v1212_v41 }
 0x118   : > { %797 = vst [vmem:[%s1228_s6 + $0xd8] sm:$0xff] %v729_v61  ;;  %v654_v5 = vadd.f32 %v653_v3, %v1212_v41  ;;  %v698_v6 = vmax.f32 %v556_v0, 0.0 }
 0x119   : > { %v730_v7 = vmax.f32 %v652_v1, 0.0  ;;  %v699_v8 = vmax.f32 %v558_v4, 0.0  ;;  %v561_v10 = vpop.f32.mrb[26].mxu0 }
 0x11a   : > { %v731_v9 = vmax.f32 %v654_v5, 0.0  ;;  %v657_v11 = vpop.f32.mrb[26].mxu1  ;;  %750 = vst [vmem:[%s1220_s29 + $0x60] sm:$0xff] %v698_v6  ;;  %v562_v12 = vadd.f32 %v561_v10, %v1210_v40  ;;  %v563_v14 = vpop.f32.mrb[27].mxu0 }
 0x11b   : > { %766 = vst [vmem:[%s1220_s29 + $0xe0] sm:$0xff] %v730_v7  ;;  %v658_v13 = vadd.f32 %v657_v11, %v1210_v40  ;;  %v659_v15 = vpop.f32.mrb[27].mxu1  ;;  %782 = vst [vmem:[%s1228_s6 + $0x60] sm:$0xff] %v699_v8  ;;  %v564_v16 = vadd.f32 %v563_v14, %v1212_v41 }
 0x11c   : > { %798 = vst [vmem:[%s1228_s6 + $0xe0] sm:$0xff] %v731_v9  ;;  %v660_v17 = vadd.f32 %v659_v15, %v1212_v41  ;;  %v700_v18 = vmax.f32 %v562_v12, 0.0 }
 0x11d   : > { %v732_v19 = vmax.f32 %v658_v13, 0.0  ;;  %v701_v20 = vmax.f32 %v564_v16, 0.0  ;;  %v567_v22 = vpop.f32.mrb[28].mxu0 }
 0x11e   : > { %v733_v21 = vmax.f32 %v660_v17, 0.0  ;;  %v663_v23 = vpop.f32.mrb[28].mxu1  ;;  %751 = vst [vmem:[%s1220_s29 + $0x68] sm:$0xff] %v700_v18  ;;  %v568_v24 = vadd.f32 %v567_v22, %v1210_v40  ;;  %v569_v26 = vpop.f32.mrb[29].mxu0 }
 0x11f   : > { %767 = vst [vmem:[%s1220_s29 + $0xe8] sm:$0xff] %v732_v19  ;;  %v664_v25 = vadd.f32 %v663_v23, %v1210_v40  ;;  %v665_v27 = vpop.f32.mrb[29].mxu1  ;;  %783 = vst [vmem:[%s1228_s6 + $0x68] sm:$0xff] %v701_v20  ;;  %v570_v28 = vadd.f32 %v569_v26, %v1212_v41 }
 0x120   : > { %799 = vst [vmem:[%s1228_s6 + $0xe8] sm:$0xff] %v733_v21  ;;  %v666_v29 = vadd.f32 %v665_v27, %v1212_v41  ;;  %v702_v30 = vmax.f32 %v568_v24, 0.0 }
 0x121   : > { %v734_v31 = vmax.f32 %v664_v25, 0.0  ;;  %v703_v32 = vmax.f32 %v570_v28, 0.0  ;;  %v573_v34 = vpop.f32.mrb[30].mxu0 }
 0x122   : > { %v735_v33 = vmax.f32 %v666_v29, 0.0  ;;  %v669_v35 = vpop.f32.mrb[30].mxu1  ;;  %752 = vst [vmem:[%s1220_s29 + $0x70] sm:$0xff] %v702_v30  ;;  %v574_v36 = vadd.f32 %v573_v34, %v1210_v40  ;;  %v575_v38 = vpop.f32.mrb[31].mxu0 }
 0x123   : > { %768 = vst [vmem:[%s1220_s29 + $0xf0] sm:$0xff] %v734_v31  ;;  %v670_v37 = vadd.f32 %v669_v35, %v1210_v40  ;;  %v671_v39 = vpop.f32.mrb[31].mxu1  ;;  %784 = vst [vmem:[%s1228_s6 + $0x70] sm:$0xff] %v703_v32  ;;  %v576_v42 = vadd.f32 %v575_v38, %v1212_v41 }
 0x124   : > { %800 = vst [vmem:[%s1228_s6 + $0xf0] sm:$0xff] %v735_v33  ;;  %v672_v43 = vadd.f32 %v671_v39, %v1212_v41  ;;  %v704_v44 = vmax.f32 %v574_v36, 0.0 }
 0x125   : > { %v736_v45 = vmax.f32 %v670_v37, 0.0  ;;  %v705_v46 = vmax.f32 %v576_v42, 0.0 }
 0x126   : > { %v737_v47 = vmax.f32 %v672_v43, 0.0  ;;  %753 = vst [vmem:[%s1220_s29 + $0x78] sm:$0xff] %v704_v44 }
 0x127   : > { %769 = vst [vmem:[%s1220_s29 + $0xf8] sm:$0xff] %v736_v45  ;;  %785 = vst [vmem:[%s1228_s6 + $0x78] sm:$0xff] %v705_v46 }
 0x128   : > { %801 = vst [vmem:[%s1228_s6 + $0xf8] sm:$0xff] %v737_v47 }
 0x129 PF: > { %s15_s17 = sadd.s32 1, %s1054_s17   ;;  %s1368_s15 = smov %s1050_s16 }
 0x12a   : > { %p12_p5 = scmp.ge.s32.totalorder %s15_s17, 4   ;;  %s1369_s16 = smov %s1371_s18 }
 0x12c   :  { %14 = sbr.rel (!%p12_p5) target bundleno = 2 (0x2), region = 74 }

// kernel: inception_forward.5
= control target key start
LH: loop header
LB: loop body
LE: loop exit
PB: predicated region body
PF: predicated region fallthrough
CT: control target
= control target key end

     0   :  { %s5953_s12 = smov 0   ;;  %s5955_s13 = smov 0   ;;  %s7529_s0 = inlined_call_operand.vmem [shape: f32[2,16,16,128], index: 0, kind: input, shape index: {}]   ;;  %s7530_s1 = inlined_call_operand.vmem [shape: f32[3,3,128,128], index: 1, kind: input, shape index: {}]   ;;  %s7531_s2 = inlined_call_operand.vmem [shape: f32[1,1,128], index: 2, kind: input, shape index: {}]   ;;  %s7532_s3 = inlined_call_operand.vmem [shape: f32[2,16,16,128], index: 3, kind: output, shape index: {}]  }
   0x1   :  { %s5957_s14 = smov 0  }
   0x2 LB: > { %s25_s15 = sadd.s32 1, %s5926_s13  ;;  %p3895_p0 = scmp.ge.s32.totalorder %s5930_s14, 1  ;;  %s5930_s14 = sphi %s5957_s14, %s13_s14   ;;  %s5926_s13 = sphi %s5955_s13, %s7690_s13   ;;  %s5922_s12 = sphi %s5953_s12, %s7689_s12  }
   0x3   : > { %p27_p1 = scmp.ge.s32.totalorder %s25_s15, 2  ;;  %p151_p2 = scmp.lt.s32.totalorder %s5930_s14, 3 }
   0x5   : > { %s7692_s15 = smov (%p27_p1, %s25_s15), 0  ;;  %p152_p3 = pnand %p3895_p0, %p151_p2 }
   0x7   : > { %155 = sbr.rel (%p152_p3) target bundleno = 559 (0x22f), region = 32 }
   0xe   : > { %v3900_v0 = vld [vmem:[%s7530_s1 + $0x80] sm:$0xff]  ;;  %v3901_v1 = vld [vmem:[%s7530_s1 + $0x88] sm:$0xff]  ;;  %vm451_vm0 = vcmask 1046528   ;;  %p180_p4 = scmp.lt.s32.totalorder %s5922_s12, 1  ;;  %v3902_v5 = vld [vmem:[%s7530_s1 + $0x90] sm:$0xff]  ;;  %v5932_v7 = vmov 0.0  }
   0xf   : > { %v3996_v2 = vld [vmem:[%s7530_s1 + $0x200] sm:$0xff]  ;;  %v5983_v3 = vpack.c.bf16 %v3901_v1, %v3900_v0  ;;  %v3997_v4 = vld [vmem:[%s7530_s1 + $0x208] sm:$0xff]  ;;  %v3903_v6 = vld [vmem:[%s7530_s1 + $0x98] sm:$0xff]  ;;  %200 = vst [vmem:[#allocation2] sm:$0xff] %v5932_v7  ;;  %v5994_v8 = vrot.slane %v5932_v7, 1  ;;  %vm1031_vm1 = vcmask 1045504  }
  0x10   : > { %202 = vst [vmem:[#allocation2 + $0x10] sm:$0x3] %v5932_v7  ;;  %203 = vst [vmem:[#allocation2 + $0x18] sm:$0xff] %v5932_v7  ;;  %v5996_v9 = vpack.c.bf16 %v3997_v4, %v3996_v2  ;;  %v5285_v10 = vpack.c.bf16 %v3903_v6, %v3902_v5  ;;  %v3998_v11 = vld [vmem:[%s7530_s1 + $0x210] sm:$0xff]  ;;  %v3999_v12 = vld [vmem:[%s7530_s1 + $0x218] sm:$0xff]  ;;  %s7694_s12 = smov (!%p180_p4, %s5922_s12), 1 }
  0x11   : > { %204 = vst [vmem:[#allocation2 + $0x20] sm:$0xff] %v5932_v7  ;;  %205 = vst [vmem:[#allocation2 + $0x28] sm:$0x3] %v5932_v7  ;;  %v3904_v13 = vld [vmem:[%s7530_s1 + $0xa0] sm:$0xff]  ;;  %5282 = vmatprep.subr.bf16.mxu1 %v5983_v3  ;;  %v6013_v14 = vpack.c.bf16 %v3999_v12, %v3998_v11  ;;  %v3905_v15 = vld [vmem:[%s7530_s1 + $0xa8] sm:$0xff]  ;;  %s4127_s17 = sshll.u32 %s7694_s12, 8  ;;  %4593 = vmatprep.mubr.f32.mxu1 %v5994_v8 }
  0x12   : > { %206 = vst [vmem:[#allocation2 + $0x30] sm:$0xff] %v5932_v7  ;;  %207 = vst [vmem:[#allocation2 + $0x38] sm:$0xff] %v5932_v7  ;;  %v4000_v16 = vld [vmem:[%s7530_s1 + $0x220] sm:$0xff]  ;;  %v4001_v17 = vld [vmem:[%s7530_s1 + $0x228] sm:$0xff]  ;;  %5410 = vmatprep.subr.bf16.mxu0 %v5996_v9  ;;  %5284 = vmatpush3.bf16.msra.mxu1 %v5983_v3  ;;  %v5289_v18 = vpack.c.bf16 %v3905_v15, %v3904_v13  ;;  %s6049_s28 = scalar_lea.vmem %s7529_s0, %s4127_s17  ;;  %s7451_s30 = scalar_lea.vmem %s7532_s3, %s4127_s17 }
  0x13   : > { %208 = vst [vmem:[#allocation2 + $0x40] sm:$0x3] %v5932_v7  ;;  %209 = vst [vmem:[#allocation2 + $0x48] sm:$0xff] %v5932_v7  ;;  %5412 = vmatpush3.bf16.msra.mxu0 %v5996_v9  ;;  %5286 = vmatprep.subr.bf16.mxu1 %v5285_v10  ;;  %v6029_v19 = vpack.c.bf16 %v4001_v17, %v4000_v16  ;;  %v3906_v20 = vld [vmem:[%s7530_s1 + $0xb0] sm:$0xff]  ;;  %v3907_v21 = vld [vmem:[%s7530_s1 + $0xb8] sm:$0xff] }
  0x14   : > { %210 = vst [vmem:[#allocation2 + $0x50] sm:$0xff] %v5932_v7  ;;  %211 = vst [vmem:[#allocation2 + $0x58] sm:$0x3] %v5932_v7  ;;  %5414 = vmatprep.subr.bf16.mxu0 %v6013_v14  ;;  %v4002_v22 = vld [vmem:[%s7530_s1 + $0x230] sm:$0xff]  ;;  %v4003_v23 = vld [vmem:[%s7530_s1 + $0x238] sm:$0xff]  ;;  %v5293_v24 = vpack.c.bf16 %v3907_v21, %v3906_v20 }
  0x15   : > { %212 = vst [vmem:[#allocation2 + $0x60] sm:$0xff] %v5932_v7  ;;  %213 = vst [vmem:[#allocation2 + $0x68] sm:$0xff] %v5932_v7  ;;  %v6053_v25 = vpack.c.bf16 %v4003_v23, %v4002_v22  ;;  %v3908_v26 = vld [vmem:[%s7530_s1 + $0xc0] sm:$0xff]  ;;  %v3909_v27 = vld [vmem:[%s7530_s1 + $0xc8] sm:$0xff] }
  0x16   : > { %214 = vst [vmem:[#allocation2 + $0x70] sm:$0x3] %v5932_v7  ;;  %215 = vst [vmem:[#allocation2 + $0x78] sm:$0xff] %v5932_v7  ;;  %5288 = vmatpush3.bf16.msra.mxu1 %v5285_v10  ;;  %v254_v28 = vld [vmem:[%s6049_s28] sm:$0xff]  ;;  %v4005_v30 = vld [vmem:[%s7530_s1 + $0x248] sm:$0xff]  ;;  %v5297_v32 = vpack.c.bf16 %v3909_v27, %v3908_v26 }
  0x17   : > { %216 = vst [vmem:[#allocation2 + $0x80] sm:$0xff] %v5932_v7  ;;  %217 = vst [vmem:[#allocation2 + $0x88] sm:$0x3] %v5932_v7  ;;  %5416 = vmatpush3.bf16.msra.mxu0 %v6013_v14  ;;  %5290 = vmatprep.subr.bf16.mxu1 %v5289_v18  ;;  %v4004_v29 = vld [vmem:[%s7530_s1 + $0x240] sm:$0xff]  ;;  %v255_v31 = vld [vmem:[%s6049_s28 + $0x8] sm:$0xff] }
  0x18   : > { %218 = vst [vmem:[#allocation2 + $0x90] sm:$0xff] %v5932_v7  ;;  %219 = vst [vmem:[#allocation2 + $0x98] sm:$0xff] %v5932_v7  ;;  %5418 = vmatprep.subr.bf16.mxu0 %v6029_v19  ;;  %v3910_v33 = vld [vmem:[%s7530_s1 + $0xd0] sm:$0xff]  ;;  %v257_v35 = vld [vmem:[%s6049_s28 + $0x18] sm:$0xff]  ;;  %v6076_v36 = vpack.c.bf16 %v4005_v30, %v4004_v29 }
  0x19   : > { %220 = vst [vmem:[#allocation2 + $0xa0] sm:$0x3] %v5932_v7  ;;  %221 = vst [vmem:[#allocation2 + $0xa8] sm:$0xff] %v5932_v7  ;;  %v256_v34 = vld [vmem:[%s6049_s28 + $0x10] sm:$0xff]  ;;  %v3911_v37 = vld [vmem:[%s7530_s1 + $0xd8] sm:$0xff] }
  0x1a   : > { %222 = vst [vmem:[#allocation2 + $0xb0] sm:$0xff] %v5932_v7  ;;  %223 = vst [vmem:[#allocation2 + $0xb8] sm:$0x3] %v5932_v7  ;;  %5292 = vmatpush3.bf16.msra.mxu1 %v5289_v18  ;;  %v258_v38 = vld [vmem:[%s6049_s28 + $0x20] sm:$0xff]  ;;  %v259_v39 = vld [vmem:[%s6049_s28 + $0x28] sm:$0xff]  ;;  %v5301_v44 = vpack.c.bf16 %v3911_v37, %v3910_v33 }
  0x1b   : > { %224 = vst [vmem:[#allocation2 + $0xc0] sm:$0xff] %v5932_v7  ;;  %225 = vst [vmem:[#allocation2 + $0xc8] sm:$0xff] %v5932_v7  ;;  %5420 = vmatpush3.bf16.msra.mxu0 %v6029_v19  ;;  %5294 = vmatprep.subr.bf16.mxu1 %v5293_v24  ;;  %v4006_v40 = vld [vmem:[%s7530_s1 + $0x250] sm:$0xff]  ;;  %v4007_v41 = vld [vmem:[%s7530_s1 + $0x258] sm:$0xff] }
  0x1c   : > { %226 = vst [vmem:[#allocation2 + $0xd0] sm:$0x3] %v5932_v7  ;;  %227 = vst [vmem:[#allocation2 + $0xd8] sm:$0xff] %v5932_v7  ;;  %5422 = vmatprep.subr.bf16.mxu0 %v6053_v25  ;;  %v260_v42 = vld [vmem:[%s6049_s28 + $0x30] sm:$0xff]  ;;  %v261_v43 = vld [vmem:[%s6049_s28 + $0x38] sm:$0xff]  ;;  %v6097_v47 = vpack.c.bf16 %v4007_v41, %v4006_v40 }
  0x1d   : > { %228 = vst [vmem:[#allocation2 + $0xe0] sm:$0xff] %v5932_v7  ;;  %229 = vst [vmem:[#allocation2 + $0xe8] sm:$0x3] %v5932_v7  ;;  %v3912_v45 = vld [vmem:[%s7530_s1 + $0xe0] sm:$0xff]  ;;  %v3913_v48 = vld [vmem:[%s7530_s1 + $0xe8] sm:$0xff] }
  0x1e   : > { %230 = vst [vmem:[#allocation2 + $0xf0] sm:$0xff] %v5932_v7  ;;  %231 = vst [vmem:[#allocation2 + $0xf8] sm:$0xff] %v5932_v7  ;;  %5296 = vmatpush3.bf16.msra.mxu1 %v5293_v24  ;;  %v262_v46 = vld [vmem:[%s6049_s28 + $0x40] sm:$0xff]  ;;  %v263_v50 = vld [vmem:[%s6049_s28 + $0x48] sm:$0xff]  ;;  %v5305_v56 = vpack.c.bf16 %v3913_v48, %v3912_v45 }
  0x1f   : > { %232 = vst [vmem:[#allocation2 + $0x100] sm:$0x3] %v5932_v7  ;;  %233 = vst [vmem:[#allocation2 + $0x108] sm:$0xff] %v5932_v7  ;;  %5424 = vmatpush3.bf16.msra.mxu0 %v6053_v25  ;;  %5298 = vmatprep.subr.bf16.mxu1 %v5297_v32  ;;  %v4008_v51 = vld [vmem:[%s7530_s1 + $0x260] sm:$0xff]  ;;  %v4009_v52 = vld [vmem:[%s7530_s1 + $0x268] sm:$0xff] }
  0x20   : > { %234 = vst [vmem:[#allocation2 + $0x110] sm:$0xff] %v5932_v7  ;;  %235 = vst [vmem:[#allocation2 + $0x118] sm:$0x3] %v5932_v7  ;;  %5426 = vmatprep.subr.bf16.mxu0 %v6076_v36  ;;  %v6119_v57 = vpack.c.bf16 %v4009_v52, %v4008_v51  ;;  %v3914_v58 = vld [vmem:[%s7530_s1 + $0xf0] sm:$0xff]  ;;  %v3915_v59 = vld [vmem:[%s7530_s1 + $0xf8] sm:$0xff] }
  0x21   : > { %236 = vst [vmem:[#allocation2 + $0x120] sm:$0xff] %v5932_v7  ;;  %237 = vst [vmem:[#allocation2 + $0x128] sm:$0xff] %v5932_v7  ;;  %v4010_v61 = vld [vmem:[%s7530_s1 + $0x270] sm:$0xff]  ;;  %v4011_v62 = vld [vmem:[%s7530_s1 + $0x278] sm:$0xff]  ;;  %v5309_v63 = vpack.c.bf16 %v3915_v59, %v3914_v58 }
  0x22   : > { %238 = vst [vmem:[#allocation2 + $0x130] sm:$0x3] %v5932_v7  ;;  %239 = vst [vmem:[#allocation2 + $0x138] sm:$0xff] %v5932_v7  ;;  %5300 = vmatpush3.bf16.msra.mxu1 %v5297_v32  ;;  %v324_v0 = vld [vmem:[#allocation2 + $0x10] sm:$0x3]  ;;  %v370_v1 = vld [vmem:[%s7530_s1] sm:$0xff]  ;;  %v6144_v3 = vpack.c.bf16 %v4011_v62, %v4010_v61 }
  0x23   : > { %240 = vst [vmem:[#allocation2 + $0x140] sm:$0xff] %v5932_v7  ;;  %241 = vst [vmem:[#allocation2 + $0x148] sm:$0x3] %v5932_v7  ;;  %5428 = vmatpush3.bf16.msra.mxu0 %v6076_v36  ;;  %5302 = vmatprep.subr.bf16.mxu1 %v5301_v44  ;;  %v264_v2 = vld [vmem:[%s6049_s28 + $0x50] sm:$0xff]  ;;  %v371_v4 = vld [vmem:[%s7530_s1 + $0x8] sm:$0xff]  ;;  %v455_v11 = vrot.slane %v324_v0, 1 }
  0x24   : > { %242 = vst [vmem:[#allocation2 + $0x150] sm:$0xff] %v5932_v7  ;;  %243 = vst [vmem:[#allocation2 + $0x158] sm:$0xff] %v5932_v7  ;;  %5430 = vmatprep.subr.bf16.mxu0 %v6097_v47  ;;  %v265_v6 = vld [vmem:[%s6049_s28 + $0x58] sm:$0xff]  ;;  %v4013_v10 = vld [vmem:[%s7530_s1 + $0x288] sm:$0xff]  ;;  %v5313_v16 = vpack.c.bf16 %v371_v4, %v370_v1 }
  0x25   : > { %244 = vst [vmem:[#allocation2 + $0x160] sm:$0x3] %v5932_v7  ;;  %245 = vst [vmem:[#allocation2 + $0x168] sm:$0xff] %v5932_v7  ;;  %v266_v15 = vld [vmem:[%s6049_s28 + $0x60] sm:$0xff]  ;;  %v4014_v20 = vld [vmem:[%s7530_s1 + $0x290] sm:$0xff]  ;;  %v456_v32 = vsel %vm451_vm0, %v5994_v8, %v455_v11 }
  0x26   : > { %246 = vst [vmem:[#allocation2 + $0x170] sm:$0xff] %v5932_v7  ;;  %247 = vst [vmem:[#allocation2 + $0x178] sm:$0x3] %v5932_v7  ;;  %5304 = vmatpush3.bf16.msra.mxu1 %v5301_v44  ;;  %v267_v21 = vld [vmem:[%s6049_s28 + $0x68] sm:$0xff]  ;;  %v4015_v24 = vld [vmem:[%s7530_s1 + $0x298] sm:$0xff] }
  0x27   : > { %248 = vst [vmem:[#allocation2 + $0x180] sm:$0xff] %v5932_v7  ;;  %249 = vst [vmem:[#allocation2 + $0x188] sm:$0xff] %v5932_v7  ;;  %5432 = vmatpush3.bf16.msra.mxu0 %v6097_v47  ;;  %5306 = vmatprep.subr.bf16.mxu1 %v5305_v56  ;;  %v268_v26 = vld [vmem:[%s6049_s28 + $0x70] sm:$0xff]  ;;  %v4017_v40 = vld [vmem:[%s7530_s1 + $0x2a8] sm:$0xff] }
  0x28   : > { %250 = vst [vmem:[#allocation2 + $0x190] sm:$0x3] %v5932_v7  ;;  %253 = vst [vmem:[#allocation2 + $0x1a8] sm:$0x3] %v5932_v7  ;;  %5434 = vmatprep.subr.bf16.mxu0 %v6119_v57  ;;  %v4012_v7 = vld [vmem:[%s7530_s1 + $0x280] sm:$0xff]  ;;  %v271_v52 = vld [vmem:[%s6049_s28 + $0x88] sm:$0xff] }
  0x29   : > { %7592 = vst [vmem:[#allocation3_spill] sm:$0xff] %v5996_v9  ;;  %7593 = vst [vmem:[#allocation4_spill] sm:$0xff] %v6013_v14  ;;  %v5441_v22 = vpack.c.bf16 %v4013_v10, %v4012_v7  ;;  %v270_v41 = vld [vmem:[%s6049_s28 + $0x80] sm:$0xff]  ;;  %v375_v62 = vld [vmem:[%s7530_s1 + $0x28] sm:$0xff] }
  0x2a   : > { %7594 = vst [vmem:[#allocation5_spill] sm:$0xff] %v6029_v19  ;;  %7595 = vst [vmem:[#allocation6_spill] sm:$0xff] %v6053_v25  ;;  %5308 = vmatpush3.bf16.msra.mxu1 %v5305_v56  ;;  %v273_v56 = vld [vmem:[%s6049_s28 + $0x98] sm:$0xff]  ;;  %v374_v61 = vld [vmem:[%s7530_s1 + $0x20] sm:$0xff] }
  0x2b   : > { %287 = vst [vmem:[#allocation2 + $0x19] sm:$0xff] %v254_v28  ;;  %288 = vst [vmem:[#allocation2 + $0x21] sm:$0xff] %v255_v31  ;;  %5436 = vmatpush3.bf16.msra.mxu0 %v6119_v57  ;;  %5310 = vmatprep.subr.bf16.mxu1 %v5309_v63  ;;  %v269_v31 = vld [vmem:[%s6049_s28 + $0x78] sm:$0xff]  ;;  %v4018_v1 = vld [vmem:[%s7530_s1 + $0x2b0] sm:$0xff] }
  0x2c   : > { %7596 = vst [vmem:[#allocation7_spill] sm:$0xff] %v6076_v36  ;;  %289 = vst [vmem:[#allocation2 + $0x31] sm:$0xff] %v256_v34  ;;  %5438 = vmatprep.subr.bf16.mxu0 %v6144_v3  ;;  %v372_v34 = vld [vmem:[%s7530_s1 + $0x10] sm:$0xff]  ;;  %v4019_v10 = vld [vmem:[%s7530_s1 + $0x2b8] sm:$0xff] }
  0x2d   : > { %290 = vst [vmem:[#allocation2 + $0x39] sm:$0xff] %v257_v35  ;;  %291 = vst [vmem:[#allocation2 + $0x49] sm:$0xff] %v258_v38  ;;  %v373_v35 = vld [vmem:[%s7530_s1 + $0x18] sm:$0xff]  ;;  %v284_v36 = vld [vmem:[%s6049_s28 + $0xf0] sm:$0xff] }
  0x2e   : > { %292 = vst [vmem:[#allocation2 + $0x51] sm:$0xff] %v259_v39  ;;  %293 = vst [vmem:[#allocation2 + $0x61] sm:$0xff] %v260_v42  ;;  %5312 = vmatpush3.bf16.msra.mxu1 %v5309_v63  ;;  %v4016_v39 = vld [vmem:[%s7530_s1 + $0x2a0] sm:$0xff]  ;;  %v5445_v42 = vpack.c.bf16 %v4015_v24, %v4014_v20  ;;  %v5317_v51 = vpack.c.bf16 %v373_v35, %v372_v34  ;;  %v377_v20 = vld [vmem:[%s7530_s1 + $0x38] sm:$0xff]  ;;  %v5453_v35 = vpack.c.bf16 %v4019_v10, %v4018_v1 }
  0x2f   : > { %294 = vst [vmem:[#allocation2 + $0x69] sm:$0xff] %v261_v43  ;;  %7597 = vst [vmem:[#allocation8_spill] sm:$0xff] %v6097_v47  ;;  %5440 = vmatpush3.bf16.msra.mxu0 %v6144_v3  ;;  %5314 = vmatprep.subr.bf16.mxu1 %v5313_v16  ;;  %v5449_v4 = vpack.c.bf16 %v4017_v40, %v4016_v39  ;;  %v274_v24 = vld [vmem:[%s6049_s28 + $0xa0] sm:$0xff]  ;;  %v277_v34 = vld [vmem:[%s6049_s28 + $0xb8] sm:$0xff] }
  0x30   : > { %295 = vst [vmem:[#allocation2 + $0x79] sm:$0xff] %v262_v46  ;;  %296 = vst [vmem:[#allocation2 + $0x81] sm:$0xff] %v263_v50  ;;  %5442 = vmatprep.subr.bf16.mxu0 %v5441_v22  ;;  %v4020_v40 = vld [vmem:[%s7530_s1 + $0x2c0] sm:$0xff]  ;;  %v285_v19 = vld [vmem:[%s6049_s28 + $0xf8] sm:$0xff] }
  0x31   : > { %7598 = vst [vmem:[#allocation9_spill] sm:$0xff] %v6119_v57  ;;  %7599 = vst [vmem:[#allocation10_spill] sm:$0xff] %v6144_v3  ;;  %4594 = vmatmul.mubr.f32.vlgmr.msra.gmra.mrb[0].mxu1 %v456_v32  ;;  %v4083_v9 = vld [vmem:[%s7530_s1 + $0x338] sm:$0xff] }
  0x32   : > { %v6102_v49 = vld [vmem:[#allocation2 + $0x18] sm:$0xff]  ;;  %v6111_v53 = vld [vmem:[#allocation2 + $0x20] sm:$0xff]  ;;  %v6149_v5 = vld [vmem:[#allocation2 + $0x28] sm:$0x3]  ;;  %297 = vst [vmem:[#allocation2 + $0x91] sm:$0xff] %v264_v2  ;;  %5316 = vmatpush3.bf16.msra.mxu1 %v5313_v16  ;;  %v5321_v16 = vpack.c.bf16 %v375_v62, %v374_v61 }
  0x33   : > { %v1791_v54 = vrot.slane %v6102_v49, 1  ;;  %v6115_v55 = vrot.slane %v6111_v53, 1  ;;  %298 = vst [vmem:[#allocation2 + $0x99] sm:$0xff] %v265_v6  ;;  %v6158_v12 = vld [vmem:[#allocation2 + $0x30] sm:$0xff]  ;;  %v1794_v17 = vrot.slane %v6149_v5, 1  ;;  %299 = vst [vmem:[#allocation2 + $0xa9] sm:$0xff] %v266_v15  ;;  %5318 = vmatprep.subr.bf16.mxu1 %v5317_v51 }
  0x34   : > { %v6160_v13 = vld [vmem:[#allocation2 + $0x38] sm:$0xff]  ;;  %v6165_v18 = vld [vmem:[#allocation2 + $0x28] sm:$0x3]  ;;  %v6172_v23 = vld [vmem:[#allocation2 + $0x40] sm:$0x3]  ;;  %300 = vst [vmem:[#allocation2 + $0xb1] sm:$0xff] %v267_v21 }
  0x35   : > { %v6129_v60 = vsel %vm451_vm0, %v1791_v54, %v6115_v55  ;;  %v1796_v27 = vrot.slane %v6158_v12, 1  ;;  %v6180_v28 = vrot.slane %v6160_v13, 1  ;;  %v6182_v29 = vld [vmem:[#allocation2 + $0x48] sm:$0xff]  ;;  %v6184_v30 = vld [vmem:[#allocation2 + $0x50] sm:$0xff]  ;;  %301 = vst [vmem:[#allocation2 + $0xc1] sm:$0xff] %v268_v26  ;;  %v460_v33 = vrot.slane %v6165_v18, 1 }
  0x36   : > { %4913 = vmatprep.mubr.f32.mxu0 %v6129_v60  ;;  %302 = vst [vmem:[#allocation2 + $0xc9] sm:$0xff] %v269_v31  ;;  %v1795_v37 = vsel %vm451_vm0, %v6115_v55, %v1794_v17  ;;  %v1799_v38 = vrot.slane %v6172_v23, 1  ;;  %v6200_v8 = vld [vmem:[#allocation2 + $0x40] sm:$0x3]  ;;  %v1801_v43 = vrot.slane %v6182_v29, 1  ;;  %v6211_v44 = vrot.slane %v6184_v30, 1  ;;  %4596 = vmatprep.mubr.f32.mxu1 %v6129_v60 }
  0x37   : > { %v6213_v45 = vld [vmem:[#allocation2 + $0x58] sm:$0x3]  ;;  %v6215_v46 = vld [vmem:[#allocation2 + $0x60] sm:$0xff]  ;;  %v6217_v48 = vld [vmem:[#allocation2 + $0x68] sm:$0xff]  ;;  %303 = vst [vmem:[#allocation2 + $0xd9] sm:$0xff] %v270_v41  ;;  %v1798_v50 = vsel %vm451_vm0, %v1796_v27, %v6180_v28  ;;  %4914 = vmatmul.mubr.f32.vlgmr.msra.gmra.mrb[0].mxu0 %v1795_v37  ;;  %v461_v58 = vsel %vm451_vm0, %v6115_v55, %v460_v33  ;;  %v465_v59 = vrot.slane %v6200_v8, 1  ;;  %5320 = vmatpush3.bf16.msra.mxu1 %v5317_v51 }
  0x38   : > { %v272_v54 = vld [vmem:[%s6049_s28 + $0x90] sm:$0xff]  ;;  %304 = vst [vmem:[#allocation2 + $0xe1] sm:$0xff] %v271_v52  ;;  %306 = vst [vmem:[#allocation2 + $0xf9] sm:$0xff] %v273_v56  ;;  %5444 = vmatpush3.bf16.msra.mxu0 %v5441_v22  ;;  %v1800_v63 = vsel %vm451_vm0, %v6180_v28, %v1799_v38  ;;  %v1804_v55 = vrot.slane %v6213_v45, 1  ;;  %v6237_v0 = vld [vmem:[#allocation2 + $0x58] sm:$0x3]  ;;  %4916 = vmatprep.mubr.f32.mxu0 %v1798_v50  ;;  %v1803_v2 = vsel %vm451_vm0, %v1801_v43, %v6211_v44 }
  0x39   : > { %305 = vst [vmem:[#allocation2 + $0xf1] sm:$0xff] %v272_v54  ;;  %5446 = vmatprep.subr.bf16.mxu0 %v5445_v42  ;;  %v1806_v60 = vrot.slane %v6215_v46, 1  ;;  %v6246_v6 = vrot.slane %v6217_v48, 1  ;;  %v6248_v7 = vld [vmem:[#allocation2 + $0x70] sm:$0x3]  ;;  %v6253_v11 = vld [vmem:[#allocation2 + $0x78] sm:$0xff]  ;;  %4597 = vmatmul.mubr.f32.gmra.mrb[2].mxu1 %v461_v58  ;;  %v466_v21 = vsel %vm451_vm0, %v6180_v28, %v465_v59 }
  0x3a   : > { %v6255_v15 = vld [vmem:[#allocation2 + $0x80] sm:$0xff]  ;;  %v376_v17 = vld [vmem:[%s7530_s1 + $0x30] sm:$0xff]  ;;  %4599 = vmatprep.mubr.f32.mxu1 %v1798_v50  ;;  %v470_v22 = vrot.slane %v6237_v0, 1  ;;  %v275_v26 = vld [vmem:[%s6049_s28 + $0xa8] sm:$0xff]  ;;  %v1805_v31 = vsel %vm451_vm0, %v6211_v44, %v1804_v55  ;;  %v1809_v32 = vrot.slane %v6248_v7, 1  ;;  %307 = vst [vmem:[#allocation2 + $0x109] sm:$0xff] %v274_v24  ;;  %5322 = vmatprep.subr.bf16.mxu1 %v5321_v16 }
  0x3b   : > { %4917 = vmatmul.mubr.f32.gmra.mrb[2].mxu0 %v1800_v63  ;;  %v276_v27 = vld [vmem:[%s6049_s28 + $0xb0] sm:$0xff]  ;;  %308 = vst [vmem:[#allocation2 + $0x111] sm:$0xff] %v275_v26  ;;  %v1808_v28 = vsel %vm451_vm0, %v1806_v60, %v6246_v6  ;;  %v7533_v37 = vrot.slane %v6253_v11, 1  ;;  %v6279_v38 = vrot.slane %v6255_v15, 1  ;;  %v6281_v39 = vld [vmem:[#allocation2 + $0x88] sm:$0x3]  ;;  %v5325_v50 = vpack.c.bf16 %v377_v20, %v376_v17  ;;  %5324 = vmatpush3.bf16.msra.mxu1 %v5321_v16 }
  0x3c   : > { %5448 = vmatpush3.bf16.msra.mxu0 %v5445_v42  ;;  %4919 = vmatprep.mubr.f32.mxu0 %v1803_v2  ;;  %v6272_v33 = vld [vmem:[#allocation2 + $0x70] sm:$0x3]  ;;  %309 = vst [vmem:[#allocation2 + $0x121] sm:$0xff] %v276_v27  ;;  %310 = vst [vmem:[#allocation2 + $0x129] sm:$0xff] %v277_v34  ;;  %v4021_v41 = vld [vmem:[%s7530_s1 + $0x2c8] sm:$0xff]  ;;  %v471_v51 = vsel %vm451_vm0, %v6211_v44, %v470_v22  ;;  %v1810_v59 = vsel %vm451_vm0, %v6246_v6, %v1809_v32  ;;  %v1814_v44 = vrot.slane %v6281_v39, 1 }
  0x3d   : > { %5450 = vmatprep.subr.bf16.mxu0 %v5449_v4  ;;  %4600 = vmatmul.mubr.f32.gmra.mrb[4].mxu1 %v466_v21  ;;  %v6289_v42 = vld [vmem:[#allocation2 + $0x90] sm:$0xff]  ;;  %v6291_v43 = vld [vmem:[#allocation2 + $0x98] sm:$0xff]  ;;  %v475_v52 = vrot.slane %v6272_v33, 1  ;;  %v6296_v54 = vld [vmem:[#allocation2 + $0x88] sm:$0x3]  ;;  %v1813_v1 = vsel %vm451_vm0, %v7533_v37, %v6279_v38  ;;  %v2180_v37 = vrot.slane %v6149_v5, 2 }
  0x3e   : > { %4602 = vmatprep.mubr.f32.mxu1 %v1803_v2  ;;  %v378_v56 = vld [vmem:[%s7530_s1 + $0x40] sm:$0xff]  ;;  %v379_v58 = vld [vmem:[%s7530_s1 + $0x48] sm:$0xff]  ;;  %v4022_v61 = vld [vmem:[%s7530_s1 + $0x2d0] sm:$0xff]  ;;  %v5457_v2 = vpack.c.bf16 %v4021_v41, %v4020_v40  ;;  %v6319_v60 = vrot.slane %v6291_v43, 1  ;;  %5326 = vmatprep.subr.bf16.mxu1 %v5325_v50  ;;  %v480_v27 = vrot.slane %v6296_v54, 1  ;;  %v1815_v34 = vsel %vm451_vm0, %v6279_v38, %v1814_v44  ;;  %317 = vst [vmem:[#allocation2 + $0x181] sm:$0xff] %v284_v36 }
  0x3f   : > { %4920 = vmatmul.mubr.f32.gmra.mrb[4].mxu0 %v1805_v31  ;;  %v278_v62 = vld [vmem:[%s6049_s28 + $0xc0] sm:$0xff]  ;;  %v279_v63 = vld [vmem:[%s6049_s28 + $0xc8] sm:$0xff]  ;;  %v280_v55 = vld [vmem:[%s6049_s28 + $0xd0] sm:$0xff]  ;;  %v5329_v16 = vpack.c.bf16 %v379_v58, %v378_v56  ;;  %v476_v26 = vsel %vm451_vm0, %v6246_v6, %v475_v52  ;;  %5328 = vmatpush3.bf16.msra.mxu1 %v5325_v50  ;;  %v6452_v57 = vrot.slane %v6160_v13, 2  ;;  %v2185_v25 = vrot.slane %v6172_v23, 2  ;;  %318 = vst [vmem:[#allocation2 + $0x189] sm:$0xff] %v285_v19 }
  0x40   : > { %5452 = vmatpush3.bf16.msra.mxu0 %v5449_v4  ;;  %4922 = vmatprep.mubr.f32.mxu0 %v1808_v28  ;;  %v1816_v4 = vrot.slane %v6289_v42, 1  ;;  %7600 = vst [vmem:[#allocation11_spill] sm:$0xff] %v6319_v60  ;;  %v6321_v10 = vld [vmem:[#allocation2 + $0xa0] sm:$0x3]  ;;  %v4023_v17 = vld [vmem:[%s7530_s1 + $0x2d8] sm:$0xff]  ;;  %311 = vst [vmem:[#allocation2 + $0x139] sm:$0xff] %v278_v62 }
  0x41   : > { %5454 = vmatprep.subr.bf16.mxu0 %v5453_v35  ;;  %312 = vst [vmem:[#allocation2 + $0x141] sm:$0xff] %v279_v63  ;;  %v281_v20 = vld [vmem:[%s6049_s28 + $0xd8] sm:$0xff]  ;;  %313 = vst [vmem:[#allocation2 + $0x151] sm:$0xff] %v280_v55  ;;  %4603 = vmatmul.mubr.f32.gmra.mrb[6].mxu1 %v471_v51  ;;  %v6327_v21 = vld [vmem:[#allocation2 + $0xa8] sm:$0xff]  ;;  %v5461_v51 = vpack.c.bf16 %v4023_v17, %v4022_v61  ;;  %v481_v63 = vsel %vm451_vm0, %v6279_v38, %v480_v27 }
  0x42   : > { %v6329_v22 = vld [vmem:[#allocation2 + $0xb0] sm:$0xff]  ;;  %314 = vst [vmem:[#allocation2 + $0x159] sm:$0xff] %v281_v20  ;;  %v282_v24 = vld [vmem:[%s6049_s28 + $0xe0] sm:$0xff]  ;;  %4605 = vmatprep.mubr.f32.mxu1 %v1808_v28  ;;  %v381_v32 = vld [vmem:[%s7530_s1 + $0x58] sm:$0xff]  ;;  %v1819_v28 = vrot.slane %v6321_v10, 1  ;;  %v6347_v41 = vsel %vm451_vm0, %v1816_v4, %v6319_v60  ;;  %v1821_v52 = vrot.slane %v6327_v21, 1  ;;  %5330 = vmatprep.subr.bf16.mxu1 %v5329_v16 }
  0x43   : > { %4923 = vmatmul.mubr.f32.gmra.mrb[6].mxu0 %v1810_v59  ;;  %v380_v31 = vld [vmem:[%s7530_s1 + $0x50] sm:$0xff]  ;;  %315 = vst [vmem:[#allocation2 + $0x169] sm:$0xff] %v282_v24  ;;  %v342_v40 = vld [vmem:[#allocation2 + $0xa0] sm:$0x3]  ;;  %v283_v6 = vld [vmem:[%s6049_s28 + $0xe8] sm:$0xff]  ;;  %v6351_v56 = vrot.slane %v6329_v22, 1  ;;  %5332 = vmatpush3.bf16.msra.mxu1 %v5329_v16 }
  0x44   : > { %5456 = vmatpush3.bf16.msra.mxu0 %v5453_v35  ;;  %4925 = vmatprep.mubr.f32.mxu0 %v1813_v1  ;;  %7601 = vst [vmem:[#allocation12_spill] sm:$0xff] %v6347_v41  ;;  %v6353_v35 = vld [vmem:[#allocation2 + $0xb8] sm:$0x3]  ;;  %v4024_v58 = vld [vmem:[%s7530_s1 + $0x2e0] sm:$0xff]  ;;  %316 = vst [vmem:[#allocation2 + $0x171] sm:$0xff] %v283_v6  ;;  %v5333_v62 = vpack.c.bf16 %v381_v32, %v380_v31  ;;  %v485_v55 = vrot.slane %v342_v40, 1  ;;  %v1820_v17 = vsel %vm451_vm0, %v6319_v60, %v1819_v28 }
  0x45   : > { %5458 = vmatprep.subr.bf16.mxu0 %v5457_v2  ;;  %7602 = vst [vmem:[#allocation13_spill] sm:$0xff] %v6351_v56  ;;  %4606 = vmatmul.mubr.f32.gmra.mrb[8].mxu1 %v476_v26  ;;  %v4025_v59 = vld [vmem:[%s7530_s1 + $0x2e8] sm:$0xff]  ;;  %v6361_v44 = vld [vmem:[#allocation2 + $0xc0] sm:$0xff]  ;;  %v345_v20 = vld [vmem:[#allocation2 + $0xb8] sm:$0x3]  ;;  %v6379_v38 = vsel %vm451_vm0, %v1821_v52, %v6351_v56 }
  0x46   : > { %v6363_v61 = vld [vmem:[#allocation2 + $0xc8] sm:$0xff]  ;;  %4608 = vmatprep.mubr.f32.mxu1 %v1813_v1  ;;  %v382_v50 = vld [vmem:[%s7530_s1 + $0x60] sm:$0xff]  ;;  %v1824_v1 = vrot.slane %v6353_v35, 1  ;;  %7603 = vst [vmem:[#allocation14_spill] sm:$0xff] %v6379_v38  ;;  %v5465_v24 = vpack.c.bf16 %v4025_v59, %v4024_v58  ;;  %v1826_v26 = vrot.slane %v6361_v44, 1  ;;  %v4026_v31 = vld [vmem:[%s7530_s1 + $0x2f0] sm:$0xff]  ;;  %5334 = vmatprep.subr.bf16.mxu1 %v5333_v62  ;;  %v486_v28 = vsel %vm451_vm0, %v6319_v60, %v485_v55 }
  0x47   : > { %4926 = vmatmul.mubr.f32.gmra.mrb[8].mxu0 %v1815_v34  ;;  %v383_v4 = vld [vmem:[%s7530_s1 + $0x68] sm:$0xff]  ;;  %v6383_v27 = vrot.slane %v6363_v61, 1  ;;  %v4027_v32 = vld [vmem:[%s7530_s1 + $0x2f8] sm:$0xff]  ;;  %v490_v40 = vrot.slane %v345_v20, 1  ;;  %v384_v16 = vld [vmem:[%s7530_s1 + $0x70] sm:$0xff]  ;;  %5336 = vmatpush3.bf16.msra.mxu1 %v5333_v62 }
  0x48   : > { %5460 = vmatpush3.bf16.msra.mxu0 %v5457_v2  ;;  %4928 = vmatprep.mubr.f32.mxu0 %v6347_v41  ;;  %v6385_v2 = vld [vmem:[#allocation2 + $0xd0] sm:$0x3]  ;;  %v5337_v34 = vpack.c.bf16 %v383_v4, %v382_v50  ;;  %v385_v6 = vld [vmem:[%s7530_s1 + $0x78] sm:$0xff]  ;;  %v1825_v52 = vsel %vm451_vm0, %v6351_v56, %v1824_v1  ;;  %v5469_v55 = vpack.c.bf16 %v4027_v32, %v4026_v31  ;;  %v2177_v50 = vrot.slane %v6102_v49, 2  ;;  %v4076_v1 = vld [vmem:[%s7530_s1 + $0x300] sm:$0xff] }
  0x49   : > { %5462 = vmatprep.subr.bf16.mxu0 %v5461_v51  ;;  %7604 = vst [vmem:[#allocation15_spill] sm:$0xff] %v6383_v27  ;;  %4609 = vmatmul.mubr.f32.gmra.mrb[10].mxu1 %v481_v63  ;;  %v1829_v58 = vrot.slane %v6385_v2, 1  ;;  %v6406_v59 = vld [vmem:[#allocation2 + $0xd0] sm:$0x3]  ;;  %v6410_v63 = vsel %vm451_vm0, %v1826_v26, %v6383_v27  ;;  %v6414_v4 = vrot.slane %v6111_v53, 2  ;;  %v4077_v20 = vld [vmem:[%s7530_s1 + $0x308] sm:$0xff]  ;;  %v5341_v26 = vpack.c.bf16 %v385_v6, %v384_v16 }
  0x4a   : > { %4611 = vmatprep.mubr.f32.mxu1 %v6347_v41  ;;  %7605 = vst [vmem:[#allocation16_spill] sm:$0xff] %v6406_v59  ;;  %7606 = vst [vmem:[#allocation17_spill] sm:$0xff] %v6410_v63  ;;  %5338 = vmatprep.subr.bf16.mxu1 %v5337_v34  ;;  %v491_v31 = vsel %vm451_vm0, %v6351_v56, %v490_v40  ;;  %v495_v62 = vrot.slane %v6406_v59, 1  ;;  %v3916_v32 = vld [vmem:[%s7530_s1 + $0x100] sm:$0xff]  ;;  %v5473_v5 = vpack.c.bf16 %v4077_v20, %v4076_v1  ;;  %v6456_v47 = vld [vmem:[#allocation2 + $0xf8] sm:$0xff] }
  0x4b   : > { %4929 = vmatmul.mubr.f32.gmra.mrb[10].mxu0 %v1820_v17  ;;  %v6418_v17 = vld [vmem:[#allocation2 + $0xe0] sm:$0xff]  ;;  %v1830_v16 = vsel %vm451_vm0, %v6383_v27, %v1829_v58  ;;  %v6448_v3 = vsel %vm1031_vm1, %v2177_v50, %v6414_v4  ;;  %v6454_v58 = vld [vmem:[#allocation2 + $0xf0] sm:$0xff]  ;;  %5340 = vmatpush3.bf16.msra.mxu1 %v5337_v34  ;;  %v4079_v1 = vld [vmem:[%s7530_s1 + $0x318] sm:$0xff] }
  0x4c   : > { %5464 = vmatpush3.bf16.msra.mxu0 %v5461_v51  ;;  %4931 = vmatprep.mubr.f32.mxu0 %v6379_v38  ;;  %v6416_v51 = vld [vmem:[#allocation2 + $0xd8] sm:$0xff]  ;;  %v6442_v6 = vrot.slane %v6418_v17, 1  ;;  %v4078_v50 = vld [vmem:[%s7530_s1 + $0x310] sm:$0xff]  ;;  %v496_v34 = vsel %vm451_vm0, %v6383_v27, %v495_v62  ;;  %v502_v36 = vrot.slane %v6454_v58, 1  ;;  %v2186_v27 = vsel %vm1031_vm1, %v6452_v57, %v2185_v25  ;;  %v4081_v56 = vld [vmem:[%s7530_s1 + $0x328] sm:$0xff] }
  0x4d   : > { %5466 = vmatprep.subr.bf16.mxu0 %v5465_v24  ;;  %4612 = vmatmul.mubr.f32.gmra.mrb[12].mxu1 %v486_v28  ;;  %v3917_v28 = vld [vmem:[%s7530_s1 + $0x108] sm:$0xff]  ;;  %v497_v40 = vrot.slane %v6416_v51, 1  ;;  %v5477_v62 = vpack.c.bf16 %v4079_v1, %v4078_v50  ;;  %v6496_v14 = vld [vmem:[#allocation2 + $0x110] sm:$0xff]  ;;  %v6514_v50 = vrot.slane %v6217_v48, 2  ;;  %v6516_v1 = vld [vmem:[#allocation2 + $0x118] sm:$0x3] }
  0x4e   : > { %4614 = vmatprep.mubr.f32.mxu1 %v6379_v38  ;;  %7607 = vst [vmem:[#allocation18_spill] sm:$0xff] %v6442_v6  ;;  %5342 = vmatprep.subr.bf16.mxu1 %v5341_v26  ;;  %v6466_v20 = vpack.c.bf16 %v3917_v28, %v3916_v32  ;;  %v6482_v28 = vrot.slane %v6456_v47, 1  ;;  %7613 = vst [vmem:[#allocation24_spill] sm:$0xff] %v6516_v1  ;;  %v6530_v38 = vld [vmem:[#allocation2 + $0x128] sm:$0xff]  ;;  %v6556_v60 = vld [vmem:[#allocation2 + $0x130] sm:$0x3] }
  0x4f   : > { %4932 = vmatmul.mubr.f32.gmra.mrb[12].mxu0 %v1825_v52  ;;  %v6444_v52 = vld [vmem:[#allocation2 + $0xe8] sm:$0x3]  ;;  %v6478_v32 = vsel %vm451_vm0, %v497_v40, %v6442_v6  ;;  %5344 = vmatpush3.bf16.msra.mxu1 %v5341_v26  ;;  %7618 = vst [vmem:[#allocation29_spill] sm:$0xff] %v6556_v60  ;;  %v515_v59 = vrot.slane %v6556_v60, 1 }
  0x50   : > { %5468 = vmatpush3.bf16.msra.mxu0 %v5465_v24  ;;  %4934 = vmatprep.mubr.f32.mxu0 %v6410_v63  ;;  %7608 = vst [vmem:[#allocation19_spill] sm:$0xff] %v6444_v52  ;;  %v2182_v24 = vrot.slane %v6158_v12, 2  ;;  %v500_v23 = vrot.slane %v6444_v52, 1  ;;  %7609 = vst [vmem:[#allocation20_spill] sm:$0xff] %v6478_v32  ;;  %v6494_v40 = vld [vmem:[#allocation2 + $0x108] sm:$0xff]  ;;  %v2202_v52 = vrot.slane %v6289_v42, 2 }
  0x51   : > { %5470 = vmatprep.subr.bf16.mxu0 %v5469_v55  ;;  %4615 = vmatmul.mubr.f32.gmra.mrb[14].mxu1 %v491_v31  ;;  %v2181_v31 = vsel %vm1031_vm1, %v6414_v4, %v2180_v37  ;;  %7610 = vst [vmem:[#allocation21_spill] sm:$0xff] %v6482_v28  ;;  %v6492_v37 = vrot.slane %v6184_v30, 2 }
  0x52   : > { %4617 = vmatprep.mubr.f32.mxu1 %v6410_v63  ;;  %v6488_v19 = vsel %vm1031_vm1, %v2182_v24, %v6452_v57  ;;  %v2190_v63 = vrot.slane %v6213_v45, 2  ;;  %v4080_v24 = vld [vmem:[%s7530_s1 + $0x320] sm:$0xff]  ;;  %5346 = vmatprep.subr.bf16.mxu1 %v6466_v20  ;;  %v501_v26 = vsel %vm451_vm0, %v6442_v6, %v500_v23  ;;  %v2192_v45 = vrot.slane %v6215_v46, 2 }
  0x53   : > { %4935 = vmatmul.mubr.f32.gmra.mrb[14].mxu0 %v1830_v16  ;;  %v6484_v16 = vld [vmem:[#allocation2 + $0x100] sm:$0x3]  ;;  %7612 = vst [vmem:[#allocation23_spill] sm:$0xff] %v6488_v19  ;;  %v6525_v23 = vrot.slane %v6496_v14, 1  ;;  %v2195_v6 = vrot.slane %v6248_v7, 2  ;;  %v5481_v41 = vpack.c.bf16 %v4081_v56, %v4080_v24  ;;  %v4082_v7 = vld [vmem:[%s7530_s1 + $0x330] sm:$0xff] }
  0x54   : > { %5472 = vmatpush3.bf16.msra.mxu0 %v5469_v55  ;;  %4993 = vmatprep.mubr.f32.mxu0 %v6448_v3  ;;  %7611 = vst [vmem:[#allocation22_spill] sm:$0xff] %v6484_v16  ;;  %v2187_v55 = vrot.slane %v6182_v29, 2  ;;  %v505_v25 = vrot.slane %v6484_v16, 1  ;;  %v510_v16 = vrot.slane %v6516_v1, 1  ;;  %v2191_v56 = vsel %vm1031_vm1, %v6492_v37, %v2190_v63 }
  0x55   : > { %5474 = vmatprep.subr.bf16.mxu0 %v5473_v5  ;;  %4618 = vmatmul.mubr.f32.gmra.mrb[16].mxu1 %v496_v34  ;;  %v6521_v34 = vsel %vm451_vm0, %v502_v36, %v6482_v28  ;;  %7615 = vst [vmem:[#allocation26_spill] sm:$0xff] %v6525_v23  ;;  %v6538_v36 = vrot.slane %v6255_v15, 2  ;;  %v2196_v63 = vsel %vm1031_vm1, %v6514_v50, %v2195_v6 }
  0x56   : > { %4620 = vmatprep.mubr.f32.mxu1 %v6478_v32  ;;  %7614 = vst [vmem:[#allocation25_spill] sm:$0xff] %v6521_v34  ;;  %v6528_v32 = vld [vmem:[#allocation2 + $0x120] sm:$0xff]  ;;  %v511_v6 = vsel %vm451_vm0, %v6525_v23, %v510_v16 }
  0x57   : > { %4994 = vmatmul.mubr.f32.vlgmr.msra.gmra.mrb[0].mxu0 %v2181_v31  ;;  %v507_v31 = vrot.slane %v6494_v40, 1  ;;  %v512_v24 = vrot.slane %v6528_v32, 1 }
  0x58   : > { %5476 = vmatpush3.bf16.msra.mxu0 %v5473_v5  ;;  %4996 = vmatprep.mubr.f32.mxu0 %v6488_v19  ;;  %v6534_v5 = vsel %vm1031_vm1, %v2187_v55, %v6492_v37  ;;  %v506_v55 = vsel %vm451_vm0, %v6482_v28, %v505_v25  ;;  %v6565_v25 = vsel %vm1031_vm1, %v2192_v45, %v6514_v50  ;;  %v6569_v28 = vld [vmem:[#allocation2 + $0x138] sm:$0xff]  ;;  %v1045_v19 = vrot.slane %v6200_v8, 2  ;;  %v6604_v8 = vld [vmem:[#allocation2 + $0x148] sm:$0x3] }
  0x59   : > { %7616 = vst [vmem:[#allocation27_spill] sm:$0xff] %v6534_v5  ;;  %5478 = vmatprep.subr.bf16.mxu0 %v5477_v62  ;;  %4621 = vmatmul.mubr.f32.gmra.mrb[18].mxu1 %v501_v26  ;;  %v6554_v26 = vrot.slane %v6530_v38, 1  ;;  %v5485_v45 = vpack.c.bf16 %v4083_v9, %v4082_v7  ;;  %v517_v16 = vrot.slane %v6569_v28, 1  ;;  %v1050_v7 = vrot.slane %v6237_v0, 2  ;;  %7623 = vst [vmem:[#allocation33_spill] sm:$0xff] %v6604_v8 }
  0x5a   : > { %4623 = vmatprep.mubr.f32.mxu1 %v6521_v34  ;;  %v7620_v34 = vrot.slane %v6253_v11, 2  ;;  %v1060_v0 = vrot.slane %v6296_v54, 2  ;;  %v4087_v54 = vld [vmem:[%s7530_s1 + $0x358] sm:$0xff] }
  0x5b   : > { %4997 = vmatmul.mubr.f32.gmra.mrb[2].mxu0 %v2186_v27  ;;  %7617 = vst [vmem:[#allocation28_spill] sm:$0xff] %v6554_v26  ;;  %v6561_v27 = vsel %vm451_vm0, %v507_v31, %v6525_v23  ;;  %v6578_v31 = vld [vmem:[#allocation2 + $0x140] sm:$0xff]  ;;  %v6595_v9 = vsel %vm451_vm0, %v512_v24, %v6554_v26  ;;  %v6612_v24 = vsel %vm1031_vm1, %v6452_v57, %v1045_v19  ;;  %v6618_v23 = vld [vmem:[#allocation2 + $0x150] sm:$0xff] }
  0x5c   : > { %4999 = vmatprep.mubr.f32.mxu0 %v6534_v5  ;;  %5480 = vmatpush3.bf16.msra.mxu0 %v5477_v62  ;;  %7619 = vst [vmem:[#allocation30_spill] sm:$0xff] %v6561_v27  ;;  %v6575_v1 = vsel %vm1031_vm1, %v7620_v34, %v6538_v36  ;;  %v2200_v62 = vrot.slane %v6281_v39, 2  ;;  %v4084_v5 = vld [vmem:[%s7530_s1 + $0x340] sm:$0xff]  ;;  %v4085_v39 = vld [vmem:[%s7530_s1 + $0x348] sm:$0xff]  ;;  %v1040_v34 = vrot.slane %v6165_v18, 2  ;;  %7621 = vst [vmem:[#allocation31_spill] sm:$0xff] %v6595_v9 }
  0x5d   : > { %5482 = vmatprep.subr.bf16.mxu0 %v5481_v41  ;;  %4624 = vmatmul.mubr.f32.gmra.mrb[20].mxu1 %v506_v55  ;;  %v1055_v55 = vrot.slane %v6272_v33, 2  ;;  %v6602_v18 = vrot.slane %v6578_v31, 1  ;;  %v6616_v33 = vrot.slane %v6291_v43, 2  ;;  %v6624_v60 = vsel %vm1031_vm1, %v6492_v37, %v1050_v7  ;;  %v4086_v57 = vld [vmem:[%s7530_s1 + $0x350] sm:$0xff]  ;;  %v6656_v7 = vld [vmem:[#allocation2 + $0x160] sm:$0x3] }
  0x5e   : > { %4626 = vmatprep.mubr.f32.mxu1 %v6561_v27  ;;  %v5489_v27 = vpack.c.bf16 %v4085_v39, %v4084_v5  ;;  %v6638_v19 = vsel %vm1031_vm1, %v6538_v36, %v1060_v0  ;;  %v516_v37 = vsel %vm451_vm0, %v6554_v26, %v515_v59  ;;  %v2205_v5 = vrot.slane %v6321_v10, 2  ;;  %7626 = vst [vmem:[#allocation36_spill] sm:$0xff] %v6656_v7 }
  0x5f   : > { %5000 = vmatmul.mubr.f32.gmra.mrb[4].mxu0 %v2191_v56  ;;  %7622 = vst [vmem:[#allocation32_spill] sm:$0xff] %v6602_v18  ;;  %v6608_v56 = vsel %vm1031_vm1, %v6414_v4, %v1040_v34  ;;  %v6628_v4 = vsel %vm1031_vm1, %v6514_v50, %v1055_v55  ;;  %v520_v50 = vrot.slane %v6604_v8, 1  ;;  %v6650_v39 = vsel %vm451_vm0, %v517_v16, %v6602_v18  ;;  %v6668_v16 = vld [vmem:[#allocation2 + $0x170] sm:$0xff] }
  0x60   : > { %5002 = vmatprep.mubr.f32.mxu0 %v6565_v25  ;;  %5484 = vmatpush3.bf16.msra.mxu0 %v5481_v41  ;;  %v6620_v41 = vld [vmem:[#allocation2 + $0x158] sm:$0xff]  ;;  %7624 = vst [vmem:[#allocation34_spill] sm:$0xff] %v6650_v39  ;;  %v6660_v10 = vsel %vm1031_vm1, %v2202_v52, %v6616_v33  ;;  %v2207_v59 = vrot.slane %v6327_v21, 2  ;;  %v5493_v55 = vpack.c.bf16 %v4087_v54, %v4086_v57  ;;  %v4089_v52 = vld [vmem:[%s7530_s1 + $0x368] sm:$0xff]  ;;  %v525_v57 = vrot.slane %v6656_v7, 1 }
  0x61   : > { %5486 = vmatprep.subr.bf16.mxu0 %v5485_v45  ;;  %4627 = vmatmul.mubr.f32.gmra.mrb[22].mxu1 %v511_v6  ;;  %v2201_v6 = vsel %vm1031_vm1, %v6538_v36, %v2200_v62  ;;  %v6654_v34 = vrot.slane %v6620_v41, 1  ;;  %v6664_v36 = vrot.slane %v6329_v22, 2  ;;  %v6666_v62 = vld [vmem:[#allocation2 + $0x168] sm:$0xff]  ;;  %v521_v0 = vsel %vm451_vm0, %v6602_v18, %v520_v50 }
  0x62   : > { %4629 = vmatprep.mubr.f32.mxu1 %v6595_v9  ;;  %v2206_v26 = vsel %vm1031_vm1, %v6616_v33, %v2205_v5  ;;  %v6692_v9 = vld [vmem:[#allocation2 + $0x178] sm:$0x3]  ;;  %v2212_v5 = vrot.slane %v6361_v44, 2  ;;  %v6700_v18 = vrot.slane %v6363_v61, 2  ;;  %v6789_v8 = vrot.slane %v6530_v38, 2 }
  0x63   : > { %5003 = vmatmul.mubr.f32.gmra.mrb[6].mxu0 %v2196_v63  ;;  %v522_v63 = vrot.slane %v6618_v23, 1  ;;  %7625 = vst [vmem:[#allocation35_spill] sm:$0xff] %v6654_v34  ;;  %7629 = vst [vmem:[#allocation39_spill] sm:$0xff] %v6692_v9  ;;  %v6696_v50 = vsel %vm1031_vm1, %v2207_v59, %v6664_v36  ;;  %v526_v59 = vsel %vm451_vm0, %v6654_v34, %v525_v57  ;;  %v530_v7 = vrot.slane %v6692_v9, 1 }
  0x64   : > { %5005 = vmatprep.mubr.f32.mxu0 %v6575_v1  ;;  %5488 = vmatpush3.bf16.msra.mxu0 %v5485_v45  ;;  %v4088_v45 = vld [vmem:[%s7530_s1 + $0x360] sm:$0xff]  ;;  %v2217_v57 = vrot.slane %v6416_v51, 2 }
  0x65   : > { %5490 = vmatprep.subr.bf16.mxu0 %v5489_v27  ;;  %4630 = vmatmul.mubr.f32.gmra.mrb[24].mxu1 %v516_v37  ;;  %v6685_v54 = vsel %vm451_vm0, %v522_v63, %v6654_v34  ;;  %v2210_v37 = vrot.slane %v6353_v35, 2  ;;  %v5497_v63 = vpack.c.bf16 %v4089_v52, %v4088_v45  ;;  %v4090_v35 = vld [vmem:[%s7530_s1 + $0x370] sm:$0xff]  ;;  %v6726_v34 = vrot.slane %v6418_v17, 2 }
  0x66   : > { %4632 = vmatprep.mubr.f32.mxu1 %v6650_v39  ;;  %7627 = vst [vmem:[#allocation37_spill] sm:$0xff] %v6685_v54  ;;  %v6690_v39 = vrot.slane %v6668_v16, 1 }
  0x67   : > { %5006 = vmatmul.mubr.f32.gmra.mrb[8].mxu0 %v2201_v6  ;;  %v527_v6 = vrot.slane %v6666_v62, 1  ;;  %v2211_v45 = vsel %vm1031_vm1, %v6664_v36, %v2210_v37  ;;  %v4092_v37 = vld [vmem:[%s7530_s1 + $0x380] sm:$0xff] }
  0x68   : > { %5008 = vmatprep.mubr.f32.mxu0 %v6660_v10  ;;  %7628 = vst [vmem:[#allocation38_spill] sm:$0xff] %v6690_v39  ;;  %5492 = vmatpush3.bf16.msra.mxu0 %v5489_v27  ;;  %v4091_v27 = vld [vmem:[%s7530_s1 + $0x378] sm:$0xff] }
  0x69   : > { %5494 = vmatprep.subr.bf16.mxu0 %v5493_v55  ;;  %4633 = vmatmul.mubr.f32.gmra.mrb[26].mxu1 %v521_v0  ;;  %v6717_v52 = vsel %vm451_vm0, %v527_v6, %v6690_v39  ;;  %v2215_v0 = vrot.slane %v6385_v2, 2  ;;  %v5501_v9 = vpack.c.bf16 %v4091_v27, %v4090_v35  ;;  %v4093_v2 = vld [vmem:[%s7530_s1 + $0x388] sm:$0xff]  ;;  %v6742_v35 = vsel %vm1031_vm1, %v2217_v57, %v6726_v34 }
  0x6a   : > { %4635 = vmatprep.mubr.f32.mxu1 %v6685_v54  ;;  %7630 = vst [vmem:[#allocation40_spill] sm:$0xff] %v6717_v52  ;;  %v3958_v54 = vld [vmem:[#allocation2 + $0xe8] sm:$0x3]  ;;  %v2222_v27 = vrot.slane %v6454_v58, 2 }
  0x6b   : > { %5009 = vmatmul.mubr.f32.gmra.mrb[10].mxu0 %v2206_v26  ;;  %v6722_v26 = vsel %vm1031_vm1, %v2212_v5, %v6700_v18  ;;  %v2216_v6 = vsel %vm1031_vm1, %v6700_v18, %v2215_v0  ;;  %v2220_v5 = vrot.slane %v3958_v54, 2  ;;  %v3919_v54 = vld [vmem:[%s7530_s1 + $0x118] sm:$0xff] }
  0x6c   : > { %5011 = vmatprep.mubr.f32.mxu0 %v6696_v50  ;;  %5496 = vmatpush3.bf16.msra.mxu0 %v5493_v55  ;;  %v531_v55 = vsel %vm451_vm0, %v6690_v39, %v530_v7  ;;  %v3918_v7 = vld [vmem:[%s7530_s1 + $0x110] sm:$0xff]  ;;  %v3964_v39 = vld [vmem:[#allocation2 + $0x118] sm:$0x3] }
  0x6d   : > { %5498 = vmatprep.subr.bf16.mxu0 %v5497_v63  ;;  %4636 = vmatmul.mubr.f32.gmra.mrb[28].mxu1 %v526_v59  ;;  %v6746_v59 = vrot.slane %v6456_v47, 2  ;;  %v2221_v0 = vsel %vm1031_vm1, %v6726_v34, %v2220_v5  ;;  %v3920_v5 = vld [vmem:[%s7530_s1 + $0x120] sm:$0xff] }
  0x6e   : > { %4638 = vmatprep.mubr.f32.mxu1 %v6717_v52  ;;  %v6748_v52 = vpack.c.bf16 %v4093_v2, %v4092_v37  ;;  %v2227_v2 = vrot.slane %v6494_v40, 2 }
  0x6f   : > { %5012 = vmatmul.mubr.f32.gmra.mrb[12].mxu0 %v2211_v45  ;;  %7631 = vst [vmem:[#allocation41_spill] sm:$0xff] %v6746_v59  ;;  %v3961_v45 = vld [vmem:[#allocation2 + $0x100] sm:$0x3]  ;;  %v6764_v37 = vsel %vm1031_vm1, %v2222_v27, %v6746_v59 }
  0x70   : > { %5014 = vmatprep.mubr.f32.mxu0 %v6722_v26  ;;  %5500 = vmatpush3.bf16.msra.mxu0 %v5497_v63  ;;  %v6756_v63 = vld [vmem:[#allocation2] sm:$0xff]  ;;  %v2225_v57 = vrot.slane %v3961_v45, 2  ;;  %v2230_v45 = vrot.slane %v3964_v39, 2  ;;  %v3923_v39 = vld [vmem:[%s7530_s1 + $0x138] sm:$0xff] }
  0x71   : > { %5502 = vmatprep.subr.bf16.mxu0 %v5501_v9  ;;  %4639 = vmatmul.mubr.f32.gmra.mrb[30].mxu1 %v531_v55  ;;  %v6768_v55 = vrot.slane %v6496_v14, 2 }
  0x72   : > { %4673 = vmatprep.mubr.f32.mxu1 %v6756_v63  ;;  %v2226_v27 = vsel %vm1031_vm1, %v6746_v59, %v2225_v57 }
  0x73   : > { %5015 = vmatmul.mubr.f32.gmra.mrb[14].mxu0 %v2216_v6  ;;  %v5349_v6 = vpack.c.bf16 %v3919_v54, %v3918_v7  ;;  %v6785_v7 = vsel %vm1031_vm1, %v2227_v2, %v6768_v55  ;;  %v2232_v54 = vrot.slane %v6528_v32, 2  ;;  %v2231_v57 = vsel %vm1031_vm1, %v6768_v55, %v2230_v45 }
  0x74   : > { %5017 = vmatprep.mubr.f32.mxu0 %v6742_v35  ;;  %5504 = vmatpush3.bf16.msra.mxu0 %v5501_v9  ;;  %v3921_v9 = vld [vmem:[%s7530_s1 + $0x128] sm:$0xff] }
  0x75   : > { %5506 = vmatprep.subr.bf16.mxu0 %v6748_v52  ;;  %4674 = vmatmul.mubr.f32.vlgmr.msra.gmra.mrb[0].mxu1 %v6756_v63 }
  0x76   : > { %5348 = vmatpush3.bf16.msra.mxu1 %v6466_v20  ;;  %4676 = vmatprep.mubr.f32.mxu1 %v6102_v49  ;;  %v5353_v20 = vpack.c.bf16 %v3921_v9, %v3920_v5  ;;  %v3922_v49 = vld [vmem:[%s7530_s1 + $0x130] sm:$0xff]  ;;  %v2237_v5 = vrot.slane %v6569_v28, 2  ;;  %v6808_v9 = vrot.slane %v6578_v31, 2 }
  0x77   : > { %5018 = vmatmul.mubr.f32.gmra.mrb[16].mxu0 %v2221_v0  ;;  %5350 = vmatprep.subr.bf16.mxu1 %v5349_v6  ;;  %v3967_v0 = vld [vmem:[#allocation2 + $0x130] sm:$0x3]  ;;  %v5357_v59 = vpack.c.bf16 %v3923_v39, %v3922_v49  ;;  %v6827_v49 = vrot.slane %v6620_v41, 2  ;;  %v3973_v39 = vld [vmem:[#allocation2 + $0x160] sm:$0x3] }
  0x78   : > { %5020 = vmatprep.mubr.f32.mxu0 %v6764_v37  ;;  %v2235_v2 = vrot.slane %v3967_v0, 2  ;;  %7632 = vst [vmem:[#allocation42_spill] sm:$0xff] %v6808_v9  ;;  %v2242_v0 = vrot.slane %v6618_v23, 2 }
  0x79   : > { %4677 = vmatmul.mubr.f32.gmra.mrb[2].mxu1 %v6111_v53  ;;  %v6804_v53 = vsel %vm1031_vm1, %v2232_v54, %v6789_v8 }
  0x7a   : > { %4679 = vmatprep.mubr.f32.mxu1 %v6158_v12  ;;  %5352 = vmatpush3.bf16.msra.mxu1 %v5349_v6  ;;  %v3924_v12 = vld [vmem:[%s7530_s1 + $0x140] sm:$0xff]  ;;  %v3925_v6 = vld [vmem:[%s7530_s1 + $0x148] sm:$0xff]  ;;  %v2236_v45 = vsel %vm1031_vm1, %v6789_v8, %v2235_v2 }
  0x7b   : > { %5021 = vmatmul.mubr.f32.gmra.mrb[18].mxu0 %v2226_v27  ;;  %5354 = vmatprep.subr.bf16.mxu1 %v5353_v20  ;;  %v3970_v27 = vld [vmem:[#allocation2 + $0x148] sm:$0x3] }
  0x7c   : > { %5023 = vmatprep.mubr.f32.mxu0 %v6785_v7  ;;  %v2240_v54 = vrot.slane %v3970_v27, 2  ;;  %v2247_v27 = vrot.slane %v6666_v62, 2 }
  0x7d   : > { %4680 = vmatmul.mubr.f32.gmra.mrb[4].mxu1 %v6160_v13  ;;  %v6823_v13 = vsel %vm1031_vm1, %v2237_v5, %v6808_v9  ;;  %v2245_v5 = vrot.slane %v3973_v39, 2 }
  0x7e   : > { %4682 = vmatprep.mubr.f32.mxu1 %v6182_v29  ;;  %5356 = vmatpush3.bf16.msra.mxu1 %v5353_v20  ;;  %7633 = vst [vmem:[#allocation43_spill] sm:$0xff] %v6823_v13  ;;  %v3926_v29 = vld [vmem:[%s7530_s1 + $0x150] sm:$0xff]  ;;  %v3927_v20 = vld [vmem:[%s7530_s1 + $0x158] sm:$0xff]  ;;  %v2241_v2 = vsel %vm1031_vm1, %v6808_v9, %v2240_v54  ;;  %v6852_v54 = vld [vmem:[#allocation2 + $0x180] sm:$0xff] }
  0x7f   : > { %5024 = vmatmul.mubr.f32.gmra.mrb[20].mxu0 %v2231_v57  ;;  %5358 = vmatprep.subr.bf16.mxu1 %v5357_v59  ;;  %v5361_v57 = vpack.c.bf16 %v3925_v6, %v3924_v12  ;;  %v6846_v12 = vrot.slane %v6668_v16, 2  ;;  %v3976_v6 = vld [vmem:[#allocation2 + $0x178] sm:$0x3]  ;;  %v2246_v39 = vsel %vm1031_vm1, %v6827_v49, %v2245_v5  ;;  %v3930_v5 = vld [vmem:[%s7530_s1 + $0x170] sm:$0xff] }
  0x80   : > { %5026 = vmatprep.mubr.f32.mxu0 %v6804_v53 }
  0x81   : > { %4683 = vmatmul.mubr.f32.gmra.mrb[6].mxu1 %v6184_v30  ;;  %v6842_v30 = vsel %vm1031_vm1, %v2242_v0, %v6827_v49  ;;  %7634 = vst [vmem:[#allocation44_spill] sm:$0xff] %v6846_v12  ;;  %v3929_v0 = vld [vmem:[%s7530_s1 + $0x168] sm:$0xff] }
  0x82   : > { %4685 = vmatprep.mubr.f32.mxu1 %v6215_v46  ;;  %5360 = vmatpush3.bf16.msra.mxu1 %v5357_v59  ;;  %v3928_v46 = vld [vmem:[%s7530_s1 + $0x160] sm:$0xff]  ;;  %v6854_v59 = vld [vmem:[#allocation2 + $0x188] sm:$0xff] }
  0x83   : > { %5027 = vmatmul.mubr.f32.gmra.mrb[22].mxu0 %v2236_v45  ;;  %5362 = vmatprep.subr.bf16.mxu1 %v5361_v57  ;;  %v5365_v45 = vpack.c.bf16 %v3927_v20, %v3926_v29  ;;  %v2250_v29 = vrot.slane %v3976_v6, 2  ;;  %v2252_v20 = vrot.slane %v6852_v54, 2  ;;  %v6869_v9 = vrot.slane %v6854_v59, 2 }
  0x84   : > { %5029 = vmatprep.mubr.f32.mxu0 %v6823_v13  ;;  %v3979_v13 = vld [vmem:[#allocation2 + $0x190] sm:$0x3] }
  0x85   : > { %4686 = vmatmul.mubr.f32.gmra.mrb[8].mxu1 %v6217_v48  ;;  %v6865_v48 = vsel %vm1031_vm1, %v2247_v27, %v6846_v12  ;;  %7636 = vst [vmem:[#allocation46_spill] sm:$0xff] %v6869_v9  ;;  %v2251_v27 = vsel %vm1031_vm1, %v6846_v12, %v2250_v29  ;;  %v2255_v6 = vrot.slane %v3979_v13, 2 }
  0x86   : > { %4688 = vmatprep.mubr.f32.mxu1 %v6253_v11  ;;  %5364 = vmatpush3.bf16.msra.mxu1 %v5361_v57  ;;  %7635 = vst [vmem:[#allocation45_spill] sm:$0xff] %v6865_v48  ;;  %v3931_v57 = vld [vmem:[%s7530_s1 + $0x178] sm:$0xff] }
  0x87   : > { %5030 = vmatmul.mubr.f32.gmra.mrb[24].mxu0 %v2241_v2  ;;  %5366 = vmatprep.subr.bf16.mxu1 %v5365_v45  ;;  %v5369_v2 = vpack.c.bf16 %v3929_v0, %v3928_v46  ;;  %v5373_v46 = vpack.c.bf16 %v3931_v57, %v3930_v5  ;;  %v3980_v0 = vld [vmem:[%s7530_s1 + $0x180] sm:$0xff]  ;;  %v2256_v13 = vsel %vm1031_vm1, %v6869_v9, %v2255_v6  ;;  %v6903_v5 = vld [vmem:[#allocation2 + $0x38] sm:$0xff]  ;;  %v4094_v57 = vld [vmem:[%s7530_s1 + $0x390] sm:$0xff] }
  0x88   : > { %5032 = vmatprep.mubr.f32.mxu0 %v6842_v30  ;;  %v3323_v6 = vrot.slane %v6903_v5, 2 }
  0x89   : > { %4689 = vmatmul.mubr.f32.gmra.mrb[10].mxu1 %v6255_v15  ;;  %v6884_v15 = vsel %vm1031_vm1, %v2252_v20, %v6869_v9 }
  0x8a   : > { %4691 = vmatprep.mubr.f32.mxu1 %v6289_v42  ;;  %5368 = vmatpush3.bf16.msra.mxu1 %v5365_v45  ;;  %7637 = vst [vmem:[#allocation47_spill] sm:$0xff] %v6884_v15  ;;  %v6897_v45 = vld [vmem:[#allocation2 + $0x30] sm:$0xff] }
  0x8b   : > { %5033 = vmatmul.mubr.f32.gmra.mrb[26].mxu0 %v2246_v39  ;;  %5370 = vmatprep.subr.bf16.mxu1 %v5369_v2  ;;  %v3981_v39 = vld [vmem:[%s7530_s1 + $0x188] sm:$0xff]  ;;  %v3322_v29 = vrot.slane %v6897_v45, 2 }
  0x8c   : > { %5035 = vmatprep.mubr.f32.mxu0 %v6865_v48  ;;  %v6900_v20 = vpack.c.bf16 %v3981_v39, %v3980_v0  ;;  %v6917_v39 = vld [vmem:[#allocation2 + $0x48] sm:$0xff]  ;;  %v4103_v48 = vld [vmem:[%s7530_s1 + $0x3d8] sm:$0xff] }
  0x8d   : > { %4692 = vmatmul.mubr.f32.gmra.mrb[12].mxu1 %v6291_v43 }
  0x8e   : > { %4694 = vmatprep.mubr.f32.mxu1 %v6327_v21  ;;  %5372 = vmatpush3.bf16.msra.mxu1 %v5369_v2  ;;  %v6912_v2 = vld [vmem:[#allocation2 + $0x40] sm:$0x3] }
  0x8f   : > { %5036 = vmatmul.mubr.f32.gmra.mrb[28].mxu0 %v2251_v27  ;;  %5374 = vmatprep.subr.bf16.mxu1 %v5373_v46  ;;  %v4095_v27 = vld [vmem:[%s7530_s1 + $0x398] sm:$0xff]  ;;  %v3325_v0 = vrot.slane %v6912_v2, 2 }
  0x90   : > { %5038 = vmatprep.mubr.f32.mxu0 %v6884_v15  ;;  %v5509_v9 = vpack.c.bf16 %v4095_v27, %v4094_v57  ;;  %v6921_v15 = vsel %vm1031_vm1, %v3322_v29, %v3323_v6  ;;  %v6937_v29 = vld [vmem:[#allocation2 + $0x50] sm:$0xff]  ;;  %v6939_v57 = vld [vmem:[#allocation2 + $0x60] sm:$0xff] }
  0x91   : > { %4695 = vmatmul.mubr.f32.gmra.mrb[14].mxu1 %v6329_v22  ;;  %7638 = vst [vmem:[#allocation48_spill] sm:$0xff] %v6921_v15  ;;  %v6931_v12 = vsel %vm1031_vm1, %v3323_v6, %v3325_v0  ;;  %v4098_v6 = vld [vmem:[%s7530_s1 + $0x3b0] sm:$0xff]  ;;  %v4099_v0 = vld [vmem:[%s7530_s1 + $0x3b8] sm:$0xff] }
  0x92   : > { %4697 = vmatprep.mubr.f32.mxu1 %v6361_v44  ;;  %5376 = vmatpush3.bf16.msra.mxu1 %v5373_v46  ;;  %v4097_v46 = vld [vmem:[%s7530_s1 + $0x3a8] sm:$0xff]  ;;  %7639 = vst [vmem:[#allocation49_spill] sm:$0xff] %v6931_v12  ;;  %v6962_v15 = vld [vmem:[#allocation2 + $0x78] sm:$0xff] }
  0x93   : > { %5039 = vmatmul.mubr.f32.gmra.mrb[30].mxu0 %v2256_v13  ;;  %5378 = vmatprep.subr.bf16.mxu1 %v6900_v20  ;;  %v4096_v13 = vld [vmem:[%s7530_s1 + $0x3a0] sm:$0xff]  ;;  %v4101_v12 = vld [vmem:[%s7530_s1 + $0x3c8] sm:$0xff] }
  0x94   : > { %5073 = vmatprep.mubr.f32.mxu0 %v6897_v45  ;;  %v5513_v27 = vpack.c.bf16 %v4097_v46, %v4096_v13  ;;  %v5517_v13 = vpack.c.bf16 %v4099_v0, %v4098_v6  ;;  %v4100_v46 = vld [vmem:[%s7530_s1 + $0x3c0] sm:$0xff]  ;;  %v4102_v0 = vld [vmem:[%s7530_s1 + $0x3d0] sm:$0xff] }
  0x95   : > { %4698 = vmatmul.mubr.f32.gmra.mrb[16].mxu1 %v6363_v61  ;;  %v5521_v6 = vpack.c.bf16 %v4101_v12, %v4100_v46  ;;  %v4104_v12 = vld [vmem:[%s7530_s1 + $0x3e0] sm:$0xff]  ;;  %v4105_v46 = vld [vmem:[%s7530_s1 + $0x3e8] sm:$0xff] }
  0x96   : > { %4700 = vmatprep.mubr.f32.mxu1 %v6416_v51 }
  0x97   : > { %5074 = vmatmul.mubr.f32.vlgmr.msra.gmra.mrb[0].mxu0 %v6903_v5 }
  0x98   : > { %5508 = vmatpush3.bf16.msra.mxu0 %v6748_v52  ;;  %5076 = vmatprep.mubr.f32.mxu0 %v6917_v39  ;;  %v6951_v52 = vld [vmem:[#allocation2 + $0x68] sm:$0xff] }
  0x99   : > { %5510 = vmatprep.subr.bf16.mxu0 %v5509_v9  ;;  %4701 = vmatmul.mubr.f32.gmra.mrb[18].mxu1 %v6418_v17 }
  0x9a   : > { %4703 = vmatprep.mubr.f32.mxu1 %v6454_v58 }
  0x9b   : > { %5077 = vmatmul.mubr.f32.gmra.mrb[2].mxu0 %v6937_v29 }
  0x9c   : > { %5079 = vmatprep.mubr.f32.mxu0 %v6939_v57  ;;  %5512 = vmatpush3.bf16.msra.mxu0 %v5509_v9  ;;  %v6965_v9 = vld [vmem:[#allocation2 + $0x80] sm:$0xff] }
  0x9d   : > { %5514 = vmatprep.subr.bf16.mxu0 %v5513_v27  ;;  %4704 = vmatmul.mubr.f32.gmra.mrb[20].mxu1 %v6456_v47 }
  0x9e   : > { %4706 = vmatprep.mubr.f32.mxu1 %v6494_v40 }
  0x9f   : > { %5080 = vmatmul.mubr.f32.gmra.mrb[4].mxu0 %v6951_v52 }
  0xa0   : > { %5082 = vmatprep.mubr.f32.mxu0 %v6962_v15  ;;  %5516 = vmatpush3.bf16.msra.mxu0 %v5513_v27  ;;  %v5525_v27 = vpack.c.bf16 %v4103_v48, %v4102_v0  ;;  %v4106_v48 = vld [vmem:[%s7530_s1 + $0x3f0] sm:$0xff] }
  0xa1   : > { %5518 = vmatprep.subr.bf16.mxu0 %v5517_v13  ;;  %4707 = vmatmul.mubr.f32.gmra.mrb[22].mxu1 %v6496_v14  ;;  %v5868_v0 = vld [vmem:[#allocation2 + $0x10] sm:$0x3] }
  0xa2   : > { %4709 = vmatprep.mubr.f32.mxu1 %v6528_v32 }
  0xa3   : > { %5083 = vmatmul.mubr.f32.gmra.mrb[6].mxu0 %v6965_v9 }
  0xa4   : > { %5085 = vmatprep.mubr.f32.mxu0 %v6289_v42  ;;  %5520 = vmatpush3.bf16.msra.mxu0 %v5517_v13  ;;  %v5529_v42 = vpack.c.bf16 %v4105_v46, %v4104_v12  ;;  %v4107_v13 = vld [vmem:[%s7530_s1 + $0x3f8] sm:$0xff]  ;;  %v1035_v12 = vrot.slane %v5868_v0, 2 }
  0xa5   : > { %5522 = vmatprep.subr.bf16.mxu0 %v5521_v6  ;;  %4710 = vmatmul.mubr.f32.gmra.mrb[24].mxu1 %v6530_v38  ;;  %v3983_v46 = vld [vmem:[%s7530_s1 + $0x198] sm:$0xff] }
  0xa6   : > { %4712 = vmatprep.mubr.f32.mxu1 %v6569_v28  ;;  %v7642_v0 = vld [vmem:[#allocation16_spill] sm:$0xff] }
  0xa7   : > { %5086 = vmatmul.mubr.f32.gmra.mrb[8].mxu0 %v6291_v43  ;;  %v6998_v43 = vrot.slane %v6756_v63, 2 }
  0xa8   : > { %5088 = vmatprep.mubr.f32.mxu0 %v6327_v21  ;;  %5524 = vmatpush3.bf16.msra.mxu0 %v5521_v6  ;;  %v5533_v21 = vpack.c.bf16 %v4107_v13, %v4106_v48  ;;  %v4108_v6 = vld [vmem:[%s7530_s1 + $0x400] sm:$0xff]  ;;  %v3986_v48 = vld [vmem:[%s7530_s1 + $0x1b0] sm:$0xff]  ;;  %v3987_v13 = vld [vmem:[%s7530_s1 + $0x1b8] sm:$0xff] }
  0xa9   : > { %5526 = vmatprep.subr.bf16.mxu0 %v5525_v27  ;;  %4713 = vmatmul.mubr.f32.gmra.mrb[26].mxu1 %v6578_v31 }
  0xaa   : > { %4715 = vmatprep.mubr.f32.mxu1 %v6618_v23 }
  0xab   : > { %5089 = vmatmul.mubr.f32.gmra.mrb[10].mxu0 %v6329_v22  ;;  %v4109_v22 = vld [vmem:[%s7530_s1 + $0x408] sm:$0xff] }
  0xac   : > { %5091 = vmatprep.mubr.f32.mxu0 %v6361_v44  ;;  %5528 = vmatpush3.bf16.msra.mxu0 %v5525_v27  ;;  %v7010_v44 = vpack.c.bf16 %v4109_v22, %v4108_v6  ;;  %v3982_v27 = vld [vmem:[%s7530_s1 + $0x190] sm:$0xff]  ;;  %v2937_v6 = vrot.slane %v6903_v5, 1  ;;  %v2942_v5 = vrot.slane %v6937_v29, 1 }
  0xad   : > { %5530 = vmatprep.subr.bf16.mxu0 %v5529_v42  ;;  %4716 = vmatmul.mubr.f32.gmra.mrb[28].mxu1 %v6620_v41 }
  0xae   : > { %4718 = vmatprep.mubr.f32.mxu1 %v6666_v62 }
  0xaf   : > { %5092 = vmatmul.mubr.f32.gmra.mrb[12].mxu0 %v6363_v61  ;;  %v1036_v61 = vsel %vm1031_vm1, %v6998_v43, %v1035_v12  ;;  %v1075_v12 = vrot.slane %v7642_v0, 2 }
  0xb0   : > { %5094 = vmatprep.mubr.f32.mxu0 %v6416_v51  ;;  %5532 = vmatpush3.bf16.msra.mxu0 %v5529_v42  ;;  %v5381_v51 = vpack.c.bf16 %v3983_v46, %v3982_v27  ;;  %v3984_v42 = vld [vmem:[%s7530_s1 + $0x1a0] sm:$0xff]  ;;  %v2939_v27 = vrot.slane %v6912_v2, 1 }
  0xb1   : > { %5534 = vmatprep.subr.bf16.mxu0 %v5533_v21  ;;  %4719 = vmatmul.mubr.f32.gmra.mrb[30].mxu1 %v6668_v16  ;;  %v1076_v2 = vsel %vm1031_vm1, %v6700_v18, %v1075_v12  ;;  %v7648_v12 = vrot.slane %v6253_v11, 1 }
  0xb2   : > { %4753 = vmatprep.mubr.f32.mxu1 %v6998_v43 }
  0xb3   : > { %5095 = vmatmul.mubr.f32.gmra.mrb[14].mxu0 %v6418_v17  ;;  %v3985_v17 = vld [vmem:[%s7530_s1 + $0x1a8] sm:$0xff] }
  0xb4   : > { %5097 = vmatprep.mubr.f32.mxu0 %v6454_v58  ;;  %5536 = vmatpush3.bf16.msra.mxu0 %v5533_v21  ;;  %v5385_v58 = vpack.c.bf16 %v3985_v17, %v3984_v42  ;;  %v3995_v21 = vld [vmem:[%s7530_s1 + $0x1f8] sm:$0xff]  ;;  %v7643_v17 = vld [vmem:[#allocation19_spill] sm:$0xff] }
  0xb5   : > { %5538 = vmatprep.subr.bf16.mxu0 %v7010_v44  ;;  %4754 = vmatmul.mubr.f32.vlgmr.msra.gmra.mrb[0].mxu1 %v1036_v61  ;;  %v7099_v61 = vld [vmem:[#allocation2 + $0x58] sm:$0x3] }
  0xb6   : > { %5380 = vmatpush3.bf16.msra.mxu1 %v6900_v20  ;;  %4756 = vmatprep.mubr.f32.mxu1 %v6448_v3  ;;  %v5389_v3 = vpack.c.bf16 %v3987_v13, %v3986_v48  ;;  %v3991_v20 = vld [vmem:[%s7530_s1 + $0x1d8] sm:$0xff]  ;;  %v2940_v48 = vsel %vm451_vm0, %v2937_v6, %v2939_v27  ;;  %v2944_v13 = vrot.slane %v7099_v61, 1 }
  0xb7   : > { %5098 = vmatmul.mubr.f32.gmra.mrb[16].mxu0 %v6456_v47  ;;  %5382 = vmatprep.subr.bf16.mxu1 %v5381_v51  ;;  %v7640_v47 = vld [vmem:[#allocation23_spill] sm:$0xff]  ;;  %v4111_v42 = vld [vmem:[%s7530_s1 + $0x418] sm:$0xff] }
  0xb8   : > { %5100 = vmatprep.mubr.f32.mxu0 %v6494_v40  ;;  %v3988_v40 = vld [vmem:[%s7530_s1 + $0x1c0] sm:$0xff] }
  0xb9   : > { %4757 = vmatmul.mubr.f32.gmra.mrb[2].mxu1 %v6608_v56  ;;  %v3989_v56 = vld [vmem:[%s7530_s1 + $0x1c8] sm:$0xff] }
  0xba   : > { %4759 = vmatprep.mubr.f32.mxu1 %v7640_v47  ;;  %5384 = vmatpush3.bf16.msra.mxu1 %v5381_v51  ;;  %v4110_v51 = vld [vmem:[%s7530_s1 + $0x410] sm:$0xff]  ;;  %v2946_v47 = vrot.slane %v6939_v57, 1 }
  0xbb   : > { %5101 = vmatmul.mubr.f32.gmra.mrb[18].mxu0 %v6496_v14  ;;  %5386 = vmatprep.subr.bf16.mxu1 %v5385_v58  ;;  %v7641_v14 = vld [vmem:[#allocation27_spill] sm:$0xff] }
  0xbc   : > { %5103 = vmatprep.mubr.f32.mxu0 %v6528_v32  ;;  %v5393_v32 = vpack.c.bf16 %v3989_v56, %v3988_v40  ;;  %v7117_v56 = vld [vmem:[#allocation2 + $0x70] sm:$0x3] }
  0xbd   : > { %4760 = vmatmul.mubr.f32.gmra.mrb[4].mxu1 %v6612_v24  ;;  %v3990_v24 = vld [vmem:[%s7530_s1 + $0x1d0] sm:$0xff] }
  0xbe   : > { %4762 = vmatprep.mubr.f32.mxu1 %v7641_v14  ;;  %5388 = vmatpush3.bf16.msra.mxu1 %v5385_v58  ;;  %v1080_v58 = vrot.slane %v7643_v17, 2  ;;  %v5541_v14 = vpack.c.bf16 %v4111_v42, %v4110_v51  ;;  %v4117_v51 = vld [vmem:[%s7530_s1 + $0x448] sm:$0xff] }
  0xbf   : > { %5104 = vmatmul.mubr.f32.gmra.mrb[20].mxu0 %v6530_v38  ;;  %5390 = vmatprep.subr.bf16.mxu1 %v5389_v3  ;;  %v5397_v38 = vpack.c.bf16 %v3991_v20, %v3990_v24  ;;  %v4112_v24 = vld [vmem:[%s7530_s1 + $0x420] sm:$0xff]  ;;  %v4113_v20 = vld [vmem:[%s7530_s1 + $0x428] sm:$0xff] }
  0xc0   : > { %5106 = vmatprep.mubr.f32.mxu0 %v6569_v28  ;;  %v3993_v28 = vld [vmem:[%s7530_s1 + $0x1e8] sm:$0xff] }
  0xc1   : > { %4763 = vmatmul.mubr.f32.gmra.mrb[6].mxu1 %v6624_v60  ;;  %v3992_v60 = vld [vmem:[%s7530_s1 + $0x1e0] sm:$0xff] }
  0xc2   : > { %4765 = vmatprep.mubr.f32.mxu1 %v6565_v25  ;;  %5392 = vmatpush3.bf16.msra.mxu1 %v5389_v3  ;;  %v5869_v25 = vld [vmem:[#allocation2 + $0xa0] sm:$0x3]  ;;  %v2947_v3 = vrot.slane %v6951_v52, 1 }
  0xc3   : > { %5107 = vmatmul.mubr.f32.gmra.mrb[22].mxu0 %v6578_v31  ;;  %5394 = vmatprep.subr.bf16.mxu1 %v5393_v32  ;;  %v1065_v31 = vrot.slane %v5869_v25, 2  ;;  %v2945_v25 = vsel %vm451_vm0, %v2942_v5, %v2944_v13  ;;  %v7166_v13 = vld [vmem:[#allocation2 + $0xb8] sm:$0x3] }
  0xc4   : > { %5109 = vmatprep.mubr.f32.mxu0 %v6618_v23  ;;  %v5401_v23 = vpack.c.bf16 %v3993_v28, %v3992_v60  ;;  %v7645_v60 = vld [vmem:[#allocation22_spill] sm:$0xff] }
  0xc5   : > { %4766 = vmatmul.mubr.f32.gmra.mrb[8].mxu1 %v6628_v4  ;;  %v3994_v4 = vld [vmem:[%s7530_s1 + $0x1f0] sm:$0xff]  ;;  %v1085_v28 = vrot.slane %v7645_v60, 2 }
  0xc6   : > { %4768 = vmatprep.mubr.f32.mxu1 %v6575_v1  ;;  %5396 = vmatpush3.bf16.msra.mxu1 %v5393_v32  ;;  %v1066_v1 = vsel %vm1031_vm1, %v6616_v33, %v1065_v31  ;;  %v5405_v22 = vpack.c.bf16 %v3995_v21, %v3994_v4  ;;  %v7644_v32 = vld [vmem:[#allocation3_spill] sm:$0xff]  ;;  %v2949_v31 = vrot.slane %v7117_v56, 1  ;;  %v2948_v4 = vsel %vm451_vm0, %v2946_v47, %v2947_v3  ;;  %v7135_v21 = vld [vmem:[#allocation2 + $0x88] sm:$0x3] }
  0xc7   : > { %5110 = vmatmul.mubr.f32.gmra.mrb[24].mxu0 %v6620_v41  ;;  %5398 = vmatprep.subr.bf16.mxu1 %v5397_v38  ;;  %v5870_v41 = vld [vmem:[#allocation2 + $0xb8] sm:$0x3]  ;;  %v2954_v0 = vrot.slane %v7135_v21, 1  ;;  %v7652_v60 = vld [vmem:[#allocation11_spill] sm:$0xff] }
  0xc8   : > { %5112 = vmatprep.mubr.f32.mxu0 %v6666_v62  ;;  %v1070_v62 = vrot.slane %v5870_v41, 2  ;;  %v4114_v41 = vld [vmem:[%s7530_s1 + $0x430] sm:$0xff] }
  0xc9   : > { %4769 = vmatmul.mubr.f32.gmra.mrb[10].mxu1 %v6638_v19  ;;  %v2936_v19 = vrot.slane %v6897_v45, 1  ;;  %v2941_v45 = vrot.slane %v6917_v39, 1 }
  0xca   : > { %4771 = vmatprep.mubr.f32.mxu1 %v6660_v10  ;;  %5400 = vmatpush3.bf16.msra.mxu1 %v5397_v38  ;;  %v1081_v38 = vsel %vm1031_vm1, %v6726_v34, %v1080_v58 }
  0xcb   : > { %5113 = vmatmul.mubr.f32.gmra.mrb[26].mxu0 %v6668_v16  ;;  %5402 = vmatprep.subr.bf16.mxu1 %v5401_v23  ;;  %v1071_v16 = vsel %vm1031_vm1, %v6664_v36, %v1070_v62  ;;  %v2938_v46 = vsel %vm451_vm0, %v2936_v19, %v2937_v6  ;;  %v2943_v40 = vsel %vm451_vm0, %v2941_v45, %v2942_v5  ;;  %v7646_v62 = vld [vmem:[#allocation41_spill] sm:$0xff]  ;;  %v7647_v6 = vld [vmem:[#allocation24_spill] sm:$0xff] }
  0xcc   : > { %5115 = vmatprep.mubr.f32.mxu0 %v6852_v54  ;;  %v1086_v19 = vsel %vm1031_vm1, %v7646_v62, %v1085_v28  ;;  %v7152_v45 = vld [vmem:[#allocation2 + $0xa0] sm:$0x3] }
  0xcd   : > { %4772 = vmatmul.mubr.f32.gmra.mrb[12].mxu1 %v1066_v1  ;;  %v5545_v1 = vpack.c.bf16 %v4113_v20, %v4112_v24  ;;  %v7650_v24 = vld [vmem:[#allocation33_spill] sm:$0xff] }
  0xce   : > { %4774 = vmatprep.mubr.f32.mxu1 %v6696_v50  ;;  %5404 = vmatpush3.bf16.msra.mxu1 %v5401_v23  ;;  %v2952_v23 = vrot.slane %v6965_v9, 1  ;;  %v1100_v20 = vrot.slane %v7650_v24, 2 }
  0xcf   : > { %5116 = vmatmul.mubr.f32.gmra.mrb[28].mxu0 %v6854_v59  ;;  %5406 = vmatprep.subr.bf16.mxu1 %v5405_v22 }
  0xd0   : > { %5118 = vmatprep.mubr.f32.mxu0 %v6756_v63  ;;  %v2953_v27 = vsel %vm451_vm0, %v7648_v12, %v2952_v23  ;;  %v2955_v58 = vsel %vm451_vm0, %v2952_v23, %v2954_v0  ;;  %v7657_v0 = vld [vmem:[#allocation13_spill] sm:$0xff] }
  0xd1   : > { %4775 = vmatmul.mubr.f32.gmra.mrb[14].mxu1 %v1071_v16  ;;  %v2950_v16 = vsel %vm451_vm0, %v2947_v3, %v2949_v31  ;;  %v4118_v3 = vld [vmem:[%s7530_s1 + $0x450] sm:$0xff] }
  0xd2   : > { %4777 = vmatprep.mubr.f32.mxu1 %v6722_v26  ;;  %5408 = vmatpush3.bf16.msra.mxu1 %v5405_v22  ;;  %v1090_v22 = vrot.slane %v7647_v6, 2  ;;  %v7182_v31 = vld [vmem:[#allocation2 + $0xd0] sm:$0x3]  ;;  %v7655_v6 = vld [vmem:[#allocation36_spill] sm:$0xff] }
  0xd3   : > { %5119 = vmatmul.mubr.f32.gmra.mrb[30].mxu0 %v6756_v63  ;;  %5569 = vmatprep.subr.bf16.mxu1 %v7644_v32 }
  0xd4   : > { %5153 = vmatprep.mubr.f32.mxu0 %v2938_v46  ;;  %v4116_v46 = vld [vmem:[%s7530_s1 + $0x440] sm:$0xff]  ;;  %v1091_v42 = vsel %vm1031_vm1, %v6768_v55, %v1090_v22  ;;  %v1105_v22 = vrot.slane %v7655_v6, 2 }
  0xd5   : > { %4778 = vmatmul.mubr.f32.gmra.mrb[16].mxu1 %v1076_v2  ;;  %v7649_v2 = vld [vmem:[#allocation29_spill] sm:$0xff]  ;;  %v5553_v47 = vpack.c.bf16 %v4117_v51, %v4116_v46  ;;  %v4122_v51 = vld [vmem:[%s7530_s1 + $0x470] sm:$0xff] }
  0xd6   : > { %4780 = vmatprep.mubr.f32.mxu1 %v6742_v35  ;;  %v1095_v17 = vrot.slane %v7649_v2, 2  ;;  %v1106_v2 = vsel %vm1031_vm1, %v6827_v49, %v1105_v22  ;;  %v7665_v6 = vld [vmem:[#allocation25_spill] sm:$0xff] }
  0xd7   : > { %5154 = vmatmul.mubr.f32.vlgmr.msra.gmra.mrb[0].mxu0 %v2940_v48  ;;  %v2959_v48 = vrot.slane %v7152_v45, 1  ;;  %v7666_v22 = vld [vmem:[#allocation21_spill] sm:$0xff] }
  0xd8   : > { %5540 = vmatpush3.bf16.msra.mxu0 %v7010_v44  ;;  %5156 = vmatprep.mubr.f32.mxu0 %v2943_v40  ;;  %v4115_v44 = vld [vmem:[%s7530_s1 + $0x438] sm:$0xff] }
  0xd9   : > { %5542 = vmatprep.subr.bf16.mxu0 %v5541_v14  ;;  %4781 = vmatmul.mubr.f32.gmra.mrb[18].mxu1 %v1081_v38  ;;  %v5549_v5 = vpack.c.bf16 %v4115_v44, %v4114_v41  ;;  %v4119_v40 = vld [vmem:[%s7530_s1 + $0x458] sm:$0xff]  ;;  %v2960_v28 = vsel %vm451_vm0, %v7652_v60, %v2959_v48  ;;  %v7653_v41 = vld [vmem:[#allocation43_spill] sm:$0xff]  ;;  %v7654_v44 = vld [vmem:[#allocation42_spill] sm:$0xff] }
  0xda   : > { %4783 = vmatprep.mubr.f32.mxu1 %v6764_v37  ;;  %v7651_v38 = vld [vmem:[#allocation12_spill] sm:$0xff]  ;;  %v5557_v23 = vpack.c.bf16 %v4119_v40, %v4118_v3  ;;  %v7659_v48 = vld [vmem:[#allocation17_spill] sm:$0xff] }
  0xdb   : > { %5157 = vmatmul.mubr.f32.gmra.mrb[2].mxu0 %v2945_v25  ;;  %v2964_v25 = vrot.slane %v7166_v13, 1 }
  0xdc   : > { %5159 = vmatprep.mubr.f32.mxu0 %v2948_v4  ;;  %5544 = vmatpush3.bf16.msra.mxu0 %v5541_v14  ;;  %v1096_v14 = vsel %vm1031_vm1, %v6789_v8, %v1095_v17  ;;  %v4120_v4 = vld [vmem:[%s7530_s1 + $0x460] sm:$0xff]  ;;  %v7658_v17 = vld [vmem:[#allocation39_spill] sm:$0xff] }
  0xdd   : > { %5546 = vmatprep.subr.bf16.mxu0 %v5545_v1  ;;  %4784 = vmatmul.mubr.f32.gmra.mrb[20].mxu1 %v1086_v19  ;;  %v1101_v19 = vsel %vm1031_vm1, %v7654_v44, %v1100_v20  ;;  %v2965_v12 = vsel %vm451_vm0, %v7657_v0, %v2964_v25  ;;  %v7661_v20 = vld [vmem:[#allocation45_spill] sm:$0xff]  ;;  %v7664_v25 = vld [vmem:[#allocation18_spill] sm:$0xff] }
  0xde   : > { %4786 = vmatprep.mubr.f32.mxu1 %v6785_v7 }
  0xdf   : > { %5160 = vmatmul.mubr.f32.gmra.mrb[4].mxu0 %v2950_v16  ;;  %v7656_v16 = vld [vmem:[#allocation14_spill] sm:$0xff] }
  0xe0   : > { %5162 = vmatprep.mubr.f32.mxu0 %v2953_v27  ;;  %5548 = vmatpush3.bf16.msra.mxu0 %v5545_v1  ;;  %v4121_v1 = vld [vmem:[%s7530_s1 + $0x468] sm:$0xff]  ;;  %v2969_v27 = vrot.slane %v7182_v31, 1 }
  0xe1   : > { %5550 = vmatprep.subr.bf16.mxu0 %v5549_v5  ;;  %4787 = vmatmul.mubr.f32.gmra.mrb[22].mxu1 %v1091_v42  ;;  %v5561_v46 = vpack.c.bf16 %v4121_v1, %v4120_v4  ;;  %v4123_v42 = vld [vmem:[%s7530_s1 + $0x478] sm:$0xff] }
  0xe2   : > { %4789 = vmatprep.mubr.f32.mxu1 %v6804_v53  ;;  %v5565_v24 = vpack.c.bf16 %v4123_v42, %v4122_v51  ;;  %v7667_v51 = vld [vmem:[#allocation30_spill] sm:$0xff] }
  0xe3   : > { %5163 = vmatmul.mubr.f32.gmra.mrb[6].mxu0 %v2955_v58  ;;  %v1110_v58 = vrot.slane %v7658_v17, 2  ;;  %v7668_v42 = vld [vmem:[#allocation26_spill] sm:$0xff] }
  0xe4   : > { %5165 = vmatprep.mubr.f32.mxu0 %v7651_v38  ;;  %5552 = vmatpush3.bf16.msra.mxu0 %v5549_v5  ;;  %v7198_v5 = vld [vmem:[#allocation2 + $0xe8] sm:$0x3]  ;;  %v7662_v38 = vld [vmem:[#allocation44_spill] sm:$0xff] }
  0xe5   : > { %5554 = vmatprep.subr.bf16.mxu0 %v5553_v47  ;;  %4790 = vmatmul.mubr.f32.gmra.mrb[24].mxu1 %v1096_v14  ;;  %v2974_v40 = vrot.slane %v7198_v5, 1  ;;  %v7214_v14 = vld [vmem:[#allocation2 + $0x100] sm:$0x3]  ;;  %v1111_v60 = vsel %vm1031_vm1, %v7662_v38, %v1110_v58  ;;  %v7669_v58 = vld [vmem:[#allocation4_spill] sm:$0xff] }
  0xe6   : > { %4792 = vmatprep.mubr.f32.mxu1 %v7653_v41  ;;  %v2979_v1 = vrot.slane %v7214_v14, 1 }
  0xe7   : > { %5166 = vmatmul.mubr.f32.gmra.mrb[8].mxu0 %v2960_v28  ;;  %v7663_v28 = vld [vmem:[#allocation20_spill] sm:$0xff]  ;;  %v2975_v4 = vsel %vm451_vm0, %v7664_v25, %v2974_v40  ;;  %v7670_v40 = vld [vmem:[#allocation31_spill] sm:$0xff]  ;;  %v7245_v25 = vld [vmem:[#allocation2 + $0x160] sm:$0x3] }
  0xe8   : > { %5168 = vmatprep.mubr.f32.mxu0 %v7656_v16  ;;  %5556 = vmatpush3.bf16.msra.mxu0 %v5553_v47  ;;  %v7660_v47 = vld [vmem:[#allocation15_spill] sm:$0xff]  ;;  %v2980_v16 = vsel %vm451_vm0, %v7666_v22, %v2979_v1  ;;  %v5877_v1 = vld [vmem:[#allocation2 + $0x60] sm:$0xff] }
  0xe9   : > { %5558 = vmatprep.subr.bf16.mxu0 %v5557_v23  ;;  %4793 = vmatmul.mubr.f32.gmra.mrb[26].mxu1 %v1101_v19  ;;  %v2970_v3 = vsel %vm451_vm0, %v7660_v47, %v2969_v27  ;;  %v5871_v19 = vld [vmem:[#allocation2 + $0x18] sm:$0xff]  ;;  %v5872_v27 = vld [vmem:[#allocation2 + $0x20] sm:$0xff] }
  0xea   : > { %4795 = vmatprep.mubr.f32.mxu1 %v6842_v30  ;;  %v5874_v47 = vld [vmem:[#allocation2 + $0x38] sm:$0xff] }
  0xeb   : > { %5169 = vmatmul.mubr.f32.gmra.mrb[10].mxu0 %v2965_v12  ;;  %v7229_v12 = vld [vmem:[#allocation2 + $0x130] sm:$0x3] }
  0xec   : > { %5171 = vmatprep.mubr.f32.mxu0 %v7659_v48  ;;  %5560 = vmatpush3.bf16.msra.mxu0 %v5557_v23  ;;  %v7223_v23 = vld [vmem:[#allocation2 + $0x118] sm:$0x3]  ;;  %v2989_v17 = vrot.slane %v7229_v12, 1  ;;  %v7237_v48 = vld [vmem:[#allocation2 + $0x148] sm:$0x3] }
  0xed   : > { %5562 = vmatprep.subr.bf16.mxu0 %v5561_v46  ;;  %4796 = vmatmul.mubr.f32.gmra.mrb[28].mxu1 %v1106_v2  ;;  %v2984_v0 = vrot.slane %v7223_v23, 1 }
  0xee   : > { %4798 = vmatprep.mubr.f32.mxu1 %v7661_v20 }
  0xef   : > { %5172 = vmatmul.mubr.f32.gmra.mrb[12].mxu0 %v2970_v3  ;;  %v2985_v2 = vsel %vm451_vm0, %v7668_v42, %v2984_v0  ;;  %v5875_v3 = vld [vmem:[#allocation2 + $0x48] sm:$0xff]  ;;  %v7252_v0 = vld [vmem:[#allocation2 + $0x178] sm:$0x3]  ;;  %v7677_v42 = vld [vmem:[#allocation35_spill] sm:$0xff] }
  0xf0   : > { %5174 = vmatprep.mubr.f32.mxu0 %v7663_v28  ;;  %5564 = vmatpush3.bf16.msra.mxu0 %v5561_v46  ;;  %v5873_v46 = vld [vmem:[#allocation2 + $0x30] sm:$0xff]  ;;  %v7672_v28 = vld [vmem:[#allocation5_spill] sm:$0xff] }
  0xf1   : > { %5566 = vmatprep.subr.bf16.mxu0 %v5565_v24  ;;  %4799 = vmatmul.mubr.f32.gmra.mrb[30].mxu1 %v1111_v60  ;;  %v2994_v60 = vrot.slane %v7237_v48, 1 }
  0xf2   : > { %4833 = vmatprep.mubr.f32.mxu1 %v5871_v19  ;;  %v7673_v19 = vld [vmem:[#allocation34_spill] sm:$0xff] }
  0xf3   : > { %5175 = vmatmul.mubr.f32.gmra.mrb[14].mxu0 %v2975_v4  ;;  %v5876_v4 = vld [vmem:[#allocation2 + $0x50] sm:$0xff] }
  0xf4   : > { %5177 = vmatprep.mubr.f32.mxu0 %v7665_v6  ;;  %5568 = vmatpush3.bf16.msra.mxu0 %v5565_v24  ;;  %v7674_v6 = vld [vmem:[#allocation32_spill] sm:$0xff] }
  0xf5   : > { %4834 = vmatmul.mubr.f32.vlgmr.msra.gmra.mrb[0].mxu1 %v5872_v27  ;;  %v2995_v22 = vsel %vm451_vm0, %v7674_v6, %v2994_v60  ;;  %v7675_v27 = vld [vmem:[#allocation6_spill] sm:$0xff] }
  0xf6   : > { %5577 = vmatpush3.bf16.msra.mxu1 %v7644_v32  ;;  %4836 = vmatprep.mubr.f32.mxu1 %v5873_v46  ;;  %v7671_v32 = vld [vmem:[#allocation28_spill] sm:$0xff]  ;;  %v5878_v46 = vld [vmem:[#allocation2 + $0x68] sm:$0xff] }
  0xf7   : > { %5178 = vmatmul.mubr.f32.gmra.mrb[16].mxu0 %v2980_v16  ;;  %5570 = vmatprep.subr.bf16.mxu1 %v7669_v58  ;;  %v2990_v24 = vsel %vm451_vm0, %v7671_v32, %v2989_v17  ;;  %v2999_v16 = vrot.slane %v7245_v25, 1  ;;  %v3004_v17 = vrot.slane %v7252_v0, 1  ;;  %v5879_v32 = vld [vmem:[#allocation2 + $0x80] sm:$0xff]  ;;  %v7680_v60 = vld [vmem:[#allocation38_spill] sm:$0xff] }
  0xf8   : > { %5180 = vmatprep.mubr.f32.mxu0 %v7667_v51  ;;  %v7676_v51 = vld [vmem:[#allocation37_spill] sm:$0xff]  ;;  %v7278_v6 = vld [vmem:[#allocation2 + $0x1a8] sm:$0x3] }
  0xf9   : > { %4837 = vmatmul.mubr.f32.gmra.mrb[2].mxu1 %v5874_v47  ;;  %v7263_v47 = vrot.slane %v6854_v59, 1 }
  0xfa   : > { %4839 = vmatprep.mubr.f32.mxu1 %v5875_v3  ;;  %5578 = vmatpush3.bf16.msra.mxu1 %v7669_v58  ;;  %v3006_v58 = vrot.slane %v6852_v54, 1  ;;  %v7265_v3 = vld [vmem:[#allocation2 + $0x190] sm:$0x3] }
  0xfb   : > { %5181 = vmatmul.mubr.f32.gmra.mrb[18].mxu0 %v2985_v2  ;;  %5571 = vmatprep.subr.bf16.mxu1 %v7672_v28  ;;  %v3000_v2 = vsel %vm451_vm0, %v7677_v42, %v2999_v16  ;;  %v5881_v16 = vld [vmem:[#allocation2 + $0x98] sm:$0xff]  ;;  %v5883_v42 = vld [vmem:[#allocation2 + $0xb0] sm:$0xff] }
  0xfc   : > { %5183 = vmatprep.mubr.f32.mxu0 %v7670_v40  ;;  %v7678_v40 = vld [vmem:[#allocation7_spill] sm:$0xff] }
  0xfd   : > { %4840 = vmatmul.mubr.f32.gmra.mrb[4].mxu1 %v5876_v4  ;;  %v3009_v4 = vrot.slane %v7265_v3, 1 }
  0xfe   : > { %4842 = vmatprep.mubr.f32.mxu1 %v5877_v1  ;;  %5579 = vmatpush3.bf16.msra.mxu1 %v7672_v28  ;;  %v3005_v28 = vsel %vm451_vm0, %v7680_v60, %v3004_v17  ;;  %v3011_v1 = vrot.slane %v6756_v63, 1  ;;  %v3014_v63 = vrot.slane %v7278_v6, 1  ;;  %v7684_v60 = vld [vmem:[#allocation48_spill] sm:$0xff] }
  0xff   : > { %5184 = vmatmul.mubr.f32.gmra.mrb[20].mxu0 %v2990_v24  ;;  %5572 = vmatprep.subr.bf16.mxu1 %v7675_v27  ;;  %v7679_v24 = vld [vmem:[#allocation40_spill] sm:$0xff] }
 0x100   : > { %5186 = vmatprep.mubr.f32.mxu0 %v7673_v19  ;;  %v7276_v19 = vsel %vm451_vm0, %v3006_v58, %v7263_v47  ;;  %v3015_v17 = vsel %vm451_vm0, %v3011_v1, %v3014_v63  ;;  %v3327_v58 = vrot.slane %v6917_v39, 2  ;;  %v3333_v39 = vrot.slane %v6951_v52, 2  ;;  %v7315_v63 = vld [vmem:[#allocation2 + $0x108] sm:$0xff] }
 0x101   : > { %4843 = vmatmul.mubr.f32.gmra.mrb[6].mxu1 %v5878_v46  ;;  %v3010_v46 = vsel %vm451_vm0, %v7263_v47, %v3009_v4  ;;  %v3332_v4 = vrot.slane %v6939_v57, 2  ;;  %v3338_v57 = vrot.slane %v6965_v9, 2 }
 0x102   : > { %4845 = vmatprep.mubr.f32.mxu1 %v6962_v15  ;;  %5580 = vmatpush3.bf16.msra.mxu1 %v7675_v27  ;;  %v5880_v15 = vld [vmem:[#allocation2 + $0x90] sm:$0xff]  ;;  %v5882_v27 = vld [vmem:[#allocation2 + $0xa8] sm:$0xff] }
 0x103   : > { %5187 = vmatmul.mubr.f32.gmra.mrb[22].mxu0 %v2995_v22  ;;  %5573 = vmatprep.subr.bf16.mxu1 %v7678_v40  ;;  %v7681_v22 = vld [vmem:[#allocation8_spill] sm:$0xff]  ;;  %v3334_v52 = vsel %vm1031_vm1, %v3332_v4, %v3333_v39 }
 0x104   : > { %5189 = vmatprep.mubr.f32.mxu0 %v7676_v51  ;;  %v7682_v51 = vld [vmem:[#allocation9_spill] sm:$0xff]  ;;  %v7351_v4 = vld [vmem:[#allocation2 + $0x158] sm:$0xff] }
 0x105   : > { %4846 = vmatmul.mubr.f32.gmra.mrb[8].mxu1 %v5879_v32  ;;  %v7683_v32 = vld [vmem:[#allocation10_spill] sm:$0xff] }
 0x106   : > { %4848 = vmatprep.mubr.f32.mxu1 %v5880_v15  ;;  %5581 = vmatpush3.bf16.msra.mxu1 %v7678_v40  ;;  %v3328_v40 = vrot.slane %v6937_v29, 2  ;;  %v5885_v15 = vld [vmem:[#allocation2 + $0xc8] sm:$0xff] }
 0x107   : > { %5190 = vmatmul.mubr.f32.gmra.mrb[24].mxu0 %v3000_v2  ;;  %5574 = vmatprep.subr.bf16.mxu1 %v7681_v22  ;;  %v5884_v2 = vld [vmem:[#allocation2 + $0xc0] sm:$0xff] }
 0x108   : > { %5192 = vmatprep.mubr.f32.mxu0 %v7679_v24  ;;  %v7292_v24 = vld [vmem:[#allocation2 + $0xd8] sm:$0xff]  ;;  %v3329_v29 = vsel %vm1031_vm1, %v3327_v58, %v3328_v40 }
 0x109   : > { %4849 = vmatmul.mubr.f32.gmra.mrb[10].mxu1 %v5881_v16  ;;  %v7305_v16 = vld [vmem:[#allocation2 + $0xf0] sm:$0xff] }
 0x10a   : > { %4851 = vmatprep.mubr.f32.mxu1 %v5882_v27  ;;  %5582 = vmatpush3.bf16.msra.mxu1 %v7681_v22  ;;  %v7685_v22 = vld [vmem:[#allocation49_spill] sm:$0xff]  ;;  %v3335_v27 = vrot.slane %v7117_v56, 2  ;;  %v7686_v56 = vrot.slane %v6253_v11, 2  ;;  %v7334_v11 = vld [vmem:[#allocation2 + $0x138] sm:$0xff] }
 0x10b   : > { %5193 = vmatmul.mubr.f32.gmra.mrb[26].mxu0 %v3005_v28  ;;  %5575 = vmatprep.subr.bf16.mxu1 %v7682_v51  ;;  %v3330_v28 = vrot.slane %v7099_v61, 2 }
 0x10c   : > { %5195 = vmatprep.mubr.f32.mxu0 %v7276_v19  ;;  %v3339_v9 = vsel %vm1031_vm1, %v7686_v56, %v3338_v57 }
 0x10d   : > { %4852 = vmatmul.mubr.f32.gmra.mrb[12].mxu1 %v5883_v42  ;;  %v3331_v61 = vsel %vm1031_vm1, %v3328_v40, %v3330_v28  ;;  %v3340_v42 = vrot.slane %v7135_v21, 2  ;;  %v3345_v40 = vrot.slane %v7152_v45, 2  ;;  %v7344_v45 = vld [vmem:[#allocation2 + $0x150] sm:$0xff] }
 0x10e   : > { %4854 = vmatprep.mubr.f32.mxu1 %v5884_v2  ;;  %5583 = vmatpush3.bf16.msra.mxu1 %v7682_v51  ;;  %v3336_v51 = vsel %vm1031_vm1, %v3333_v39, %v3335_v27  ;;  %v7323_v2 = vld [vmem:[#allocation2 + $0x110] sm:$0xff]  ;;  %v3370_v27 = vrot.slane %v7223_v23, 2 }
 0x10f   : > { %5196 = vmatmul.mubr.f32.gmra.mrb[28].mxu0 %v3010_v46  ;;  %5576 = vmatprep.subr.bf16.mxu1 %v7683_v32  ;;  %v7312_v46 = vld [vmem:[#allocation2 + $0xf8] sm:$0xff]  ;;  %v3341_v58 = vsel %vm1031_vm1, %v3338_v57, %v3340_v42  ;;  %v3346_v21 = vsel %vm1031_vm1, %v6616_v33, %v3345_v40  ;;  %v7354_v33 = vld [vmem:[#allocation2 + $0x168] sm:$0xff]  ;;  %v7363_v39 = vld [vmem:[#allocation2 + $0x170] sm:$0xff]  ;;  %v1842_v57 = vrot.slane %v7323_v2, 1 }
 0x110   : > { %5198 = vmatprep.mubr.f32.mxu0 %v3011_v1  ;;  %v7301_v1 = vld [vmem:[#allocation2 + $0xe0] sm:$0xff]  ;;  %v5904_v40 = vld [vmem:[#allocation2 + $0x148] sm:$0x3] }
 0x111   : > { %4855 = vmatmul.mubr.f32.gmra.mrb[14].mxu1 %v5885_v15  ;;  %v3350_v15 = vrot.slane %v7166_v13, 2 }
 0x112   : > { %4857 = vmatprep.mubr.f32.mxu1 %v7292_v24  ;;  %5584 = vmatpush3.bf16.msra.mxu1 %v7683_v32  ;;  %v7331_v32 = vld [vmem:[#allocation2 + $0x128] sm:$0xff] }
 0x113   : > { %5199 = vmatmul.mubr.f32.gmra.mrb[30].mxu0 %v3015_v17  ;;  %v7326_v17 = vld [vmem:[#allocation2 + $0x120] sm:$0xff]  ;;  %v3351_v28 = vsel %vm1031_vm1, %v6664_v36, %v3350_v15  ;;  %v1831_v36 = vrot.slane %v7292_v24, 1  ;;  %v1836_v24 = vrot.slane %v7305_v16, 1 }
 0x114   : > { %5233 = vmatprep.mubr.f32.mxu0 %v7684_v60  ;;  %v7341_v60 = vld [vmem:[#allocation2 + $0x140] sm:$0xff] }
 0x115   : > { %4858 = vmatmul.mubr.f32.gmra.mrb[16].mxu1 %v7301_v1 }
 0x116   : > { %4860 = vmatprep.mubr.f32.mxu1 %v7305_v16  ;;  %v1841_v16 = vrot.slane %v7315_v63, 1 }
 0x117   : > { %5234 = vmatmul.mubr.f32.vlgmr.msra.gmra.mrb[0].mxu0 %v7685_v22 }
 0x118   : > { %5236 = vmatprep.mubr.f32.mxu0 %v3329_v29  ;;  %v5900_v29 = vld [vmem:[#allocation2 + $0xe8] sm:$0x3]  ;;  %v1843_v23 = vsel %vm451_vm0, %v1841_v16, %v1842_v57 }
 0x119   : > { %4861 = vmatmul.mubr.f32.gmra.mrb[18].mxu1 %v7312_v46  ;;  %v1834_v22 = vrot.slane %v5900_v29, 1  ;;  %v7688_v29 = vld [vmem:[#allocation46_spill] sm:$0xff] }
 0x11a   : > { %4863 = vmatprep.mubr.f32.mxu1 %v7315_v63  ;;  %v1846_v63 = vrot.slane %v7326_v17, 1 }
 0x11b   : > { %5237 = vmatmul.mubr.f32.gmra.mrb[2].mxu0 %v3331_v61 }
 0x11c   : > { %5239 = vmatprep.mubr.f32.mxu0 %v3334_v52  ;;  %v5902_v52 = vld [vmem:[#allocation2 + $0x118] sm:$0x3] }
 0x11d   : > { %4864 = vmatmul.mubr.f32.gmra.mrb[20].mxu1 %v7323_v2  ;;  %v1851_v2 = vrot.slane %v7334_v11, 1 }
 0x11e   : > { %4866 = vmatprep.mubr.f32.mxu1 %v7326_v17  ;;  %v1852_v17 = vrot.slane %v7341_v60, 1 }
 0x11f   : > { %5240 = vmatmul.mubr.f32.gmra.mrb[4].mxu0 %v3336_v51  ;;  %v1847_v51 = vrot.slane %v7331_v32, 1 }
 0x120   : > { %5242 = vmatprep.mubr.f32.mxu0 %v3339_v9 }
 0x121   : > { %4867 = vmatmul.mubr.f32.gmra.mrb[22].mxu1 %v7331_v32  ;;  %v1854_v32 = vrot.slane %v5904_v40, 1 }
 0x122   : > { %4869 = vmatprep.mubr.f32.mxu1 %v7334_v11  ;;  %v1856_v11 = vrot.slane %v7344_v45, 1 }
 0x123   : > { %5243 = vmatmul.mubr.f32.gmra.mrb[6].mxu0 %v3341_v58  ;;  %v1855_v15 = vsel %vm451_vm0, %v1852_v17, %v1854_v32 }
 0x124   : > { %5245 = vmatprep.mubr.f32.mxu0 %v6660_v10  ;;  %v3355_v10 = vrot.slane %v7182_v31, 2  ;;  %v1832_v31 = vrot.slane %v7301_v1, 1  ;;  %v1837_v1 = vrot.slane %v7312_v46, 1  ;;  %v1844_v46 = vrot.slane %v5902_v52, 1 }
 0x125   : > { %4870 = vmatmul.mubr.f32.gmra.mrb[24].mxu1 %v7341_v60 }
 0x126   : > { %4872 = vmatprep.mubr.f32.mxu1 %v7344_v45  ;;  %v3356_v13 = vsel %vm1031_vm1, %v6700_v18, %v3355_v10  ;;  %v1835_v61 = vsel %vm451_vm0, %v1832_v31, %v1834_v22  ;;  %v1845_v42 = vsel %vm451_vm0, %v1842_v57, %v1844_v46  ;;  %v1861_v45 = vrot.slane %v7354_v33, 1 }
 0x127   : > { %5246 = vmatmul.mubr.f32.gmra.mrb[8].mxu0 %v3346_v21  ;;  %v1857_v21 = vrot.slane %v7351_v4, 1  ;;  %v1862_v10 = vrot.slane %v7363_v39, 1 }
 0x128   : > { %5248 = vmatprep.mubr.f32.mxu0 %v6696_v50  ;;  %v3360_v50 = vrot.slane %v7198_v5, 2  ;;  %v1833_v5 = vsel %vm451_vm0, %v1831_v36, %v1832_v31  ;;  %v5907_v36 = vld [vmem:[#allocation2 + $0x190] sm:$0x3] }
 0x129   : > { %4873 = vmatmul.mubr.f32.gmra.mrb[26].mxu1 %v7351_v4  ;;  %v1869_v31 = vrot.slane %v5907_v36, 1 }
 0x12a   : > { %4875 = vmatprep.mubr.f32.mxu1 %v7354_v33  ;;  %v3361_v18 = vsel %vm1031_vm1, %v6726_v34, %v3360_v50  ;;  %v1838_v34 = vsel %vm451_vm0, %v1836_v24, %v1837_v1 }
 0x12b   : > { %5249 = vmatmul.mubr.f32.gmra.mrb[10].mxu0 %v3351_v28 }
 0x12c   : > { %5251 = vmatprep.mubr.f32.mxu0 %v6722_v26  ;;  %v3365_v26 = vrot.slane %v7214_v14, 2  ;;  %v5901_v14 = vld [vmem:[#allocation2 + $0x100] sm:$0x3] }
 0x12d   : > { %4876 = vmatmul.mubr.f32.gmra.mrb[28].mxu1 %v7363_v39  ;;  %v7687_v39 = vld [vmem:[#allocation47_spill] sm:$0xff] }
 0x12e   : > { %4878 = vmatprep.mubr.f32.mxu1 %v6852_v54  ;;  %v3366_v54 = vsel %vm1031_vm1, %v7646_v62, %v3365_v26  ;;  %v3375_v62 = vrot.slane %v7229_v12, 2  ;;  %v5903_v12 = vld [vmem:[#allocation2 + $0x130] sm:$0x3] }
 0x12f   : > { %5252 = vmatmul.mubr.f32.gmra.mrb[12].mxu0 %v3356_v13  ;;  %v1849_v9 = vrot.slane %v5903_v12, 1  ;;  %v5906_v13 = vld [vmem:[#allocation2 + $0x178] sm:$0x3] }
 0x130   : > { %5254 = vmatprep.mubr.f32.mxu0 %v6742_v35  ;;  %v1839_v35 = vrot.slane %v5901_v14, 1  ;;  %v3376_v56 = vsel %vm1031_vm1, %v6789_v8, %v3375_v62  ;;  %v3385_v8 = vrot.slane %v7245_v25, 2  ;;  %v5905_v25 = vld [vmem:[#allocation2 + $0x160] sm:$0x3]  ;;  %v1864_v50 = vrot.slane %v5906_v13, 1 }
 0x131   : > { %4879 = vmatmul.mubr.f32.gmra.mrb[30].mxu1 %v6854_v59  ;;  %v1850_v58 = vsel %vm451_vm0, %v1847_v51, %v1849_v9  ;;  %v1859_v28 = vrot.slane %v5905_v25, 1 }
 0x132   : > { %4937 = vmatprep.mubr.f32.mxu1 %v1833_v5  ;;  %v1840_v59 = vsel %vm451_vm0, %v1837_v1, %v1839_v35  ;;  %v3386_v60 = vsel %vm1031_vm1, %v6827_v49, %v3385_v8  ;;  %v1865_v33 = vsel %vm451_vm0, %v1862_v10, %v1864_v50 }
 0x133   : > { %5255 = vmatmul.mubr.f32.gmra.mrb[14].mxu0 %v3361_v18  ;;  %v1860_v4 = vsel %vm451_vm0, %v1857_v21, %v1859_v28 }
 0x134   : > { %5257 = vmatprep.mubr.f32.mxu0 %v6764_v37  ;;  %v3371_v37 = vsel %vm1031_vm1, %v6768_v55, %v3370_v27  ;;  %v1848_v55 = vsel %vm451_vm0, %v1846_v63, %v1847_v51 }
 0x135   : > { %4938 = vmatmul.mubr.f32.vlgmr.msra.gmra.mrb[16].mxu1 %v1835_v61 }
 0x136   : > { %4940 = vmatprep.mubr.f32.mxu1 %v1838_v34 }
 0x137   : > { %5258 = vmatmul.mubr.f32.gmra.mrb[16].mxu0 %v3366_v54 }
 0x138   : > { %5260 = vmatprep.mubr.f32.mxu0 %v6785_v7  ;;  %v3380_v7 = vrot.slane %v7237_v48, 2  ;;  %v1853_v48 = vsel %vm451_vm0, %v1851_v2, %v1852_v17 }
 0x139   : > { %4941 = vmatmul.mubr.f32.gmra.mrb[18].mxu1 %v1840_v59  ;;  %v7443_v59 = vld [vmem:[%s7531_s2] ss:$0 sm:$0xff] }
 0x13a   : > { %4943 = vmatprep.mubr.f32.mxu1 %v1843_v23 }
 0x13b   : > { %5261 = vmatmul.mubr.f32.gmra.mrb[18].mxu0 %v3371_v37 }
 0x13c   : > { %5263 = vmatprep.mubr.f32.mxu0 %v6804_v53  ;;  %v3381_v53 = vsel %vm1031_vm1, %v7654_v44, %v3380_v7  ;;  %v3390_v44 = vrot.slane %v7252_v0, 2  ;;  %v3395_v0 = vrot.slane %v7265_v3, 2 }
 0x13d   : > { %4944 = vmatmul.mubr.f32.gmra.mrb[20].mxu1 %v1845_v42 }
 0x13e   : > { %4946 = vmatprep.mubr.f32.mxu1 %v1848_v55  ;;  %v3391_v49 = vsel %vm1031_vm1, %v7662_v38, %v3390_v44  ;;  %v3396_v22 = vsel %vm1031_vm1, %v7688_v29, %v3395_v0  ;;  %v1870_v38 = vsel %vm451_vm0, %v7263_v47, %v1869_v31 }
 0x13f   : > { %5264 = vmatmul.mubr.f32.gmra.mrb[20].mxu0 %v3376_v56 }
 0x140   : > { %5266 = vmatprep.mubr.f32.mxu0 %v7653_v41  ;;  %v1858_v41 = vsel %vm451_vm0, %v1856_v11, %v1857_v21 }
 0x141   : > { %4947 = vmatmul.mubr.f32.gmra.mrb[22].mxu1 %v1850_v58 }
 0x142   : > { %4949 = vmatprep.mubr.f32.mxu1 %v1853_v48 }
 0x143   : > { %5267 = vmatmul.mubr.f32.gmra.mrb[22].mxu0 %v3381_v53 }
 0x144   : > { %5269 = vmatprep.mubr.f32.mxu0 %v6842_v30  ;;  %v1863_v30 = vsel %vm451_vm0, %v1861_v45, %v1862_v10 }
 0x145   : > { %4950 = vmatmul.mubr.f32.gmra.mrb[24].mxu1 %v1855_v15 }
 0x146   : > { %4952 = vmatprep.mubr.f32.mxu1 %v1858_v41 }
 0x147   : > { %5270 = vmatmul.mubr.f32.gmra.mrb[24].mxu0 %v3386_v60 }
 0x148   : > { %5272 = vmatprep.mubr.f32.mxu0 %v7661_v20  ;;  %v3400_v20 = vrot.slane %v7278_v6, 2 }
 0x149   : > { %4953 = vmatmul.mubr.f32.gmra.mrb[26].mxu1 %v1860_v4 }
 0x14a   : > { %4955 = vmatprep.mubr.f32.mxu1 %v1863_v30  ;;  %v3401_v3 = vsel %vm1031_vm1, %v6998_v43, %v3400_v20 }
 0x14b   : > { %5273 = vmatmul.mubr.f32.gmra.mrb[26].mxu0 %v3391_v49 }
 0x14c   : > { %5275 = vmatprep.mubr.f32.mxu0 %v7687_v39 }
 0x14d   : > { %4956 = vmatmul.mubr.f32.gmra.mrb[28].mxu1 %v1865_v33 }
 0x14e   : > { %4958 = vmatprep.mubr.f32.mxu1 %v7276_v19 }
 0x14f   : > { %5276 = vmatmul.mubr.f32.gmra.mrb[28].mxu0 %v3396_v22 }
 0x150   : > { %5278 = vmatprep.mubr.f32.mxu0 %v6998_v43 }
 0x151   : > { %4959 = vmatmul.mubr.f32.gmra.mrb[30].mxu1 %v1870_v38 }
 0x153   : > { %5279 = vmatmul.mubr.f32.gmra.mrb[30].mxu0 %v3401_v3 }
 0x1c8   : > { %v4835_v26 = vpop.f32.mrb[0].mxu1 }
 0x1c9   : > { %v1535_v18 = vpop.f32.mrb[1].mxu1 }
 0x1cc   : > { %v4838_v5 = vpop.f32.mrb[2].mxu1 }
 0x1cd   : > { %v1545_v24 = vpop.f32.mrb[3].mxu1 }
 0x1d0   : > { %v4841_v1 = vpop.f32.mrb[4].mxu1 }
 0x1d1   : > { %v1555_v6 = vpop.f32.mrb[5].mxu1 }
 0x1d4   : > { %v4844_v61 = vpop.f32.mrb[6].mxu1 }
 0x1d5   : > { %v1565_v54 = vpop.f32.mrb[7].mxu1 }
 0x1d8   : > { %v4847_v19 = vpop.f32.mrb[8].mxu1 }
 0x1d9   : > { %v1575_v14 = vpop.f32.mrb[9].mxu1 }
 0x1dc   : > { %v4850_v35 = vpop.f32.mrb[10].mxu1 }
 0x1dd   : > { %v1585_v47 = vpop.f32.mrb[11].mxu1 }
 0x1e0   : > { %v7432_v34 = vpop.f32.mrb[12].mxu1 }
 0x1e1   : > { %v7434_v27 = vpop.f32.mrb[13].mxu1 }
 0x1e4   : > { %v7436_v43 = vpop.f32.mrb[14].mxu1 }
 0x1e5   : > { %v7438_v16 = vpop.f32.mrb[15].mxu1 }
 0x1ea   : > { %v5235_v57 = vpop.f32.mrb[0].mxu0 }
 0x1eb   : > { %v5585_v52 = vadd.f32 %v5235_v57, %v4835_v26  ;;  %v3500_v46 = vpop.f32.mrb[1].mxu0 }
 0x1ec   : > { %v5586_v62 = vadd.f32 %v3500_v46, %v1535_v18 }
 0x1ed   : > { %v3699_v37 = vadd.f32 %v5585_v52, %v7443_v59 }
 0x1ee   : > { %v3698_v23 = vadd.f32 %v5586_v62, %v7443_v59  ;;  %v5238_v63 = vpop.f32.mrb[2].mxu0 }
 0x1ef   : > { %v3731_v51 = vmax.f32 %v3699_v37, 0.0  ;;  %v5587_v42 = vadd.f32 %v5238_v63, %v4838_v5  ;;  %v3510_v56 = vpop.f32.mrb[3].mxu0 }
 0x1f0   : > { %v3730_v12 = vmax.f32 %v3698_v23, 0.0  ;;  %v5588_v9 = vadd.f32 %v3510_v56, %v1545_v24 }
 0x1f1   : > { %3763 = vst [vmem:[%s7451_s30 + $0x8] sm:$0xff] %v3731_v51  ;;  %v3701_v55 = vadd.f32 %v5587_v42, %v7443_v59 }
 0x1f2   : > { %3762 = vst [vmem:[%s7451_s30] sm:$0xff] %v3730_v12  ;;  %v3700_v7 = vadd.f32 %v5588_v9, %v7443_v59  ;;  %v5241_v2 = vpop.f32.mrb[4].mxu0 }
 0x1f3   : > { %v3733_v17 = vmax.f32 %v3701_v55, 0.0  ;;  %v5589_v58 = vadd.f32 %v5241_v2, %v4841_v1  ;;  %v3520_v40 = vpop.f32.mrb[5].mxu0 }
 0x1f4   : > { %v3732_v32 = vmax.f32 %v3700_v7, 0.0  ;;  %v5590_v8 = vadd.f32 %v3520_v40, %v1555_v6 }
 0x1f5   : > { %3765 = vst [vmem:[%s7451_s30 + $0x18] sm:$0xff] %v3733_v17  ;;  %v3703_v53 = vadd.f32 %v5589_v58, %v7443_v59 }
 0x1f6   : > { %3764 = vst [vmem:[%s7451_s30 + $0x10] sm:$0xff] %v3732_v32  ;;  %v3702_v48 = vadd.f32 %v5590_v8, %v7443_v59  ;;  %v5244_v11 = vpop.f32.mrb[6].mxu0 }
 0x1f7   : > { %v3735_v21 = vmax.f32 %v3703_v53, 0.0  ;;  %v5591_v15 = vadd.f32 %v5244_v11, %v4844_v61  ;;  %v3530_v60 = vpop.f32.mrb[7].mxu0 }
 0x1f8   : > { %v3734_v25 = vmax.f32 %v3702_v48, 0.0  ;;  %v5592_v28 = vadd.f32 %v3530_v60, %v1565_v54 }
 0x1f9   : > { %3767 = vst [vmem:[%s7451_s30 + $0x28] sm:$0xff] %v3735_v21  ;;  %v3705_v41 = vadd.f32 %v5591_v15, %v7443_v59 }
 0x1fa   : > { %3766 = vst [vmem:[%s7451_s30 + $0x20] sm:$0xff] %v3734_v25  ;;  %v3704_v44 = vadd.f32 %v5592_v28, %v7443_v59  ;;  %v5247_v45 = vpop.f32.mrb[8].mxu0 }
 0x1fb   : > { %v3737_v10 = vmax.f32 %v3705_v41, 0.0  ;;  %v5593_v4 = vadd.f32 %v5247_v45, %v4847_v19  ;;  %v3540_v13 = vpop.f32.mrb[9].mxu0 }
 0x1fc   : > { %v3736_v50 = vmax.f32 %v3704_v44, 0.0  ;;  %v5594_v49 = vadd.f32 %v3540_v13, %v1575_v14 }
 0x1fd   : > { %3769 = vst [vmem:[%s7451_s30 + $0x38] sm:$0xff] %v3737_v10  ;;  %v3707_v30 = vadd.f32 %v5593_v4, %v7443_v59 }
 0x1fe   : > { %3768 = vst [vmem:[%s7451_s30 + $0x30] sm:$0xff] %v3736_v50  ;;  %v3706_v0 = vadd.f32 %v5594_v49, %v7443_v59  ;;  %v5250_v33 = vpop.f32.mrb[10].mxu0 }
 0x1ff   : > { %v3739_v36 = vmax.f32 %v3707_v30, 0.0  ;;  %v5595_v31 = vadd.f32 %v5250_v33, %v4850_v35  ;;  %v3550_v39 = vpop.f32.mrb[11].mxu0 }
 0x200   : > { %v3738_v29 = vmax.f32 %v3706_v0, 0.0  ;;  %v5596_v22 = vadd.f32 %v3550_v39, %v1585_v47 }
 0x201   : > { %3771 = vst [vmem:[%s7451_s30 + $0x48] sm:$0xff] %v3739_v36  ;;  %v3709_v20 = vadd.f32 %v5595_v31, %v7443_v59 }
 0x202   : > { %3770 = vst [vmem:[%s7451_s30 + $0x40] sm:$0xff] %v3738_v29  ;;  %v3708_v38 = vadd.f32 %v5596_v22, %v7443_v59  ;;  %v5253_v3 = vpop.f32.mrb[12].mxu0 }
 0x203   : > { %v3741_v26 = vmax.f32 %v3709_v20, 0.0  ;;  %v5597_v18 = vadd.f32 %v5253_v3, %v7432_v34  ;;  %v3560_v5 = vpop.f32.mrb[13].mxu0 }
 0x204   : > { %v3740_v24 = vmax.f32 %v3708_v38, 0.0  ;;  %v5598_v1 = vadd.f32 %v3560_v5, %v7434_v27 }
 0x205   : > { %3773 = vst [vmem:[%s7451_s30 + $0x58] sm:$0xff] %v3741_v26  ;;  %v3711_v6 = vadd.f32 %v5597_v18, %v7443_v59 }
 0x206   : > { %3772 = vst [vmem:[%s7451_s30 + $0x50] sm:$0xff] %v3740_v24  ;;  %v3710_v61 = vadd.f32 %v5598_v1, %v7443_v59  ;;  %v5256_v54 = vpop.f32.mrb[14].mxu0 }
 0x207   : > { %v3743_v19 = vmax.f32 %v3711_v6, 0.0  ;;  %v5599_v14 = vadd.f32 %v5256_v54, %v7436_v43  ;;  %v3570_v35 = vpop.f32.mrb[15].mxu0 }
 0x208   : > { %v3742_v47 = vmax.f32 %v3710_v61, 0.0  ;;  %v5600_v34 = vadd.f32 %v3570_v35, %v7438_v16  ;;  %v4939_v27 = vpop.f32.mrb[16].mxu1 }
 0x209   : > { %3775 = vst [vmem:[%s7451_s30 + $0x68] sm:$0xff] %v3743_v19  ;;  %v3713_v57 = vadd.f32 %v5599_v14, %v7443_v59  ;;  %v2049_v62 = vpop.f32.mrb[17].mxu1 }
 0x20a   : > { %3774 = vst [vmem:[%s7451_s30 + $0x60] sm:$0xff] %v3742_v47  ;;  %v3712_v52 = vadd.f32 %v5600_v34, %v7443_v59  ;;  %v5259_v46 = vpop.f32.mrb[16].mxu0 }
 0x20b   : > { %v3745_v37 = vmax.f32 %v3713_v57, 0.0  ;;  %v5601_v23 = vadd.f32 %v5259_v46, %v4939_v27  ;;  %v3580_v63 = vpop.f32.mrb[17].mxu0 }
 0x20c   : > { %v3744_v43 = vmax.f32 %v3712_v52, 0.0  ;;  %v5602_v51 = vadd.f32 %v3580_v63, %v2049_v62  ;;  %v4942_v42 = vpop.f32.mrb[18].mxu1 }
 0x20d   : > { %3777 = vst [vmem:[%s7451_s30 + $0x78] sm:$0xff] %v3745_v37  ;;  %v3715_v16 = vadd.f32 %v5601_v23, %v7443_v59  ;;  %v2059_v9 = vpop.f32.mrb[19].mxu1 }
 0x20e   : > { %3776 = vst [vmem:[%s7451_s30 + $0x70] sm:$0xff] %v3744_v43  ;;  %v3714_v56 = vadd.f32 %v5602_v51, %v7443_v59  ;;  %v5262_v12 = vpop.f32.mrb[18].mxu0 }
 0x20f   : > { %v3747_v55 = vmax.f32 %v3715_v16, 0.0  ;;  %v5603_v7 = vadd.f32 %v5262_v12, %v4942_v42  ;;  %v3590_v2 = vpop.f32.mrb[19].mxu0 }
 0x210   : > { %v3746_v17 = vmax.f32 %v3714_v56, 0.0  ;;  %v5604_v58 = vadd.f32 %v3590_v2, %v2059_v9  ;;  %v4945_v32 = vpop.f32.mrb[20].mxu1 }
 0x211   : > { %3779 = vst [vmem:[%s7451_s30 + $0x88] sm:$0xff] %v3747_v55  ;;  %v3717_v40 = vadd.f32 %v5603_v7, %v7443_v59  ;;  %v2069_v48 = vpop.f32.mrb[21].mxu1 }
 0x212   : > { %3778 = vst [vmem:[%s7451_s30 + $0x80] sm:$0xff] %v3746_v17  ;;  %v3716_v8 = vadd.f32 %v5604_v58, %v7443_v59  ;;  %v5265_v53 = vpop.f32.mrb[20].mxu0 }
 0x213   : > { %v3749_v11 = vmax.f32 %v3717_v40, 0.0  ;;  %v5605_v21 = vadd.f32 %v5265_v53, %v4945_v32  ;;  %v3600_v15 = vpop.f32.mrb[21].mxu0 }
 0x214   : > { %v3748_v60 = vmax.f32 %v3716_v8, 0.0  ;;  %v5606_v25 = vadd.f32 %v3600_v15, %v2069_v48  ;;  %v4948_v41 = vpop.f32.mrb[22].mxu1 }
 0x215   : > { %3781 = vst [vmem:[%s7451_s30 + $0x98] sm:$0xff] %v3749_v11  ;;  %v3719_v28 = vadd.f32 %v5605_v21, %v7443_v59  ;;  %v2079_v10 = vpop.f32.mrb[23].mxu1 }
 0x216   : > { %3780 = vst [vmem:[%s7451_s30 + $0x90] sm:$0xff] %v3748_v60  ;;  %v3718_v44 = vadd.f32 %v5606_v25, %v7443_v59  ;;  %v5268_v45 = vpop.f32.mrb[22].mxu0 }
 0x217   : > { %v3751_v4 = vmax.f32 %v3719_v28, 0.0  ;;  %v5607_v13 = vadd.f32 %v5268_v45, %v4948_v41  ;;  %v3610_v50 = vpop.f32.mrb[23].mxu0 }
 0x218   : > { %v3750_v49 = vmax.f32 %v3718_v44, 0.0  ;;  %v5608_v30 = vadd.f32 %v3610_v50, %v2079_v10  ;;  %v4951_v33 = vpop.f32.mrb[24].mxu1 }
 0x219   : > { %3783 = vst [vmem:[%s7451_s30 + $0xa8] sm:$0xff] %v3751_v4  ;;  %v3721_v0 = vadd.f32 %v5607_v13, %v7443_v59  ;;  %v2089_v39 = vpop.f32.mrb[25].mxu1 }
 0x21a   : > { %3782 = vst [vmem:[%s7451_s30 + $0xa0] sm:$0xff] %v3750_v49  ;;  %v3720_v36 = vadd.f32 %v5608_v30, %v7443_v59  ;;  %v5271_v31 = vpop.f32.mrb[24].mxu0 }
 0x21b   : > { %v3753_v29 = vmax.f32 %v3721_v0, 0.0  ;;  %v5609_v22 = vadd.f32 %v5271_v31, %v4951_v33  ;;  %v3620_v20 = vpop.f32.mrb[25].mxu0 }
 0x21c   : > { %v3752_v38 = vmax.f32 %v3720_v36, 0.0  ;;  %v5610_v3 = vadd.f32 %v3620_v20, %v2089_v39  ;;  %v4954_v18 = vpop.f32.mrb[26].mxu1 }
 0x21d   : > { %3785 = vst [vmem:[%s7451_s30 + $0xb8] sm:$0xff] %v3753_v29  ;;  %v3723_v26 = vadd.f32 %v5609_v22, %v7443_v59  ;;  %v2099_v1 = vpop.f32.mrb[27].mxu1 }
 0x21e   : > { %3784 = vst [vmem:[%s7451_s30 + $0xb0] sm:$0xff] %v3752_v38  ;;  %v3722_v5 = vadd.f32 %v5610_v3, %v7443_v59  ;;  %v5274_v24 = vpop.f32.mrb[26].mxu0 }
 0x21f   : > { %v3755_v6 = vmax.f32 %v3723_v26, 0.0  ;;  %v5611_v61 = vadd.f32 %v5274_v24, %v4954_v18  ;;  %v3630_v54 = vpop.f32.mrb[27].mxu0 }
 0x220   : > { %v3754_v19 = vmax.f32 %v3722_v5, 0.0  ;;  %v5612_v14 = vadd.f32 %v3630_v54, %v2099_v1  ;;  %v4957_v47 = vpop.f32.mrb[28].mxu1 }
 0x221   : > { %3787 = vst [vmem:[%s7451_s30 + $0xc8] sm:$0xff] %v3755_v6  ;;  %v3725_v35 = vadd.f32 %v5611_v61, %v7443_v59  ;;  %v2109_v27 = vpop.f32.mrb[29].mxu1 }
 0x222   : > { %3786 = vst [vmem:[%s7451_s30 + $0xc0] sm:$0xff] %v3754_v19  ;;  %v3724_v34 = vadd.f32 %v5612_v14, %v7443_v59  ;;  %v5277_v57 = vpop.f32.mrb[28].mxu0 }
 0x223   : > { %v3757_v52 = vmax.f32 %v3725_v35, 0.0  ;;  %v5613_v46 = vadd.f32 %v5277_v57, %v4957_v47  ;;  %v3640_v62 = vpop.f32.mrb[29].mxu0 }
 0x224   : > { %v3756_v37 = vmax.f32 %v3724_v34, 0.0  ;;  %v5614_v23 = vadd.f32 %v3640_v62, %v2109_v27  ;;  %v4960_v43 = vpop.f32.mrb[30].mxu1 }
 0x225   : > { %3789 = vst [vmem:[%s7451_s30 + $0xd8] sm:$0xff] %v3757_v52  ;;  %v3727_v63 = vadd.f32 %v5613_v46, %v7443_v59  ;;  %v2119_v42 = vpop.f32.mrb[31].mxu1 }
 0x226   : > { %3788 = vst [vmem:[%s7451_s30 + $0xd0] sm:$0xff] %v3756_v37  ;;  %v3726_v51 = vadd.f32 %v5614_v23, %v7443_v59  ;;  %v5280_v16 = vpop.f32.mrb[30].mxu0 }
 0x227   : > { %v3759_v56 = vmax.f32 %v3727_v63, 0.0  ;;  %v5615_v12 = vadd.f32 %v5280_v16, %v4960_v43  ;;  %v3650_v9 = vpop.f32.mrb[31].mxu0 }
 0x228   : > { %v3758_v55 = vmax.f32 %v3726_v51, 0.0  ;;  %v5616_v7 = vadd.f32 %v3650_v9, %v2119_v42 }
 0x229   : > { %3791 = vst [vmem:[%s7451_s30 + $0xe8] sm:$0xff] %v3759_v56  ;;  %v3729_v2 = vadd.f32 %v5615_v12, %v7443_v59 }
 0x22a   : > { %3790 = vst [vmem:[%s7451_s30 + $0xe0] sm:$0xff] %v3758_v55  ;;  %v3728_v17 = vadd.f32 %v5616_v7, %v7443_v59 }
 0x22b   : > { %v3761_v58 = vmax.f32 %v3729_v2, 0.0 }
 0x22c   : > { %v3760_v40 = vmax.f32 %v3728_v17, 0.0 }
 0x22d   : > { %3793 = vst [vmem:[%s7451_s30 + $0xf8] sm:$0xff] %v3761_v58 }
 0x22e   : > { %3792 = vst [vmem:[%s7451_s30 + $0xf0] sm:$0xff] %v3760_v40 }
 0x22f PF: > { %s13_s14 = sadd.s32 1, %s5930_s14   ;;  %s7689_s12 = smov %s5926_s13 }
 0x230   : > { %p10_p5 = scmp.ge.s32.totalorder %s13_s14, 4   ;;  %s7690_s13 = smov %s7692_s15 }
 0x232   :  { %12 = sbr.rel (!%p10_p5) target bundleno = 2 (0x2), region = 78 }

// kernel: inception_forward.7
= control target key start
LH: loop header
LB: loop body
LE: loop exit
PB: predicated region body
PF: predicated region fallthrough
CT: control target
= control target key end

     0   :  { %s5963_s12 = smov 0   ;;  %s5965_s13 = smov 0   ;;  %s7496_s0 = inlined_call_operand.vmem [shape: f32[2,16,16,128], index: 0, kind: input, shape index: {}]   ;;  %s7497_s1 = inlined_call_operand.vmem [shape: f32[3,3,128,128], index: 1, kind: input, shape index: {}]   ;;  %s7498_s2 = inlined_call_operand.vmem [shape: f32[1,1,128], index: 2, kind: input, shape index: {}]   ;;  %s7499_s3 = inlined_call_operand.vmem [shape: f32[2,16,16,128], index: 3, kind: output, shape index: {}]  }
   0x1   :  { %s5967_s14 = smov 0  }
   0x2 LB: > { %s25_s15 = sadd.s32 1, %s5936_s13  ;;  %p3907_p0 = scmp.ge.s32.totalorder %s5940_s14, 1  ;;  %s5940_s14 = sphi %s5967_s14, %s13_s14   ;;  %s5936_s13 = sphi %s5965_s13, %s7656_s13   ;;  %s5932_s12 = sphi %s5963_s12, %s7655_s12  }
   0x3   : > { %p27_p1 = scmp.ge.s32.totalorder %s25_s15, 2  ;;  %p151_p2 = scmp.lt.s32.totalorder %s5940_s14, 3 }
   0x5   : > { %s7658_s15 = smov (%p27_p1, %s25_s15), 0  ;;  %p152_p3 = pnand %p3907_p0, %p151_p2 }
   0x7   : > { %155 = sbr.rel (%p152_p3) target bundleno = 561 (0x231), region = 32 }
   0xe   : > { %v3912_v0 = vld [vmem:[%s7497_s1 + $0x80] sm:$0xff]  ;;  %v3913_v1 = vld [vmem:[%s7497_s1 + $0x88] sm:$0xff]  ;;  %vm463_vm0 = vcmask 1044480   ;;  %p180_p4 = scmp.lt.s32.totalorder %s5932_s12, 1  ;;  %v3914_v5 = vld [vmem:[%s7497_s1 + $0x90] sm:$0xff]  ;;  %v5942_v7 = vmov 0.0  }
   0xf   : > { %v5992_v2 = vld [vmem:[%s7497_s1 + $0x200] sm:$0xff]  ;;  %v5995_v3 = vpack.c.bf16 %v3913_v1, %v3912_v0  ;;  %v4009_v4 = vld [vmem:[%s7497_s1 + $0x208] sm:$0xff]  ;;  %v3915_v6 = vld [vmem:[%s7497_s1 + $0x98] sm:$0xff]  ;;  %200 = vst [vmem:[#allocation2] sm:$0xff] %v5942_v7  ;;  %v6006_v8 = vrot.slane %v5942_v7, 3  ;;  %vm1043_vm1 = vcmask 1041408  }
  0x10   : > { %202 = vst [vmem:[#allocation2 + $0x10] sm:$0x3f] %v5942_v7  ;;  %205 = vst [vmem:[#allocation2 + $0x28] sm:$0x3f] %v5942_v7  ;;  %v6009_v9 = vpack.c.bf16 %v4009_v4, %v5992_v2  ;;  %v5297_v10 = vpack.c.bf16 %v3915_v6, %v3914_v5  ;;  %v4010_v11 = vld [vmem:[%s7497_s1 + $0x210] sm:$0xff]  ;;  %v4011_v12 = vld [vmem:[%s7497_s1 + $0x218] sm:$0xff] }
  0x11   : > { %208 = vst [vmem:[#allocation2 + $0x40] sm:$0x3f] %v5942_v7  ;;  %209 = vst [vmem:[#allocation2 + $0x48] sm:$0xff] %v5942_v7  ;;  %v3916_v13 = vld [vmem:[%s7497_s1 + $0xa0] sm:$0xff]  ;;  %s7660_s12 = smov (!%p180_p4, %s5932_s12), 1  ;;  %5294 = vmatprep.subr.bf16.mxu1 %v5995_v3  ;;  %v6026_v14 = vpack.c.bf16 %v4011_v12, %v4010_v11  ;;  %v3917_v15 = vld [vmem:[%s7497_s1 + $0xa8] sm:$0xff]  ;;  %4605 = vmatprep.mubr.f32.mxu1 %v6006_v8 }
  0x12   : > { %210 = vst [vmem:[#allocation2 + $0x50] sm:$0xff] %v5942_v7  ;;  %211 = vst [vmem:[#allocation2 + $0x58] sm:$0x3f] %v5942_v7  ;;  %v4012_v16 = vld [vmem:[%s7497_s1 + $0x220] sm:$0xff]  ;;  %v4013_v17 = vld [vmem:[%s7497_s1 + $0x228] sm:$0xff]  ;;  %5422 = vmatprep.subr.bf16.mxu0 %v6009_v9  ;;  %5296 = vmatpush3.bf16.msra.mxu1 %v5995_v3  ;;  %s4139_s17 = sshll.u32 %s7660_s12, 8  ;;  %v5301_v18 = vpack.c.bf16 %v3917_v15, %v3916_v13 }
  0x13   : > { %212 = vst [vmem:[#allocation2 + $0x60] sm:$0xff] %v5942_v7  ;;  %213 = vst [vmem:[#allocation2 + $0x68] sm:$0xff] %v5942_v7  ;;  %5424 = vmatpush3.bf16.msra.mxu0 %v6009_v9  ;;  %5298 = vmatprep.subr.bf16.mxu1 %v5297_v10  ;;  %v6042_v19 = vpack.c.bf16 %v4013_v17, %v4012_v16  ;;  %v3918_v20 = vld [vmem:[%s7497_s1 + $0xb0] sm:$0xff]  ;;  %v3919_v21 = vld [vmem:[%s7497_s1 + $0xb8] sm:$0xff]  ;;  %s6062_s28 = scalar_lea.vmem %s7496_s0, %s4139_s17  ;;  %s7418_s29 = scalar_lea.vmem %s7499_s3, %s4139_s17 }
  0x14   : > { %214 = vst [vmem:[#allocation2 + $0x70] sm:$0x3f] %v5942_v7  ;;  %215 = vst [vmem:[#allocation2 + $0x78] sm:$0xff] %v5942_v7  ;;  %5426 = vmatprep.subr.bf16.mxu0 %v6026_v14  ;;  %v4014_v22 = vld [vmem:[%s7497_s1 + $0x230] sm:$0xff]  ;;  %v4015_v23 = vld [vmem:[%s7497_s1 + $0x238] sm:$0xff]  ;;  %v5305_v24 = vpack.c.bf16 %v3919_v21, %v3918_v20 }
  0x15   : > { %216 = vst [vmem:[#allocation2 + $0x80] sm:$0xff] %v5942_v7  ;;  %217 = vst [vmem:[#allocation2 + $0x88] sm:$0x3f] %v5942_v7  ;;  %v6066_v25 = vpack.c.bf16 %v4015_v23, %v4014_v22  ;;  %v3920_v26 = vld [vmem:[%s7497_s1 + $0xc0] sm:$0xff]  ;;  %v3921_v27 = vld [vmem:[%s7497_s1 + $0xc8] sm:$0xff] }
  0x16   : > { %218 = vst [vmem:[#allocation2 + $0x90] sm:$0xff] %v5942_v7  ;;  %219 = vst [vmem:[#allocation2 + $0x98] sm:$0xff] %v5942_v7  ;;  %5300 = vmatpush3.bf16.msra.mxu1 %v5297_v10  ;;  %v266_v28 = vld [vmem:[%s6062_s28] sm:$0xff]  ;;  %v4017_v30 = vld [vmem:[%s7497_s1 + $0x248] sm:$0xff]  ;;  %v5309_v32 = vpack.c.bf16 %v3921_v27, %v3920_v26 }
  0x17   : > { %220 = vst [vmem:[#allocation2 + $0xa0] sm:$0x3f] %v5942_v7  ;;  %221 = vst [vmem:[#allocation2 + $0xa8] sm:$0xff] %v5942_v7  ;;  %5428 = vmatpush3.bf16.msra.mxu0 %v6026_v14  ;;  %5302 = vmatprep.subr.bf16.mxu1 %v5301_v18  ;;  %v4016_v29 = vld [vmem:[%s7497_s1 + $0x240] sm:$0xff]  ;;  %v267_v31 = vld [vmem:[%s6062_s28 + $0x8] sm:$0xff] }
  0x18   : > { %222 = vst [vmem:[#allocation2 + $0xb0] sm:$0xff] %v5942_v7  ;;  %223 = vst [vmem:[#allocation2 + $0xb8] sm:$0x3f] %v5942_v7  ;;  %5430 = vmatprep.subr.bf16.mxu0 %v6042_v19  ;;  %v268_v33 = vld [vmem:[%s6062_s28 + $0x10] sm:$0xff]  ;;  %v269_v34 = vld [vmem:[%s6062_s28 + $0x18] sm:$0xff]  ;;  %v6086_v35 = vpack.c.bf16 %v4017_v30, %v4016_v29 }
  0x19   : > { %224 = vst [vmem:[#allocation2 + $0xc0] sm:$0xff] %v5942_v7  ;;  %225 = vst [vmem:[#allocation2 + $0xc8] sm:$0xff] %v5942_v7  ;;  %v3922_v36 = vld [vmem:[%s7497_s1 + $0xd0] sm:$0xff]  ;;  %v3923_v37 = vld [vmem:[%s7497_s1 + $0xd8] sm:$0xff] }
  0x1a   : > { %226 = vst [vmem:[#allocation2 + $0xd0] sm:$0x3f] %v5942_v7  ;;  %227 = vst [vmem:[#allocation2 + $0xd8] sm:$0xff] %v5942_v7  ;;  %5304 = vmatpush3.bf16.msra.mxu1 %v5301_v18  ;;  %v270_v38 = vld [vmem:[%s6062_s28 + $0x20] sm:$0xff]  ;;  %v4018_v39 = vld [vmem:[%s7497_s1 + $0x250] sm:$0xff]  ;;  %v5313_v42 = vpack.c.bf16 %v3923_v37, %v3922_v36 }
  0x1b   : > { %228 = vst [vmem:[#allocation2 + $0xe0] sm:$0xff] %v5942_v7  ;;  %229 = vst [vmem:[#allocation2 + $0xe8] sm:$0x3f] %v5942_v7  ;;  %5432 = vmatpush3.bf16.msra.mxu0 %v6042_v19  ;;  %5306 = vmatprep.subr.bf16.mxu1 %v5305_v24  ;;  %v4019_v40 = vld [vmem:[%s7497_s1 + $0x258] sm:$0xff]  ;;  %v271_v41 = vld [vmem:[%s6062_s28 + $0x28] sm:$0xff] }
  0x1c   : > { %230 = vst [vmem:[#allocation2 + $0xf0] sm:$0xff] %v5942_v7  ;;  %231 = vst [vmem:[#allocation2 + $0xf8] sm:$0xff] %v5942_v7  ;;  %5434 = vmatprep.subr.bf16.mxu0 %v6066_v25  ;;  %v3924_v43 = vld [vmem:[%s7497_s1 + $0xe0] sm:$0xff]  ;;  %v272_v44 = vld [vmem:[%s6062_s28 + $0x30] sm:$0xff]  ;;  %v6109_v46 = vpack.c.bf16 %v4019_v40, %v4018_v39 }
  0x1d   : > { %232 = vst [vmem:[#allocation2 + $0x100] sm:$0x3f] %v5942_v7  ;;  %233 = vst [vmem:[#allocation2 + $0x108] sm:$0xff] %v5942_v7  ;;  %v273_v45 = vld [vmem:[%s6062_s28 + $0x38] sm:$0xff]  ;;  %v3925_v47 = vld [vmem:[%s7497_s1 + $0xe8] sm:$0xff] }
  0x1e   : > { %234 = vst [vmem:[#allocation2 + $0x110] sm:$0xff] %v5942_v7  ;;  %235 = vst [vmem:[#allocation2 + $0x118] sm:$0x3f] %v5942_v7  ;;  %5308 = vmatpush3.bf16.msra.mxu1 %v5305_v24  ;;  %v274_v49 = vld [vmem:[%s6062_s28 + $0x40] sm:$0xff]  ;;  %v4021_v51 = vld [vmem:[%s7497_s1 + $0x268] sm:$0xff]  ;;  %v5317_v56 = vpack.c.bf16 %v3925_v47, %v3924_v43 }
  0x1f   : > { %236 = vst [vmem:[#allocation2 + $0x120] sm:$0xff] %v5942_v7  ;;  %237 = vst [vmem:[#allocation2 + $0x128] sm:$0xff] %v5942_v7  ;;  %5436 = vmatpush3.bf16.msra.mxu0 %v6066_v25  ;;  %5310 = vmatprep.subr.bf16.mxu1 %v5309_v32  ;;  %v4020_v50 = vld [vmem:[%s7497_s1 + $0x260] sm:$0xff]  ;;  %v275_v55 = vld [vmem:[%s6062_s28 + $0x48] sm:$0xff] }
  0x20   : > { %238 = vst [vmem:[#allocation2 + $0x130] sm:$0x3f] %v5942_v7  ;;  %239 = vst [vmem:[#allocation2 + $0x138] sm:$0xff] %v5942_v7  ;;  %5438 = vmatprep.subr.bf16.mxu0 %v6086_v35  ;;  %v6132_v57 = vpack.c.bf16 %v4021_v51, %v4020_v50  ;;  %v3926_v58 = vld [vmem:[%s7497_s1 + $0xf0] sm:$0xff]  ;;  %v3927_v59 = vld [vmem:[%s7497_s1 + $0xf8] sm:$0xff] }
  0x21   : > { %240 = vst [vmem:[#allocation2 + $0x140] sm:$0xff] %v5942_v7  ;;  %241 = vst [vmem:[#allocation2 + $0x148] sm:$0x3f] %v5942_v7  ;;  %v4022_v61 = vld [vmem:[%s7497_s1 + $0x270] sm:$0xff]  ;;  %v4023_v62 = vld [vmem:[%s7497_s1 + $0x278] sm:$0xff]  ;;  %v5321_v0 = vpack.c.bf16 %v3927_v59, %v3926_v58 }
  0x22   : > { %242 = vst [vmem:[#allocation2 + $0x150] sm:$0xff] %v5942_v7  ;;  %243 = vst [vmem:[#allocation2 + $0x158] sm:$0xff] %v5942_v7  ;;  %5312 = vmatpush3.bf16.msra.mxu1 %v5309_v32  ;;  %v276_v63 = vld [vmem:[%s6062_s28 + $0x50] sm:$0xff]  ;;  %v382_v2 = vld [vmem:[%s7497_s1] sm:$0xff]  ;;  %v6157_v3 = vpack.c.bf16 %v4023_v62, %v4022_v61 }
  0x23   : > { %244 = vst [vmem:[#allocation2 + $0x160] sm:$0x3f] %v5942_v7  ;;  %245 = vst [vmem:[#allocation2 + $0x168] sm:$0xff] %v5942_v7  ;;  %5440 = vmatpush3.bf16.msra.mxu0 %v6086_v35  ;;  %5314 = vmatprep.subr.bf16.mxu1 %v5313_v42  ;;  %v336_v1 = vld [vmem:[#allocation2 + $0x10] sm:$0x3f]  ;;  %v383_v4 = vld [vmem:[%s7497_s1 + $0x8] sm:$0xff] }
  0x24   : > { %246 = vst [vmem:[#allocation2 + $0x170] sm:$0xff] %v5942_v7  ;;  %247 = vst [vmem:[#allocation2 + $0x178] sm:$0x3f] %v5942_v7  ;;  %5442 = vmatprep.subr.bf16.mxu0 %v6109_v46  ;;  %v277_v6 = vld [vmem:[%s6062_s28 + $0x58] sm:$0xff]  ;;  %v4025_v10 = vld [vmem:[%s7497_s1 + $0x288] sm:$0xff]  ;;  %v467_v12 = vrot.slane %v336_v1, 3  ;;  %v5325_v17 = vpack.c.bf16 %v383_v4, %v382_v2 }
  0x25   : > { %248 = vst [vmem:[#allocation2 + $0x180] sm:$0xff] %v5942_v7  ;;  %249 = vst [vmem:[#allocation2 + $0x188] sm:$0xff] %v5942_v7  ;;  %v278_v11 = vld [vmem:[%s6062_s28 + $0x60] sm:$0xff]  ;;  %v279_v16 = vld [vmem:[%s6062_s28 + $0x68] sm:$0xff] }
  0x26   : > { %250 = vst [vmem:[#allocation2 + $0x190] sm:$0x3f] %v5942_v7  ;;  %251 = vst [vmem:[#allocation2 + $0x198] sm:$0xff] %v5942_v7  ;;  %5316 = vmatpush3.bf16.msra.mxu1 %v5313_v42  ;;  %v339_v20 = vld [vmem:[#allocation2 + $0x28] sm:$0x3f]  ;;  %v4026_v21 = vld [vmem:[%s7497_s1 + $0x290] sm:$0xff]  ;;  %v468_v32 = vsel %vm463_vm0, %v6006_v8, %v467_v12 }
  0x27   : > { %252 = vst [vmem:[#allocation2 + $0x1a0] sm:$0xff] %v5942_v7  ;;  %253 = vst [vmem:[#allocation2 + $0x1a8] sm:$0x3f] %v5942_v7  ;;  %5444 = vmatpush3.bf16.msra.mxu0 %v6109_v46  ;;  %5318 = vmatprep.subr.bf16.mxu1 %v5317_v56  ;;  %v4027_v24 = vld [vmem:[%s7497_s1 + $0x298] sm:$0xff]  ;;  %v280_v26 = vld [vmem:[%s6062_s28 + $0x70] sm:$0xff] }
  0x28   : > { %254 = vst [vmem:[#allocation2 + $0x1b0] sm:$0xff] %v5942_v7  ;;  %255 = vst [vmem:[#allocation2 + $0x1b8] sm:$0xff] %v5942_v7  ;;  %5446 = vmatprep.subr.bf16.mxu0 %v6132_v57  ;;  %v385_v36 = vld [vmem:[%s7497_s1 + $0x18] sm:$0xff]  ;;  %v342_v39 = vld [vmem:[#allocation2 + $0x40] sm:$0x3f]  ;;  %v5457_v40 = vpack.c.bf16 %v4027_v24, %v4026_v21 }
  0x29   : > { %256 = vst [vmem:[#allocation2 + $0x1c0] sm:$0x3f] %v5942_v7  ;;  %259 = vst [vmem:[#allocation2 + $0x1d8] sm:$0x3f] %v5942_v7  ;;  %v387_v58 = vld [vmem:[%s7497_s1 + $0x28] sm:$0xff]  ;;  %v282_v1 = vld [vmem:[%s6062_s28 + $0x80] sm:$0xff] }
  0x2a   : > { %262 = vst [vmem:[#allocation2 + $0x1f0] sm:$0x3f] %v5942_v7  ;;  %265 = vst [vmem:[#allocation2 + $0x208] sm:$0x3f] %v5942_v7  ;;  %v4024_v7 = vld [vmem:[%s7497_s1 + $0x280] sm:$0xff]  ;;  %5320 = vmatpush3.bf16.msra.mxu1 %v5317_v56  ;;  %v284_v12 = vld [vmem:[%s6062_s28 + $0x90] sm:$0xff] }
  0x2b   : > { %7564 = vst [vmem:[#allocation3_spill] sm:$0xff] %v6026_v14  ;;  %7565 = vst [vmem:[#allocation4_spill] sm:$0xff] %v6042_v19  ;;  %5448 = vmatpush3.bf16.msra.mxu0 %v6132_v57  ;;  %5322 = vmatprep.subr.bf16.mxu1 %v5321_v0  ;;  %v5453_v22 = vpack.c.bf16 %v4025_v10, %v4024_v7  ;;  %v386_v56 = vld [vmem:[%s7497_s1 + $0x20] sm:$0xff]  ;;  %v388_v24 = vld [vmem:[%s7497_s1 + $0x30] sm:$0xff] }
  0x2c   : > { %7566 = vst [vmem:[#allocation5_spill] sm:$0xff] %v6066_v25  ;;  %299 = vst [vmem:[#allocation2 + $0x4b] sm:$0xff] %v266_v28  ;;  %5450 = vmatprep.subr.bf16.mxu0 %v6157_v3 }
  0x2d   : > { %300 = vst [vmem:[#allocation2 + $0x53] sm:$0xff] %v267_v31  ;;  %7567 = vst [vmem:[#allocation6_spill] sm:$0xff] %v6086_v35  ;;  %v281_v31 = vld [vmem:[%s6062_s28 + $0x78] sm:$0xff]  ;;  %v4094_v35 = vld [vmem:[%s7497_s1 + $0x330] sm:$0xff] }
  0x2e   : > { %301 = vst [vmem:[#allocation2 + $0x63] sm:$0xff] %v268_v33  ;;  %302 = vst [vmem:[#allocation2 + $0x6b] sm:$0xff] %v269_v34  ;;  %5324 = vmatpush3.bf16.msra.mxu1 %v5321_v0  ;;  %v472_v33 = vrot.slane %v339_v20, 3  ;;  %v384_v34 = vld [vmem:[%s7497_s1 + $0x10] sm:$0xff]  ;;  %v4031_v0 = vld [vmem:[%s7497_s1 + $0x2b8] sm:$0xff]  ;;  %v5333_v20 = vpack.c.bf16 %v387_v58, %v386_v56 }
  0x2f   : > { %303 = vst [vmem:[#allocation2 + $0x7b] sm:$0xff] %v270_v38  ;;  %304 = vst [vmem:[#allocation2 + $0x83] sm:$0xff] %v271_v41  ;;  %5452 = vmatpush3.bf16.msra.mxu0 %v6157_v3  ;;  %5326 = vmatprep.subr.bf16.mxu1 %v5325_v17  ;;  %v5329_v47 = vpack.c.bf16 %v385_v36, %v384_v34  ;;  %v4033_v34 = vld [vmem:[%s7497_s1 + $0x2c8] sm:$0xff]  ;;  %v286_v36 = vld [vmem:[%s6062_s28 + $0xa0] sm:$0xff] }
  0x30   : > { %7568 = vst [vmem:[#allocation7_spill] sm:$0xff] %v6109_v46  ;;  %305 = vst [vmem:[#allocation2 + $0x93] sm:$0xff] %v272_v44  ;;  %5454 = vmatprep.subr.bf16.mxu0 %v5453_v22  ;;  %v4028_v44 = vld [vmem:[%s7497_s1 + $0x2a0] sm:$0xff] }
  0x31   : > { %306 = vst [vmem:[#allocation2 + $0x9b] sm:$0xff] %v273_v45  ;;  %307 = vst [vmem:[#allocation2 + $0xab] sm:$0xff] %v274_v49  ;;  %4606 = vmatmul.mubr.f32.vlgmr.msra.gmra.mrb[0].mxu1 %v468_v32  ;;  %v4029_v49 = vld [vmem:[%s7497_s1 + $0x2a8] sm:$0xff]  ;;  %v390_v56 = vld [vmem:[%s7497_s1 + $0x40] sm:$0xff] }
  0x32   : > { %308 = vst [vmem:[#allocation2 + $0xb3] sm:$0xff] %v275_v55  ;;  %7569 = vst [vmem:[#allocation8_spill] sm:$0xff] %v6132_v57  ;;  %5328 = vmatpush3.bf16.msra.mxu1 %v5325_v17  ;;  %v477_v55 = vrot.slane %v342_v39, 3  ;;  %4608 = vmatprep.mubr.f32.mxu1 %v6006_v8  ;;  %v5461_v4 = vpack.c.bf16 %v4029_v49, %v4028_v44  ;;  %v288_v44 = vld [vmem:[%s6062_s28 + $0xb0] sm:$0xff]  ;;  %v289_v49 = vld [vmem:[%s6062_s28 + $0xb8] sm:$0xff] }
  0x33   : > { %v6114_v48 = vld [vmem:[#allocation2 + $0x48] sm:$0xff]  ;;  %309 = vst [vmem:[#allocation2 + $0xc3] sm:$0xff] %v276_v63  ;;  %7570 = vst [vmem:[#allocation9_spill] sm:$0xff] %v6157_v3  ;;  %v4030_v63 = vld [vmem:[%s7497_s1 + $0x2b0] sm:$0xff]  ;;  %5330 = vmatprep.subr.bf16.mxu1 %v5329_v47 }
  0x34   : > { %v6123_v52 = vld [vmem:[#allocation2 + $0x50] sm:$0xff]  ;;  %v1803_v53 = vrot.slane %v6114_v48, 3  ;;  %v6162_v5 = vld [vmem:[#allocation2 + $0x58] sm:$0x3f]  ;;  %310 = vst [vmem:[#allocation2 + $0xcb] sm:$0xff] %v277_v6  ;;  %311 = vst [vmem:[#allocation2 + $0xdb] sm:$0xff] %v278_v11  ;;  %v478_v21 = vsel %vm463_vm0, %v6006_v8, %v477_v55 }
  0x35   : > { %v6127_v54 = vrot.slane %v6123_v52, 3  ;;  %v6172_v13 = vld [vmem:[#allocation2 + $0x60] sm:$0xff]  ;;  %v6174_v15 = vld [vmem:[#allocation2 + $0x68] sm:$0xff]  ;;  %v1806_v18 = vrot.slane %v6162_v5, 3  ;;  %312 = vst [vmem:[#allocation2 + $0xe3] sm:$0xff] %v279_v16  ;;  %313 = vst [vmem:[#allocation2 + $0xf3] sm:$0xff] %v280_v26 }
  0x36   : > { %v6183_v23 = vld [vmem:[#allocation2 + $0x70] sm:$0x3f]  ;;  %v1808_v27 = vrot.slane %v6172_v13, 3  ;;  %v6191_v28 = vrot.slane %v6174_v15, 3  ;;  %v6193_v29 = vld [vmem:[#allocation2 + $0x78] sm:$0xff]  ;;  %v6195_v30 = vld [vmem:[#allocation2 + $0x80] sm:$0xff]  ;;  %5332 = vmatpush3.bf16.msra.mxu1 %v5329_v47 }
  0x37   : > { %v6142_v60 = vsel %vm463_vm0, %v1803_v53, %v6127_v54  ;;  %314 = vst [vmem:[#allocation2 + $0xfb] sm:$0xff] %v281_v31  ;;  %v1807_v37 = vsel %vm463_vm0, %v6127_v54, %v1806_v18  ;;  %v1811_v38 = vrot.slane %v6183_v23, 3  ;;  %v1813_v41 = vrot.slane %v6193_v29, 3  ;;  %v6214_v43 = vld [vmem:[#allocation2 + $0x88] sm:$0x3f]  ;;  %v6226_v50 = vld [vmem:[#allocation2 + $0x90] sm:$0xff]  ;;  %5334 = vmatprep.subr.bf16.mxu1 %v5333_v20 }
  0x38   : > { %4925 = vmatprep.mubr.f32.mxu0 %v6142_v60  ;;  %v6212_v42 = vrot.slane %v6195_v30, 3  ;;  %v6221_v45 = vsel %vm463_vm0, %v1808_v27, %v6191_v28  ;;  %v6228_v51 = vld [vmem:[#allocation2 + $0x98] sm:$0xff]  ;;  %v473_v53 = vsel %vm463_vm0, %v6006_v8, %v472_v33  ;;  %v1816_v61 = vrot.slane %v6214_v43, 3  ;;  %v6258_v10 = vld [vmem:[#allocation2 + $0xa0] sm:$0x3f]  ;;  %v283_v11 = vld [vmem:[%s6062_s28 + $0x88] sm:$0xff] }
  0x39   : > { %4926 = vmatmul.mubr.f32.vlgmr.msra.gmra.mrb[0].mxu0 %v1807_v37  ;;  %v1812_v59 = vsel %vm463_vm0, %v6191_v28, %v1811_v38  ;;  %v345_v62 = vld [vmem:[#allocation2 + $0x58] sm:$0x3f]  ;;  %v7500_v6 = vrot.slane %v6226_v50, 3  ;;  %v6256_v7 = vrot.slane %v6228_v51, 3  ;;  %315 = vst [vmem:[#allocation2 + $0x10b] sm:$0xff] %v282_v1  ;;  %4609 = vmatmul.mubr.f32.gmra.mrb[2].mxu1 %v473_v53  ;;  %v6262_v16 = vld [vmem:[#allocation2 + $0xa8] sm:$0xff]  ;;  %v5465_v38 = vpack.c.bf16 %v4031_v0, %v4030_v63 }
  0x3a   : > { %5456 = vmatpush3.bf16.msra.mxu0 %v5453_v22  ;;  %4928 = vmatprep.mubr.f32.mxu0 %v6221_v45  ;;  %v6252_v2 = vsel %vm463_vm0, %v1813_v41, %v6212_v42  ;;  %v6264_v17 = vld [vmem:[#allocation2 + $0xb0] sm:$0xff]  ;;  %316 = vst [vmem:[#allocation2 + $0x113] sm:$0xff] %v283_v11  ;;  %317 = vst [vmem:[#allocation2 + $0x123] sm:$0xff] %v284_v12  ;;  %v482_v22 = vrot.slane %v345_v62, 3  ;;  %v389_v26 = vld [vmem:[%s7497_s1 + $0x38] sm:$0xff]  ;;  %v1817_v31 = vsel %vm463_vm0, %v6212_v42, %v1816_v61 }
  0x3b   : > { %5458 = vmatprep.subr.bf16.mxu0 %v5457_v40  ;;  %v6266_v18 = vld [vmem:[#allocation2 + $0x70] sm:$0x3f]  ;;  %4611 = vmatprep.mubr.f32.mxu1 %v6006_v8  ;;  %v285_v27 = vld [vmem:[%s6062_s28 + $0x98] sm:$0xff]  ;;  %v1821_v8 = vrot.slane %v6258_v10, 3  ;;  %v4032_v33 = vld [vmem:[%s7497_s1 + $0x2c0] sm:$0xff]  ;;  %v6295_v37 = vsel %vm463_vm0, %v7500_v6, %v6256_v7  ;;  %v1823_v39 = vrot.slane %v6262_v16, 3  ;;  %v5337_v55 = vpack.c.bf16 %v389_v26, %v388_v24 }
  0x3c   : > { %v6282_v32 = vld [vmem:[#allocation2 + $0xb8] sm:$0x3f]  ;;  %318 = vst [vmem:[#allocation2 + $0x12b] sm:$0xff] %v285_v27  ;;  %v287_v41 = vld [vmem:[%s6062_s28 + $0xa8] sm:$0xff]  ;;  %319 = vst [vmem:[#allocation2 + $0x13b] sm:$0xff] %v286_v36  ;;  %v483_v58 = vsel %vm463_vm0, %v6127_v54, %v482_v22  ;;  %v5469_v11 = vpack.c.bf16 %v4033_v34, %v4032_v33  ;;  %5336 = vmatpush3.bf16.msra.mxu1 %v5333_v20  ;;  %v2190_v6 = vrot.slane %v6123_v52, 6 }
  0x3d   : > { %4929 = vmatmul.mubr.f32.gmra.mrb[2].mxu0 %v1812_v59  ;;  %4612 = vmatmul.mubr.f32.gmra.mrb[4].mxu1 %v478_v21  ;;  %v6304_v47 = vld [vmem:[#allocation2 + $0xc0] sm:$0xff]  ;;  %v6306_v53 = vld [vmem:[#allocation2 + $0xc8] sm:$0xff]  ;;  %320 = vst [vmem:[#allocation2 + $0x143] sm:$0xff] %v287_v41  ;;  %321 = vst [vmem:[#allocation2 + $0x153] sm:$0xff] %v288_v44  ;;  %v487_v59 = vrot.slane %v6266_v18, 3  ;;  %v1822_v0 = vsel %vm463_vm0, %v6256_v7, %v1821_v8  ;;  %v1826_v1 = vrot.slane %v6282_v32, 3 }
  0x3e   : > { %5460 = vmatpush3.bf16.msra.mxu0 %v5457_v40  ;;  %4931 = vmatprep.mubr.f32.mxu0 %v6252_v2  ;;  %v6299_v40 = vrot.slane %v6264_v17, 3  ;;  %322 = vst [vmem:[#allocation2 + $0x15b] sm:$0xff] %v289_v49  ;;  %v391_v61 = vld [vmem:[%s7497_s1 + $0x48] sm:$0xff]  ;;  %v290_v62 = vld [vmem:[%s6062_s28 + $0xc0] sm:$0xff]  ;;  %v1828_v12 = vrot.slane %v6304_v47, 3  ;;  %v4034_v22 = vld [vmem:[%s7497_s1 + $0x2d0] sm:$0xff] }
  0x3f   : > { %5462 = vmatprep.subr.bf16.mxu0 %v5461_v4  ;;  %4614 = vmatprep.mubr.f32.mxu1 %v6142_v60  ;;  %v291_v63 = vld [vmem:[%s6062_s28 + $0xc8] sm:$0xff]  ;;  %323 = vst [vmem:[#allocation2 + $0x16b] sm:$0xff] %v290_v62  ;;  %v6332_v21 = vld [vmem:[#allocation2 + $0xd0] sm:$0x3f]  ;;  %v4035_v24 = vld [vmem:[%s7497_s1 + $0x2d8] sm:$0xff]  ;;  %v5341_v20 = vpack.c.bf16 %v391_v61, %v390_v56  ;;  %v6464_v3 = vrot.slane %v6174_v15, 6 }
  0x40   : > { %7571 = vst [vmem:[#allocation10_spill] sm:$0xff] %v6299_v40  ;;  %v351_v60 = vld [vmem:[#allocation2 + $0x88] sm:$0x3f]  ;;  %324 = vst [vmem:[#allocation2 + $0x173] sm:$0xff] %v291_v63  ;;  %v6326_v54 = vsel %vm463_vm0, %v1823_v39, %v6299_v40  ;;  %v6340_v26 = vld [vmem:[#allocation2 + $0xd8] sm:$0xff]  ;;  %5338 = vmatprep.subr.bf16.mxu1 %v5337_v55  ;;  %v1827_v36 = vsel %vm463_vm0, %v6299_v40, %v1826_v1  ;;  %v5473_v41 = vpack.c.bf16 %v4035_v24, %v4034_v22 }
  0x41   : > { %4932 = vmatmul.mubr.f32.gmra.mrb[4].mxu0 %v1817_v31  ;;  %4615 = vmatmul.mubr.f32.gmra.mrb[6].mxu1 %v483_v58  ;;  %v6342_v27 = vld [vmem:[#allocation2 + $0xe0] sm:$0xff]  ;;  %v488_v31 = vsel %vm463_vm0, %v6191_v28, %v487_v59  ;;  %v492_v8 = vrot.slane %v351_v60, 3  ;;  %v392_v33 = vld [vmem:[%s7497_s1 + $0x50] sm:$0xff]  ;;  %v393_v34 = vld [vmem:[%s7497_s1 + $0x58] sm:$0xff]  ;;  %v1833_v44 = vrot.slane %v6340_v26, 3  ;;  %v2207_v46 = vrot.slane %v6258_v10, 6 }
  0x42   : > { %5464 = vmatpush3.bf16.msra.mxu0 %v5461_v4  ;;  %4934 = vmatprep.mubr.f32.mxu0 %v6295_v37  ;;  %v6330_v4 = vrot.slane %v6306_v53, 3  ;;  %v6357_v39 = vld [vmem:[#allocation2 + $0xa0] sm:$0x3f]  ;;  %v6365_v49 = vrot.slane %v6342_v27, 3  ;;  %v4037_v58 = vld [vmem:[%s7497_s1 + $0x2e8] sm:$0xff]  ;;  %v6375_v59 = vld [vmem:[#allocation2 + $0xf0] sm:$0xff]  ;;  %v5345_v62 = vpack.c.bf16 %v393_v34, %v392_v33 }
  0x43   : > { %5466 = vmatprep.subr.bf16.mxu0 %v5465_v38  ;;  %4617 = vmatprep.mubr.f32.mxu1 %v6221_v45  ;;  %v1831_v45 = vrot.slane %v6332_v21, 3  ;;  %v4036_v56 = vld [vmem:[%s7497_s1 + $0x2e0] sm:$0xff]  ;;  %v6377_v61 = vld [vmem:[#allocation2 + $0xf8] sm:$0xff]  ;;  %v493_v63 = vsel %vm463_vm0, %v6212_v42, %v492_v8  ;;  %v395_v1 = vld [vmem:[%s7497_s1 + $0x68] sm:$0xff]  ;;  %v1838_v24 = vrot.slane %v6375_v59, 3  ;;  %v6534_v10 = vrot.slane %v6264_v17, 6 }
  0x44   : > { %7572 = vst [vmem:[#allocation11_spill] sm:$0xff] %v6330_v4  ;;  %v6361_v28 = vsel %vm463_vm0, %v1828_v12, %v6330_v4  ;;  %7574 = vst [vmem:[#allocation13_spill] sm:$0xff] %v6365_v49  ;;  %5340 = vmatpush3.bf16.msra.mxu1 %v5337_v55  ;;  %v394_v55 = vld [vmem:[%s7497_s1 + $0x60] sm:$0xff]  ;;  %v6393_v12 = vld [vmem:[#allocation2 + $0xb8] sm:$0x3f]  ;;  %v6397_v42 = vsel %vm463_vm0, %v1833_v44, %v6365_v49  ;;  %v5477_v22 = vpack.c.bf16 %v4037_v58, %v4036_v56 }
  0x45   : > { %4935 = vmatmul.mubr.f32.gmra.mrb[6].mxu0 %v1822_v0  ;;  %7573 = vst [vmem:[#allocation12_spill] sm:$0xff] %v6361_v28  ;;  %4618 = vmatmul.mubr.f32.gmra.mrb[8].mxu1 %v488_v31  ;;  %v497_v0 = vrot.slane %v6357_v39, 3  ;;  %v1832_v60 = vsel %vm463_vm0, %v6330_v4, %v1831_v45  ;;  %7575 = vst [vmem:[#allocation14_spill] sm:$0xff] %v6397_v42  ;;  %v6403_v31 = vld [vmem:[#allocation2 + $0x100] sm:$0x3f]  ;;  %v4038_v8 = vld [vmem:[%s7497_s1 + $0x2f0] sm:$0xff] }
  0x46   : > { %5468 = vmatpush3.bf16.msra.mxu0 %v5465_v38  ;;  %4937 = vmatprep.mubr.f32.mxu0 %v6326_v54  ;;  %v6367_v38 = vld [vmem:[#allocation2 + $0xe8] sm:$0x3f]  ;;  %v4039_v33 = vld [vmem:[%s7497_s1 + $0x2f8] sm:$0xff]  ;;  %v6411_v34 = vld [vmem:[#allocation2 + $0xd0] sm:$0x3f]  ;;  %v502_v45 = vrot.slane %v6393_v12, 3 }
  0x47   : > { %5470 = vmatprep.subr.bf16.mxu0 %v5469_v11  ;;  %5342 = vmatprep.subr.bf16.mxu1 %v5341_v20  ;;  %v396_v44 = vld [vmem:[%s7497_s1 + $0x70] sm:$0xff]  ;;  %v397_v56 = vld [vmem:[%s7497_s1 + $0x78] sm:$0xff]  ;;  %v7583_v25 = vrot.slane %v6226_v50, 6  ;;  %v2212_v14 = vrot.slane %v6282_v32, 6 }
  0x48   : > { %4620 = vmatprep.mubr.f32.mxu1 %v6252_v2  ;;  %v1836_v2 = vrot.slane %v6367_v38, 3  ;;  %5344 = vmatpush3.bf16.msra.mxu1 %v5341_v20  ;;  %v498_v20 = vsel %vm463_vm0, %v6256_v7, %v497_v0  ;;  %v292_v58 = vld [vmem:[%s6062_s28 + $0xd0] sm:$0xff]  ;;  %v293_v7 = vld [vmem:[%s6062_s28 + $0xd8] sm:$0xff]  ;;  %v294_v0 = vld [vmem:[%s6062_s28 + $0xe0] sm:$0xff]  ;;  %v503_v52 = vsel %vm463_vm0, %v6299_v40, %v502_v45 }
  0x49   : > { %4938 = vmatmul.mubr.f32.gmra.mrb[8].mxu0 %v1827_v36  ;;  %4621 = vmatmul.mubr.f32.gmra.mrb[10].mxu1 %v493_v63  ;;  %v5349_v36 = vpack.c.bf16 %v395_v1, %v394_v55  ;;  %v1841_v63 = vrot.slane %v6403_v31, 3  ;;  %325 = vst [vmem:[#allocation2 + $0x183] sm:$0xff] %v292_v58  ;;  %v295_v55 = vld [vmem:[%s6062_s28 + $0xe8] sm:$0xff]  ;;  %326 = vst [vmem:[#allocation2 + $0x18b] sm:$0xff] %v293_v7  ;;  %v297_v58 = vld [vmem:[%s6062_s28 + $0xf8] sm:$0xff] }
  0x4a   : > { %5472 = vmatpush3.bf16.msra.mxu0 %v5469_v11  ;;  %4940 = vmatprep.mubr.f32.mxu0 %v6361_v28  ;;  %v6401_v11 = vrot.slane %v6377_v61, 3  ;;  %327 = vst [vmem:[#allocation2 + $0x19b] sm:$0xff] %v294_v0  ;;  %328 = vst [vmem:[#allocation2 + $0x1a3] sm:$0xff] %v295_v55  ;;  %v3929_v7 = vld [vmem:[%s7497_s1 + $0x108] sm:$0xff]  ;;  %v2194_v55 = vrot.slane %v6172_v13, 6 }
  0x4b   : > { %5474 = vmatprep.subr.bf16.mxu0 %v5473_v41  ;;  %5346 = vmatprep.subr.bf16.mxu1 %v5345_v62  ;;  %330 = vst [vmem:[#allocation2 + $0x1bb] sm:$0xff] %v297_v58 }
  0x4c   : > { %7576 = vst [vmem:[#allocation15_spill] sm:$0xff] %v6401_v11  ;;  %4623 = vmatprep.mubr.f32.mxu1 %v6295_v37  ;;  %v1837_v37 = vsel %vm463_vm0, %v6365_v49, %v1836_v2  ;;  %v6433_v1 = vsel %vm463_vm0, %v1838_v24, %v6401_v11  ;;  %v4088_v2 = vld [vmem:[%s7497_s1 + $0x300] sm:$0xff]  ;;  %5348 = vmatpush3.bf16.msra.mxu1 %v5345_v62  ;;  %v4089_v24 = vld [vmem:[%s7497_s1 + $0x308] sm:$0xff]  ;;  %v507_v62 = vrot.slane %v6411_v34, 3 }
  0x4d   : > { %4941 = vmatmul.mubr.f32.gmra.mrb[10].mxu0 %v1832_v60  ;;  %7577 = vst [vmem:[#allocation16_spill] sm:$0xff] %v6433_v1  ;;  %v5481_v60 = vpack.c.bf16 %v4039_v33, %v4038_v8  ;;  %4624 = vmatmul.mubr.f32.gmra.mrb[12].mxu1 %v498_v20  ;;  %v5353_v8 = vpack.c.bf16 %v397_v56, %v396_v44  ;;  %v296_v33 = vld [vmem:[%s6062_s28 + $0xf0] sm:$0xff]  ;;  %v3928_v20 = vld [vmem:[%s7497_s1 + $0x100] sm:$0xff]  ;;  %v2192_v44 = vrot.slane %v6162_v5, 6  ;;  %v6459_v56 = vld [vmem:[#allocation2 + $0xe8] sm:$0x3f] }
  0x4e   : > { %5476 = vmatpush3.bf16.msra.mxu0 %v5473_v41  ;;  %4943 = vmatprep.mubr.f32.mxu0 %v6397_v42  ;;  %v2189_v41 = vrot.slane %v6114_v48, 6  ;;  %329 = vst [vmem:[#allocation2 + $0x1b3] sm:$0xff] %v296_v33  ;;  %v1842_v45 = vsel %vm463_vm0, %v6401_v11, %v1841_v63  ;;  %v5485_v0 = vpack.c.bf16 %v4089_v24, %v4088_v2  ;;  %v4090_v5 = vld [vmem:[%s7497_s1 + $0x310] sm:$0xff]  ;;  %v2197_v24 = vrot.slane %v6183_v23, 6  ;;  %v6480_v33 = vld [vmem:[#allocation2 + $0x100] sm:$0x3f] }
  0x4f   : > { %5478 = vmatprep.subr.bf16.mxu0 %v5477_v22  ;;  %5350 = vmatprep.subr.bf16.mxu1 %v5349_v36  ;;  %v6472_v63 = vpack.c.bf16 %v3929_v7, %v3928_v20  ;;  %v2193_v2 = vsel %vm1043_vm1, %v2190_v6, %v2192_v44  ;;  %v6484_v58 = vsel %vm1043_vm1, %v2194_v55, %v6464_v3  ;;  %v2200_v20 = vrot.slane %v6195_v30, 6  ;;  %v6488_v7 = vld [vmem:[#allocation2 + $0x108] sm:$0xff] }
  0x50   : > { %4626 = vmatprep.mubr.f32.mxu1 %v6326_v54  ;;  %5352 = vmatpush3.bf16.msra.mxu1 %v5349_v36  ;;  %v512_v36 = vrot.slane %v6459_v56, 3  ;;  %v2202_v23 = vrot.slane %v6214_v43, 6  ;;  %v4093_v44 = vld [vmem:[%s7497_s1 + $0x328] sm:$0xff]  ;;  %v2198_v43 = vsel %vm1043_vm1, %v6464_v3, %v2197_v24 }
  0x51   : > { %4944 = vmatmul.mubr.f32.gmra.mrb[12].mxu0 %v1837_v37  ;;  %v2191_v37 = vsel %vm1043_vm1, %v2189_v41, %v2190_v6  ;;  %4627 = vmatmul.mubr.f32.gmra.mrb[14].mxu1 %v503_v52  ;;  %v508_v41 = vsel %vm463_vm0, %v6330_v4, %v507_v62  ;;  %v2199_v52 = vrot.slane %v6193_v29, 6  ;;  %v4092_v6 = vld [vmem:[%s7497_s1 + $0x320] sm:$0xff]  ;;  %v4099_v4 = vld [vmem:[%s7497_s1 + $0x358] sm:$0xff]  ;;  %v3988_v40 = vld [vmem:[#allocation2 + $0x1a8] sm:$0x3f] }
  0x52   : > { %5480 = vmatpush3.bf16.msra.mxu0 %v5477_v22  ;;  %4946 = vmatprep.mubr.f32.mxu0 %v6433_v1  ;;  %v4091_v22 = vld [vmem:[%s7497_s1 + $0x318] sm:$0xff]  ;;  %v5493_v57 = vpack.c.bf16 %v4093_v44, %v4092_v6  ;;  %v2203_v24 = vsel %vm1043_vm1, %v2200_v20, %v2202_v23 }
  0x53   : > { %5482 = vmatprep.subr.bf16.mxu0 %v5481_v60  ;;  %5354 = vmatprep.subr.bf16.mxu1 %v5353_v8  ;;  %v5489_v62 = vpack.c.bf16 %v4091_v22, %v4090_v5  ;;  %v6511_v5 = vld [vmem:[#allocation2 + $0x118] sm:$0x3f]  ;;  %v2201_v22 = vsel %vm1043_vm1, %v2199_v52, %v2200_v20  ;;  %v2209_v20 = vrot.slane %v6262_v16, 6 }
  0x54   : > { %4629 = vmatprep.mubr.f32.mxu1 %v6361_v28  ;;  %5356 = vmatpush3.bf16.msra.mxu1 %v5353_v8  ;;  %v517_v8 = vrot.slane %v6480_v33, 3  ;;  %7579 = vst [vmem:[#allocation18_spill] sm:$0xff] %v6511_v5  ;;  %v4095_v52 = vld [vmem:[%s7497_s1 + $0x338] sm:$0xff]  ;;  %v522_v6 = vrot.slane %v6511_v5, 3 }
  0x55   : > { %4947 = vmatmul.mubr.f32.gmra.mrb[14].mxu0 %v1842_v45  ;;  %4630 = vmatmul.mubr.f32.gmra.mrb[16].mxu1 %v508_v41  ;;  %v513_v45 = vsel %vm463_vm0, %v6365_v49, %v512_v36  ;;  %v2205_v36 = vrot.slane %v6228_v51, 6  ;;  %v2217_v49 = vrot.slane %v6332_v21, 6  ;;  %v6614_v21 = vrot.slane %v6342_v27, 6 }
  0x56   : > { %5484 = vmatpush3.bf16.msra.mxu0 %v5481_v60  ;;  %5005 = vmatprep.mubr.f32.mxu0 %v2191_v37  ;;  %v6490_v60 = vld [vmem:[#allocation2 + $0x110] sm:$0xff]  ;;  %v519_v37 = vrot.slane %v6488_v7, 3  ;;  %v518_v41 = vsel %vm463_vm0, %v6401_v11, %v517_v8  ;;  %v1067_v8 = vrot.slane %v6266_v18, 6  ;;  %v4096_v11 = vld [vmem:[%s7497_s1 + $0x340] sm:$0xff]  ;;  %v4097_v18 = vld [vmem:[%s7497_s1 + $0x348] sm:$0xff] }
  0x57   : > { %5486 = vmatprep.subr.bf16.mxu0 %v5485_v0  ;;  %5358 = vmatprep.subr.bf16.mxu1 %v6472_v63  ;;  %v6509_v55 = vrot.slane %v6490_v60, 3  ;;  %v6550_v19 = vsel %vm1043_vm1, %v7583_v25, %v2205_v36  ;;  %v2208_v32 = vsel %vm1043_vm1, %v2205_v36, %v2207_v46  ;;  %v6586_v46 = vld [vmem:[#allocation2 + $0x148] sm:$0x3f] }
  0x58   : > { %4632 = vmatprep.mubr.f32.mxu1 %v6397_v42  ;;  %v6565_v25 = vsel %vm1043_vm1, %v6464_v3, %v1067_v8  ;;  %v6580_v3 = vsel %vm1043_vm1, %v2209_v20, %v6534_v10  ;;  %7586 = vst [vmem:[#allocation24_spill] sm:$0xff] %v6586_v46  ;;  %v6590_v8 = vrot.slane %v6306_v53, 6  ;;  %v5501_v20 = vpack.c.bf16 %v4097_v18, %v4096_v11 }
  0x59   : > { %5006 = vmatmul.mubr.f32.vlgmr.msra.gmra.mrb[0].mxu0 %v2193_v2  ;;  %7578 = vst [vmem:[#allocation17_spill] sm:$0xff] %v6509_v55  ;;  %v6518_v2 = vld [vmem:[#allocation2 + $0x128] sm:$0xff]  ;;  %4633 = vmatmul.mubr.f32.gmra.mrb[18].mxu1 %v513_v45  ;;  %v6538_v23 = vsel %vm463_vm0, %v519_v37, %v6509_v55  ;;  %v5497_v37 = vpack.c.bf16 %v4095_v52, %v4094_v35  ;;  %v1077_v52 = vrot.slane %v6357_v39, 6  ;;  %v2214_v39 = vrot.slane %v6304_v47, 6 }
  0x5a   : > { %5488 = vmatpush3.bf16.msra.mxu0 %v5485_v0  ;;  %5008 = vmatprep.mubr.f32.mxu0 %v6484_v58  ;;  %v6516_v0 = vld [vmem:[#allocation2 + $0x120] sm:$0xff]  ;;  %7580 = vst [vmem:[#allocation19_spill] sm:$0xff] %v6538_v23  ;;  %v6542_v45 = vrot.slane %v6518_v2, 3  ;;  %v523_v35 = vsel %vm463_vm0, %v6509_v55, %v522_v6  ;;  %v6592_v55 = vld [vmem:[#allocation2 + $0x150] sm:$0xff]  ;;  %v2219_v42 = vrot.slane %v6340_v26, 6 }
  0x5b   : > { %5490 = vmatprep.subr.bf16.mxu0 %v5489_v62  ;;  %4635 = vmatprep.mubr.f32.mxu1 %v6433_v1  ;;  %v524_v44 = vrot.slane %v6516_v0, 3  ;;  %v534_v18 = vrot.slane %v6592_v55, 3 }
  0x5c   : > { %7581 = vst [vmem:[#allocation20_spill] sm:$0xff] %v6542_v45 }
  0x5d   : > { %5009 = vmatmul.mubr.f32.gmra.mrb[2].mxu0 %v2198_v43  ;;  %v6544_v43 = vld [vmem:[#allocation2 + $0x130] sm:$0x3f]  ;;  %4636 = vmatmul.mubr.f32.gmra.mrb[20].mxu1 %v518_v41  ;;  %v6576_v1 = vsel %vm463_vm0, %v524_v44, %v6542_v45  ;;  %v6594_v44 = vld [vmem:[#allocation2 + $0x158] sm:$0xff] }
  0x5e   : > { %5011 = vmatprep.mubr.f32.mxu0 %v2201_v22  ;;  %5492 = vmatpush3.bf16.msra.mxu0 %v5489_v62  ;;  %7582 = vst [vmem:[#allocation21_spill] sm:$0xff] %v6544_v43  ;;  %v6552_v62 = vld [vmem:[#allocation2 + $0x138] sm:$0xff]  ;;  %v6554_v22 = vld [vmem:[#allocation2 + $0x140] sm:$0xff]  ;;  %v527_v41 = vrot.slane %v6544_v43, 3  ;;  %7584 = vst [vmem:[#allocation22_spill] sm:$0xff] %v6576_v1 }
  0x5f   : > { %5494 = vmatprep.subr.bf16.mxu0 %v5493_v57  ;;  %4638 = vmatprep.mubr.f32.mxu1 %v6538_v23  ;;  %v6584_v6 = vrot.slane %v6554_v22, 3  ;;  %v2213_v23 = vsel %vm1043_vm1, %v6534_v10, %v2212_v14  ;;  %v4098_v43 = vld [vmem:[%s7497_s1 + $0x350] sm:$0xff]  ;;  %v532_v14 = vrot.slane %v6586_v46, 3  ;;  %v4100_v46 = vld [vmem:[%s7497_s1 + $0x360] sm:$0xff] }
  0x60   : > { %v528_v11 = vsel %vm463_vm0, %v6542_v45, %v527_v41  ;;  %v6629_v41 = vsel %vm1043_vm1, %v2214_v39, %v6590_v8  ;;  %v6633_v45 = vld [vmem:[#allocation2 + $0x170] sm:$0xff] }
  0x61   : > { %5012 = vmatmul.mubr.f32.gmra.mrb[4].mxu0 %v2203_v24  ;;  %v529_v24 = vrot.slane %v6552_v62, 3  ;;  %7585 = vst [vmem:[#allocation23_spill] sm:$0xff] %v6584_v6  ;;  %4639 = vmatmul.mubr.f32.gmra.mrb[22].mxu1 %v523_v35  ;;  %v6623_v35 = vrot.slane %v6594_v44, 3  ;;  %v533_v39 = vsel %vm463_vm0, %v6584_v6, %v532_v14  ;;  %v6661_v14 = vld [vmem:[#allocation2 + $0x178] sm:$0x3f] }
  0x62   : > { %5014 = vmatprep.mubr.f32.mxu0 %v6550_v19  ;;  %5496 = vmatpush3.bf16.msra.mxu0 %v5493_v57  ;;  %v6597_v57 = vsel %vm1043_vm1, %v2205_v36, %v1077_v52  ;;  %v6631_v52 = vld [vmem:[#allocation2 + $0x168] sm:$0xff]  ;;  %7592 = vst [vmem:[#allocation30_spill] sm:$0xff] %v6661_v14  ;;  %v542_v28 = vrot.slane %v6661_v14, 3 }
  0x63   : > { %5498 = vmatprep.subr.bf16.mxu0 %v5497_v37  ;;  %4641 = vmatprep.mubr.f32.mxu1 %v6576_v1  ;;  %v6619_v36 = vsel %vm463_vm0, %v529_v24, %v6584_v6  ;;  %7588 = vst [vmem:[#allocation26_spill] sm:$0xff] %v6623_v35  ;;  %v5505_v1 = vpack.c.bf16 %v4099_v4, %v4098_v43  ;;  %v2222_v24 = vrot.slane %v6367_v38, 6  ;;  %v6665_v6 = vrot.slane %v6377_v61, 6 }
  0x64   : > { %7587 = vst [vmem:[#allocation25_spill] sm:$0xff] %v6619_v36  ;;  %v2218_v4 = vsel %vm1043_vm1, %v6590_v8, %v2217_v49  ;;  %v6651_v38 = vsel %vm463_vm0, %v534_v18, %v6623_v35  ;;  %v2224_v49 = vrot.slane %v6375_v59, 6 }
  0x65   : > { %5015 = vmatmul.mubr.f32.gmra.mrb[6].mxu0 %v2208_v32  ;;  %v6625_v32 = vld [vmem:[#allocation2 + $0x160] sm:$0x3f]  ;;  %4642 = vmatmul.mubr.f32.gmra.mrb[24].mxu1 %v528_v11  ;;  %7590 = vst [vmem:[#allocation28_spill] sm:$0xff] %v6651_v38  ;;  %v6655_v11 = vsel %vm1043_vm1, %v2219_v42, %v6614_v21  ;;  %7593 = vst [vmem:[#allocation31_spill] sm:$0xff] %v6665_v6  ;;  %v4102_v42 = vld [vmem:[%s7497_s1 + $0x370] sm:$0xff] }
  0x66   : > { %5017 = vmatprep.mubr.f32.mxu0 %v6580_v3  ;;  %7589 = vst [vmem:[#allocation27_spill] sm:$0xff] %v6625_v32  ;;  %5500 = vmatpush3.bf16.msra.mxu0 %v5497_v37  ;;  %v4101_v37 = vld [vmem:[%s7497_s1 + $0x368] sm:$0xff]  ;;  %v537_v43 = vrot.slane %v6625_v32, 3  ;;  %v4103_v32 = vld [vmem:[%s7497_s1 + $0x378] sm:$0xff] }
  0x67   : > { %5502 = vmatprep.subr.bf16.mxu0 %v5501_v20  ;;  %4644 = vmatprep.mubr.f32.mxu1 %v6619_v36  ;;  %v6659_v36 = vrot.slane %v6633_v45, 3  ;;  %v5509_v18 = vpack.c.bf16 %v4101_v37, %v4100_v46  ;;  %v2223_v46 = vsel %vm1043_vm1, %v6614_v21, %v2222_v24  ;;  %v5513_v14 = vpack.c.bf16 %v4103_v32, %v4102_v42  ;;  %v4104_v24 = vld [vmem:[%s7497_s1 + $0x380] sm:$0xff] }
  0x68   : > { %v2234_v42 = vrot.slane %v6516_v0, 6 }
  0x69   : > { %5018 = vmatmul.mubr.f32.gmra.mrb[8].mxu0 %v2213_v23  ;;  %v539_v23 = vrot.slane %v6631_v52, 3  ;;  %7591 = vst [vmem:[#allocation29_spill] sm:$0xff] %v6659_v36  ;;  %4645 = vmatmul.mubr.f32.gmra.mrb[26].mxu1 %v533_v39  ;;  %v2227_v39 = vrot.slane %v6403_v31, 6  ;;  %v4105_v31 = vld [vmem:[%s7497_s1 + $0x388] sm:$0xff] }
  0x6a   : > { %5020 = vmatprep.mubr.f32.mxu0 %v6629_v41  ;;  %5504 = vmatpush3.bf16.msra.mxu0 %v5501_v20  ;;  %v538_v20 = vsel %vm463_vm0, %v6623_v35, %v537_v43  ;;  %v2229_v43 = vrot.slane %v6488_v7, 6  ;;  %v6691_v35 = vrot.slane %v6490_v60, 6 }
  0x6b   : > { %5506 = vmatprep.subr.bf16.mxu0 %v5505_v1  ;;  %4647 = vmatprep.mubr.f32.mxu1 %v6651_v38  ;;  %v6682_v37 = vsel %vm463_vm0, %v539_v23, %v6659_v36  ;;  %v3970_v38 = vld [vmem:[#allocation2 + $0x118] sm:$0x3f]  ;;  %v2228_v32 = vsel %vm1043_vm1, %v6665_v6, %v2227_v39 }
  0x6c   : > { %7594 = vst [vmem:[#allocation32_spill] sm:$0xff] %v6682_v37  ;;  %7596 = vst [vmem:[#allocation34_spill] sm:$0xff] %v6691_v35  ;;  %v2232_v23 = vrot.slane %v3970_v38, 6  ;;  %v3931_v38 = vld [vmem:[%s7497_s1 + $0x118] sm:$0xff] }
  0x6d   : > { %5021 = vmatmul.mubr.f32.gmra.mrb[10].mxu0 %v2218_v4  ;;  %v6687_v4 = vsel %vm1043_vm1, %v2224_v49, %v6665_v6  ;;  %4648 = vmatmul.mubr.f32.gmra.mrb[28].mxu1 %v538_v20  ;;  %v6707_v49 = vsel %vm1043_vm1, %v2229_v43, %v6691_v35  ;;  %v6711_v20 = vrot.slane %v6518_v2, 6  ;;  %v3985_v6 = vld [vmem:[#allocation2 + $0x190] sm:$0x3f] }
  0x6e   : > { %5023 = vmatprep.mubr.f32.mxu0 %v6655_v11  ;;  %5508 = vmatpush3.bf16.msra.mxu0 %v5505_v1  ;;  %7595 = vst [vmem:[#allocation33_spill] sm:$0xff] %v6687_v4  ;;  %v543_v1 = vsel %vm463_vm0, %v6659_v36, %v542_v28  ;;  %7597 = vst [vmem:[#allocation35_spill] sm:$0xff] %v6707_v49  ;;  %v3930_v28 = vld [vmem:[%s7497_s1 + $0x110] sm:$0xff]  ;;  %v2233_v39 = vsel %vm1043_vm1, %v6691_v35, %v2232_v23  ;;  %v3976_v36 = vld [vmem:[#allocation2 + $0x148] sm:$0x3f]  ;;  %v6754_v35 = vrot.slane %v6594_v44, 6 }
  0x6f   : > { %5510 = vmatprep.subr.bf16.mxu0 %v5509_v18  ;;  %4650 = vmatprep.mubr.f32.mxu1 %v6682_v37  ;;  %7598 = vst [vmem:[#allocation36_spill] sm:$0xff] %v6711_v20  ;;  %v6713_v37 = vpack.c.bf16 %v4105_v31, %v4104_v24  ;;  %v6729_v24 = vsel %vm1043_vm1, %v2234_v42, %v6711_v20  ;;  %v2239_v31 = vrot.slane %v6552_v62, 6  ;;  %v3932_v23 = vld [vmem:[%s7497_s1 + $0x120] sm:$0xff] }
  0x70   : > { %7599 = vst [vmem:[#allocation37_spill] sm:$0xff] %v6729_v24  ;;  %7602 = vst [vmem:[#allocation40_spill] sm:$0xff] %v6754_v35 }
  0x71   : > { %5024 = vmatmul.mubr.f32.gmra.mrb[12].mxu0 %v2223_v46  ;;  %v3973_v46 = vld [vmem:[#allocation2 + $0x130] sm:$0x3f]  ;;  %4651 = vmatmul.mubr.f32.gmra.mrb[30].mxu1 %v543_v1  ;;  %v6733_v1 = vrot.slane %v6554_v22, 6 }
  0x72   : > { %5026 = vmatprep.mubr.f32.mxu0 %v6687_v4  ;;  %5512 = vmatpush3.bf16.msra.mxu0 %v5509_v18  ;;  %v6721_v18 = vld [vmem:[#allocation2] sm:$0xff]  ;;  %v2237_v43 = vrot.slane %v3973_v46, 6  ;;  %v2242_v46 = vrot.slane %v3976_v36, 6  ;;  %v3935_v36 = vld [vmem:[%s7497_s1 + $0x138] sm:$0xff] }
  0x73   : > { %5514 = vmatprep.subr.bf16.mxu0 %v5513_v14  ;;  %4685 = vmatprep.mubr.f32.mxu1 %v6721_v18  ;;  %7600 = vst [vmem:[#allocation38_spill] sm:$0xff] %v6733_v1 }
  0x74   : > { %v2238_v42 = vsel %vm1043_vm1, %v6711_v20, %v2237_v43  ;;  %v2243_v43 = vsel %vm1043_vm1, %v6733_v1, %v2242_v46  ;;  %v6773_v20 = vrot.slane %v6633_v45, 6  ;;  %v6781_v46 = vld [vmem:[#allocation2 + $0x188] sm:$0xff] }
  0x75   : > { %5027 = vmatmul.mubr.f32.gmra.mrb[14].mxu0 %v2228_v32  ;;  %v5361_v32 = vpack.c.bf16 %v3931_v38, %v3930_v28  ;;  %4686 = vmatmul.mubr.f32.vlgmr.msra.gmra.mrb[0].mxu1 %v6721_v18  ;;  %v6750_v28 = vsel %vm1043_vm1, %v2239_v31, %v6733_v1  ;;  %v2244_v38 = vrot.slane %v6592_v55, 6  ;;  %v6796_v5 = vrot.slane %v6781_v46, 6 }
  0x76   : > { %5029 = vmatprep.mubr.f32.mxu0 %v6707_v49  ;;  %5516 = vmatpush3.bf16.msra.mxu0 %v5513_v14  ;;  %v3933_v14 = vld [vmem:[%s7497_s1 + $0x128] sm:$0xff]  ;;  %7601 = vst [vmem:[#allocation39_spill] sm:$0xff] %v6750_v28  ;;  %7604 = vst [vmem:[#allocation42_spill] sm:$0xff] %v6773_v20 }
  0x77   : > { %5518 = vmatprep.subr.bf16.mxu0 %v6713_v37  ;;  %5360 = vmatpush3.bf16.msra.mxu1 %v6472_v63  ;;  %v5365_v63 = vpack.c.bf16 %v3933_v14, %v3932_v23  ;;  %v6769_v23 = vsel %vm1043_vm1, %v2244_v38, %v6754_v35  ;;  %v2249_v14 = vrot.slane %v6631_v52, 6  ;;  %v3937_v38 = vld [vmem:[%s7497_s1 + $0x148] sm:$0xff] }
  0x78   : > { %4688 = vmatprep.mubr.f32.mxu1 %v6721_v18  ;;  %5362 = vmatprep.subr.bf16.mxu1 %v5361_v32  ;;  %7603 = vst [vmem:[#allocation41_spill] sm:$0xff] %v6769_v23 }
  0x79   : > { %5030 = vmatmul.mubr.f32.gmra.mrb[16].mxu0 %v2233_v39  ;;  %v3979_v39 = vld [vmem:[#allocation2 + $0x160] sm:$0x3f]  ;;  %4689 = vmatmul.mubr.f32.gmra.mrb[2].mxu1 %v6721_v18 }
  0x7a   : > { %5032 = vmatprep.mubr.f32.mxu0 %v6729_v24  ;;  %v3934_v24 = vld [vmem:[%s7497_s1 + $0x130] sm:$0xff]  ;;  %4691 = vmatprep.mubr.f32.mxu1 %v6721_v18  ;;  %v2247_v31 = vrot.slane %v3979_v39, 6 }
  0x7b   : > { %5364 = vmatpush3.bf16.msra.mxu1 %v5361_v32  ;;  %v5369_v49 = vpack.c.bf16 %v3935_v36, %v3934_v24  ;;  %v6779_v32 = vld [vmem:[#allocation2 + $0x180] sm:$0xff]  ;;  %v6792_v36 = vsel %vm1043_vm1, %v2249_v14, %v6773_v20  ;;  %v3939_v14 = vld [vmem:[%s7497_s1 + $0x158] sm:$0xff] }
  0x7c   : > { %5366 = vmatprep.subr.bf16.mxu1 %v5365_v63  ;;  %v2248_v24 = vsel %vm1043_vm1, %v6754_v35, %v2247_v31  ;;  %7605 = vst [vmem:[#allocation43_spill] sm:$0xff] %v6792_v36  ;;  %v2254_v1 = vrot.slane %v6779_v32, 6  ;;  %v6806_v31 = vld [vmem:[#allocation2 + $0x1a0] sm:$0xff] }
  0x7d   : > { %5033 = vmatmul.mubr.f32.gmra.mrb[18].mxu0 %v2238_v42  ;;  %v3982_v42 = vld [vmem:[#allocation2 + $0x178] sm:$0x3f]  ;;  %4692 = vmatmul.mubr.f32.gmra.mrb[4].mxu1 %v6721_v18  ;;  %v6821_v4 = vrot.slane %v6806_v31, 6 }
  0x7e   : > { %5035 = vmatprep.mubr.f32.mxu0 %v6750_v28  ;;  %v3936_v28 = vld [vmem:[%s7497_s1 + $0x140] sm:$0xff]  ;;  %4694 = vmatprep.mubr.f32.mxu1 %v6114_v48  ;;  %v2252_v39 = vrot.slane %v3982_v42, 6  ;;  %v3938_v48 = vld [vmem:[%s7497_s1 + $0x150] sm:$0xff]  ;;  %v2257_v42 = vrot.slane %v3985_v6, 6 }
  0x7f   : > { %5368 = vmatpush3.bf16.msra.mxu1 %v5365_v63  ;;  %v6804_v63 = vld [vmem:[#allocation2 + $0x198] sm:$0xff]  ;;  %v6827_v6 = vld [vmem:[#allocation2 + $0x1b0] sm:$0xff] }
  0x80   : > { %5370 = vmatprep.subr.bf16.mxu1 %v5369_v49  ;;  %v2259_v35 = vrot.slane %v6804_v63, 6 }
  0x81   : > { %5036 = vmatmul.mubr.f32.gmra.mrb[20].mxu0 %v2243_v43  ;;  %v5373_v43 = vpack.c.bf16 %v3937_v38, %v3936_v28  ;;  %v2253_v28 = vsel %vm1043_vm1, %v6773_v20, %v2252_v39  ;;  %v6817_v38 = vsel %vm1043_vm1, %v2254_v1, %v6796_v5  ;;  %v3941_v1 = vld [vmem:[%s7497_s1 + $0x168] sm:$0xff]  ;;  %v2258_v39 = vsel %vm1043_vm1, %v6796_v5, %v2257_v42 }
  0x82   : > { %5038 = vmatprep.mubr.f32.mxu0 %v6769_v23  ;;  %v6801_v23 = vld [vmem:[#allocation2 + $0x50] sm:$0xff] }
  0x83   : > { %4695 = vmatmul.mubr.f32.gmra.mrb[6].mxu1 %v6801_v23 }
  0x84   : > { %4697 = vmatprep.mubr.f32.mxu1 %v6172_v13  ;;  %5372 = vmatpush3.bf16.msra.mxu1 %v5369_v49  ;;  %v3940_v13 = vld [vmem:[%s7497_s1 + $0x160] sm:$0xff]  ;;  %v6829_v49 = vld [vmem:[#allocation2 + $0x1b8] sm:$0xff] }
  0x85   : > { %5039 = vmatmul.mubr.f32.gmra.mrb[22].mxu0 %v2248_v24  ;;  %5374 = vmatprep.subr.bf16.mxu1 %v5373_v43  ;;  %v5377_v24 = vpack.c.bf16 %v3939_v14, %v3938_v48  ;;  %v2262_v48 = vrot.slane %v3988_v40, 6  ;;  %v2264_v14 = vrot.slane %v6827_v6, 6  ;;  %v6844_v20 = vrot.slane %v6829_v49, 6  ;;  %v3943_v40 = vld [vmem:[%s7497_s1 + $0x178] sm:$0xff] }
  0x86   : > { %5041 = vmatprep.mubr.f32.mxu0 %v6792_v36  ;;  %v3991_v36 = vld [vmem:[#allocation2 + $0x1c0] sm:$0x3f] }
  0x87   : > { %4698 = vmatmul.mubr.f32.gmra.mrb[8].mxu1 %v6174_v15  ;;  %v6840_v15 = vsel %vm1043_vm1, %v2259_v35, %v6821_v4  ;;  %v2263_v35 = vsel %vm1043_vm1, %v6821_v4, %v2262_v48  ;;  %v4107_v48 = vld [vmem:[%s7497_s1 + $0x398] sm:$0xff] }
  0x88   : > { %4700 = vmatprep.mubr.f32.mxu1 %v6193_v29  ;;  %5376 = vmatpush3.bf16.msra.mxu1 %v5373_v43  ;;  %v3942_v29 = vld [vmem:[%s7497_s1 + $0x170] sm:$0xff]  ;;  %v2267_v43 = vrot.slane %v3991_v36, 6 }
  0x89   : > { %5042 = vmatmul.mubr.f32.gmra.mrb[24].mxu0 %v2253_v28  ;;  %5378 = vmatprep.subr.bf16.mxu1 %v5377_v24  ;;  %v5381_v28 = vpack.c.bf16 %v3941_v1, %v3940_v13  ;;  %v5385_v42 = vpack.c.bf16 %v3943_v40, %v3942_v29  ;;  %v3992_v13 = vld [vmem:[%s7497_s1 + $0x180] sm:$0xff]  ;;  %v3993_v1 = vld [vmem:[%s7497_s1 + $0x188] sm:$0xff] }
  0x8a   : > { %5044 = vmatprep.mubr.f32.mxu0 %v6817_v38  ;;  %v2268_v36 = vsel %vm1043_vm1, %v6844_v20, %v2267_v43  ;;  %v4109_v29 = vld [vmem:[%s7497_s1 + $0x3a8] sm:$0xff]  ;;  %v4111_v43 = vld [vmem:[%s7497_s1 + $0x3b8] sm:$0xff] }
  0x8b   : > { %4701 = vmatmul.mubr.f32.gmra.mrb[10].mxu1 %v6195_v30  ;;  %v6859_v30 = vsel %vm1043_vm1, %v2264_v14, %v6844_v20 }
  0x8c   : > { %4703 = vmatprep.mubr.f32.mxu1 %v6226_v50  ;;  %5380 = vmatpush3.bf16.msra.mxu1 %v5377_v24  ;;  %v6872_v24 = vpack.c.bf16 %v3993_v1, %v3992_v13  ;;  %v4117_v13 = vld [vmem:[%s7497_s1 + $0x3e8] sm:$0xff]  ;;  %v4119_v1 = vld [vmem:[%s7497_s1 + $0x3f8] sm:$0xff] }
  0x8d   : > { %5045 = vmatmul.mubr.f32.gmra.mrb[26].mxu0 %v2258_v39  ;;  %5382 = vmatprep.subr.bf16.mxu1 %v5381_v28  ;;  %v4106_v39 = vld [vmem:[%s7497_s1 + $0x390] sm:$0xff] }
  0x8e   : > { %5047 = vmatprep.mubr.f32.mxu0 %v6840_v15  ;;  %v5521_v14 = vpack.c.bf16 %v4107_v48, %v4106_v39  ;;  %v5880_v39 = vld [vmem:[#allocation2 + $0x10] sm:$0x3f] }
  0x8f   : > { %4704 = vmatmul.mubr.f32.gmra.mrb[12].mxu1 %v6228_v51  ;;  %v1047_v48 = vrot.slane %v5880_v39, 6 }
  0x90   : > { %4706 = vmatprep.mubr.f32.mxu1 %v6262_v16  ;;  %5384 = vmatpush3.bf16.msra.mxu1 %v5381_v28  ;;  %v4108_v28 = vld [vmem:[%s7497_s1 + $0x3a0] sm:$0xff] }
  0x91   : > { %5048 = vmatmul.mubr.f32.gmra.mrb[28].mxu0 %v2263_v35  ;;  %5386 = vmatprep.subr.bf16.mxu1 %v5385_v42  ;;  %v5525_v40 = vpack.c.bf16 %v4109_v29, %v4108_v28  ;;  %v4110_v35 = vld [vmem:[%s7497_s1 + $0x3b0] sm:$0xff]  ;;  %v3995_v28 = vld [vmem:[%s7497_s1 + $0x198] sm:$0xff] }
  0x92   : > { %5050 = vmatprep.mubr.f32.mxu0 %v6859_v30 }
  0x93   : > { %4707 = vmatmul.mubr.f32.gmra.mrb[14].mxu1 %v6264_v17 }
  0x94   : > { %4709 = vmatprep.mubr.f32.mxu1 %v6304_v47  ;;  %5388 = vmatpush3.bf16.msra.mxu1 %v5385_v42  ;;  %v4115_v42 = vld [vmem:[%s7497_s1 + $0x3d8] sm:$0xff] }
  0x95   : > { %5051 = vmatmul.mubr.f32.gmra.mrb[30].mxu0 %v2268_v36  ;;  %5390 = vmatprep.subr.bf16.mxu1 %v6872_v24  ;;  %v4120_v36 = vld [vmem:[%s7497_s1 + $0x400] sm:$0xff] }
  0x96   : > { %5085 = vmatprep.mubr.f32.mxu0 %v6226_v50 }
  0x97   : > { %4710 = vmatmul.mubr.f32.gmra.mrb[16].mxu1 %v6306_v53 }
  0x98   : > { %4712 = vmatprep.mubr.f32.mxu1 %v6340_v26 }
  0x99   : > { %5086 = vmatmul.mubr.f32.vlgmr.msra.gmra.mrb[0].mxu0 %v6228_v51  ;;  %v5529_v51 = vpack.c.bf16 %v4111_v43, %v4110_v35  ;;  %v3996_v35 = vld [vmem:[%s7497_s1 + $0x1a0] sm:$0xff] }
  0x9a   : > { %5520 = vmatpush3.bf16.msra.mxu0 %v6713_v37  ;;  %5088 = vmatprep.mubr.f32.mxu0 %v6262_v16  ;;  %v4112_v16 = vld [vmem:[%s7497_s1 + $0x3c0] sm:$0xff]  ;;  %v4113_v37 = vld [vmem:[%s7497_s1 + $0x3c8] sm:$0xff] }
  0x9b   : > { %5522 = vmatprep.subr.bf16.mxu0 %v5521_v14  ;;  %4713 = vmatmul.mubr.f32.gmra.mrb[18].mxu1 %v6342_v27  ;;  %v5882_v43 = vld [vmem:[#allocation2 + $0x40] sm:$0x3f] }
  0x9c   : > { %4715 = vmatprep.mubr.f32.mxu1 %v6375_v59 }
  0x9d   : > { %5089 = vmatmul.mubr.f32.gmra.mrb[2].mxu0 %v6264_v17  ;;  %v5533_v17 = vpack.c.bf16 %v4113_v37, %v4112_v16  ;;  %v6985_v16 = vld [vmem:[#allocation2 + $0x48] sm:$0xff] }
  0x9e   : > { %5091 = vmatprep.mubr.f32.mxu0 %v6304_v47  ;;  %5524 = vmatpush3.bf16.msra.mxu0 %v5521_v14  ;;  %v4114_v47 = vld [vmem:[%s7497_s1 + $0x3d0] sm:$0xff]  ;;  %v1059_v37 = vrot.slane %v6985_v16, 6 }
  0x9f   : > { %5526 = vmatprep.subr.bf16.mxu0 %v5525_v40  ;;  %4716 = vmatmul.mubr.f32.gmra.mrb[20].mxu1 %v6377_v61  ;;  %v3994_v14 = vld [vmem:[%s7497_s1 + $0x190] sm:$0xff] }
  0xa0   : > { %4718 = vmatprep.mubr.f32.mxu1 %v6488_v7 }
  0xa1   : > { %5092 = vmatmul.mubr.f32.gmra.mrb[4].mxu0 %v6306_v53  ;;  %v5537_v53 = vpack.c.bf16 %v4115_v42, %v4114_v47  ;;  %v5884_v42 = vld [vmem:[#allocation2 + $0x58] sm:$0x3f] }
  0xa2   : > { %5094 = vmatprep.mubr.f32.mxu0 %v6340_v26  ;;  %5528 = vmatpush3.bf16.msra.mxu0 %v5525_v40  ;;  %v4116_v26 = vld [vmem:[%s7497_s1 + $0x3e0] sm:$0xff]  ;;  %v5393_v40 = vpack.c.bf16 %v3995_v28, %v3994_v14  ;;  %v4003_v14 = vld [vmem:[%s7497_s1 + $0x1d8] sm:$0xff]  ;;  %v5887_v28 = vld [vmem:[#allocation2 + $0x88] sm:$0x3f] }
  0xa3   : > { %5530 = vmatprep.subr.bf16.mxu0 %v5529_v51  ;;  %4719 = vmatmul.mubr.f32.gmra.mrb[22].mxu1 %v6490_v60 }
  0xa4   : > { %4721 = vmatprep.mubr.f32.mxu1 %v6516_v0 }
  0xa5   : > { %5095 = vmatmul.mubr.f32.gmra.mrb[6].mxu0 %v6342_v27  ;;  %v5541_v27 = vpack.c.bf16 %v4117_v13, %v4116_v26 }
  0xa6   : > { %5097 = vmatprep.mubr.f32.mxu0 %v6375_v59  ;;  %5532 = vmatpush3.bf16.msra.mxu0 %v5529_v51  ;;  %v4118_v59 = vld [vmem:[%s7497_s1 + $0x3f0] sm:$0xff]  ;;  %v1057_v51 = vrot.slane %v5882_v43, 6  ;;  %v1082_v43 = vrot.slane %v6393_v12, 6  ;;  %v1087_v12 = vrot.slane %v6411_v34, 6  ;;  %v4123_v34 = vld [vmem:[%s7497_s1 + $0x418] sm:$0xff] }
  0xa7   : > { %5534 = vmatprep.subr.bf16.mxu0 %v5533_v17  ;;  %4722 = vmatmul.mubr.f32.gmra.mrb[24].mxu1 %v6518_v2 }
  0xa8   : > { %4724 = vmatprep.mubr.f32.mxu1 %v6552_v62 }
  0xa9   : > { %5098 = vmatmul.mubr.f32.gmra.mrb[8].mxu0 %v6377_v61  ;;  %v6946_v61 = vrot.slane %v6721_v18, 6 }
  0xaa   : > { %5100 = vmatprep.mubr.f32.mxu0 %v6488_v7  ;;  %5536 = vmatpush3.bf16.msra.mxu0 %v5533_v17  ;;  %v5545_v7 = vpack.c.bf16 %v4119_v1, %v4118_v59  ;;  %v1060_v17 = vrot.slane %v6801_v23, 6  ;;  %v7010_v1 = vld [vmem:[#allocation2 + $0x78] sm:$0xff] }
  0xab   : > { %5538 = vmatprep.subr.bf16.mxu0 %v5537_v53  ;;  %4725 = vmatmul.mubr.f32.gmra.mrb[26].mxu1 %v6554_v22 }
  0xac   : > { %4727 = vmatprep.mubr.f32.mxu1 %v6592_v55  ;;  %v1061_v26 = vsel %vm1043_vm1, %v1059_v37, %v1060_v17 }
  0xad   : > { %5101 = vmatmul.mubr.f32.gmra.mrb[10].mxu0 %v6490_v60  ;;  %v4121_v60 = vld [vmem:[%s7497_s1 + $0x408] sm:$0xff] }
  0xae   : > { %5103 = vmatprep.mubr.f32.mxu0 %v6516_v0  ;;  %5540 = vmatpush3.bf16.msra.mxu0 %v5537_v53  ;;  %v6958_v0 = vpack.c.bf16 %v4121_v60, %v4120_v36  ;;  %v1062_v53 = vrot.slane %v5884_v42, 6  ;;  %v7013_v36 = vld [vmem:[#allocation2 + $0x80] sm:$0xff]  ;;  %v7062_v42 = vld [vmem:[#allocation2 + $0xb8] sm:$0x3f] }
  0xaf   : > { %5542 = vmatprep.subr.bf16.mxu0 %v5541_v27  ;;  %4728 = vmatmul.mubr.f32.gmra.mrb[28].mxu1 %v6594_v44  ;;  %v1070_v60 = vrot.slane %v7013_v36, 6 }
  0xb0   : > { %4730 = vmatprep.mubr.f32.mxu1 %v6631_v52  ;;  %v1063_v59 = vsel %vm1043_vm1, %v1060_v17, %v1062_v53  ;;  %v7049_v17 = vld [vmem:[#allocation2 + $0xa0] sm:$0x3f]  ;;  %v1088_v53 = vsel %vm1043_vm1, %v6590_v8, %v1087_v12  ;;  %v4129_v12 = vld [vmem:[%s7497_s1 + $0x448] sm:$0xff] }
  0xb1   : > { %5104 = vmatmul.mubr.f32.gmra.mrb[12].mxu0 %v6518_v2  ;;  %v1048_v2 = vsel %vm1043_vm1, %v6946_v61, %v1047_v48  ;;  %v4002_v48 = vld [vmem:[%s7497_s1 + $0x1d0] sm:$0xff] }
  0xb2   : > { %5106 = vmatprep.mubr.f32.mxu0 %v6552_v62  ;;  %5544 = vmatpush3.bf16.msra.mxu0 %v5541_v27  ;;  %v5881_v62 = vld [vmem:[#allocation2 + $0x28] sm:$0x3f]  ;;  %v4000_v27 = vld [vmem:[%s7497_s1 + $0x1c0] sm:$0xff] }
  0xb3   : > { %5546 = vmatprep.subr.bf16.mxu0 %v5545_v7  ;;  %4731 = vmatmul.mubr.f32.gmra.mrb[30].mxu1 %v6633_v45  ;;  %v1052_v29 = vrot.slane %v5881_v62, 6 }
  0xb4   : > { %4765 = vmatprep.mubr.f32.mxu1 %v6946_v61 }
  0xb5   : > { %5107 = vmatmul.mubr.f32.gmra.mrb[14].mxu0 %v6554_v22  ;;  %v3997_v22 = vld [vmem:[%s7497_s1 + $0x1a8] sm:$0xff] }
  0xb6   : > { %5109 = vmatprep.mubr.f32.mxu0 %v6592_v55  ;;  %5548 = vmatpush3.bf16.msra.mxu0 %v5545_v7  ;;  %v1053_v55 = vsel %vm1043_vm1, %v6946_v61, %v1052_v29  ;;  %v5397_v47 = vpack.c.bf16 %v3997_v22, %v3996_v35  ;;  %v1069_v7 = vrot.slane %v7010_v1, 6  ;;  %v5409_v29 = vpack.c.bf16 %v4003_v14, %v4002_v48  ;;  %v4005_v35 = vld [vmem:[%s7497_s1 + $0x1e8] sm:$0xff] }
  0xb7   : > { %5550 = vmatprep.subr.bf16.mxu0 %v6958_v0  ;;  %4766 = vmatmul.mubr.f32.vlgmr.msra.gmra.mrb[0].mxu1 %v1048_v2  ;;  %v1072_v2 = vrot.slane %v5887_v28, 6  ;;  %v7607_v48 = vld [vmem:[#allocation10_spill] sm:$0xff] }
  0xb8   : > { %5392 = vmatpush3.bf16.msra.mxu1 %v6872_v24  ;;  %4768 = vmatprep.mubr.f32.mxu1 %v6946_v61  ;;  %v3999_v24 = vld [vmem:[%s7497_s1 + $0x1b8] sm:$0xff]  ;;  %v1071_v62 = vsel %vm1043_vm1, %v1069_v7, %v1070_v60  ;;  %v4124_v7 = vld [vmem:[%s7497_s1 + $0x420] sm:$0xff] }
  0xb9   : > { %5110 = vmatmul.mubr.f32.gmra.mrb[16].mxu0 %v6594_v44  ;;  %5394 = vmatprep.subr.bf16.mxu1 %v5393_v40  ;;  %v3998_v44 = vld [vmem:[%s7497_s1 + $0x1b0] sm:$0xff] }
  0xba   : > { %5112 = vmatprep.mubr.f32.mxu0 %v6631_v52  ;;  %v1058_v52 = vsel %vm1043_vm1, %v6946_v61, %v1057_v51  ;;  %v5401_v13 = vpack.c.bf16 %v3999_v24, %v3998_v44  ;;  %v7046_v51 = vld [vmem:[#allocation2 + $0x98] sm:$0xff]  ;;  %v2951_v44 = vrot.slane %v7049_v17, 3  ;;  %v7606_v24 = vrot.slane %v6226_v50, 3 }
  0xbb   : > { %4769 = vmatmul.mubr.f32.gmra.mrb[2].mxu1 %v1053_v55  ;;  %v4007_v55 = vld [vmem:[%s7497_s1 + $0x1f8] sm:$0xff]  ;;  %v2949_v37 = vrot.slane %v7046_v51, 3 }
  0xbc   : > { %4771 = vmatprep.mubr.f32.mxu1 %v6946_v61  ;;  %5396 = vmatpush3.bf16.msra.mxu1 %v5393_v40  ;;  %v4004_v40 = vld [vmem:[%s7497_s1 + $0x1e0] sm:$0xff] }
  0xbd   : > { %5113 = vmatmul.mubr.f32.gmra.mrb[18].mxu0 %v6633_v45  ;;  %5398 = vmatprep.subr.bf16.mxu1 %v5397_v47  ;;  %v4001_v45 = vld [vmem:[%s7497_s1 + $0x1c8] sm:$0xff]  ;;  %v5413_v22 = vpack.c.bf16 %v4005_v35, %v4004_v40 }
  0xbe   : > { %5115 = vmatprep.mubr.f32.mxu0 %v6779_v32  ;;  %v5405_v39 = vpack.c.bf16 %v4001_v45, %v4000_v27  ;;  %v2956_v27 = vrot.slane %v7062_v42, 3  ;;  %v7077_v45 = vld [vmem:[#allocation2 + $0xd0] sm:$0x3f]  ;;  %v7610_v35 = vld [vmem:[#allocation18_spill] sm:$0xff] }
  0xbf   : > { %4772 = vmatmul.mubr.f32.gmra.mrb[4].mxu1 %v1058_v52  ;;  %v2950_v52 = vsel %vm463_vm0, %v7606_v24, %v2949_v37  ;;  %v2961_v28 = vrot.slane %v7077_v45, 3  ;;  %v7614_v24 = vld [vmem:[#allocation34_spill] sm:$0xff] }
  0xc0   : > { %4774 = vmatprep.mubr.f32.mxu1 %v1061_v26  ;;  %5400 = vmatpush3.bf16.msra.mxu1 %v5397_v47  ;;  %v1092_v26 = vrot.slane %v6459_v56, 6  ;;  %v4125_v56 = vld [vmem:[%s7497_s1 + $0x428] sm:$0xff]  ;;  %v2957_v14 = vsel %vm463_vm0, %v7607_v48, %v2956_v27  ;;  %v7619_v48 = vld [vmem:[#allocation36_spill] sm:$0xff] }
  0xc1   : > { %5116 = vmatmul.mubr.f32.gmra.mrb[20].mxu0 %v6781_v46  ;;  %5402 = vmatprep.subr.bf16.mxu1 %v5401_v13 }
  0xc2   : > { %5118 = vmatprep.mubr.f32.mxu0 %v6804_v63 }
  0xc3   : > { %4775 = vmatmul.mubr.f32.gmra.mrb[6].mxu1 %v1063_v59 }
  0xc4   : > { %4777 = vmatprep.mubr.f32.mxu1 %v6484_v58  ;;  %5404 = vmatpush3.bf16.msra.mxu1 %v5401_v13  ;;  %v1073_v58 = vsel %vm1043_vm1, %v1070_v60, %v1072_v2  ;;  %v2952_v13 = vsel %vm463_vm0, %v2949_v37, %v2951_v44  ;;  %v1093_v60 = vsel %vm1043_vm1, %v6614_v21, %v1092_v26  ;;  %v7095_v2 = vld [vmem:[#allocation2 + $0xe8] sm:$0x3f]  ;;  %v7111_v37 = vld [vmem:[#allocation2 + $0x100] sm:$0x3f]  ;;  %v7613_v44 = vld [vmem:[#allocation35_spill] sm:$0xff] }
  0xc5   : > { %5119 = vmatmul.mubr.f32.gmra.mrb[22].mxu0 %v6806_v31  ;;  %5406 = vmatprep.subr.bf16.mxu1 %v5405_v39  ;;  %v7617_v26 = vld [vmem:[#allocation13_spill] sm:$0xff]  ;;  %v2971_v27 = vrot.slane %v7111_v37, 3 }
  0xc6   : > { %5121 = vmatprep.mubr.f32.mxu0 %v6827_v6 }
  0xc7   : > { %4778 = vmatmul.mubr.f32.gmra.mrb[8].mxu1 %v6565_v25  ;;  %v4006_v25 = vld [vmem:[%s7497_s1 + $0x1f0] sm:$0xff] }
  0xc8   : > { %4780 = vmatprep.mubr.f32.mxu1 %v1071_v62  ;;  %5408 = vmatpush3.bf16.msra.mxu1 %v5405_v39  ;;  %v5417_v47 = vpack.c.bf16 %v4007_v55, %v4006_v25  ;;  %v1097_v39 = vrot.slane %v6480_v33, 6  ;;  %v5557_v62 = vpack.c.bf16 %v4125_v56, %v4124_v7  ;;  %v4127_v33 = vld [vmem:[%s7497_s1 + $0x438] sm:$0xff]  ;;  %v7612_v25 = vld [vmem:[#allocation11_spill] sm:$0xff] }
  0xc9   : > { %5122 = vmatmul.mubr.f32.gmra.mrb[24].mxu0 %v6829_v49  ;;  %5410 = vmatprep.subr.bf16.mxu1 %v5409_v29  ;;  %v2962_v55 = vsel %vm463_vm0, %v7612_v25, %v2961_v28  ;;  %v4130_v56 = vld [vmem:[%s7497_s1 + $0x450] sm:$0xff]  ;;  %v7620_v28 = vld [vmem:[#allocation24_spill] sm:$0xff]  ;;  %v4132_v25 = vld [vmem:[%s7497_s1 + $0x460] sm:$0xff] }
  0xca   : > { %5124 = vmatprep.mubr.f32.mxu0 %v6721_v18 }
  0xcb   : > { %4781 = vmatmul.mubr.f32.gmra.mrb[10].mxu1 %v1073_v58  ;;  %v1102_v58 = vrot.slane %v7610_v35, 6 }
  0xcc   : > { %4783 = vmatprep.mubr.f32.mxu1 %v6550_v19  ;;  %5412 = vmatpush3.bf16.msra.mxu1 %v5409_v29  ;;  %v1083_v19 = vsel %vm1043_vm1, %v6534_v10, %v1082_v43  ;;  %v4126_v29 = vld [vmem:[%s7497_s1 + $0x430] sm:$0xff]  ;;  %v2966_v43 = vrot.slane %v7095_v2, 3 }
  0xcd   : > { %5125 = vmatmul.mubr.f32.gmra.mrb[26].mxu0 %v6721_v18  ;;  %5414 = vmatprep.subr.bf16.mxu1 %v5413_v22 }
  0xce   : > { %5127 = vmatprep.mubr.f32.mxu0 %v6721_v18 }
  0xcf   : > { %4784 = vmatmul.mubr.f32.gmra.mrb[12].mxu1 %v6597_v57  ;;  %v4122_v57 = vld [vmem:[%s7497_s1 + $0x410] sm:$0xff] }
  0xd0   : > { %4786 = vmatprep.mubr.f32.mxu1 %v6580_v3  ;;  %5416 = vmatpush3.bf16.msra.mxu1 %v5413_v22  ;;  %v5553_v59 = vpack.c.bf16 %v4123_v34, %v4122_v57  ;;  %v7611_v22 = vld [vmem:[#allocation12_spill] sm:$0xff]  ;;  %v7615_v57 = vld [vmem:[#allocation21_spill] sm:$0xff] }
  0xd1   : > { %5128 = vmatmul.mubr.f32.gmra.mrb[28].mxu0 %v6721_v18  ;;  %5418 = vmatprep.subr.bf16.mxu1 %v5417_v47  ;;  %v1107_v34 = vrot.slane %v7615_v57, 6  ;;  %v7626_v57 = vld [vmem:[#allocation19_spill] sm:$0xff] }
  0xd2   : > { %5130 = vmatprep.mubr.f32.mxu0 %v6721_v18 }
  0xd3   : > { %4787 = vmatmul.mubr.f32.gmra.mrb[14].mxu1 %v1083_v19  ;;  %v4128_v19 = vld [vmem:[%s7497_s1 + $0x440] sm:$0xff] }
  0xd4   : > { %4789 = vmatprep.mubr.f32.mxu1 %v6629_v41  ;;  %5420 = vmatpush3.bf16.msra.mxu1 %v5417_v47  ;;  %v5561_v47 = vpack.c.bf16 %v4127_v33, %v4126_v29  ;;  %v5565_v7 = vpack.c.bf16 %v4129_v12, %v4128_v19  ;;  %v7621_v29 = vld [vmem:[#allocation16_spill] sm:$0xff]  ;;  %v7622_v33 = vld [vmem:[#allocation15_spill] sm:$0xff]  ;;  %v7624_v19 = vld [vmem:[#allocation38_spill] sm:$0xff] }
  0xd5   : > { %5131 = vmatmul.mubr.f32.gmra.mrb[30].mxu0 %v6721_v18  ;;  %5581 = vmatprep.subr.bf16.mxu1 %v6009_v9 }
  0xd6   : > { %5165 = vmatprep.mubr.f32.mxu0 %v2950_v52  ;;  %v1103_v52 = vsel %vm1043_vm1, %v7614_v24, %v1102_v58  ;;  %v7143_v58 = vld [vmem:[#allocation2 + $0x130] sm:$0x3f] }
  0xd7   : > { %4790 = vmatmul.mubr.f32.gmra.mrb[16].mxu1 %v1088_v53  ;;  %v7616_v53 = vld [vmem:[#allocation14_spill] sm:$0xff] }
  0xd8   : > { %4792 = vmatprep.mubr.f32.mxu1 %v6655_v11 }
  0xd9   : > { %5166 = vmatmul.mubr.f32.vlgmr.msra.gmra.mrb[0].mxu0 %v2952_v13  ;;  %v2967_v13 = vsel %vm463_vm0, %v7617_v26, %v2966_v43  ;;  %v7623_v43 = vld [vmem:[#allocation39_spill] sm:$0xff]  ;;  %v2981_v26 = vrot.slane %v7143_v58, 3 }
  0xda   : > { %5552 = vmatpush3.bf16.msra.mxu0 %v6958_v0  ;;  %5168 = vmatprep.mubr.f32.mxu0 %v6326_v54  ;;  %v7608_v54 = vld [vmem:[#allocation33_spill] sm:$0xff]  ;;  %v7609_v0 = vld [vmem:[#allocation31_spill] sm:$0xff] }
  0xdb   : > { %5554 = vmatprep.subr.bf16.mxu0 %v5553_v59  ;;  %4793 = vmatmul.mubr.f32.gmra.mrb[18].mxu1 %v1093_v60  ;;  %v1098_v40 = vsel %vm1043_vm1, %v7609_v0, %v1097_v39  ;;  %v4131_v60 = vld [vmem:[%s7497_s1 + $0x458] sm:$0xff]  ;;  %v7618_v39 = vld [vmem:[#allocation37_spill] sm:$0xff] }
  0xdc   : > { %4795 = vmatprep.mubr.f32.mxu1 %v7608_v54 }
  0xdd   : > { %5169 = vmatmul.mubr.f32.gmra.mrb[2].mxu0 %v2957_v14  ;;  %v1108_v14 = vsel %vm1043_vm1, %v7619_v48, %v1107_v34  ;;  %v7627_v34 = vld [vmem:[#allocation17_spill] sm:$0xff] }
  0xde   : > { %5171 = vmatprep.mubr.f32.mxu0 %v7611_v22  ;;  %5556 = vmatpush3.bf16.msra.mxu0 %v5553_v59  ;;  %v7127_v59 = vld [vmem:[#allocation2 + $0x118] sm:$0x3f]  ;;  %v5569_v22 = vpack.c.bf16 %v4131_v60, %v4130_v56  ;;  %v4134_v56 = vld [vmem:[%s7497_s1 + $0x470] sm:$0xff] }
  0xdf   : > { %5558 = vmatprep.subr.bf16.mxu0 %v5557_v62  ;;  %4796 = vmatmul.mubr.f32.gmra.mrb[20].mxu1 %v1098_v40  ;;  %v2972_v40 = vsel %vm463_vm0, %v7622_v33, %v2971_v27  ;;  %v2976_v35 = vrot.slane %v7127_v59, 3  ;;  %v4135_v60 = vld [vmem:[%s7497_s1 + $0x478] sm:$0xff]  ;;  %v7631_v33 = vld [vmem:[#allocation22_spill] sm:$0xff] }
  0xe0   : > { %4798 = vmatprep.mubr.f32.mxu1 %v7613_v44 }
  0xe1   : > { %5172 = vmatmul.mubr.f32.gmra.mrb[4].mxu0 %v2962_v55  ;;  %v4133_v55 = vld [vmem:[%s7497_s1 + $0x468] sm:$0xff] }
  0xe2   : > { %5174 = vmatprep.mubr.f32.mxu0 %v7616_v53  ;;  %5560 = vmatpush3.bf16.msra.mxu0 %v5557_v62  ;;  %v1112_v62 = vrot.slane %v7620_v28, 6  ;;  %v2977_v53 = vsel %vm463_vm0, %v7627_v34, %v2976_v35  ;;  %v5573_v27 = vpack.c.bf16 %v4133_v55, %v4132_v25  ;;  %v7629_v28 = vld [vmem:[#allocation40_spill] sm:$0xff]  ;;  %v7175_v55 = vld [vmem:[#allocation2 + $0x160] sm:$0x3f] }
  0xe3   : > { %5562 = vmatprep.subr.bf16.mxu0 %v5561_v47  ;;  %4799 = vmatmul.mubr.f32.gmra.mrb[22].mxu1 %v1103_v52  ;;  %v7635_v34 = vld [vmem:[#allocation25_spill] sm:$0xff] }
  0xe4   : > { %4801 = vmatprep.mubr.f32.mxu1 %v7618_v39  ;;  %v1113_v12 = vsel %vm1043_vm1, %v7624_v19, %v1112_v62 }
  0xe5   : > { %5175 = vmatmul.mubr.f32.gmra.mrb[6].mxu0 %v2967_v13  ;;  %v7159_v13 = vld [vmem:[#allocation2 + $0x148] sm:$0x3f] }
  0xe6   : > { %5177 = vmatprep.mubr.f32.mxu0 %v7621_v29  ;;  %5564 = vmatpush3.bf16.msra.mxu0 %v5561_v47  ;;  %v7625_v47 = vld [vmem:[#allocation27_spill] sm:$0xff]  ;;  %v2986_v25 = vrot.slane %v7159_v13, 3 }
  0xe7   : > { %5566 = vmatprep.subr.bf16.mxu0 %v5565_v7  ;;  %4802 = vmatmul.mubr.f32.gmra.mrb[24].mxu1 %v1108_v14  ;;  %v1117_v52 = vrot.slane %v7625_v47, 6  ;;  %v7628_v14 = vld [vmem:[#allocation41_spill] sm:$0xff]  ;;  %v7633_v47 = vld [vmem:[#allocation43_spill] sm:$0xff] }
  0xe8   : > { %4804 = vmatprep.mubr.f32.mxu1 %v7623_v43 }
  0xe9   : > { %5178 = vmatmul.mubr.f32.gmra.mrb[8].mxu0 %v2972_v40  ;;  %v1118_v62 = vsel %vm1043_vm1, %v7629_v28, %v1117_v52  ;;  %v7632_v40 = vld [vmem:[#allocation20_spill] sm:$0xff] }
  0xea   : > { %5180 = vmatprep.mubr.f32.mxu0 %v7626_v57  ;;  %5568 = vmatpush3.bf16.msra.mxu0 %v5565_v7  ;;  %v7630_v7 = vld [vmem:[#allocation30_spill] sm:$0xff]  ;;  %v2982_v35 = vsel %vm463_vm0, %v7632_v40, %v2981_v26  ;;  %v2991_v26 = vrot.slane %v7175_v55, 3  ;;  %v7193_v40 = vrot.slane %v6781_v46, 3 }
  0xeb   : > { %5570 = vmatprep.subr.bf16.mxu0 %v5569_v22  ;;  %4805 = vmatmul.mubr.f32.gmra.mrb[26].mxu1 %v1113_v12  ;;  %v1122_v29 = vrot.slane %v7630_v7, 6  ;;  %v5577_v12 = vpack.c.bf16 %v4135_v60, %v4134_v56  ;;  %v7634_v57 = vld [vmem:[#allocation42_spill] sm:$0xff]  ;;  %v7637_v56 = vld [vmem:[#allocation28_spill] sm:$0xff] }
  0xec   : > { %4807 = vmatprep.mubr.f32.mxu1 %v7628_v14  ;;  %v7638_v60 = vld [vmem:[#allocation26_spill] sm:$0xff] }
  0xed   : > { %5181 = vmatmul.mubr.f32.gmra.mrb[10].mxu0 %v2977_v53  ;;  %v1123_v52 = vsel %vm1043_vm1, %v7634_v57, %v1122_v29  ;;  %v7636_v53 = vld [vmem:[#allocation23_spill] sm:$0xff] }
  0xee   : > { %5183 = vmatprep.mubr.f32.mxu0 %v7631_v33  ;;  %5572 = vmatpush3.bf16.msra.mxu0 %v5569_v22  ;;  %v2987_v7 = vsel %vm463_vm0, %v7636_v53, %v2986_v25  ;;  %v7184_v22 = vld [vmem:[#allocation2 + $0x178] sm:$0x3f]  ;;  %v2998_v33 = vrot.slane %v6779_v32, 3  ;;  %v7640_v25 = vld [vmem:[#allocation29_spill] sm:$0xff]  ;;  %v7205_v53 = vrot.slane %v6806_v31, 3 }
  0xef   : > { %5574 = vmatprep.subr.bf16.mxu0 %v5573_v27  ;;  %4808 = vmatmul.mubr.f32.gmra.mrb[28].mxu1 %v1118_v62  ;;  %v2992_v62 = vsel %vm463_vm0, %v7638_v60, %v2991_v26  ;;  %v2996_v29 = vrot.slane %v7184_v22, 3  ;;  %v5890_v26 = vld [vmem:[#allocation2 + $0x68] sm:$0xff] }
  0xf0   : > { %4810 = vmatprep.mubr.f32.mxu1 %v7633_v47  ;;  %7641 = vst [vmem:[#allocation10_spill] sm:$0xff] %v7205_v53 }
  0xf1   : > { %5184 = vmatmul.mubr.f32.gmra.mrb[12].mxu0 %v2982_v35  ;;  %v7639_v35 = vld [vmem:[#allocation32_spill] sm:$0xff] }
  0xf2   : > { %5186 = vmatprep.mubr.f32.mxu0 %v7635_v34  ;;  %5576 = vmatpush3.bf16.msra.mxu0 %v5573_v27  ;;  %v7195_v27 = vld [vmem:[#allocation2 + $0x190] sm:$0x3f]  ;;  %v3003_v34 = vrot.slane %v6804_v63, 3 }
  0xf3   : > { %5578 = vmatprep.subr.bf16.mxu0 %v5577_v12  ;;  %4811 = vmatmul.mubr.f32.gmra.mrb[30].mxu1 %v1123_v52  ;;  %v2997_v52 = vsel %vm463_vm0, %v7640_v25, %v2996_v29  ;;  %v7222_v29 = vrot.slane %v6829_v49, 3 }
  0xf4   : > { %4845 = vmatprep.mubr.f32.mxu1 %v6985_v16  ;;  %v5889_v16 = vld [vmem:[#allocation2 + $0x60] sm:$0xff] }
  0xf5   : > { %5187 = vmatmul.mubr.f32.gmra.mrb[14].mxu0 %v2987_v7  ;;  %v7642_v7 = vld [vmem:[#allocation3_spill] sm:$0xff]  ;;  %7643 = vst [vmem:[#allocation33_spill] sm:$0xff] %v7222_v29 }
  0xf6   : > { %5189 = vmatprep.mubr.f32.mxu0 %v7637_v56  ;;  %5580 = vmatpush3.bf16.msra.mxu0 %v5577_v12  ;;  %v3001_v12 = vrot.slane %v7195_v27, 3 }
  0xf7   : > { %4846 = vmatmul.mubr.f32.vlgmr.msra.gmra.mrb[0].mxu1 %v6801_v23  ;;  %v7209_v23 = vsel %vm463_vm0, %v2998_v33, %v7193_v40  ;;  %v7226_v33 = vsel %vm463_vm0, %v3003_v34, %v7205_v53 }
  0xf8   : > { %5589 = vmatpush3.bf16.msra.mxu1 %v6009_v9  ;;  %4848 = vmatprep.mubr.f32.mxu1 %v5889_v16  ;;  %v7212_v9 = vld [vmem:[#allocation2 + $0x1a8] sm:$0x3f]  ;;  %v3002_v56 = vsel %vm463_vm0, %v7193_v40, %v3001_v12  ;;  %v7644_v16 = vld [vmem:[#allocation4_spill] sm:$0xff]  ;;  %v3013_v12 = vrot.slane %v6721_v18, 3 }
  0xf9   : > { %5190 = vmatmul.mubr.f32.gmra.mrb[16].mxu0 %v2992_v62  ;;  %5582 = vmatprep.subr.bf16.mxu1 %v7642_v7  ;;  %v3006_v60 = vrot.slane %v7212_v9, 3  ;;  %v3008_v62 = vrot.slane %v6827_v6, 3 }
  0xfa   : > { %5192 = vmatprep.mubr.f32.mxu0 %v7639_v35  ;;  %v5891_v35 = vld [vmem:[#allocation2 + $0x90] sm:$0xff] }
  0xfb   : > { %4849 = vmatmul.mubr.f32.gmra.mrb[2].mxu1 %v5890_v26  ;;  %v3007_v25 = vsel %vm463_vm0, %v7205_v53, %v3006_v60  ;;  %v7240_v34 = vsel %vm463_vm0, %v3008_v62, %v7222_v29  ;;  %v5892_v26 = vld [vmem:[#allocation2 + $0xa8] sm:$0xff]  ;;  %v7251_v60 = vld [vmem:[#allocation2 + $0x1f0] sm:$0x3f] }
  0xfc   : > { %4851 = vmatprep.mubr.f32.mxu1 %v7010_v1  ;;  %5590 = vmatpush3.bf16.msra.mxu1 %v7642_v7  ;;  %v7229_v1 = vld [vmem:[#allocation2 + $0x1c0] sm:$0x3f]  ;;  %7645 = vst [vmem:[#allocation31_spill] sm:$0xff] %v7240_v34  ;;  %v7242_v7 = vld [vmem:[#allocation2 + $0x1d8] sm:$0x3f]  ;;  %v7647_v62 = vld [vmem:[#allocation6_spill] sm:$0xff] }
  0xfd   : > { %5193 = vmatmul.mubr.f32.gmra.mrb[18].mxu0 %v2997_v52  ;;  %5583 = vmatprep.subr.bf16.mxu1 %v7644_v16  ;;  %v3011_v52 = vrot.slane %v7229_v1, 3  ;;  %v3016_v18 = vrot.slane %v7242_v7, 3  ;;  %v5898_v53 = vld [vmem:[#allocation2 + $0xf0] sm:$0xff] }
  0xfe   : > { %5195 = vmatprep.mubr.f32.mxu0 %v7209_v23 }
  0xff   : > { %4852 = vmatmul.mubr.f32.gmra.mrb[4].mxu1 %v7013_v36  ;;  %v7646_v36 = vld [vmem:[#allocation5_spill] sm:$0xff] }
 0x100   : > { %4854 = vmatprep.mubr.f32.mxu1 %v5891_v35  ;;  %5591 = vmatpush3.bf16.msra.mxu1 %v7644_v16  ;;  %v5893_v16 = vld [vmem:[#allocation2 + $0xb0] sm:$0xff]  ;;  %v5894_v35 = vld [vmem:[#allocation2 + $0xc0] sm:$0xff] }
 0x101   : > { %5196 = vmatmul.mubr.f32.gmra.mrb[20].mxu0 %v3002_v56  ;;  %5584 = vmatprep.subr.bf16.mxu1 %v7646_v36  ;;  %v3012_v56 = vsel %vm463_vm0, %v7222_v29, %v3011_v52  ;;  %v7257_v52 = vld [vmem:[#allocation2 + $0x208] sm:$0x3f]  ;;  %v7648_v29 = vld [vmem:[#allocation7_spill] sm:$0xff] }
 0x102   : > { %5198 = vmatprep.mubr.f32.mxu0 %v7226_v33 }
 0x103   : > { %4855 = vmatmul.mubr.f32.gmra.mrb[6].mxu1 %v7046_v51 }
 0x104   : > { %4857 = vmatprep.mubr.f32.mxu1 %v5892_v26  ;;  %5592 = vmatpush3.bf16.msra.mxu1 %v7646_v36  ;;  %v3021_v26 = vrot.slane %v7251_v60, 3  ;;  %v5895_v36 = vld [vmem:[#allocation2 + $0xc8] sm:$0xff] }
 0x105   : > { %5199 = vmatmul.mubr.f32.gmra.mrb[22].mxu0 %v3007_v25  ;;  %5585 = vmatprep.subr.bf16.mxu1 %v7647_v62  ;;  %v3017_v25 = vsel %vm463_vm0, %v3013_v12, %v3016_v18  ;;  %v3335_v18 = vrot.slane %v7046_v51, 6  ;;  %v5899_v51 = vld [vmem:[#allocation2 + $0xf8] sm:$0xff] }
 0x106   : > { %5201 = vmatprep.mubr.f32.mxu0 %v7240_v34  ;;  %v5896_v34 = vld [vmem:[#allocation2 + $0xd8] sm:$0xff] }
 0x107   : > { %4858 = vmatmul.mubr.f32.gmra.mrb[8].mxu1 %v5893_v16  ;;  %v3026_v16 = vrot.slane %v7257_v52, 3 }
 0x108   : > { %4860 = vmatprep.mubr.f32.mxu1 %v5894_v35  ;;  %5593 = vmatpush3.bf16.msra.mxu1 %v7647_v62  ;;  %v7649_v35 = vld [vmem:[#allocation8_spill] sm:$0xff]  ;;  %v5897_v62 = vld [vmem:[#allocation2 + $0xe0] sm:$0xff] }
 0x109   : > { %5202 = vmatmul.mubr.f32.gmra.mrb[24].mxu0 %v3012_v56  ;;  %5586 = vmatprep.subr.bf16.mxu1 %v7648_v29  ;;  %v3022_v56 = vsel %vm463_vm0, %v3013_v12, %v3021_v26  ;;  %v7650_v26 = vrot.slane %v6226_v50, 6  ;;  %v7281_v50 = vld [vmem:[#allocation2 + $0x120] sm:$0xff] }
 0x10a   : > { %5204 = vmatprep.mubr.f32.mxu0 %v3013_v12 }
 0x10b   : > { %4861 = vmatmul.mubr.f32.gmra.mrb[10].mxu1 %v5895_v36  ;;  %v7651_v36 = vld [vmem:[#allocation9_spill] sm:$0xff] }
 0x10c   : > { %4863 = vmatprep.mubr.f32.mxu1 %v5896_v34  ;;  %5594 = vmatpush3.bf16.msra.mxu1 %v7648_v29  ;;  %v3337_v34 = vrot.slane %v7049_v17, 6  ;;  %v3336_v29 = vsel %vm1043_vm1, %v7650_v26, %v3335_v18  ;;  %v3342_v17 = vrot.slane %v7062_v42, 6  ;;  %v7291_v42 = vld [vmem:[#allocation2 + $0x138] sm:$0xff]  ;;  %v7318_v26 = vld [vmem:[#allocation2 + $0x170] sm:$0xff] }
 0x10d   : > { %5205 = vmatmul.mubr.f32.gmra.mrb[26].mxu0 %v3017_v25  ;;  %5587 = vmatprep.subr.bf16.mxu1 %v7649_v35  ;;  %v3027_v25 = vsel %vm463_vm0, %v3013_v12, %v3026_v16  ;;  %v3347_v16 = vrot.slane %v7077_v45, 6 }
 0x10e   : > { %5207 = vmatprep.mubr.f32.mxu0 %v3013_v12 }
 0x10f   : > { %4864 = vmatmul.mubr.f32.gmra.mrb[12].mxu1 %v5897_v62  ;;  %v7272_v62 = vld [vmem:[#allocation2 + $0x108] sm:$0xff] }
 0x110   : > { %4866 = vmatprep.mubr.f32.mxu1 %v5898_v53  ;;  %5595 = vmatpush3.bf16.msra.mxu1 %v7649_v35  ;;  %v3338_v53 = vsel %vm1043_vm1, %v3335_v18, %v3337_v34  ;;  %v7288_v18 = vld [vmem:[#allocation2 + $0x128] sm:$0xff]  ;;  %v3348_v35 = vsel %vm1043_vm1, %v6590_v8, %v3347_v16  ;;  %v7308_v34 = vld [vmem:[#allocation2 + $0x158] sm:$0xff] }
 0x111   : > { %5208 = vmatmul.mubr.f32.gmra.mrb[28].mxu0 %v3022_v56  ;;  %5588 = vmatprep.subr.bf16.mxu1 %v7651_v36  ;;  %v3343_v56 = vsel %vm1043_vm1, %v6534_v10, %v3342_v17  ;;  %v7301_v10 = vld [vmem:[#allocation2 + $0x150] sm:$0xff]  ;;  %v7311_v8 = vld [vmem:[#allocation2 + $0x168] sm:$0xff]  ;;  %v1859_v17 = vrot.slane %v7308_v34, 3 }
 0x112   : > { %5210 = vmatprep.mubr.f32.mxu0 %v3013_v12  ;;  %v7278_v12 = vld [vmem:[#allocation2 + $0x110] sm:$0xff]  ;;  %v1863_v16 = vrot.slane %v7311_v8, 3 }
 0x113   : > { %4867 = vmatmul.mubr.f32.gmra.mrb[14].mxu1 %v5899_v51  ;;  %v5912_v51 = vld [vmem:[#allocation2 + $0x148] sm:$0x3f] }
 0x114   : > { %4869 = vmatprep.mubr.f32.mxu1 %v7272_v62  ;;  %5596 = vmatpush3.bf16.msra.mxu1 %v7651_v36 }
 0x115   : > { %5211 = vmatmul.mubr.f32.gmra.mrb[30].mxu0 %v3027_v25  ;;  %v7298_v25 = vld [vmem:[#allocation2 + $0x140] sm:$0xff] }
 0x116   : > { %5245 = vmatprep.mubr.f32.mxu0 %v3336_v29  ;;  %v1853_v29 = vrot.slane %v7291_v42, 3  ;;  %v1854_v36 = vrot.slane %v7298_v25, 3 }
 0x117   : > { %4870 = vmatmul.mubr.f32.gmra.mrb[16].mxu1 %v7278_v12 }
 0x118   : > { %4872 = vmatprep.mubr.f32.mxu1 %v7281_v50 }
 0x119   : > { %5246 = vmatmul.mubr.f32.vlgmr.msra.gmra.mrb[0].mxu0 %v3338_v53  ;;  %v1858_v53 = vrot.slane %v7301_v10, 3 }
 0x11a   : > { %5248 = vmatprep.mubr.f32.mxu0 %v6580_v3  ;;  %v3352_v3 = vrot.slane %v7095_v2, 6 }
 0x11b   : > { %4873 = vmatmul.mubr.f32.gmra.mrb[18].mxu1 %v7288_v18 }
 0x11c   : > { %4875 = vmatprep.mubr.f32.mxu1 %v7291_v42  ;;  %v3353_v45 = vsel %vm1043_vm1, %v6614_v21, %v3352_v3 }
 0x11d   : > { %5249 = vmatmul.mubr.f32.gmra.mrb[2].mxu0 %v3343_v56 }
 0x11e   : > { %5251 = vmatprep.mubr.f32.mxu0 %v6629_v41  ;;  %v3357_v41 = vrot.slane %v7111_v37, 6  ;;  %v3367_v37 = vrot.slane %v7143_v58, 6  ;;  %v1849_v58 = vrot.slane %v7288_v18, 3  ;;  %v1864_v18 = vrot.slane %v7318_v26, 3 }
 0x11f   : > { %4876 = vmatmul.mubr.f32.gmra.mrb[20].mxu1 %v7298_v25 }
 0x120   : > { %4878 = vmatprep.mubr.f32.mxu1 %v7301_v10  ;;  %v3358_v2 = vsel %vm1043_vm1, %v7609_v0, %v3357_v41  ;;  %v3372_v0 = vrot.slane %v7159_v13, 6  ;;  %v5911_v13 = vld [vmem:[#allocation2 + $0x130] sm:$0x3f] }
 0x121   : > { %5252 = vmatmul.mubr.f32.gmra.mrb[4].mxu0 %v3348_v35  ;;  %v5914_v35 = vld [vmem:[#allocation2 + $0x178] sm:$0x3f]  ;;  %v5915_v10 = vld [vmem:[#allocation2 + $0x190] sm:$0x3f] }
 0x122   : > { %5254 = vmatprep.mubr.f32.mxu0 %v6655_v11  ;;  %v3362_v11 = vrot.slane %v7127_v59, 6  ;;  %v1866_v3 = vrot.slane %v5914_v35, 3 }
 0x123   : > { %4879 = vmatmul.mubr.f32.gmra.mrb[22].mxu1 %v7308_v34 }
 0x124   : > { %4881 = vmatprep.mubr.f32.mxu1 %v7311_v8  ;;  %v3363_v21 = vsel %vm1043_vm1, %v7614_v24, %v3362_v11  ;;  %v5910_v24 = vld [vmem:[#allocation2 + $0x118] sm:$0x3f]  ;;  %v1867_v25 = vsel %vm463_vm0, %v1864_v18, %v1866_v3  ;;  %v3412_v11 = vrot.slane %v7257_v52, 6 }
 0x125   : > { %5255 = vmatmul.mubr.f32.gmra.mrb[6].mxu0 %v3353_v45  ;;  %v1846_v59 = vrot.slane %v5910_v24, 3  ;;  %v1871_v45 = vrot.slane %v5915_v10, 3 }
 0x126   : > { %5257 = vmatprep.mubr.f32.mxu0 %v7608_v54  ;;  %v3368_v54 = vsel %vm1043_vm1, %v7619_v48, %v3367_v37  ;;  %v1848_v48 = vrot.slane %v7281_v50, 3 }
 0x127   : > { %4882 = vmatmul.mubr.f32.gmra.mrb[24].mxu1 %v7318_v26  ;;  %v7653_v26 = vld [vmem:[#allocation31_spill] sm:$0xff] }
 0x128   : > { %4884 = vmatprep.mubr.f32.mxu1 %v6779_v32  ;;  %v1843_v32 = vrot.slane %v7272_v62, 3  ;;  %v1856_v62 = vrot.slane %v5912_v51, 3 }
 0x129   : > { %5258 = vmatmul.mubr.f32.gmra.mrb[8].mxu0 %v3358_v2 }
 0x12a   : > { %5260 = vmatprep.mubr.f32.mxu0 %v7613_v44  ;;  %v1844_v44 = vrot.slane %v7278_v12, 3  ;;  %v1857_v12 = vsel %vm463_vm0, %v1854_v36, %v1856_v62 }
 0x12b   : > { %4885 = vmatmul.mubr.f32.gmra.mrb[26].mxu1 %v6781_v46  ;;  %v3377_v46 = vrot.slane %v7175_v55, 6  ;;  %v3382_v55 = vrot.slane %v7184_v22, 6  ;;  %v1855_v22 = vsel %vm463_vm0, %v1853_v29, %v1854_v36 }
 0x12c   : > { %4887 = vmatprep.mubr.f32.mxu1 %v6804_v63  ;;  %v3373_v63 = vsel %vm1043_vm1, %v7624_v19, %v3372_v0  ;;  %v1850_v19 = vsel %vm463_vm0, %v1848_v48, %v1849_v58 }
 0x12d   : > { %5261 = vmatmul.mubr.f32.gmra.mrb[10].mxu0 %v3363_v21 }
 0x12e   : > { %5263 = vmatprep.mubr.f32.mxu0 %v7618_v39  ;;  %v1845_v39 = vsel %vm463_vm0, %v1843_v32, %v1844_v44 }
 0x12f   : > { %4888 = vmatmul.mubr.f32.gmra.mrb[28].mxu1 %v6806_v31  ;;  %v1847_v31 = vsel %vm463_vm0, %v1844_v44, %v1846_v59 }
 0x130   : > { %4890 = vmatprep.mubr.f32.mxu1 %v6827_v6  ;;  %v3378_v6 = vsel %vm1043_vm1, %v7629_v28, %v3377_v46  ;;  %v3387_v28 = vrot.slane %v7195_v27, 6  ;;  %v5913_v27 = vld [vmem:[#allocation2 + $0x160] sm:$0x3f] }
 0x131   : > { %5264 = vmatmul.mubr.f32.gmra.mrb[12].mxu0 %v3368_v54  ;;  %v1861_v56 = vrot.slane %v5913_v27, 3 }
 0x132   : > { %5266 = vmatprep.mubr.f32.mxu0 %v7623_v43  ;;  %v1851_v43 = vrot.slane %v5911_v13, 3  ;;  %v3388_v50 = vsel %vm1043_vm1, %v6796_v5, %v3387_v28 }
 0x133   : > { %4891 = vmatmul.mubr.f32.gmra.mrb[30].mxu1 %v6829_v49  ;;  %v1862_v42 = vsel %vm463_vm0, %v1859_v17, %v1861_v56 }
 0x134   : > { %4949 = vmatprep.mubr.f32.mxu1 %v1845_v39  ;;  %v1852_v49 = vsel %vm463_vm0, %v1849_v58, %v1851_v43  ;;  %v7410_v43 = vld [vmem:[%s7498_s2] ss:$0 sm:$0xff] }
 0x135   : > { %5267 = vmatmul.mubr.f32.gmra.mrb[14].mxu0 %v3373_v63 }
 0x136   : > { %5269 = vmatprep.mubr.f32.mxu0 %v7628_v14  ;;  %v3383_v14 = vsel %vm1043_vm1, %v7634_v57, %v3382_v55  ;;  %v3392_v57 = vrot.slane %v7212_v9, 6  ;;  %v3397_v9 = vrot.slane %v7229_v1, 6  ;;  %v5916_v1 = vld [vmem:[#allocation2 + $0x1a8] sm:$0x3f] }
 0x137   : > { %4950 = vmatmul.mubr.f32.vlgmr.msra.gmra.mrb[16].mxu1 %v1847_v31  ;;  %v1876_v34 = vrot.slane %v5916_v1, 3 }
 0x138   : > { %4952 = vmatprep.mubr.f32.mxu1 %v1850_v19  ;;  %v3393_v5 = vsel %vm1043_vm1, %v6821_v4, %v3392_v57  ;;  %v3398_v41 = vsel %vm1043_vm1, %v6844_v20, %v3397_v9  ;;  %v1872_v4 = vsel %vm463_vm0, %v7193_v40, %v1871_v45  ;;  %v7652_v20 = vld [vmem:[#allocation10_spill] sm:$0xff] }
 0x139   : > { %5270 = vmatmul.mubr.f32.gmra.mrb[16].mxu0 %v3378_v6 }
 0x13a   : > { %5272 = vmatprep.mubr.f32.mxu0 %v7633_v47  ;;  %v1860_v47 = vsel %vm463_vm0, %v1858_v53, %v1859_v17 }
 0x13b   : > { %4953 = vmatmul.mubr.f32.gmra.mrb[18].mxu1 %v1852_v49 }
 0x13c   : > { %4955 = vmatprep.mubr.f32.mxu1 %v1855_v22 }
 0x13d   : > { %5273 = vmatmul.mubr.f32.gmra.mrb[18].mxu0 %v3383_v14 }
 0x13e   : > { %5275 = vmatprep.mubr.f32.mxu0 %v6817_v38  ;;  %v1865_v38 = vsel %vm463_vm0, %v1863_v16, %v1864_v18 }
 0x13f   : > { %4956 = vmatmul.mubr.f32.gmra.mrb[20].mxu1 %v1857_v12 }
 0x140   : > { %4958 = vmatprep.mubr.f32.mxu1 %v1860_v47 }
 0x141   : > { %5276 = vmatmul.mubr.f32.gmra.mrb[20].mxu0 %v3388_v50 }
 0x142   : > { %5278 = vmatprep.mubr.f32.mxu0 %v6840_v15  ;;  %v3402_v15 = vrot.slane %v7242_v7, 6  ;;  %v1877_v7 = vsel %vm463_vm0, %v7652_v20, %v1876_v34 }
 0x143   : > { %4959 = vmatmul.mubr.f32.gmra.mrb[22].mxu1 %v1862_v42 }
 0x144   : > { %4961 = vmatprep.mubr.f32.mxu1 %v1865_v38  ;;  %v3403_v8 = vsel %vm1043_vm1, %v6946_v61, %v3402_v15 }
 0x145   : > { %5279 = vmatmul.mubr.f32.gmra.mrb[22].mxu0 %v3393_v5 }
 0x146   : > { %5281 = vmatprep.mubr.f32.mxu0 %v6859_v30  ;;  %v3407_v30 = vrot.slane %v7251_v60, 6  ;;  %v7654_v60 = vld [vmem:[#allocation33_spill] sm:$0xff] }
 0x147   : > { %4962 = vmatmul.mubr.f32.gmra.mrb[24].mxu1 %v1867_v25 }
 0x148   : > { %4964 = vmatprep.mubr.f32.mxu1 %v7209_v23  ;;  %v5917_v23 = vld [vmem:[#allocation2 + $0x1c0] sm:$0x3f]  ;;  %v3408_v40 = vsel %vm1043_vm1, %v6946_v61, %v3407_v30 }
 0x149   : > { %5282 = vmatmul.mubr.f32.gmra.mrb[24].mxu0 %v3398_v41  ;;  %v1881_v2 = vrot.slane %v5917_v23, 3 }
 0x14a   : > { %5284 = vmatprep.mubr.f32.mxu0 %v6946_v61 }
 0x14b   : > { %4965 = vmatmul.mubr.f32.gmra.mrb[26].mxu1 %v1872_v4  ;;  %v1882_v21 = vsel %vm463_vm0, %v7654_v60, %v1881_v2 }
 0x14c   : > { %4967 = vmatprep.mubr.f32.mxu1 %v7226_v33  ;;  %v3413_v33 = vsel %vm1043_vm1, %v6946_v61, %v3412_v11 }
 0x14d   : > { %5285 = vmatmul.mubr.f32.gmra.mrb[26].mxu0 %v3403_v8 }
 0x14e   : > { %5287 = vmatprep.mubr.f32.mxu0 %v6946_v61 }
 0x14f   : > { %4968 = vmatmul.mubr.f32.gmra.mrb[28].mxu1 %v1877_v7 }
 0x150   : > { %4970 = vmatprep.mubr.f32.mxu1 %v7653_v26 }
 0x151   : > { %5288 = vmatmul.mubr.f32.gmra.mrb[28].mxu0 %v3408_v40 }
 0x152   : > { %5290 = vmatprep.mubr.f32.mxu0 %v6946_v61 }
 0x153   : > { %4971 = vmatmul.mubr.f32.gmra.mrb[30].mxu1 %v1882_v21 }
 0x155   : > { %5291 = vmatmul.mubr.f32.gmra.mrb[30].mxu0 %v3413_v33 }
 0x1ca   : > { %v4847_v37 = vpop.f32.mrb[0].mxu1 }
 0x1cb   : > { %v1547_v54 = vpop.f32.mrb[1].mxu1 }
 0x1ce   : > { %v4850_v0 = vpop.f32.mrb[2].mxu1 }
 0x1cf   : > { %v1557_v32 = vpop.f32.mrb[3].mxu1 }
 0x1d2   : > { %v4853_v44 = vpop.f32.mrb[4].mxu1 }
 0x1d3   : > { %v1567_v52 = vpop.f32.mrb[5].mxu1 }
 0x1d6   : > { %v4856_v24 = vpop.f32.mrb[6].mxu1 }
 0x1d7   : > { %v1577_v59 = vpop.f32.mrb[7].mxu1 }
 0x1da   : > { %v4859_v46 = vpop.f32.mrb[8].mxu1 }
 0x1db   : > { %v1587_v63 = vpop.f32.mrb[9].mxu1 }
 0x1de   : > { %v4862_v39 = vpop.f32.mrb[10].mxu1 }
 0x1df   : > { %v1597_v48 = vpop.f32.mrb[11].mxu1 }
 0x1e2   : > { %v7399_v58 = vpop.f32.mrb[12].mxu1 }
 0x1e3   : > { %v7401_v31 = vpop.f32.mrb[13].mxu1 }
 0x1e6   : > { %v7403_v61 = vpop.f32.mrb[14].mxu1 }
 0x1e7   : > { %v7405_v6 = vpop.f32.mrb[15].mxu1 }
 0x1ec   : > { %v5247_v13 = vpop.f32.mrb[0].mxu0 }
 0x1ed   : > { %v5597_v19 = vadd.f32 %v5247_v13, %v4847_v37  ;;  %v3512_v55 = vpop.f32.mrb[1].mxu0 }
 0x1ee   : > { %v5598_v29 = vadd.f32 %v3512_v55, %v1547_v54 }
 0x1ef   : > { %v3711_v36 = vadd.f32 %v5597_v19, %v7410_v43 }
 0x1f0   : > { %v3710_v49 = vadd.f32 %v5598_v29, %v7410_v43  ;;  %v5250_v51 = vpop.f32.mrb[2].mxu0 }
 0x1f1   : > { %v3743_v62 = vmax.f32 %v3711_v36, 0.0  ;;  %v5599_v28 = vadd.f32 %v5250_v51, %v4850_v0  ;;  %v3522_v14 = vpop.f32.mrb[3].mxu0 }
 0x1f2   : > { %v3742_v22 = vmax.f32 %v3710_v49, 0.0  ;;  %v5600_v53 = vadd.f32 %v3522_v14, %v1557_v32 }
 0x1f3   : > { %3775 = vst [vmem:[%s7418_s29 + $0x8] sm:$0xff] %v3743_v62  ;;  %v3713_v17 = vadd.f32 %v5599_v28, %v7410_v43 }
 0x1f4   : > { %3774 = vst [vmem:[%s7418_s29] sm:$0xff] %v3742_v22  ;;  %v3712_v12 = vadd.f32 %v5600_v53, %v7410_v43  ;;  %v5253_v50 = vpop.f32.mrb[4].mxu0 }
 0x1f5   : > { %v3745_v27 = vmax.f32 %v3713_v17, 0.0  ;;  %v5601_v56 = vadd.f32 %v5253_v50, %v4853_v44  ;;  %v3532_v47 = vpop.f32.mrb[5].mxu0 }
 0x1f6   : > { %v3744_v57 = vmax.f32 %v3712_v12, 0.0  ;;  %v5602_v16 = vadd.f32 %v3532_v47, %v1567_v52 }
 0x1f7   : > { %3777 = vst [vmem:[%s7418_s29 + $0x18] sm:$0xff] %v3745_v27  ;;  %v3715_v18 = vadd.f32 %v5601_v56, %v7410_v43 }
 0x1f8   : > { %3776 = vst [vmem:[%s7418_s29 + $0x10] sm:$0xff] %v3744_v57  ;;  %v3714_v42 = vadd.f32 %v5602_v16, %v7410_v43  ;;  %v5256_v35 = vpop.f32.mrb[6].mxu0 }
 0x1f9   : > { %v3747_v3 = vmax.f32 %v3715_v18, 0.0  ;;  %v5603_v5 = vadd.f32 %v5256_v35, %v4856_v24  ;;  %v3542_v38 = vpop.f32.mrb[7].mxu0 }
 0x1fa   : > { %v3746_v9 = vmax.f32 %v3714_v42, 0.0  ;;  %v5604_v25 = vadd.f32 %v3542_v38, %v1577_v59 }
 0x1fb   : > { %3779 = vst [vmem:[%s7418_s29 + $0x28] sm:$0xff] %v3747_v3  ;;  %v3717_v10 = vadd.f32 %v5603_v5, %v7410_v43 }
 0x1fc   : > { %3778 = vst [vmem:[%s7418_s29 + $0x20] sm:$0xff] %v3746_v9  ;;  %v3716_v45 = vadd.f32 %v5604_v25, %v7410_v43  ;;  %v5259_v41 = vpop.f32.mrb[8].mxu0 }
 0x1fd   : > { %v3749_v15 = vmax.f32 %v3717_v10, 0.0  ;;  %v5605_v4 = vadd.f32 %v5259_v41, %v4859_v46  ;;  %v3552_v1 = vpop.f32.mrb[9].mxu0 }
 0x1fe   : > { %v3748_v34 = vmax.f32 %v3716_v45, 0.0  ;;  %v5606_v8 = vadd.f32 %v3552_v1, %v1587_v63 }
 0x1ff   : > { %3781 = vst [vmem:[%s7418_s29 + $0x38] sm:$0xff] %v3749_v15  ;;  %v3719_v30 = vadd.f32 %v5605_v4, %v7410_v43 }
 0x200   : > { %3780 = vst [vmem:[%s7418_s29 + $0x30] sm:$0xff] %v3748_v34  ;;  %v3718_v20 = vadd.f32 %v5606_v8, %v7410_v43  ;;  %v5262_v7 = vpop.f32.mrb[10].mxu0 }
 0x201   : > { %v3751_v23 = vmax.f32 %v3719_v30, 0.0  ;;  %v5607_v2 = vadd.f32 %v5262_v7, %v4862_v39  ;;  %v3562_v40 = vpop.f32.mrb[11].mxu0 }
 0x202   : > { %v3750_v11 = vmax.f32 %v3718_v20, 0.0  ;;  %v5608_v26 = vadd.f32 %v3562_v40, %v1597_v48 }
 0x203   : > { %3783 = vst [vmem:[%s7418_s29 + $0x48] sm:$0xff] %v3751_v23  ;;  %v3721_v60 = vadd.f32 %v5607_v2, %v7410_v43 }
 0x204   : > { %3782 = vst [vmem:[%s7418_s29 + $0x40] sm:$0xff] %v3750_v11  ;;  %v3720_v21 = vadd.f32 %v5608_v26, %v7410_v43  ;;  %v5265_v33 = vpop.f32.mrb[12].mxu0 }
 0x205   : > { %v3753_v37 = vmax.f32 %v3721_v60, 0.0  ;;  %v5609_v54 = vadd.f32 %v5265_v33, %v7399_v58  ;;  %v3572_v0 = vpop.f32.mrb[13].mxu0 }
 0x206   : > { %v3752_v32 = vmax.f32 %v3720_v21, 0.0  ;;  %v5610_v44 = vadd.f32 %v3572_v0, %v7401_v31 }
 0x207   : > { %3785 = vst [vmem:[%s7418_s29 + $0x58] sm:$0xff] %v3753_v37  ;;  %v3723_v52 = vadd.f32 %v5609_v54, %v7410_v43 }
 0x208   : > { %3784 = vst [vmem:[%s7418_s29 + $0x50] sm:$0xff] %v3752_v32  ;;  %v3722_v24 = vadd.f32 %v5610_v44, %v7410_v43  ;;  %v5268_v59 = vpop.f32.mrb[14].mxu0 }
 0x209   : > { %v3755_v46 = vmax.f32 %v3723_v52, 0.0  ;;  %v5611_v63 = vadd.f32 %v5268_v59, %v7403_v61  ;;  %v3582_v39 = vpop.f32.mrb[15].mxu0 }
 0x20a   : > { %v3754_v48 = vmax.f32 %v3722_v24, 0.0  ;;  %v5612_v58 = vadd.f32 %v3582_v39, %v7405_v6  ;;  %v4951_v31 = vpop.f32.mrb[16].mxu1 }
 0x20b   : > { %3787 = vst [vmem:[%s7418_s29 + $0x68] sm:$0xff] %v3755_v46  ;;  %v3725_v13 = vadd.f32 %v5611_v63, %v7410_v43  ;;  %v2061_v29 = vpop.f32.mrb[17].mxu1 }
 0x20c   : > { %3786 = vst [vmem:[%s7418_s29 + $0x60] sm:$0xff] %v3754_v48  ;;  %v3724_v19 = vadd.f32 %v5612_v58, %v7410_v43  ;;  %v5271_v55 = vpop.f32.mrb[16].mxu0 }
 0x20d   : > { %v3757_v36 = vmax.f32 %v3725_v13, 0.0  ;;  %v5613_v49 = vadd.f32 %v5271_v55, %v4951_v31  ;;  %v3592_v51 = vpop.f32.mrb[17].mxu0 }
 0x20e   : > { %v3756_v61 = vmax.f32 %v3724_v19, 0.0  ;;  %v5614_v62 = vadd.f32 %v3592_v51, %v2061_v29  ;;  %v4954_v28 = vpop.f32.mrb[18].mxu1 }
 0x20f   : > { %3789 = vst [vmem:[%s7418_s29 + $0x78] sm:$0xff] %v3757_v36  ;;  %v3727_v6 = vadd.f32 %v5613_v49, %v7410_v43  ;;  %v2071_v53 = vpop.f32.mrb[19].mxu1 }
 0x210   : > { %3788 = vst [vmem:[%s7418_s29 + $0x70] sm:$0xff] %v3756_v61  ;;  %v3726_v14 = vadd.f32 %v5614_v62, %v7410_v43  ;;  %v5274_v22 = vpop.f32.mrb[18].mxu0 }
 0x211   : > { %v3759_v17 = vmax.f32 %v3727_v6, 0.0  ;;  %v5615_v12 = vadd.f32 %v5274_v22, %v4954_v28  ;;  %v3602_v50 = vpop.f32.mrb[19].mxu0 }
 0x212   : > { %v3758_v27 = vmax.f32 %v3726_v14, 0.0  ;;  %v5616_v56 = vadd.f32 %v3602_v50, %v2071_v53  ;;  %v4957_v57 = vpop.f32.mrb[20].mxu1 }
 0x213   : > { %3791 = vst [vmem:[%s7418_s29 + $0x88] sm:$0xff] %v3759_v17  ;;  %v3729_v47 = vadd.f32 %v5615_v12, %v7410_v43  ;;  %v2081_v42 = vpop.f32.mrb[21].mxu1 }
 0x214   : > { %3790 = vst [vmem:[%s7418_s29 + $0x80] sm:$0xff] %v3758_v27  ;;  %v3728_v16 = vadd.f32 %v5616_v56, %v7410_v43  ;;  %v5277_v18 = vpop.f32.mrb[20].mxu0 }
 0x215   : > { %v3761_v35 = vmax.f32 %v3729_v47, 0.0  ;;  %v5617_v3 = vadd.f32 %v5277_v18, %v4957_v57  ;;  %v3612_v5 = vpop.f32.mrb[21].mxu0 }
 0x216   : > { %v3760_v38 = vmax.f32 %v3728_v16, 0.0  ;;  %v5618_v9 = vadd.f32 %v3612_v5, %v2081_v42  ;;  %v4960_v10 = vpop.f32.mrb[22].mxu1 }
 0x217   : > { %3793 = vst [vmem:[%s7418_s29 + $0x98] sm:$0xff] %v3761_v35  ;;  %v3731_v25 = vadd.f32 %v5617_v3, %v7410_v43  ;;  %v2091_v15 = vpop.f32.mrb[23].mxu1 }
 0x218   : > { %3792 = vst [vmem:[%s7418_s29 + $0x90] sm:$0xff] %v3760_v38  ;;  %v3730_v45 = vadd.f32 %v5618_v9, %v7410_v43  ;;  %v5280_v41 = vpop.f32.mrb[22].mxu0 }
 0x219   : > { %v3763_v4 = vmax.f32 %v3731_v25, 0.0  ;;  %v5619_v1 = vadd.f32 %v5280_v41, %v4960_v10  ;;  %v3622_v34 = vpop.f32.mrb[23].mxu0 }
 0x21a   : > { %v3762_v8 = vmax.f32 %v3730_v45, 0.0  ;;  %v5620_v30 = vadd.f32 %v3622_v34, %v2091_v15  ;;  %v4963_v7 = vpop.f32.mrb[24].mxu1 }
 0x21b   : > { %3795 = vst [vmem:[%s7418_s29 + $0xa8] sm:$0xff] %v3763_v4  ;;  %v3733_v20 = vadd.f32 %v5619_v1, %v7410_v43  ;;  %v2101_v40 = vpop.f32.mrb[25].mxu1 }
 0x21c   : > { %3794 = vst [vmem:[%s7418_s29 + $0xa0] sm:$0xff] %v3762_v8  ;;  %v3732_v23 = vadd.f32 %v5620_v30, %v7410_v43  ;;  %v5283_v2 = vpop.f32.mrb[24].mxu0 }
 0x21d   : > { %v3765_v11 = vmax.f32 %v3733_v20, 0.0  ;;  %v5621_v26 = vadd.f32 %v5283_v2, %v4963_v7  ;;  %v3632_v60 = vpop.f32.mrb[25].mxu0 }
 0x21e   : > { %v3764_v21 = vmax.f32 %v3732_v23, 0.0  ;;  %v5622_v33 = vadd.f32 %v3632_v60, %v2101_v40  ;;  %v4966_v54 = vpop.f32.mrb[26].mxu1 }
 0x21f   : > { %3797 = vst [vmem:[%s7418_s29 + $0xb8] sm:$0xff] %v3765_v11  ;;  %v3735_v37 = vadd.f32 %v5621_v26, %v7410_v43  ;;  %v2111_v44 = vpop.f32.mrb[27].mxu1 }
 0x220   : > { %3796 = vst [vmem:[%s7418_s29 + $0xb0] sm:$0xff] %v3764_v21  ;;  %v3734_v0 = vadd.f32 %v5622_v33, %v7410_v43  ;;  %v5286_v32 = vpop.f32.mrb[26].mxu0 }
 0x221   : > { %v3767_v52 = vmax.f32 %v3735_v37, 0.0  ;;  %v5623_v24 = vadd.f32 %v5286_v32, %v4966_v54  ;;  %v3642_v59 = vpop.f32.mrb[27].mxu0 }
 0x222   : > { %v3766_v46 = vmax.f32 %v3734_v0, 0.0  ;;  %v5624_v63 = vadd.f32 %v3642_v59, %v2111_v44  ;;  %v4969_v48 = vpop.f32.mrb[28].mxu1 }
 0x223   : > { %3799 = vst [vmem:[%s7418_s29 + $0xc8] sm:$0xff] %v3767_v52  ;;  %v3737_v39 = vadd.f32 %v5623_v24, %v7410_v43  ;;  %v2121_v31 = vpop.f32.mrb[29].mxu1 }
 0x224   : > { %3798 = vst [vmem:[%s7418_s29 + $0xc0] sm:$0xff] %v3766_v46  ;;  %v3736_v58 = vadd.f32 %v5624_v63, %v7410_v43  ;;  %v5289_v13 = vpop.f32.mrb[28].mxu0 }
 0x225   : > { %v3769_v19 = vmax.f32 %v3737_v39, 0.0  ;;  %v5625_v55 = vadd.f32 %v5289_v13, %v4969_v48  ;;  %v3652_v29 = vpop.f32.mrb[29].mxu0 }
 0x226   : > { %v3768_v36 = vmax.f32 %v3736_v58, 0.0  ;;  %v5626_v49 = vadd.f32 %v3652_v29, %v2121_v31  ;;  %v4972_v61 = vpop.f32.mrb[30].mxu1 }
 0x227   : > { %3801 = vst [vmem:[%s7418_s29 + $0xd8] sm:$0xff] %v3769_v19  ;;  %v3739_v51 = vadd.f32 %v5625_v55, %v7410_v43  ;;  %v2131_v28 = vpop.f32.mrb[31].mxu1 }
 0x228   : > { %3800 = vst [vmem:[%s7418_s29 + $0xd0] sm:$0xff] %v3768_v36  ;;  %v3738_v62 = vadd.f32 %v5626_v49, %v7410_v43  ;;  %v5292_v6 = vpop.f32.mrb[30].mxu0 }
 0x229   : > { %v3771_v14 = vmax.f32 %v3739_v51, 0.0  ;;  %v5627_v22 = vadd.f32 %v5292_v6, %v4972_v61  ;;  %v3662_v53 = vpop.f32.mrb[31].mxu0 }
 0x22a   : > { %v3770_v17 = vmax.f32 %v3738_v62, 0.0  ;;  %v5628_v12 = vadd.f32 %v3662_v53, %v2131_v28 }
 0x22b   : > { %3803 = vst [vmem:[%s7418_s29 + $0xe8] sm:$0xff] %v3771_v14  ;;  %v3741_v50 = vadd.f32 %v5627_v22, %v7410_v43 }
 0x22c   : > { %3802 = vst [vmem:[%s7418_s29 + $0xe0] sm:$0xff] %v3770_v17  ;;  %v3740_v27 = vadd.f32 %v5628_v12, %v7410_v43 }
 0x22d   : > { %v3773_v56 = vmax.f32 %v3741_v50, 0.0 }
 0x22e   : > { %v3772_v47 = vmax.f32 %v3740_v27, 0.0 }
 0x22f   : > { %3805 = vst [vmem:[%s7418_s29 + $0xf8] sm:$0xff] %v3773_v56 }
 0x230   : > { %3804 = vst [vmem:[%s7418_s29 + $0xf0] sm:$0xff] %v3772_v47 }
 0x231 PF: > { %s13_s14 = sadd.s32 1, %s5940_s14   ;;  %s7655_s12 = smov %s5936_s13 }
 0x232   : > { %p10_p5 = scmp.ge.s32.totalorder %s13_s14, 4   ;;  %s7656_s13 = smov %s7658_s15 }
 0x234   :  { %12 = sbr.rel (!%p10_p5) target bundleno = 2 (0x2), region = 78 }

// kernel: inception_forward.6
= control target key start
LH: loop header
LB: loop body
LE: loop exit
PB: predicated region body
PF: predicated region fallthrough
CT: control target
= control target key end

     0   :  { %s5957_s12 = smov 0   ;;  %s5959_s13 = smov 0   ;;  %s7522_s0 = inlined_call_operand.vmem [shape: f32[2,16,16,128], index: 0, kind: input, shape index: {}]   ;;  %s7523_s1 = inlined_call_operand.vmem [shape: f32[3,3,128,128], index: 1, kind: input, shape index: {}]   ;;  %s7524_s2 = inlined_call_operand.vmem [shape: f32[1,1,128], index: 2, kind: input, shape index: {}]   ;;  %s7525_s3 = inlined_call_operand.vmem [shape: f32[2,16,16,128], index: 3, kind: output, shape index: {}]  }
   0x1   :  { %s5961_s14 = smov 0  }
   0x2 LB: > { %s25_s15 = sadd.s32 1, %s5930_s13  ;;  %p3901_p0 = scmp.ge.s32.totalorder %s5934_s14, 1  ;;  %s5934_s14 = sphi %s5961_s14, %s13_s14   ;;  %s5930_s13 = sphi %s5959_s13, %s7685_s13   ;;  %s5926_s12 = sphi %s5957_s12, %s7684_s12  }
   0x3   : > { %p27_p1 = scmp.ge.s32.totalorder %s25_s15, 2  ;;  %p151_p2 = scmp.lt.s32.totalorder %s5934_s14, 3 }
   0x5   : > { %s7687_s15 = smov (%p27_p1, %s25_s15), 0  ;;  %p152_p3 = pnand %p3901_p0, %p151_p2 }
   0x7   : > { %155 = sbr.rel (%p152_p3) target bundleno = 560 (0x230), region = 32 }
   0xe   : > { %v3906_v0 = vld [vmem:[%s7523_s1 + $0x80] sm:$0xff]  ;;  %v3907_v1 = vld [vmem:[%s7523_s1 + $0x88] sm:$0xff]  ;;  %vm457_vm0 = vcmask 1045504   ;;  %p180_p4 = scmp.lt.s32.totalorder %s5926_s12, 1  ;;  %v3908_v5 = vld [vmem:[%s7523_s1 + $0x90] sm:$0xff]  ;;  %v5936_v7 = vmov 0.0  }
   0xf   : > { %v4002_v2 = vld [vmem:[%s7523_s1 + $0x200] sm:$0xff]  ;;  %v5987_v3 = vpack.c.bf16 %v3907_v1, %v3906_v0  ;;  %v4003_v4 = vld [vmem:[%s7523_s1 + $0x208] sm:$0xff]  ;;  %v3909_v6 = vld [vmem:[%s7523_s1 + $0x98] sm:$0xff]  ;;  %200 = vst [vmem:[#allocation2] sm:$0xff] %v5936_v7  ;;  %v5998_v8 = vrot.slane %v5936_v7, 2  ;;  %vm1037_vm1 = vcmask 1043456  }
  0x10   : > { %202 = vst [vmem:[#allocation2 + $0x10] sm:$0xf] %v5936_v7  ;;  %205 = vst [vmem:[#allocation2 + $0x28] sm:$0xf] %v5936_v7  ;;  %v6000_v9 = vpack.c.bf16 %v4003_v4, %v4002_v2  ;;  %v5291_v10 = vpack.c.bf16 %v3909_v6, %v3908_v5  ;;  %v4004_v11 = vld [vmem:[%s7523_s1 + $0x210] sm:$0xff]  ;;  %v4005_v12 = vld [vmem:[%s7523_s1 + $0x218] sm:$0xff] }
  0x11   : > { %206 = vst [vmem:[#allocation2 + $0x30] sm:$0xff] %v5936_v7  ;;  %207 = vst [vmem:[#allocation2 + $0x38] sm:$0xff] %v5936_v7  ;;  %v3910_v13 = vld [vmem:[%s7523_s1 + $0xa0] sm:$0xff]  ;;  %s7689_s12 = smov (!%p180_p4, %s5926_s12), 1  ;;  %5288 = vmatprep.subr.bf16.mxu1 %v5987_v3  ;;  %v6017_v14 = vpack.c.bf16 %v4005_v12, %v4004_v11  ;;  %v3911_v15 = vld [vmem:[%s7523_s1 + $0xa8] sm:$0xff]  ;;  %4599 = vmatprep.mubr.f32.mxu1 %v5998_v8 }
  0x12   : > { %208 = vst [vmem:[#allocation2 + $0x40] sm:$0xf] %v5936_v7  ;;  %209 = vst [vmem:[#allocation2 + $0x48] sm:$0xff] %v5936_v7  ;;  %v4006_v16 = vld [vmem:[%s7523_s1 + $0x220] sm:$0xff]  ;;  %v4007_v17 = vld [vmem:[%s7523_s1 + $0x228] sm:$0xff]  ;;  %5416 = vmatprep.subr.bf16.mxu0 %v6000_v9  ;;  %5290 = vmatpush3.bf16.msra.mxu1 %v5987_v3  ;;  %s4133_s17 = sshll.u32 %s7689_s12, 8  ;;  %v5295_v18 = vpack.c.bf16 %v3911_v15, %v3910_v13 }
  0x13   : > { %210 = vst [vmem:[#allocation2 + $0x50] sm:$0xff] %v5936_v7  ;;  %211 = vst [vmem:[#allocation2 + $0x58] sm:$0xf] %v5936_v7  ;;  %5418 = vmatpush3.bf16.msra.mxu0 %v6000_v9  ;;  %5292 = vmatprep.subr.bf16.mxu1 %v5291_v10  ;;  %v6033_v19 = vpack.c.bf16 %v4007_v17, %v4006_v16  ;;  %v3912_v20 = vld [vmem:[%s7523_s1 + $0xb0] sm:$0xff]  ;;  %v3913_v21 = vld [vmem:[%s7523_s1 + $0xb8] sm:$0xff]  ;;  %s6053_s28 = scalar_lea.vmem %s7522_s0, %s4133_s17  ;;  %s7444_s29 = scalar_lea.vmem %s7525_s3, %s4133_s17 }
  0x14   : > { %212 = vst [vmem:[#allocation2 + $0x60] sm:$0xff] %v5936_v7  ;;  %213 = vst [vmem:[#allocation2 + $0x68] sm:$0xff] %v5936_v7  ;;  %5420 = vmatprep.subr.bf16.mxu0 %v6017_v14  ;;  %v4008_v22 = vld [vmem:[%s7523_s1 + $0x230] sm:$0xff]  ;;  %v4009_v23 = vld [vmem:[%s7523_s1 + $0x238] sm:$0xff]  ;;  %v5299_v24 = vpack.c.bf16 %v3913_v21, %v3912_v20 }
  0x15   : > { %214 = vst [vmem:[#allocation2 + $0x70] sm:$0xf] %v5936_v7  ;;  %215 = vst [vmem:[#allocation2 + $0x78] sm:$0xff] %v5936_v7  ;;  %v6057_v25 = vpack.c.bf16 %v4009_v23, %v4008_v22  ;;  %v3914_v26 = vld [vmem:[%s7523_s1 + $0xc0] sm:$0xff]  ;;  %v3915_v27 = vld [vmem:[%s7523_s1 + $0xc8] sm:$0xff] }
  0x16   : > { %216 = vst [vmem:[#allocation2 + $0x80] sm:$0xff] %v5936_v7  ;;  %217 = vst [vmem:[#allocation2 + $0x88] sm:$0xf] %v5936_v7  ;;  %5294 = vmatpush3.bf16.msra.mxu1 %v5291_v10  ;;  %v260_v28 = vld [vmem:[%s6053_s28] sm:$0xff]  ;;  %v4011_v30 = vld [vmem:[%s7523_s1 + $0x248] sm:$0xff]  ;;  %v5303_v32 = vpack.c.bf16 %v3915_v27, %v3914_v26 }
  0x17   : > { %218 = vst [vmem:[#allocation2 + $0x90] sm:$0xff] %v5936_v7  ;;  %219 = vst [vmem:[#allocation2 + $0x98] sm:$0xff] %v5936_v7  ;;  %5422 = vmatpush3.bf16.msra.mxu0 %v6017_v14  ;;  %5296 = vmatprep.subr.bf16.mxu1 %v5295_v18  ;;  %v4010_v29 = vld [vmem:[%s7523_s1 + $0x240] sm:$0xff]  ;;  %v261_v31 = vld [vmem:[%s6053_s28 + $0x8] sm:$0xff] }
  0x18   : > { %220 = vst [vmem:[#allocation2 + $0xa0] sm:$0xf] %v5936_v7  ;;  %221 = vst [vmem:[#allocation2 + $0xa8] sm:$0xff] %v5936_v7  ;;  %5424 = vmatprep.subr.bf16.mxu0 %v6033_v19  ;;  %v262_v33 = vld [vmem:[%s6053_s28 + $0x10] sm:$0xff]  ;;  %v263_v34 = vld [vmem:[%s6053_s28 + $0x18] sm:$0xff]  ;;  %v6077_v35 = vpack.c.bf16 %v4011_v30, %v4010_v29 }
  0x19   : > { %222 = vst [vmem:[#allocation2 + $0xb0] sm:$0xff] %v5936_v7  ;;  %223 = vst [vmem:[#allocation2 + $0xb8] sm:$0xf] %v5936_v7  ;;  %v3916_v36 = vld [vmem:[%s7523_s1 + $0xd0] sm:$0xff]  ;;  %v3917_v37 = vld [vmem:[%s7523_s1 + $0xd8] sm:$0xff] }
  0x1a   : > { %224 = vst [vmem:[#allocation2 + $0xc0] sm:$0xff] %v5936_v7  ;;  %225 = vst [vmem:[#allocation2 + $0xc8] sm:$0xff] %v5936_v7  ;;  %5298 = vmatpush3.bf16.msra.mxu1 %v5295_v18  ;;  %v264_v38 = vld [vmem:[%s6053_s28 + $0x20] sm:$0xff]  ;;  %v4012_v39 = vld [vmem:[%s7523_s1 + $0x250] sm:$0xff]  ;;  %v5307_v43 = vpack.c.bf16 %v3917_v37, %v3916_v36 }
  0x1b   : > { %226 = vst [vmem:[#allocation2 + $0xd0] sm:$0xf] %v5936_v7  ;;  %227 = vst [vmem:[#allocation2 + $0xd8] sm:$0xff] %v5936_v7  ;;  %5426 = vmatpush3.bf16.msra.mxu0 %v6033_v19  ;;  %5300 = vmatprep.subr.bf16.mxu1 %v5299_v24  ;;  %v4013_v40 = vld [vmem:[%s7523_s1 + $0x258] sm:$0xff]  ;;  %v265_v41 = vld [vmem:[%s6053_s28 + $0x28] sm:$0xff] }
  0x1c   : > { %228 = vst [vmem:[#allocation2 + $0xe0] sm:$0xff] %v5936_v7  ;;  %229 = vst [vmem:[#allocation2 + $0xe8] sm:$0xf] %v5936_v7  ;;  %5428 = vmatprep.subr.bf16.mxu0 %v6057_v25  ;;  %v266_v42 = vld [vmem:[%s6053_s28 + $0x30] sm:$0xff]  ;;  %v3918_v44 = vld [vmem:[%s7523_s1 + $0xe0] sm:$0xff]  ;;  %v6103_v47 = vpack.c.bf16 %v4013_v40, %v4012_v39 }
  0x1d   : > { %230 = vst [vmem:[#allocation2 + $0xf0] sm:$0xff] %v5936_v7  ;;  %231 = vst [vmem:[#allocation2 + $0xf8] sm:$0xff] %v5936_v7  ;;  %v3919_v45 = vld [vmem:[%s7523_s1 + $0xe8] sm:$0xff]  ;;  %v267_v46 = vld [vmem:[%s6053_s28 + $0x38] sm:$0xff] }
  0x1e   : > { %232 = vst [vmem:[#allocation2 + $0x100] sm:$0xf] %v5936_v7  ;;  %233 = vst [vmem:[#allocation2 + $0x108] sm:$0xff] %v5936_v7  ;;  %5302 = vmatpush3.bf16.msra.mxu1 %v5299_v24  ;;  %v268_v49 = vld [vmem:[%s6053_s28 + $0x40] sm:$0xff]  ;;  %v269_v50 = vld [vmem:[%s6053_s28 + $0x48] sm:$0xff]  ;;  %v5311_v56 = vpack.c.bf16 %v3919_v45, %v3918_v44 }
  0x1f   : > { %234 = vst [vmem:[#allocation2 + $0x110] sm:$0xff] %v5936_v7  ;;  %235 = vst [vmem:[#allocation2 + $0x118] sm:$0xf] %v5936_v7  ;;  %5430 = vmatpush3.bf16.msra.mxu0 %v6057_v25  ;;  %5304 = vmatprep.subr.bf16.mxu1 %v5303_v32  ;;  %v4014_v51 = vld [vmem:[%s7523_s1 + $0x260] sm:$0xff]  ;;  %v4015_v52 = vld [vmem:[%s7523_s1 + $0x268] sm:$0xff] }
  0x20   : > { %236 = vst [vmem:[#allocation2 + $0x120] sm:$0xff] %v5936_v7  ;;  %237 = vst [vmem:[#allocation2 + $0x128] sm:$0xff] %v5936_v7  ;;  %5432 = vmatprep.subr.bf16.mxu0 %v6077_v35  ;;  %v6123_v57 = vpack.c.bf16 %v4015_v52, %v4014_v51  ;;  %v3920_v58 = vld [vmem:[%s7523_s1 + $0xf0] sm:$0xff]  ;;  %v3921_v59 = vld [vmem:[%s7523_s1 + $0xf8] sm:$0xff] }
  0x21   : > { %238 = vst [vmem:[#allocation2 + $0x130] sm:$0xf] %v5936_v7  ;;  %239 = vst [vmem:[#allocation2 + $0x138] sm:$0xff] %v5936_v7  ;;  %v4016_v61 = vld [vmem:[%s7523_s1 + $0x270] sm:$0xff]  ;;  %v4017_v62 = vld [vmem:[%s7523_s1 + $0x278] sm:$0xff]  ;;  %v5315_v63 = vpack.c.bf16 %v3921_v59, %v3920_v58 }
  0x22   : > { %240 = vst [vmem:[#allocation2 + $0x140] sm:$0xff] %v5936_v7  ;;  %241 = vst [vmem:[#allocation2 + $0x148] sm:$0xf] %v5936_v7  ;;  %5306 = vmatpush3.bf16.msra.mxu1 %v5303_v32  ;;  %v330_v0 = vld [vmem:[#allocation2 + $0x10] sm:$0xf]  ;;  %v6145_v2 = vpack.c.bf16 %v4017_v62, %v4016_v61  ;;  %v376_v3 = vld [vmem:[%s7523_s1] sm:$0xff] }
  0x23   : > { %242 = vst [vmem:[#allocation2 + $0x150] sm:$0xff] %v5936_v7  ;;  %243 = vst [vmem:[#allocation2 + $0x158] sm:$0xff] %v5936_v7  ;;  %5434 = vmatpush3.bf16.msra.mxu0 %v6077_v35  ;;  %5308 = vmatprep.subr.bf16.mxu1 %v5307_v43  ;;  %v270_v1 = vld [vmem:[%s6053_s28 + $0x50] sm:$0xff]  ;;  %v377_v4 = vld [vmem:[%s7523_s1 + $0x8] sm:$0xff]  ;;  %v461_v11 = vrot.slane %v330_v0, 2 }
  0x24   : > { %244 = vst [vmem:[#allocation2 + $0x160] sm:$0xf] %v5936_v7  ;;  %245 = vst [vmem:[#allocation2 + $0x168] sm:$0xff] %v5936_v7  ;;  %5436 = vmatprep.subr.bf16.mxu0 %v6103_v47  ;;  %v4018_v6 = vld [vmem:[%s7523_s1 + $0x280] sm:$0xff]  ;;  %v271_v10 = vld [vmem:[%s6053_s28 + $0x58] sm:$0xff]  ;;  %v5319_v16 = vpack.c.bf16 %v377_v4, %v376_v3 }
  0x25   : > { %246 = vst [vmem:[#allocation2 + $0x170] sm:$0xff] %v5936_v7  ;;  %247 = vst [vmem:[#allocation2 + $0x178] sm:$0xf] %v5936_v7  ;;  %v272_v15 = vld [vmem:[%s6053_s28 + $0x60] sm:$0xff]  ;;  %v333_v18 = vld [vmem:[#allocation2 + $0x28] sm:$0xf]  ;;  %v462_v32 = vsel %vm457_vm0, %v5998_v8, %v461_v11 }
  0x26   : > { %248 = vst [vmem:[#allocation2 + $0x180] sm:$0xff] %v5936_v7  ;;  %249 = vst [vmem:[#allocation2 + $0x188] sm:$0xff] %v5936_v7  ;;  %5310 = vmatpush3.bf16.msra.mxu1 %v5307_v43  ;;  %v4020_v20 = vld [vmem:[%s7523_s1 + $0x290] sm:$0xff]  ;;  %v273_v21 = vld [vmem:[%s6053_s28 + $0x68] sm:$0xff] }
  0x27   : > { %250 = vst [vmem:[#allocation2 + $0x190] sm:$0xf] %v5936_v7  ;;  %251 = vst [vmem:[#allocation2 + $0x198] sm:$0xff] %v5936_v7  ;;  %5438 = vmatpush3.bf16.msra.mxu0 %v6103_v47  ;;  %5312 = vmatprep.subr.bf16.mxu1 %v5311_v56  ;;  %v4021_v24 = vld [vmem:[%s7523_s1 + $0x298] sm:$0xff]  ;;  %v274_v30 = vld [vmem:[%s6053_s28 + $0x70] sm:$0xff] }
  0x28   : > { %252 = vst [vmem:[#allocation2 + $0x1a0] sm:$0xff] %v5936_v7  ;;  %253 = vst [vmem:[#allocation2 + $0x1a8] sm:$0xf] %v5936_v7  ;;  %5440 = vmatprep.subr.bf16.mxu0 %v6123_v57  ;;  %v379_v36 = vld [vmem:[%s7523_s1 + $0x18] sm:$0xff]  ;;  %v4022_v40 = vld [vmem:[%s7523_s1 + $0x2a0] sm:$0xff] }
  0x29   : > { %256 = vst [vmem:[#allocation2 + $0x1c0] sm:$0xf] %v5936_v7  ;;  %259 = vst [vmem:[#allocation2 + $0x1d8] sm:$0xf] %v5936_v7  ;;  %v4019_v7 = vld [vmem:[%s7523_s1 + $0x288] sm:$0xff]  ;;  %v276_v45 = vld [vmem:[%s6053_s28 + $0x80] sm:$0xff] }
  0x2a   : > { %7589 = vst [vmem:[#allocation3_spill] sm:$0xff] %v6000_v9  ;;  %7590 = vst [vmem:[#allocation4_spill] sm:$0xff] %v6017_v14  ;;  %5314 = vmatpush3.bf16.msra.mxu1 %v5311_v56  ;;  %v5447_v22 = vpack.c.bf16 %v4019_v7, %v4018_v6  ;;  %v4023_v51 = vld [vmem:[%s7523_s1 + $0x2a8] sm:$0xff]  ;;  %v380_v59 = vld [vmem:[%s7523_s1 + $0x20] sm:$0xff] }
  0x2b   : > { %7591 = vst [vmem:[#allocation5_spill] sm:$0xff] %v6033_v19  ;;  %7592 = vst [vmem:[#allocation6_spill] sm:$0xff] %v6057_v25  ;;  %5442 = vmatpush3.bf16.msra.mxu0 %v6123_v57  ;;  %5316 = vmatprep.subr.bf16.mxu1 %v5315_v63  ;;  %v381_v61 = vld [vmem:[%s7523_s1 + $0x28] sm:$0xff]  ;;  %v4025_v3 = vld [vmem:[%s7523_s1 + $0x2b8] sm:$0xff]  ;;  %v5455_v4 = vpack.c.bf16 %v4023_v51, %v4022_v40 }
  0x2c   : > { %293 = vst [vmem:[#allocation2 + $0x32] sm:$0xff] %v260_v28  ;;  %294 = vst [vmem:[#allocation2 + $0x3a] sm:$0xff] %v261_v31  ;;  %5444 = vmatprep.subr.bf16.mxu0 %v6145_v2  ;;  %v275_v31 = vld [vmem:[%s6053_s28 + $0x78] sm:$0xff]  ;;  %v278_v11 = vld [vmem:[%s6053_s28 + $0x90] sm:$0xff] }
  0x2d   : > { %7593 = vst [vmem:[#allocation7_spill] sm:$0xff] %v6077_v35  ;;  %295 = vst [vmem:[#allocation2 + $0x4a] sm:$0xff] %v262_v33  ;;  %v466_v33 = vrot.slane %v333_v18, 2  ;;  %v5327_v18 = vpack.c.bf16 %v381_v61, %v380_v59  ;;  %v283_v51 = vld [vmem:[%s6053_s28 + $0xb8] sm:$0xff]  ;;  %v385_v59 = vld [vmem:[%s7523_s1 + $0x48] sm:$0xff] }
  0x2e   : > { %296 = vst [vmem:[#allocation2 + $0x52] sm:$0xff] %v263_v34  ;;  %297 = vst [vmem:[#allocation2 + $0x62] sm:$0xff] %v264_v38  ;;  %5318 = vmatpush3.bf16.msra.mxu1 %v5315_v63  ;;  %v378_v34 = vld [vmem:[%s7523_s1 + $0x10] sm:$0xff]  ;;  %v284_v61 = vld [vmem:[%s6053_s28 + $0xc0] sm:$0xff] }
  0x2f   : > { %298 = vst [vmem:[#allocation2 + $0x6a] sm:$0xff] %v265_v41  ;;  %299 = vst [vmem:[#allocation2 + $0x7a] sm:$0xff] %v266_v42  ;;  %5446 = vmatpush3.bf16.msra.mxu0 %v6145_v2  ;;  %5320 = vmatprep.subr.bf16.mxu1 %v5319_v16  ;;  %v5451_v41 = vpack.c.bf16 %v4021_v24, %v4020_v20  ;;  %v467_v56 = vsel %vm457_vm0, %v5998_v8, %v466_v33  ;;  %v382_v20 = vld [vmem:[%s7523_s1 + $0x30] sm:$0xff]  ;;  %v383_v24 = vld [vmem:[%s7523_s1 + $0x38] sm:$0xff] }
  0x30   : > { %7594 = vst [vmem:[#allocation8_spill] sm:$0xff] %v6103_v47  ;;  %300 = vst [vmem:[#allocation2 + $0x82] sm:$0xff] %v267_v46  ;;  %5448 = vmatprep.subr.bf16.mxu0 %v5447_v22  ;;  %v277_v46 = vld [vmem:[%s6053_s28 + $0x88] sm:$0xff]  ;;  %v4086_v19 = vld [vmem:[%s7523_s1 + $0x320] sm:$0xff] }
  0x31   : > { %301 = vst [vmem:[#allocation2 + $0x92] sm:$0xff] %v268_v49  ;;  %302 = vst [vmem:[#allocation2 + $0x9a] sm:$0xff] %v269_v50  ;;  %4600 = vmatmul.mubr.f32.vlgmr.msra.gmra.mrb[0].mxu1 %v462_v32  ;;  %v5323_v50 = vpack.c.bf16 %v379_v36, %v378_v34  ;;  %v4027_v33 = vld [vmem:[%s7523_s1 + $0x2c8] sm:$0xff] }
  0x32   : > { %7595 = vst [vmem:[#allocation9_spill] sm:$0xff] %v6123_v57  ;;  %7596 = vst [vmem:[#allocation10_spill] sm:$0xff] %v6145_v2  ;;  %5322 = vmatpush3.bf16.msra.mxu1 %v5319_v16  ;;  %4602 = vmatprep.mubr.f32.mxu1 %v5998_v8  ;;  %v290_v2 = vld [vmem:[%s6053_s28 + $0xf0] sm:$0xff]  ;;  %v4091_v9 = vld [vmem:[%s7523_s1 + $0x348] sm:$0xff] }
  0x33   : > { %v6105_v48 = vld [vmem:[#allocation2 + $0x30] sm:$0xff]  ;;  %v6115_v53 = vld [vmem:[#allocation2 + $0x38] sm:$0xff]  ;;  %v6153_v5 = vld [vmem:[#allocation2 + $0x40] sm:$0xf]  ;;  %303 = vst [vmem:[#allocation2 + $0xaa] sm:$0xff] %v270_v1  ;;  %5324 = vmatprep.subr.bf16.mxu1 %v5323_v50 }
  0x34   : > { %v1797_v54 = vrot.slane %v6105_v48, 2  ;;  %v6119_v55 = vrot.slane %v6115_v53, 2  ;;  %v6162_v12 = vld [vmem:[#allocation2 + $0x48] sm:$0xff]  ;;  %304 = vst [vmem:[#allocation2 + $0xb2] sm:$0xff] %v271_v10  ;;  %v1800_v17 = vrot.slane %v6153_v5, 2  ;;  %305 = vst [vmem:[#allocation2 + $0xc2] sm:$0xff] %v272_v15 }
  0x35   : > { %v6164_v13 = vld [vmem:[#allocation2 + $0x50] sm:$0xff]  ;;  %v6174_v23 = vld [vmem:[#allocation2 + $0x58] sm:$0xf]  ;;  %v6179_v26 = vld [vmem:[#allocation2 + $0x60] sm:$0xff]  ;;  %306 = vst [vmem:[#allocation2 + $0xca] sm:$0xff] %v273_v21  ;;  %v1802_v27 = vrot.slane %v6162_v12, 2  ;;  %4603 = vmatmul.mubr.f32.gmra.mrb[2].mxu1 %v467_v56 }
  0x36   : > { %v6133_v60 = vsel %vm457_vm0, %v1797_v54, %v6119_v55  ;;  %v6183_v28 = vrot.slane %v6164_v13, 2  ;;  %v6185_v29 = vld [vmem:[#allocation2 + $0x68] sm:$0xff]  ;;  %307 = vst [vmem:[#allocation2 + $0xda] sm:$0xff] %v274_v30  ;;  %308 = vst [vmem:[#allocation2 + $0xe2] sm:$0xff] %v275_v31  ;;  %v1801_v37 = vsel %vm457_vm0, %v6119_v55, %v1800_v17  ;;  %v1805_v38 = vrot.slane %v6174_v23, 2  ;;  %v6221_v52 = vld [vmem:[#allocation2 + $0x78] sm:$0xff]  ;;  %5326 = vmatpush3.bf16.msra.mxu1 %v5323_v50 }
  0x37   : > { %4919 = vmatprep.mubr.f32.mxu0 %v6133_v60  ;;  %v6201_v39 = vld [vmem:[#allocation2 + $0x40] sm:$0xf]  ;;  %v1807_v42 = vrot.slane %v6179_v26, 2  ;;  %v6208_v43 = vrot.slane %v6185_v29, 2  ;;  %v6210_v44 = vld [vmem:[#allocation2 + $0x70] sm:$0xf]  ;;  %4605 = vmatprep.mubr.f32.mxu1 %v6133_v60 }
  0x38   : > { %v6216_v49 = vsel %vm457_vm0, %v1802_v27, %v6183_v28  ;;  %v6223_v54 = vld [vmem:[#allocation2 + $0x80] sm:$0xff]  ;;  %309 = vst [vmem:[#allocation2 + $0xf2] sm:$0xff] %v276_v45  ;;  %310 = vst [vmem:[#allocation2 + $0xfa] sm:$0xff] %v277_v46  ;;  %4920 = vmatmul.mubr.f32.vlgmr.msra.gmra.mrb[0].mxu0 %v1801_v37  ;;  %v471_v58 = vrot.slane %v6201_v39, 2  ;;  %v1806_v62 = vsel %vm457_vm0, %v6183_v28, %v1805_v38  ;;  %v1810_v63 = vrot.slane %v6210_v44, 2  ;;  %v4024_v1 = vld [vmem:[%s7523_s1 + $0x2b0] sm:$0xff] }
  0x39   : > { %5450 = vmatpush3.bf16.msra.mxu0 %v5447_v22  ;;  %v6238_v0 = vld [vmem:[#allocation2 + $0x58] sm:$0xf]  ;;  %4922 = vmatprep.mubr.f32.mxu0 %v6216_v49  ;;  %v6249_v8 = vsel %vm457_vm0, %v1807_v42, %v6208_v43  ;;  %v7526_v6 = vrot.slane %v6221_v52, 2  ;;  %v6253_v7 = vrot.slane %v6223_v54, 2  ;;  %v6255_v10 = vld [vmem:[#allocation2 + $0x88] sm:$0xf]  ;;  %v5459_v36 = vpack.c.bf16 %v4025_v3, %v4024_v1 }
  0x3a   : > { %5452 = vmatprep.subr.bf16.mxu0 %v5451_v41  ;;  %v279_v15 = vld [vmem:[%s6053_s28 + $0x98] sm:$0xff]  ;;  %v6259_v16 = vld [vmem:[#allocation2 + $0x90] sm:$0xff]  ;;  %311 = vst [vmem:[#allocation2 + $0x10a] sm:$0xff] %v278_v11  ;;  %v472_v21 = vsel %vm457_vm0, %v6119_v55, %v471_v58  ;;  %v476_v22 = vrot.slane %v6238_v0, 2  ;;  %v280_v27 = vld [vmem:[%s6053_s28 + $0xa0] sm:$0xff]  ;;  %v1811_v31 = vsel %vm457_vm0, %v6208_v43, %v1810_v63  ;;  %v1815_v32 = vrot.slane %v6255_v10, 2  ;;  %5328 = vmatprep.subr.bf16.mxu1 %v5327_v18 }
  0x3b   : > { %v6261_v17 = vld [vmem:[#allocation2 + $0x98] sm:$0xff]  ;;  %312 = vst [vmem:[#allocation2 + $0x112] sm:$0xff] %v279_v15  ;;  %v281_v30 = vld [vmem:[%s6053_s28 + $0xa8] sm:$0xff]  ;;  %v6279_v60 = vld [vmem:[#allocation2 + $0x70] sm:$0xf]  ;;  %v6291_v34 = vsel %vm457_vm0, %v7526_v6, %v6253_v7  ;;  %v1817_v37 = vrot.slane %v6259_v16, 2  ;;  %4606 = vmatmul.mubr.f32.gmra.mrb[4].mxu1 %v472_v21  ;;  %v5331_v46 = vpack.c.bf16 %v383_v24, %v382_v20 }
  0x3c   : > { %4923 = vmatmul.mubr.f32.gmra.mrb[2].mxu0 %v1806_v62  ;;  %v4026_v55 = vld [vmem:[%s7523_s1 + $0x2c0] sm:$0xff]  ;;  %313 = vst [vmem:[#allocation2 + $0x122] sm:$0xff] %v280_v27  ;;  %314 = vst [vmem:[#allocation2 + $0x12a] sm:$0xff] %v281_v30  ;;  %v6295_v38 = vrot.slane %v6261_v17, 2  ;;  %v6304_v45 = vld [vmem:[#allocation2 + $0xb0] sm:$0xff]  ;;  %4608 = vmatprep.mubr.f32.mxu1 %v6216_v49  ;;  %v477_v56 = vsel %vm457_vm0, %v6183_v28, %v476_v22  ;;  %v481_v58 = vrot.slane %v6279_v60, 2 }
  0x3d   : > { %5454 = vmatpush3.bf16.msra.mxu0 %v5451_v41  ;;  %4925 = vmatprep.mubr.f32.mxu0 %v6249_v8  ;;  %v6297_v40 = vld [vmem:[#allocation2 + $0xa0] sm:$0xf]  ;;  %v6299_v41 = vld [vmem:[#allocation2 + $0xa8] sm:$0xff]  ;;  %v282_v50 = vld [vmem:[%s6053_s28 + $0xb0] sm:$0xff]  ;;  %316 = vst [vmem:[#allocation2 + $0x142] sm:$0xff] %v283_v51  ;;  %v1816_v63 = vsel %vm457_vm0, %v6253_v7, %v1815_v32  ;;  %v6332_v15 = vrot.slane %v6304_v45, 2 }
  0x3e   : > { %5456 = vmatprep.subr.bf16.mxu0 %v5455_v4  ;;  %7597 = vst [vmem:[#allocation11_spill] sm:$0xff] %v6295_v38  ;;  %v384_v42 = vld [vmem:[%s7523_s1 + $0x40] sm:$0xff]  ;;  %315 = vst [vmem:[#allocation2 + $0x13a] sm:$0xff] %v282_v50  ;;  %v285_v62 = vld [vmem:[%s6053_s28 + $0xc8] sm:$0xff]  ;;  %v1820_v49 = vrot.slane %v6297_v40, 2  ;;  %v6328_v3 = vsel %vm457_vm0, %v1817_v37, %v6295_v38  ;;  %5330 = vmatpush3.bf16.msra.mxu1 %v5327_v18  ;;  %v1822_v11 = vrot.slane %v6299_v41, 2 }
  0x3f   : > { %v6321_v1 = vld [vmem:[#allocation2 + $0x88] sm:$0xf]  ;;  %v4028_v28 = vld [vmem:[%s7523_s1 + $0x2d0] sm:$0xff]  ;;  %317 = vst [vmem:[#allocation2 + $0x152] sm:$0xff] %v284_v61  ;;  %318 = vst [vmem:[#allocation2 + $0x15a] sm:$0xff] %v285_v62  ;;  %4609 = vmatmul.mubr.f32.gmra.mrb[6].mxu1 %v477_v56  ;;  %5332 = vmatprep.subr.bf16.mxu1 %v5331_v46  ;;  %v5335_v27 = vpack.c.bf16 %v385_v59, %v384_v42  ;;  %v2188_v57 = vrot.slane %v6162_v12, 4 }
  0x40   : > { %4926 = vmatmul.mubr.f32.gmra.mrb[4].mxu0 %v1811_v31  ;;  %7598 = vst [vmem:[#allocation12_spill] sm:$0xff] %v6328_v3  ;;  %7599 = vst [vmem:[#allocation13_spill] sm:$0xff] %v6332_v15  ;;  %v6334_v20 = vld [vmem:[#allocation2 + $0xb8] sm:$0xf]  ;;  %v6339_v22 = vld [vmem:[#allocation2 + $0xc0] sm:$0xff]  ;;  %4611 = vmatprep.mubr.f32.mxu1 %v6249_v8  ;;  %v482_v31 = vsel %vm457_vm0, %v6208_v43, %v481_v58  ;;  %v486_v32 = vrot.slane %v6321_v1, 2  ;;  %v1821_v8 = vsel %vm457_vm0, %v6295_v38, %v1820_v49 }
  0x41   : > { %5458 = vmatpush3.bf16.msra.mxu0 %v5455_v4  ;;  %4928 = vmatprep.mubr.f32.mxu0 %v6291_v34  ;;  %v5463_v4 = vpack.c.bf16 %v4027_v33, %v4026_v55  ;;  %v4029_v21 = vld [vmem:[%s7523_s1 + $0x2d8] sm:$0xff]  ;;  %v6341_v24 = vld [vmem:[#allocation2 + $0xc8] sm:$0xff]  ;;  %v286_v30 = vld [vmem:[%s6053_s28 + $0xd0] sm:$0xff]  ;;  %v1825_v43 = vrot.slane %v6334_v20, 2  ;;  %v6361_v42 = vsel %vm457_vm0, %v1822_v11, %v6332_v15  ;;  %v1827_v51 = vrot.slane %v6339_v22, 2  ;;  %323 = vst [vmem:[#allocation2 + $0x19a] sm:$0xff] %v290_v2 }
  0x42   : > { %5460 = vmatprep.subr.bf16.mxu0 %v5459_v36  ;;  %v287_v18 = vld [vmem:[%s6053_s28 + $0xd8] sm:$0xff]  ;;  %v386_v55 = vld [vmem:[%s7523_s1 + $0x50] sm:$0xff]  ;;  %319 = vst [vmem:[#allocation2 + $0x16a] sm:$0xff] %v286_v30  ;;  %v348_v37 = vld [vmem:[#allocation2 + $0xa0] sm:$0xf]  ;;  %v5467_v50 = vpack.c.bf16 %v4029_v21, %v4028_v28  ;;  %v6365_v56 = vrot.slane %v6341_v24, 2  ;;  %5334 = vmatpush3.bf16.msra.mxu1 %v5331_v46  ;;  %v487_v49 = vsel %vm457_vm0, %v6253_v7, %v486_v32 }
  0x43   : > { %v387_v33 = vld [vmem:[%s7523_s1 + $0x58] sm:$0xff]  ;;  %320 = vst [vmem:[#allocation2 + $0x172] sm:$0xff] %v287_v18  ;;  %7600 = vst [vmem:[#allocation14_spill] sm:$0xff] %v6361_v42  ;;  %v4030_v58 = vld [vmem:[%s7523_s1 + $0x2e0] sm:$0xff]  ;;  %4612 = vmatmul.mubr.f32.gmra.mrb[8].mxu1 %v482_v31  ;;  %5336 = vmatprep.subr.bf16.mxu1 %v5335_v27  ;;  %v491_v28 = vrot.slane %v348_v37, 2  ;;  %v1826_v21 = vsel %vm457_vm0, %v6332_v15, %v1825_v43  ;;  %v2196_v25 = vrot.slane %v6210_v44, 4 }
  0x44   : > { %4929 = vmatmul.mubr.f32.gmra.mrb[6].mxu0 %v1816_v63  ;;  %7601 = vst [vmem:[#allocation15_spill] sm:$0xff] %v6365_v56  ;;  %v4031_v59 = vld [vmem:[%s7523_s1 + $0x2e8] sm:$0xff]  ;;  %v6375_v61 = vld [vmem:[#allocation2 + $0xd8] sm:$0xff]  ;;  %v6377_v62 = vld [vmem:[#allocation2 + $0xe0] sm:$0xff]  ;;  %v5339_v63 = vpack.c.bf16 %v387_v33, %v386_v55  ;;  %4614 = vmatprep.mubr.f32.mxu1 %v6291_v34  ;;  %v6394_v7 = vsel %vm457_vm0, %v1827_v51, %v6365_v56 }
  0x45   : > { %5462 = vmatpush3.bf16.msra.mxu0 %v5459_v36  ;;  %4931 = vmatprep.mubr.f32.mxu0 %v6328_v3  ;;  %v6367_v36 = vld [vmem:[#allocation2 + $0xd0] sm:$0xf]  ;;  %v388_v46 = vld [vmem:[%s7523_s1 + $0x60] sm:$0xff]  ;;  %v389_v11 = vld [vmem:[%s7523_s1 + $0x68] sm:$0xff]  ;;  %7602 = vst [vmem:[#allocation16_spill] sm:$0xff] %v6394_v7  ;;  %v5471_v18 = vpack.c.bf16 %v4031_v59, %v4030_v58  ;;  %v1832_v31 = vrot.slane %v6375_v61, 2  ;;  %v492_v43 = vsel %vm457_vm0, %v6295_v38, %v491_v28 }
  0x46   : > { %5464 = vmatprep.subr.bf16.mxu0 %v5463_v4  ;;  %v1830_v34 = vrot.slane %v6367_v36, 2  ;;  %v351_v30 = vld [vmem:[#allocation2 + $0xb8] sm:$0xf]  ;;  %v6398_v32 = vrot.slane %v6377_v62, 2  ;;  %5338 = vmatpush3.bf16.msra.mxu1 %v5335_v27  ;;  %v4032_v55 = vld [vmem:[%s7523_s1 + $0x2f0] sm:$0xff]  ;;  %v3923_v6 = vld [vmem:[%s7523_s1 + $0x108] sm:$0xff] }
  0x47   : > { %4615 = vmatmul.mubr.f32.gmra.mrb[10].mxu1 %v487_v49  ;;  %v4033_v33 = vld [vmem:[%s7523_s1 + $0x2f8] sm:$0xff]  ;;  %5340 = vmatprep.subr.bf16.mxu1 %v5339_v63  ;;  %v496_v27 = vrot.slane %v351_v30, 2  ;;  %v390_v37 = vld [vmem:[%s7523_s1 + $0x70] sm:$0xff]  ;;  %v289_v30 = vld [vmem:[%s6053_s28 + $0xe8] sm:$0xff] }
  0x48   : > { %4932 = vmatmul.mubr.f32.gmra.mrb[8].mxu0 %v1821_v8  ;;  %7603 = vst [vmem:[#allocation17_spill] sm:$0xff] %v6398_v32  ;;  %v5343_v8 = vpack.c.bf16 %v389_v11, %v388_v46  ;;  %4617 = vmatprep.mubr.f32.mxu1 %v6328_v3  ;;  %v391_v51 = vld [vmem:[%s7523_s1 + $0x78] sm:$0xff]  ;;  %v1831_v58 = vsel %vm457_vm0, %v6365_v56, %v1830_v34  ;;  %v6421_v49 = vld [vmem:[#allocation2 + $0xd0] sm:$0xf]  ;;  %v2183_v11 = vrot.slane %v6105_v48, 4  ;;  %v4082_v34 = vld [vmem:[%s7523_s1 + $0x300] sm:$0xff] }
  0x49   : > { %5466 = vmatpush3.bf16.msra.mxu0 %v5463_v4  ;;  %4934 = vmatprep.mubr.f32.mxu0 %v6361_v42  ;;  %v6400_v4 = vld [vmem:[#allocation2 + $0xe8] sm:$0xf]  ;;  %v6425_v28 = vsel %vm457_vm0, %v1832_v31, %v6398_v32  ;;  %v5475_v46 = vpack.c.bf16 %v4033_v33, %v4032_v55  ;;  %v5347_v55 = vpack.c.bf16 %v391_v51, %v390_v37  ;;  %v291_v37 = vld [vmem:[%s6053_s28 + $0xf8] sm:$0xff]  ;;  %v2186_v51 = vrot.slane %v6153_v5, 4  ;;  %v4084_v2 = vld [vmem:[%s7523_s1 + $0x310] sm:$0xff] }
  0x4a   : > { %5468 = vmatprep.subr.bf16.mxu0 %v5467_v50  ;;  %v1835_v59 = vrot.slane %v6400_v4, 2  ;;  %7604 = vst [vmem:[#allocation18_spill] sm:$0xff] %v6425_v28  ;;  %5342 = vmatpush3.bf16.msra.mxu1 %v5339_v63  ;;  %v4083_v31 = vld [vmem:[%s7523_s1 + $0x308] sm:$0xff]  ;;  %v3922_v63 = vld [vmem:[%s7523_s1 + $0x100] sm:$0xff]  ;;  %322 = vst [vmem:[#allocation2 + $0x18a] sm:$0xff] %v289_v30  ;;  %v497_v33 = vsel %vm457_vm0, %v6332_v15, %v496_v27  ;;  %v6463_v5 = vrot.slane %v6164_v13, 4 }
  0x4b   : > { %4618 = vmatmul.mubr.f32.gmra.mrb[12].mxu1 %v492_v43  ;;  %5344 = vmatprep.subr.bf16.mxu1 %v5343_v8  ;;  %v501_v43 = vrot.slane %v6421_v49, 2  ;;  %324 = vst [vmem:[#allocation2 + $0x1a2] sm:$0xff] %v291_v37  ;;  %v5479_v30 = vpack.c.bf16 %v4083_v31, %v4082_v34  ;;  %v6467_v47 = vld [vmem:[#allocation2 + $0xf8] sm:$0xff]  ;;  %v6499_v35 = vld [vmem:[#allocation2 + $0x108] sm:$0xff]  ;;  %v2203_v15 = vrot.slane %v6259_v16, 4  ;;  %v6575_v38 = vld [vmem:[#allocation2 + $0x140] sm:$0xff] }
  0x4c   : > { %4935 = vmatmul.mubr.f32.gmra.mrb[10].mxu0 %v1826_v21  ;;  %v6429_v21 = vrot.slane %v6115_v53, 4  ;;  %4620 = vmatprep.mubr.f32.mxu1 %v6361_v42  ;;  %v6526_v14 = vld [vmem:[#allocation2 + $0x118] sm:$0xf]  ;;  %v7614_v42 = vrot.slane %v6221_v52, 4 }
  0x4d   : > { %5470 = vmatpush3.bf16.msra.mxu0 %v5467_v50  ;;  %4937 = vmatprep.mubr.f32.mxu0 %v6394_v7  ;;  %v288_v50 = vld [vmem:[%s6053_s28 + $0xe0] sm:$0xff]  ;;  %v502_v34 = vsel %vm457_vm0, %v6365_v56, %v501_v43  ;;  %v6493_v43 = vsel %vm1037_vm1, %v2188_v57, %v6463_v5  ;;  %v4087_v57 = vld [vmem:[%s7523_s1 + $0x328] sm:$0xff]  ;;  %7610 = vst [vmem:[#allocation24_spill] sm:$0xff] %v6526_v14 }
  0x4e   : > { %5472 = vmatprep.subr.bf16.mxu0 %v5471_v18  ;;  %321 = vst [vmem:[#allocation2 + $0x182] sm:$0xff] %v288_v50  ;;  %v6455_v50 = vld [vmem:[#allocation2 + $0xe8] sm:$0xf]  ;;  %v6459_v27 = vsel %vm1037_vm1, %v2183_v11, %v6429_v21  ;;  %5346 = vmatpush3.bf16.msra.mxu1 %v5343_v8  ;;  %v6475_v11 = vpack.c.bf16 %v3923_v6, %v3922_v63  ;;  %v6487_v6 = vrot.slane %v6467_v47, 2  ;;  %v6489_v63 = vld [vmem:[#allocation2 + $0x100] sm:$0xf] }
  0x4f   : > { %7605 = vst [vmem:[#allocation19_spill] sm:$0xff] %v6455_v50  ;;  %4621 = vmatmul.mubr.f32.gmra.mrb[14].mxu1 %v497_v33  ;;  %5348 = vmatprep.subr.bf16.mxu1 %v5347_v55  ;;  %v506_v8 = vrot.slane %v6455_v50, 2  ;;  %v2187_v31 = vsel %vm1037_vm1, %v6429_v21, %v2186_v51  ;;  %v2191_v33 = vrot.slane %v6174_v23, 4  ;;  %7607 = vst [vmem:[#allocation21_spill] sm:$0xff] %v6489_v63  ;;  %v6501_v23 = vld [vmem:[#allocation2 + $0x110] sm:$0xff] }
  0x50   : > { %4938 = vmatmul.mubr.f32.gmra.mrb[12].mxu0 %v1831_v58  ;;  %v1836_v58 = vsel %vm457_vm0, %v6398_v32, %v1835_v59  ;;  %v4085_v59 = vld [vmem:[%s7523_s1 + $0x318] sm:$0xff]  ;;  %4623 = vmatprep.mubr.f32.mxu1 %v6394_v7  ;;  %7606 = vst [vmem:[#allocation20_spill] sm:$0xff] %v6487_v6  ;;  %v2201_v7 = vrot.slane %v6255_v10, 4  ;;  %v6553_v10 = vrot.slane %v6261_v17, 4 }
  0x51   : > { %5474 = vmatpush3.bf16.msra.mxu0 %v5471_v18  ;;  %4940 = vmatprep.mubr.f32.mxu0 %v6425_v28  ;;  %v6465_v18 = vld [vmem:[#allocation2 + $0xf0] sm:$0xff]  ;;  %v5483_v51 = vpack.c.bf16 %v4085_v59, %v4084_v2  ;;  %v507_v2 = vsel %vm457_vm0, %v6398_v32, %v506_v8  ;;  %v2192_v44 = vsel %vm1037_vm1, %v6463_v5, %v2191_v33  ;;  %v2199_v33 = vrot.slane %v6223_v54, 4  ;;  %v6534_v32 = vld [vmem:[#allocation2 + $0x120] sm:$0xff] }
  0x52   : > { %5476 = vmatprep.subr.bf16.mxu0 %v5475_v46  ;;  %v508_v37 = vrot.slane %v6465_v18, 2  ;;  %5350 = vmatpush3.bf16.msra.mxu1 %v5347_v55  ;;  %v511_v55 = vrot.slane %v6489_v63, 2  ;;  %v2206_v63 = vrot.slane %v6297_v40, 4 }
  0x53   : > { %4624 = vmatmul.mubr.f32.gmra.mrb[16].mxu1 %v502_v34  ;;  %5352 = vmatprep.subr.bf16.mxu1 %v6475_v11  ;;  %v513_v34 = vrot.slane %v6499_v35, 2 }
  0x54   : > { %4941 = vmatmul.mubr.f32.gmra.mrb[14].mxu0 %v1836_v58  ;;  %v6497_v58 = vrot.slane %v6185_v29, 4  ;;  %4626 = vmatprep.mubr.f32.mxu1 %v6425_v28  ;;  %v6520_v59 = vsel %vm457_vm0, %v508_v37, %v6487_v6  ;;  %v6536_v37 = vld [vmem:[#allocation2 + $0x128] sm:$0xff]  ;;  %v5487_v28 = vpack.c.bf16 %v4087_v57, %v4086_v19  ;;  %v512_v19 = vsel %vm457_vm0, %v6487_v6, %v511_v55  ;;  %v6565_v55 = vld [vmem:[#allocation2 + $0x130] sm:$0xf] }
  0x55   : > { %5478 = vmatpush3.bf16.msra.mxu0 %v5475_v46  ;;  %4999 = vmatprep.mubr.f32.mxu0 %v6459_v27  ;;  %v2193_v46 = vrot.slane %v6179_v26, 4  ;;  %7608 = vst [vmem:[#allocation22_spill] sm:$0xff] %v6520_v59  ;;  %v1051_v57 = vrot.slane %v6201_v39, 4  ;;  %7613 = vst [vmem:[#allocation27_spill] sm:$0xff] %v6565_v55  ;;  %v1056_v6 = vrot.slane %v6238_v0, 4  ;;  %v6571_v39 = vsel %vm1037_vm1, %v7614_v42, %v2199_v33  ;;  %v4090_v42 = vld [vmem:[%s7523_s1 + $0x340] sm:$0xff] }
  0x56   : > { %5480 = vmatprep.subr.bf16.mxu0 %v5479_v30  ;;  %v2197_v56 = vsel %vm1037_vm1, %v6497_v58, %v2196_v25  ;;  %v516_v25 = vrot.slane %v6526_v14, 2  ;;  %v1061_v14 = vrot.slane %v6279_v60, 4  ;;  %v2202_v0 = vsel %vm1037_vm1, %v2199_v33, %v2201_v7 }
  0x57   : > { %v6530_v8 = vsel %vm1037_vm1, %v2193_v46, %v6497_v58  ;;  %4627 = vmatmul.mubr.f32.gmra.mrb[18].mxu1 %v507_v2  ;;  %v4088_v46 = vld [vmem:[%s7523_s1 + $0x330] sm:$0xff]  ;;  %v6579_v3 = vsel %vm1037_vm1, %v6429_v21, %v1051_v57  ;;  %v521_v40 = vrot.slane %v6565_v55, 2  ;;  %v1066_v21 = vrot.slane %v6321_v1, 4  ;;  %v4094_v55 = vld [vmem:[%s7523_s1 + $0x360] sm:$0xff] }
  0x58   : > { %5000 = vmatmul.mubr.f32.vlgmr.msra.gmra.mrb[0].mxu0 %v2187_v31  ;;  %v6524_v31 = vrot.slane %v6501_v23, 2  ;;  %4629 = vmatprep.mubr.f32.mxu1 %v6520_v59  ;;  %v6563_v59 = vrot.slane %v6536_v37, 2  ;;  %v6600_v7 = vsel %vm1037_vm1, %v6497_v58, %v1061_v14  ;;  %v6616_v14 = vld [vmem:[#allocation2 + $0x148] sm:$0xf]  ;;  %v2208_v1 = vrot.slane %v6299_v41, 4 }
  0x59   : > { %5482 = vmatpush3.bf16.msra.mxu0 %v5479_v30  ;;  %5002 = vmatprep.mubr.f32.mxu0 %v6493_v43  ;;  %v4089_v30 = vld [vmem:[%s7523_s1 + $0x338] sm:$0xff]  ;;  %7617 = vst [vmem:[#allocation30_spill] sm:$0xff] %v6616_v14  ;;  %v6620_v58 = vrot.slane %v6304_v45, 4  ;;  %v2207_v57 = vsel %vm1037_vm1, %v6553_v10, %v2206_v63  ;;  %v2213_v63 = vrot.slane %v6339_v22, 4 }
  0x5a   : > { %7609 = vst [vmem:[#allocation23_spill] sm:$0xff] %v6524_v31  ;;  %5484 = vmatprep.subr.bf16.mxu0 %v5483_v51  ;;  %v6559_v2 = vsel %vm457_vm0, %v513_v34, %v6524_v31  ;;  %7612 = vst [vmem:[#allocation26_spill] sm:$0xff] %v6563_v59  ;;  %v5491_v34 = vpack.c.bf16 %v4089_v30, %v4088_v46  ;;  %v6592_v30 = vsel %vm1037_vm1, %v6463_v5, %v1056_v6 }
  0x5b   : > { %7611 = vst [vmem:[#allocation25_spill] sm:$0xff] %v6559_v2  ;;  %4630 = vmatmul.mubr.f32.gmra.mrb[20].mxu1 %v512_v19  ;;  %v517_v60 = vsel %vm457_vm0, %v6524_v31, %v516_v25  ;;  %v6614_v46 = vrot.slane %v6575_v38, 2  ;;  %v6622_v19 = vld [vmem:[#allocation2 + $0x150] sm:$0xff]  ;;  %v6624_v25 = vld [vmem:[#allocation2 + $0x158] sm:$0xff] }
  0x5c   : > { %5003 = vmatmul.mubr.f32.gmra.mrb[2].mxu0 %v2192_v44  ;;  %v518_v44 = vrot.slane %v6534_v32, 2  ;;  %4632 = vmatprep.mubr.f32.mxu1 %v6559_v2  ;;  %v4092_v31 = vld [vmem:[%s7523_s1 + $0x350] sm:$0xff]  ;;  %v4093_v2 = vld [vmem:[%s7523_s1 + $0x358] sm:$0xff] }
  0x5d   : > { %5005 = vmatprep.mubr.f32.mxu0 %v6530_v8  ;;  %5486 = vmatpush3.bf16.msra.mxu0 %v5483_v51  ;;  %v6573_v51 = vld [vmem:[#allocation2 + $0x138] sm:$0xff]  ;;  %7616 = vst [vmem:[#allocation29_spill] sm:$0xff] %v6614_v46 }
  0x5e   : > { %5488 = vmatprep.subr.bf16.mxu0 %v5487_v28  ;;  %v6606_v5 = vsel %vm457_vm0, %v518_v44, %v6563_v59  ;;  %v523_v6 = vrot.slane %v6573_v51, 2  ;;  %v2211_v44 = vrot.slane %v6334_v20, 4  ;;  %v6644_v20 = vrot.slane %v6341_v24, 4 }
  0x5f   : > { %7615 = vst [vmem:[#allocation28_spill] sm:$0xff] %v6606_v5  ;;  %4633 = vmatmul.mubr.f32.gmra.mrb[22].mxu1 %v517_v60  ;;  %v6653_v60 = vrot.slane %v6624_v25, 2 }
  0x60   : > { %5006 = vmatmul.mubr.f32.gmra.mrb[4].mxu0 %v2197_v56  ;;  %v6610_v56 = vsel %vm1037_vm1, %v2203_v15, %v6553_v10  ;;  %v5495_v15 = vpack.c.bf16 %v4091_v9, %v4090_v42  ;;  %4635 = vmatprep.mubr.f32.mxu1 %v6606_v5  ;;  %v522_v9 = vsel %vm457_vm0, %v6563_v59, %v521_v40  ;;  %v6661_v59 = vld [vmem:[#allocation2 + $0x168] sm:$0xff]  ;;  %v6663_v5 = vld [vmem:[#allocation2 + $0x170] sm:$0xff] }
  0x61   : > { %5008 = vmatprep.mubr.f32.mxu0 %v6571_v39  ;;  %5490 = vmatpush3.bf16.msra.mxu0 %v5487_v28  ;;  %v6627_v28 = vsel %vm1037_vm1, %v2199_v33, %v1066_v21  ;;  %v526_v33 = vrot.slane %v6616_v14, 2  ;;  %v6649_v42 = vsel %vm457_vm0, %v523_v6, %v6614_v46  ;;  %7619 = vst [vmem:[#allocation32_spill] sm:$0xff] %v6653_v60  ;;  %v6655_v21 = vld [vmem:[#allocation2 + $0x160] sm:$0xf] }
  0x62   : > { %5492 = vmatprep.subr.bf16.mxu0 %v5491_v34  ;;  %7618 = vst [vmem:[#allocation31_spill] sm:$0xff] %v6649_v42  ;;  %7620 = vst [vmem:[#allocation33_spill] sm:$0xff] %v6655_v21  ;;  %v6659_v40 = vsel %vm1037_vm1, %v2208_v1, %v6620_v58  ;;  %v5499_v14 = vpack.c.bf16 %v4093_v2, %v4092_v31  ;;  %v2212_v6 = vsel %vm1037_vm1, %v6620_v58, %v2211_v44 }
  0x63   : > { %4636 = vmatmul.mubr.f32.gmra.mrb[24].mxu1 %v522_v9  ;;  %v527_v1 = vsel %vm457_vm0, %v6614_v46, %v526_v33  ;;  %v6678_v31 = vsel %vm1037_vm1, %v2213_v63, %v6644_v20  ;;  %v531_v2 = vrot.slane %v6655_v21, 2  ;;  %v2216_v9 = vrot.slane %v6367_v36, 4  ;;  %v6691_v33 = vld [vmem:[#allocation2 + $0x178] sm:$0xf]  ;;  %v4096_v36 = vld [vmem:[%s7523_s1 + $0x370] sm:$0xff] }
  0x64   : > { %5009 = vmatmul.mubr.f32.gmra.mrb[6].mxu0 %v2202_v0  ;;  %v528_v0 = vrot.slane %v6622_v19, 2  ;;  %4638 = vmatprep.mubr.f32.mxu1 %v6649_v42  ;;  %v6689_v42 = vrot.slane %v6663_v5, 2  ;;  %7623 = vst [vmem:[#allocation36_spill] sm:$0xff] %v6691_v33  ;;  %v2218_v63 = vrot.slane %v6375_v61, 4  ;;  %v6695_v46 = vrot.slane %v6377_v62, 4 }
  0x65   : > { %5011 = vmatprep.mubr.f32.mxu0 %v6610_v56  ;;  %5494 = vmatpush3.bf16.msra.mxu0 %v5491_v34  ;;  %v4095_v34 = vld [vmem:[%s7523_s1 + $0x368] sm:$0xff]  ;;  %v536_v50 = vrot.slane %v6691_v33, 2 }
  0x66   : > { %5496 = vmatprep.subr.bf16.mxu0 %v5495_v15  ;;  %v6684_v44 = vsel %vm457_vm0, %v528_v0, %v6653_v60  ;;  %7622 = vst [vmem:[#allocation35_spill] sm:$0xff] %v6689_v42  ;;  %v5503_v21 = vpack.c.bf16 %v4095_v34, %v4094_v55  ;;  %v4097_v0 = vld [vmem:[%s7523_s1 + $0x378] sm:$0xff]  ;;  %v2217_v55 = vsel %vm1037_vm1, %v6644_v20, %v2216_v9  ;;  %v4098_v9 = vld [vmem:[%s7523_s1 + $0x380] sm:$0xff] }
  0x67   : > { %7621 = vst [vmem:[#allocation34_spill] sm:$0xff] %v6684_v44  ;;  %4639 = vmatmul.mubr.f32.gmra.mrb[26].mxu1 %v527_v1  ;;  %v2221_v1 = vrot.slane %v6400_v4, 4  ;;  %v5507_v33 = vpack.c.bf16 %v4097_v0, %v4096_v36  ;;  %v4099_v4 = vld [vmem:[%s7523_s1 + $0x388] sm:$0xff]  ;;  %v2228_v0 = vrot.slane %v6499_v35, 4 }
  0x68   : > { %5012 = vmatmul.mubr.f32.gmra.mrb[8].mxu0 %v2207_v57  ;;  %v533_v57 = vrot.slane %v6661_v59, 2  ;;  %4641 = vmatprep.mubr.f32.mxu1 %v6684_v44  ;;  %v3964_v44 = vld [vmem:[#allocation2 + $0x100] sm:$0xf] }
  0x69   : > { %5014 = vmatprep.mubr.f32.mxu0 %v6659_v40  ;;  %5498 = vmatpush3.bf16.msra.mxu0 %v5495_v15  ;;  %v532_v15 = vsel %vm457_vm0, %v6653_v60, %v531_v2  ;;  %v2223_v2 = vrot.slane %v6465_v18, 4  ;;  %v6721_v60 = vrot.slane %v6467_v47, 4 }
  0x6a   : > { %5500 = vmatprep.subr.bf16.mxu0 %v5499_v14  ;;  %v6712_v34 = vsel %vm457_vm0, %v533_v57, %v6689_v42  ;;  %v2222_v57 = vsel %vm1037_vm1, %v6695_v46, %v2221_v1 }
  0x6b   : > { %7624 = vst [vmem:[#allocation37_spill] sm:$0xff] %v6712_v34  ;;  %7625 = vst [vmem:[#allocation38_spill] sm:$0xff] %v6721_v60  ;;  %4642 = vmatmul.mubr.f32.gmra.mrb[28].mxu1 %v532_v15  ;;  %v6737_v36 = vsel %vm1037_vm1, %v2223_v2, %v6721_v60  ;;  %v6741_v15 = vrot.slane %v6501_v23, 4 }
  0x6c   : > { %5015 = vmatmul.mubr.f32.gmra.mrb[10].mxu0 %v2212_v6  ;;  %v6717_v6 = vsel %vm1037_vm1, %v2218_v63, %v6695_v46  ;;  %4644 = vmatprep.mubr.f32.mxu1 %v6712_v34  ;;  %v2226_v63 = vrot.slane %v3964_v44, 4  ;;  %7626 = vst [vmem:[#allocation39_spill] sm:$0xff] %v6737_v36  ;;  %v6743_v34 = vpack.c.bf16 %v4099_v4, %v4098_v9  ;;  %v6751_v44 = vld [vmem:[#allocation2] sm:$0xff]  ;;  %v2233_v4 = vrot.slane %v6534_v32, 4 }
  0x6d   : > { %5017 = vmatprep.mubr.f32.mxu0 %v6678_v31  ;;  %5502 = vmatpush3.bf16.msra.mxu0 %v5499_v14  ;;  %v537_v14 = vsel %vm457_vm0, %v6689_v42, %v536_v50  ;;  %7627 = vst [vmem:[#allocation40_spill] sm:$0xff] %v6741_v15  ;;  %v3924_v50 = vld [vmem:[%s7523_s1 + $0x110] sm:$0xff]  ;;  %v6759_v9 = vsel %vm1037_vm1, %v2228_v0, %v6741_v15 }
  0x6e   : > { %5504 = vmatprep.subr.bf16.mxu0 %v5503_v21  ;;  %v2227_v1 = vsel %vm1037_vm1, %v6721_v60, %v2226_v63  ;;  %7628 = vst [vmem:[#allocation41_spill] sm:$0xff] %v6759_v9  ;;  %v3970_v42 = vld [vmem:[#allocation2 + $0x130] sm:$0xf]  ;;  %v3926_v63 = vld [vmem:[%s7523_s1 + $0x120] sm:$0xff]  ;;  %v6784_v60 = vrot.slane %v6575_v38, 4 }
  0x6f   : > { %4645 = vmatmul.mubr.f32.gmra.mrb[30].mxu1 %v537_v14  ;;  %v6763_v14 = vrot.slane %v6536_v37, 4 }
  0x70   : > { %5018 = vmatmul.mubr.f32.gmra.mrb[12].mxu0 %v2217_v55  ;;  %v3967_v55 = vld [vmem:[#allocation2 + $0x118] sm:$0xf]  ;;  %4679 = vmatprep.mubr.f32.mxu1 %v6751_v44  ;;  %7629 = vst [vmem:[#allocation42_spill] sm:$0xff] %v6784_v60 }
  0x71   : > { %5020 = vmatprep.mubr.f32.mxu0 %v6717_v6  ;;  %5506 = vmatpush3.bf16.msra.mxu0 %v5503_v21  ;;  %v3925_v21 = vld [vmem:[%s7523_s1 + $0x118] sm:$0xff]  ;;  %v2231_v2 = vrot.slane %v3967_v55, 4  ;;  %v2236_v55 = vrot.slane %v3970_v42, 4 }
  0x72   : > { %5508 = vmatprep.subr.bf16.mxu0 %v5507_v33  ;;  %v3929_v42 = vld [vmem:[%s7523_s1 + $0x138] sm:$0xff] }
  0x73   : > { %4680 = vmatmul.mubr.f32.vlgmr.msra.gmra.mrb[0].mxu1 %v6751_v44  ;;  %v2232_v0 = vsel %vm1037_vm1, %v6741_v15, %v2231_v2  ;;  %v2237_v2 = vsel %vm1037_vm1, %v6763_v14, %v2236_v55  ;;  %v6803_v15 = vrot.slane %v6624_v25, 4 }
  0x74   : > { %5021 = vmatmul.mubr.f32.gmra.mrb[14].mxu0 %v2222_v57  ;;  %v5355_v57 = vpack.c.bf16 %v3925_v21, %v3924_v50  ;;  %5354 = vmatpush3.bf16.msra.mxu1 %v6475_v11  ;;  %v6780_v50 = vsel %vm1037_vm1, %v2233_v4, %v6763_v14  ;;  %v2238_v21 = vrot.slane %v6573_v51, 4 }
  0x75   : > { %5023 = vmatprep.mubr.f32.mxu0 %v6737_v36  ;;  %5510 = vmatpush3.bf16.msra.mxu0 %v5507_v33  ;;  %v3927_v33 = vld [vmem:[%s7523_s1 + $0x128] sm:$0xff]  ;;  %7631 = vst [vmem:[#allocation44_spill] sm:$0xff] %v6803_v15 }
  0x76   : > { %5512 = vmatprep.subr.bf16.mxu0 %v6743_v34  ;;  %4682 = vmatprep.mubr.f32.mxu1 %v6751_v44  ;;  %v5359_v11 = vpack.c.bf16 %v3927_v33, %v3926_v63  ;;  %v6799_v63 = vsel %vm1037_vm1, %v2238_v21, %v6784_v60  ;;  %v2243_v33 = vrot.slane %v6622_v19, 4 }
  0x77   : > { %5356 = vmatprep.subr.bf16.mxu1 %v5355_v57  ;;  %4683 = vmatmul.mubr.f32.gmra.mrb[2].mxu1 %v6751_v44  ;;  %7630 = vst [vmem:[#allocation43_spill] sm:$0xff] %v6799_v63 }
  0x78   : > { %5024 = vmatmul.mubr.f32.gmra.mrb[16].mxu0 %v2227_v1  ;;  %v3973_v1 = vld [vmem:[#allocation2 + $0x148] sm:$0xf]  ;;  %4685 = vmatprep.mubr.f32.mxu1 %v6105_v48  ;;  %v3930_v48 = vld [vmem:[%s7523_s1 + $0x140] sm:$0xff] }
  0x79   : > { %5026 = vmatprep.mubr.f32.mxu0 %v6759_v9  ;;  %v3928_v9 = vld [vmem:[%s7523_s1 + $0x130] sm:$0xff]  ;;  %5358 = vmatpush3.bf16.msra.mxu1 %v5355_v57  ;;  %v2241_v4 = vrot.slane %v3973_v1, 4  ;;  %v3931_v57 = vld [vmem:[%s7523_s1 + $0x148] sm:$0xff]  ;;  %v6822_v1 = vrot.slane %v6663_v5, 4 }
  0x7a   : > { %5360 = vmatprep.subr.bf16.mxu1 %v5359_v11  ;;  %v5363_v36 = vpack.c.bf16 %v3929_v42, %v3928_v9  ;;  %v2248_v9 = vrot.slane %v6661_v59, 4  ;;  %v3979_v42 = vld [vmem:[#allocation2 + $0x178] sm:$0xf] }
  0x7b   : > { %4686 = vmatmul.mubr.f32.gmra.mrb[4].mxu1 %v6115_v53  ;;  %v2242_v55 = vsel %vm1037_vm1, %v6784_v60, %v2241_v4  ;;  %v6818_v53 = vsel %vm1037_vm1, %v2243_v33, %v6803_v15  ;;  %v6828_v4 = vld [vmem:[#allocation2 + $0x180] sm:$0xff]  ;;  %v3933_v33 = vld [vmem:[%s7523_s1 + $0x158] sm:$0xff] }
  0x7c   : > { %5027 = vmatmul.mubr.f32.gmra.mrb[18].mxu0 %v2232_v0  ;;  %v3976_v0 = vld [vmem:[#allocation2 + $0x160] sm:$0xf]  ;;  %4688 = vmatprep.mubr.f32.mxu1 %v6162_v12  ;;  %7632 = vst [vmem:[#allocation45_spill] sm:$0xff] %v6818_v53  ;;  %v3932_v12 = vld [vmem:[%s7523_s1 + $0x150] sm:$0xff] }
  0x7d   : > { %5029 = vmatprep.mubr.f32.mxu0 %v6780_v50  ;;  %v2246_v21 = vrot.slane %v3976_v0, 4  ;;  %5362 = vmatpush3.bf16.msra.mxu1 %v5359_v11  ;;  %v6830_v11 = vld [vmem:[#allocation2 + $0x188] sm:$0xff] }
  0x7e   : > { %5364 = vmatprep.subr.bf16.mxu1 %v5363_v36  ;;  %v6845_v60 = vrot.slane %v6830_v11, 4 }
  0x7f   : > { %4689 = vmatmul.mubr.f32.gmra.mrb[6].mxu1 %v6164_v13  ;;  %v2247_v0 = vsel %vm1037_vm1, %v6803_v15, %v2246_v21  ;;  %v6841_v13 = vsel %vm1037_vm1, %v2248_v9, %v6822_v1  ;;  %v6851_v21 = vld [vmem:[#allocation2 + $0x198] sm:$0xff]  ;;  %v3935_v9 = vld [vmem:[%s7523_s1 + $0x168] sm:$0xff] }
  0x80   : > { %5030 = vmatmul.mubr.f32.gmra.mrb[20].mxu0 %v2237_v2  ;;  %v5367_v2 = vpack.c.bf16 %v3931_v57, %v3930_v48  ;;  %4691 = vmatprep.mubr.f32.mxu1 %v6179_v26  ;;  %v2251_v48 = vrot.slane %v3979_v42, 4  ;;  %v2253_v57 = vrot.slane %v6828_v4, 4  ;;  %v3934_v26 = vld [vmem:[%s7523_s1 + $0x160] sm:$0xff] }
  0x81   : > { %5032 = vmatprep.mubr.f32.mxu0 %v6799_v63  ;;  %5366 = vmatpush3.bf16.msra.mxu1 %v5363_v36  ;;  %v3982_v63 = vld [vmem:[#allocation2 + $0x190] sm:$0xf]  ;;  %v6853_v36 = vld [vmem:[#allocation2 + $0x1a0] sm:$0xff] }
  0x82   : > { %5368 = vmatprep.subr.bf16.mxu1 %v5367_v2  ;;  %v2252_v42 = vsel %vm1037_vm1, %v6822_v1, %v2251_v48  ;;  %v6868_v15 = vrot.slane %v6853_v36, 4 }
  0x83   : > { %4692 = vmatmul.mubr.f32.gmra.mrb[8].mxu1 %v6185_v29  ;;  %v6864_v29 = vsel %vm1037_vm1, %v2253_v57, %v6845_v60 }
  0x84   : > { %5033 = vmatmul.mubr.f32.gmra.mrb[22].mxu0 %v2242_v55  ;;  %v5371_v55 = vpack.c.bf16 %v3933_v33, %v3932_v12  ;;  %4694 = vmatprep.mubr.f32.mxu1 %v6221_v52  ;;  %v2256_v12 = vrot.slane %v3982_v63, 4  ;;  %v2258_v33 = vrot.slane %v6851_v21, 4  ;;  %7633 = vst [vmem:[#allocation46_spill] sm:$0xff] %v6868_v15  ;;  %v3936_v63 = vld [vmem:[%s7523_s1 + $0x170] sm:$0xff] }
  0x85   : > { %5035 = vmatprep.mubr.f32.mxu0 %v6818_v53  ;;  %5370 = vmatpush3.bf16.msra.mxu1 %v5367_v2  ;;  %v6870_v53 = vld [vmem:[#allocation2 + $0x1a8] sm:$0xf]  ;;  %v3937_v2 = vld [vmem:[%s7523_s1 + $0x178] sm:$0xff] }
  0x86   : > { %7634 = vst [vmem:[#allocation47_spill] sm:$0xff] %v6870_v53  ;;  %5372 = vmatprep.subr.bf16.mxu1 %v5371_v55  ;;  %v2257_v48 = vsel %vm1037_vm1, %v6845_v60, %v2256_v12  ;;  %v2261_v57 = vrot.slane %v6870_v53, 4  ;;  %v6899_v12 = vld [vmem:[#allocation2 + $0x60] sm:$0xff] }
  0x87   : > { %4695 = vmatmul.mubr.f32.gmra.mrb[10].mxu1 %v6223_v54  ;;  %v6886_v54 = vsel %vm1037_vm1, %v2258_v33, %v6868_v15  ;;  %v3328_v33 = vrot.slane %v6899_v12, 4 }
  0x88   : > { %5036 = vmatmul.mubr.f32.gmra.mrb[24].mxu0 %v2247_v0  ;;  %v5375_v0 = vpack.c.bf16 %v3935_v9, %v3934_v26  ;;  %4697 = vmatprep.mubr.f32.mxu1 %v6259_v16  ;;  %7635 = vst [vmem:[#allocation48_spill] sm:$0xff] %v6886_v54  ;;  %v5379_v26 = vpack.c.bf16 %v3937_v2, %v3936_v63  ;;  %v3986_v9 = vld [vmem:[%s7523_s1 + $0x180] sm:$0xff]  ;;  %v6905_v2 = vld [vmem:[#allocation2 + $0x68] sm:$0xff] }
  0x89   : > { %5038 = vmatprep.mubr.f32.mxu0 %v6841_v13  ;;  %5374 = vmatpush3.bf16.msra.mxu1 %v5371_v55  ;;  %v2262_v55 = vsel %vm1037_vm1, %v6868_v15, %v2261_v57  ;;  %v4101_v57 = vld [vmem:[%s7523_s1 + $0x398] sm:$0xff] }
  0x8a   : > { %5376 = vmatprep.subr.bf16.mxu1 %v5375_v0 }
  0x8b   : > { %4698 = vmatmul.mubr.f32.gmra.mrb[12].mxu1 %v6261_v17 }
  0x8c   : > { %5039 = vmatmul.mubr.f32.gmra.mrb[26].mxu0 %v2252_v42  ;;  %v3987_v42 = vld [vmem:[%s7523_s1 + $0x188] sm:$0xff]  ;;  %4700 = vmatprep.mubr.f32.mxu1 %v6299_v41 }
  0x8d   : > { %5041 = vmatprep.mubr.f32.mxu0 %v6864_v29  ;;  %5378 = vmatpush3.bf16.msra.mxu1 %v5375_v0  ;;  %v6902_v63 = vpack.c.bf16 %v3987_v42, %v3986_v9  ;;  %v6914_v0 = vld [vmem:[#allocation2 + $0x70] sm:$0xf]  ;;  %v3329_v9 = vrot.slane %v6905_v2, 4 }
  0x8e   : > { %5380 = vmatprep.subr.bf16.mxu1 %v5379_v26  ;;  %v3331_v42 = vrot.slane %v6914_v0, 4 }
  0x8f   : > { %4701 = vmatmul.mubr.f32.gmra.mrb[14].mxu1 %v6304_v45  ;;  %v6921_v15 = vsel %vm1037_vm1, %v3328_v33, %v3329_v9  ;;  %v6936_v33 = vld [vmem:[#allocation2 + $0x78] sm:$0xff] }
  0x90   : > { %5042 = vmatmul.mubr.f32.gmra.mrb[28].mxu0 %v2257_v48  ;;  %v4100_v48 = vld [vmem:[%s7523_s1 + $0x390] sm:$0xff]  ;;  %4703 = vmatprep.mubr.f32.mxu1 %v6339_v22 }
  0x91   : > { %5044 = vmatprep.mubr.f32.mxu0 %v6886_v54  ;;  %5382 = vmatpush3.bf16.msra.mxu1 %v5379_v26  ;;  %v5515_v53 = vpack.c.bf16 %v4101_v57, %v4100_v48  ;;  %v4103_v54 = vld [vmem:[%s7523_s1 + $0x3a8] sm:$0xff]  ;;  %v6931_v26 = vsel %vm1037_vm1, %v3329_v9, %v3331_v42  ;;  %v6939_v48 = vld [vmem:[#allocation2 + $0x80] sm:$0xff]  ;;  %v4104_v9 = vld [vmem:[%s7523_s1 + $0x3b0] sm:$0xff] }
  0x92   : > { %5384 = vmatprep.subr.bf16.mxu1 %v6902_v63  ;;  %v4105_v42 = vld [vmem:[%s7523_s1 + $0x3b8] sm:$0xff] }
  0x93   : > { %4704 = vmatmul.mubr.f32.gmra.mrb[16].mxu1 %v6341_v24 }
  0x94   : > { %5045 = vmatmul.mubr.f32.gmra.mrb[30].mxu0 %v2262_v55  ;;  %v4102_v55 = vld [vmem:[%s7523_s1 + $0x3a0] sm:$0xff]  ;;  %4706 = vmatprep.mubr.f32.mxu1 %v6375_v61 }
  0x95   : > { %5079 = vmatprep.mubr.f32.mxu0 %v6899_v12  ;;  %v5519_v57 = vpack.c.bf16 %v4103_v54, %v4102_v55  ;;  %v4106_v54 = vld [vmem:[%s7523_s1 + $0x3c0] sm:$0xff]  ;;  %v4107_v55 = vld [vmem:[%s7523_s1 + $0x3c8] sm:$0xff] }
  0x97   : > { %4707 = vmatmul.mubr.f32.gmra.mrb[18].mxu1 %v6377_v62 }
  0x98   : > { %5080 = vmatmul.mubr.f32.vlgmr.msra.gmra.mrb[0].mxu0 %v6905_v2  ;;  %4709 = vmatprep.mubr.f32.mxu1 %v6465_v18 }
  0x99   : > { %5514 = vmatpush3.bf16.msra.mxu0 %v6743_v34  ;;  %5082 = vmatprep.mubr.f32.mxu0 %v6936_v33  ;;  %v5523_v34 = vpack.c.bf16 %v4105_v42, %v4104_v9  ;;  %v4109_v9 = vld [vmem:[%s7523_s1 + $0x3d8] sm:$0xff] }
  0x9a   : > { %5516 = vmatprep.subr.bf16.mxu0 %v5515_v53  ;;  %v4113_v42 = vld [vmem:[%s7523_s1 + $0x3f8] sm:$0xff] }
  0x9b   : > { %4710 = vmatmul.mubr.f32.gmra.mrb[20].mxu1 %v6467_v47 }
  0x9c   : > { %5083 = vmatmul.mubr.f32.gmra.mrb[2].mxu0 %v6939_v48  ;;  %4712 = vmatprep.mubr.f32.mxu1 %v6499_v35 }
  0x9d   : > { %5085 = vmatprep.mubr.f32.mxu0 %v6259_v16  ;;  %5518 = vmatpush3.bf16.msra.mxu0 %v5515_v53  ;;  %v5527_v16 = vpack.c.bf16 %v4107_v55, %v4106_v54  ;;  %v4108_v53 = vld [vmem:[%s7523_s1 + $0x3d0] sm:$0xff] }
  0x9e   : > { %5520 = vmatprep.subr.bf16.mxu0 %v5519_v57  ;;  %v5874_v54 = vld [vmem:[#allocation2 + $0x10] sm:$0xf] }
  0x9f   : > { %4713 = vmatmul.mubr.f32.gmra.mrb[22].mxu1 %v6501_v23  ;;  %v1041_v55 = vrot.slane %v5874_v54, 4 }
  0xa0   : > { %5086 = vmatmul.mubr.f32.gmra.mrb[4].mxu0 %v6261_v17  ;;  %4715 = vmatprep.mubr.f32.mxu1 %v6534_v32  ;;  %v5531_v17 = vpack.c.bf16 %v4109_v9, %v4108_v53  ;;  %v3989_v53 = vld [vmem:[%s7523_s1 + $0x198] sm:$0xff] }
  0xa1   : > { %5088 = vmatprep.mubr.f32.mxu0 %v6299_v41  ;;  %5522 = vmatpush3.bf16.msra.mxu0 %v5519_v57  ;;  %v4110_v41 = vld [vmem:[%s7523_s1 + $0x3e0] sm:$0xff]  ;;  %v4111_v57 = vld [vmem:[%s7523_s1 + $0x3e8] sm:$0xff] }
  0xa2   : > { %5524 = vmatprep.subr.bf16.mxu0 %v5523_v34 }
  0xa3   : > { %4716 = vmatmul.mubr.f32.gmra.mrb[24].mxu1 %v6536_v37 }
  0xa4   : > { %5089 = vmatmul.mubr.f32.gmra.mrb[6].mxu0 %v6304_v45  ;;  %4718 = vmatprep.mubr.f32.mxu1 %v6573_v51  ;;  %v5535_v45 = vpack.c.bf16 %v4111_v57, %v4110_v41  ;;  %v3990_v41 = vld [vmem:[%s7523_s1 + $0x1a0] sm:$0xff] }
  0xa5   : > { %5091 = vmatprep.mubr.f32.mxu0 %v6339_v22  ;;  %5526 = vmatpush3.bf16.msra.mxu0 %v5523_v34  ;;  %v4112_v22 = vld [vmem:[%s7523_s1 + $0x3f0] sm:$0xff]  ;;  %v4114_v34 = vld [vmem:[%s7523_s1 + $0x400] sm:$0xff] }
  0xa6   : > { %5528 = vmatprep.subr.bf16.mxu0 %v5527_v16 }
  0xa7   : > { %4719 = vmatmul.mubr.f32.gmra.mrb[26].mxu1 %v6575_v38 }
  0xa8   : > { %5092 = vmatmul.mubr.f32.gmra.mrb[8].mxu0 %v6341_v24  ;;  %4721 = vmatprep.mubr.f32.mxu1 %v6622_v19  ;;  %v6992_v24 = vrot.slane %v6751_v44, 4 }
  0xa9   : > { %5094 = vmatprep.mubr.f32.mxu0 %v6375_v61  ;;  %5530 = vmatpush3.bf16.msra.mxu0 %v5527_v16  ;;  %v5539_v61 = vpack.c.bf16 %v4113_v42, %v4112_v22  ;;  %v3988_v16 = vld [vmem:[%s7523_s1 + $0x190] sm:$0xff]  ;;  %v3995_v22 = vld [vmem:[%s7523_s1 + $0x1c8] sm:$0xff]  ;;  %v5877_v42 = vld [vmem:[#allocation2 + $0xb8] sm:$0xf] }
  0xaa   : > { %5532 = vmatprep.subr.bf16.mxu0 %v5531_v17 }
  0xab   : > { %4722 = vmatmul.mubr.f32.gmra.mrb[28].mxu1 %v6624_v25 }
  0xac   : > { %5095 = vmatmul.mubr.f32.gmra.mrb[10].mxu0 %v6377_v62  ;;  %v4115_v62 = vld [vmem:[%s7523_s1 + $0x408] sm:$0xff]  ;;  %4724 = vmatprep.mubr.f32.mxu1 %v6661_v59 }
  0xad   : > { %5097 = vmatprep.mubr.f32.mxu0 %v6465_v18  ;;  %5534 = vmatpush3.bf16.msra.mxu0 %v5531_v17  ;;  %v7004_v18 = vpack.c.bf16 %v4115_v62, %v4114_v34  ;;  %v5387_v17 = vpack.c.bf16 %v3989_v53, %v3988_v16  ;;  %v2943_v34 = vrot.slane %v6905_v2, 2  ;;  %v2945_v16 = vrot.slane %v6914_v0, 2  ;;  %v7093_v53 = vld [vmem:[#allocation2 + $0x88] sm:$0xf] }
  0xae   : > { %5536 = vmatprep.subr.bf16.mxu0 %v5535_v45 }
  0xaf   : > { %4725 = vmatmul.mubr.f32.gmra.mrb[30].mxu1 %v6663_v5 }
  0xb0   : > { %5098 = vmatmul.mubr.f32.gmra.mrb[12].mxu0 %v6467_v47  ;;  %4759 = vmatprep.mubr.f32.mxu1 %v6992_v24  ;;  %v5875_v47 = vld [vmem:[#allocation2 + $0x28] sm:$0xf] }
  0xb1   : > { %5100 = vmatprep.mubr.f32.mxu0 %v6499_v35  ;;  %5538 = vmatpush3.bf16.msra.mxu0 %v5535_v45  ;;  %v1042_v35 = vsel %vm1037_vm1, %v6992_v24, %v1041_v55  ;;  %v1046_v9 = vrot.slane %v5875_v47, 4  ;;  %v3992_v45 = vld [vmem:[%s7523_s1 + $0x1b0] sm:$0xff]  ;;  %v1081_v55 = vrot.slane %v6421_v49, 4  ;;  %v4117_v49 = vld [vmem:[%s7523_s1 + $0x418] sm:$0xff]  ;;  %v7636_v47 = vld [vmem:[#allocation19_spill] sm:$0xff] }
  0xb2   : > { %5540 = vmatprep.subr.bf16.mxu0 %v5539_v61 }
  0xb3   : > { %4760 = vmatmul.mubr.f32.vlgmr.msra.gmra.mrb[0].mxu1 %v1042_v35  ;;  %v4116_v35 = vld [vmem:[%s7523_s1 + $0x410] sm:$0xff]  ;;  %v1082_v0 = vsel %vm1037_vm1, %v6644_v20, %v1081_v55  ;;  %v4122_v55 = vld [vmem:[%s7523_s1 + $0x440] sm:$0xff] }
  0xb4   : > { %5101 = vmatmul.mubr.f32.gmra.mrb[14].mxu0 %v6501_v23  ;;  %v3991_v23 = vld [vmem:[%s7523_s1 + $0x1a8] sm:$0xff]  ;;  %5386 = vmatpush3.bf16.msra.mxu1 %v6902_v63  ;;  %v3994_v63 = vld [vmem:[%s7523_s1 + $0x1c0] sm:$0xff] }
  0xb5   : > { %5103 = vmatprep.mubr.f32.mxu0 %v6534_v32  ;;  %5542 = vmatpush3.bf16.msra.mxu0 %v5539_v61  ;;  %v1047_v32 = vsel %vm1037_vm1, %v6992_v24, %v1046_v9  ;;  %v5391_v57 = vpack.c.bf16 %v3991_v23, %v3990_v41  ;;  %v1076_v61 = vrot.slane %v5877_v42, 4  ;;  %v1086_v9 = vrot.slane %v7636_v47, 4  ;;  %v7643_v42 = vld [vmem:[#allocation12_spill] sm:$0xff]  ;;  %v7648_v47 = vld [vmem:[#allocation14_spill] sm:$0xff] }
  0xb6   : > { %5544 = vmatprep.subr.bf16.mxu0 %v7004_v18  ;;  %4762 = vmatprep.mubr.f32.mxu1 %v6992_v24  ;;  %v2950_v41 = vrot.slane %v7093_v53, 2  ;;  %v7637_v23 = vrot.slane %v6221_v52, 2 }
  0xb7   : > { %5388 = vmatprep.subr.bf16.mxu1 %v5387_v17  ;;  %4763 = vmatmul.mubr.f32.gmra.mrb[2].mxu1 %v1047_v32  ;;  %v1077_v54 = vsel %vm1037_vm1, %v6620_v58, %v1076_v61  ;;  %v7644_v61 = vld [vmem:[#allocation11_spill] sm:$0xff] }
  0xb8   : > { %5104 = vmatmul.mubr.f32.gmra.mrb[16].mxu0 %v6536_v37  ;;  %v3993_v37 = vld [vmem:[%s7523_s1 + $0x1b8] sm:$0xff]  ;;  %4765 = vmatprep.mubr.f32.mxu1 %v6459_v27 }
  0xb9   : > { %5106 = vmatprep.mubr.f32.mxu0 %v6573_v51  ;;  %5390 = vmatpush3.bf16.msra.mxu1 %v5387_v17  ;;  %v5395_v51 = vpack.c.bf16 %v3993_v37, %v3992_v45  ;;  %v3997_v27 = vld [vmem:[%s7523_s1 + $0x1d8] sm:$0xff]  ;;  %v2946_v17 = vsel %vm457_vm0, %v2943_v34, %v2945_v16  ;;  %v5547_v45 = vpack.c.bf16 %v4117_v49, %v4116_v35  ;;  %v7638_v37 = vld [vmem:[#allocation3_spill] sm:$0xff]  ;;  %v4123_v16 = vld [vmem:[%s7523_s1 + $0x448] sm:$0xff] }
  0xba   : > { %5392 = vmatprep.subr.bf16.mxu1 %v5391_v57  ;;  %v7647_v49 = vld [vmem:[#allocation27_spill] sm:$0xff] }
  0xbb   : > { %4766 = vmatmul.mubr.f32.gmra.mrb[4].mxu1 %v6579_v3  ;;  %v3996_v3 = vld [vmem:[%s7523_s1 + $0x1d0] sm:$0xff] }
  0xbc   : > { %5107 = vmatmul.mubr.f32.gmra.mrb[18].mxu0 %v6575_v38  ;;  %4768 = vmatprep.mubr.f32.mxu1 %v6493_v43  ;;  %v5399_v38 = vpack.c.bf16 %v3995_v22, %v3994_v63  ;;  %v5403_v43 = vpack.c.bf16 %v3997_v27, %v3996_v3  ;;  %v4119_v63 = vld [vmem:[%s7523_s1 + $0x428] sm:$0xff]  ;;  %v1087_v22 = vsel %vm1037_vm1, %v6695_v46, %v1086_v9  ;;  %v7649_v9 = vld [vmem:[#allocation13_spill] sm:$0xff] }
  0xbd   : > { %5109 = vmatprep.mubr.f32.mxu0 %v6622_v19  ;;  %5394 = vmatpush3.bf16.msra.mxu1 %v5391_v57  ;;  %v7111_v57 = vld [vmem:[#allocation2 + $0xa0] sm:$0xf] }
  0xbe   : > { %5396 = vmatprep.subr.bf16.mxu1 %v5395_v51 }
  0xbf   : > { %4769 = vmatmul.mubr.f32.gmra.mrb[6].mxu1 %v6592_v30  ;;  %v3999_v30 = vld [vmem:[%s7523_s1 + $0x1e8] sm:$0xff] }
  0xc0   : > { %5110 = vmatmul.mubr.f32.gmra.mrb[20].mxu0 %v6624_v25  ;;  %4771 = vmatprep.mubr.f32.mxu1 %v6530_v8  ;;  %v5876_v8 = vld [vmem:[#allocation2 + $0xa0] sm:$0xf]  ;;  %v4001_v25 = vld [vmem:[%s7523_s1 + $0x1f8] sm:$0xff] }
  0xc1   : > { %5112 = vmatprep.mubr.f32.mxu0 %v6661_v59  ;;  %5398 = vmatpush3.bf16.msra.mxu1 %v5395_v51  ;;  %v3998_v59 = vld [vmem:[%s7523_s1 + $0x1e0] sm:$0xff] }
  0xc2   : > { %5400 = vmatprep.subr.bf16.mxu1 %v5399_v38  ;;  %v5407_v19 = vpack.c.bf16 %v3999_v30, %v3998_v59  ;;  %v4118_v51 = vld [vmem:[%s7523_s1 + $0x420] sm:$0xff]  ;;  %v7127_v59 = vld [vmem:[#allocation2 + $0xb8] sm:$0xf] }
  0xc3   : > { %4772 = vmatmul.mubr.f32.gmra.mrb[8].mxu1 %v6600_v7  ;;  %v4000_v7 = vld [vmem:[%s7523_s1 + $0x1f0] sm:$0xff]  ;;  %v5551_v30 = vpack.c.bf16 %v4119_v63, %v4118_v51  ;;  %v4125_v51 = vld [vmem:[%s7523_s1 + $0x458] sm:$0xff] }
  0xc4   : > { %5113 = vmatmul.mubr.f32.gmra.mrb[22].mxu0 %v6663_v5  ;;  %4774 = vmatprep.mubr.f32.mxu1 %v6571_v39  ;;  %v1071_v5 = vrot.slane %v5876_v8, 4  ;;  %v5411_v62 = vpack.c.bf16 %v4001_v25, %v4000_v7  ;;  %v4120_v8 = vld [vmem:[%s7523_s1 + $0x430] sm:$0xff]  ;;  %v7642_v25 = vld [vmem:[#allocation24_spill] sm:$0xff] }
  0xc5   : > { %5115 = vmatprep.mubr.f32.mxu0 %v6828_v4  ;;  %5402 = vmatpush3.bf16.msra.mxu1 %v5399_v38  ;;  %v7639_v38 = vld [vmem:[#allocation21_spill] sm:$0xff] }
  0xc6   : > { %5404 = vmatprep.subr.bf16.mxu1 %v5403_v43  ;;  %v1072_v39 = vsel %vm1037_vm1, %v6553_v10, %v1071_v5  ;;  %v1091_v3 = vrot.slane %v7639_v38, 4  ;;  %v4121_v5 = vld [vmem:[%s7523_s1 + $0x438] sm:$0xff] }
  0xc7   : > { %4775 = vmatmul.mubr.f32.gmra.mrb[10].mxu1 %v6627_v28  ;;  %v2942_v28 = vrot.slane %v6899_v12, 2  ;;  %v2948_v12 = vrot.slane %v6939_v48, 2 }
  0xc8   : > { %5116 = vmatmul.mubr.f32.gmra.mrb[24].mxu0 %v6830_v11  ;;  %4777 = vmatprep.mubr.f32.mxu1 %v6610_v56 }
  0xc9   : > { %5118 = vmatprep.mubr.f32.mxu0 %v6851_v21  ;;  %5406 = vmatpush3.bf16.msra.mxu1 %v5403_v43  ;;  %v2944_v2 = vsel %vm457_vm0, %v2942_v28, %v2943_v34  ;;  %v2949_v32 = vsel %vm457_vm0, %v7637_v23, %v2948_v12  ;;  %v2951_v27 = vsel %vm457_vm0, %v2948_v12, %v2950_v41  ;;  %v2955_v43 = vrot.slane %v7111_v57, 2  ;;  %v7645_v12 = vld [vmem:[#allocation41_spill] sm:$0xff]  ;;  %v7159_v23 = vld [vmem:[#allocation2 + $0xe8] sm:$0xf] }
  0xca   : > { %5408 = vmatprep.subr.bf16.mxu1 %v5407_v19  ;;  %v2960_v34 = vrot.slane %v7127_v59, 2 }
  0xcb   : > { %4778 = vmatmul.mubr.f32.gmra.mrb[12].mxu1 %v1072_v39  ;;  %v1096_v39 = vrot.slane %v7642_v25, 4  ;;  %v2956_v28 = vsel %vm457_vm0, %v7644_v61, %v2955_v43  ;;  %v4127_v25 = vld [vmem:[%s7523_s1 + $0x468] sm:$0xff] }
  0xcc   : > { %5119 = vmatmul.mubr.f32.gmra.mrb[26].mxu0 %v6853_v36  ;;  %4780 = vmatprep.mubr.f32.mxu1 %v6659_v40 }
  0xcd   : > { %5121 = vmatprep.mubr.f32.mxu0 %v6751_v44  ;;  %5410 = vmatpush3.bf16.msra.mxu1 %v5407_v19  ;;  %v7641_v19 = vld [vmem:[#allocation38_spill] sm:$0xff] }
  0xce   : > { %5412 = vmatprep.subr.bf16.mxu1 %v5411_v62  ;;  %v1092_v7 = vsel %vm1037_vm1, %v7641_v19, %v1091_v3  ;;  %v7651_v3 = vld [vmem:[#allocation16_spill] sm:$0xff] }
  0xcf   : > { %4781 = vmatmul.mubr.f32.gmra.mrb[14].mxu1 %v1077_v54  ;;  %v5555_v54 = vpack.c.bf16 %v4121_v5, %v4120_v8  ;;  %v7175_v8 = vld [vmem:[#allocation2 + $0x100] sm:$0xf] }
  0xd0   : > { %5122 = vmatmul.mubr.f32.gmra.mrb[28].mxu0 %v6751_v44  ;;  %4783 = vmatprep.mubr.f32.mxu1 %v6678_v31 }
  0xd1   : > { %5124 = vmatprep.mubr.f32.mxu0 %v6751_v44  ;;  %5414 = vmatpush3.bf16.msra.mxu1 %v5411_v62  ;;  %v7143_v62 = vld [vmem:[#allocation2 + $0xd0] sm:$0xf] }
  0xd2   : > { %5575 = vmatprep.subr.bf16.mxu1 %v7638_v37  ;;  %v2965_v41 = vrot.slane %v7143_v62, 2 }
  0xd3   : > { %4784 = vmatmul.mubr.f32.gmra.mrb[16].mxu1 %v1082_v0  ;;  %v1101_v0 = vrot.slane %v7647_v49, 4  ;;  %v7191_v49 = vld [vmem:[#allocation2 + $0x118] sm:$0xf] }
  0xd4   : > { %5125 = vmatmul.mubr.f32.gmra.mrb[30].mxu0 %v6751_v44  ;;  %4786 = vmatprep.mubr.f32.mxu1 %v6717_v6 }
  0xd5   : > { %5159 = vmatprep.mubr.f32.mxu0 %v2944_v2  ;;  %v7646_v2 = vld [vmem:[#allocation40_spill] sm:$0xff]  ;;  %v1102_v63 = vsel %vm1037_vm1, %v6763_v14, %v1101_v0 }
  0xd6   : > { %v1097_v35 = vsel %vm1037_vm1, %v7646_v2, %v1096_v39  ;;  %v7653_v39 = vld [vmem:[#allocation43_spill] sm:$0xff] }
  0xd7   : > { %4787 = vmatmul.mubr.f32.gmra.mrb[18].mxu1 %v1087_v22  ;;  %v7650_v22 = vld [vmem:[#allocation30_spill] sm:$0xff] }
  0xd8   : > { %5160 = vmatmul.mubr.f32.vlgmr.msra.gmra.mrb[0].mxu0 %v2946_v17  ;;  %v2961_v17 = vsel %vm457_vm0, %v7649_v9, %v2960_v34  ;;  %v1106_v38 = vrot.slane %v7650_v22, 4  ;;  %v4129_v9 = vld [vmem:[%s7523_s1 + $0x478] sm:$0xff]  ;;  %v7662_v22 = vld [vmem:[#allocation20_spill] sm:$0xff] }
  0xd9   : > { %5546 = vmatpush3.bf16.msra.mxu0 %v7004_v18  ;;  %5162 = vmatprep.mubr.f32.mxu0 %v2949_v32  ;;  %v7640_v18 = vld [vmem:[#allocation39_spill] sm:$0xff]  ;;  %v5559_v32 = vpack.c.bf16 %v4123_v16, %v4122_v55  ;;  %v7657_v55 = vld [vmem:[#allocation17_spill] sm:$0xff] }
  0xda   : > { %5548 = vmatprep.subr.bf16.mxu0 %v5547_v45  ;;  %4789 = vmatprep.mubr.f32.mxu1 %v7640_v18 }
  0xdb   : > { %4790 = vmatmul.mubr.f32.gmra.mrb[20].mxu1 %v1092_v7  ;;  %v4126_v7 = vld [vmem:[%s7523_s1 + $0x460] sm:$0xff] }
  0xdc   : > { %5163 = vmatmul.mubr.f32.gmra.mrb[2].mxu0 %v2951_v27  ;;  %4792 = vmatprep.mubr.f32.mxu1 %v7645_v12  ;;  %v7652_v27 = vld [vmem:[#allocation15_spill] sm:$0xff]  ;;  %v5567_v0 = vpack.c.bf16 %v4127_v25, %v4126_v7  ;;  %v7663_v7 = vld [vmem:[#allocation25_spill] sm:$0xff] }
  0xdd   : > { %5165 = vmatprep.mubr.f32.mxu0 %v7643_v42  ;;  %5550 = vmatpush3.bf16.msra.mxu0 %v5547_v45  ;;  %v4124_v45 = vld [vmem:[%s7523_s1 + $0x450] sm:$0xff]  ;;  %v2966_v43 = vsel %vm457_vm0, %v7652_v27, %v2965_v41  ;;  %v7654_v42 = vld [vmem:[#allocation42_spill] sm:$0xff]  ;;  %v7659_v41 = vld [vmem:[#allocation44_spill] sm:$0xff] }
  0xde   : > { %5552 = vmatprep.subr.bf16.mxu0 %v5551_v30  ;;  %v5563_v5 = vpack.c.bf16 %v4125_v51, %v4124_v45  ;;  %v1107_v61 = vsel %vm1037_vm1, %v7654_v42, %v1106_v38  ;;  %v7207_v27 = vld [vmem:[#allocation2 + $0x130] sm:$0xf]  ;;  %v7664_v25 = vld [vmem:[#allocation23_spill] sm:$0xff] }
  0xdf   : > { %4793 = vmatmul.mubr.f32.gmra.mrb[22].mxu1 %v1097_v35  ;;  %v2975_v35 = vrot.slane %v7175_v8, 2 }
  0xe0   : > { %5166 = vmatmul.mubr.f32.gmra.mrb[4].mxu0 %v2956_v28  ;;  %4795 = vmatprep.mubr.f32.mxu1 %v6780_v50  ;;  %v7655_v28 = vld [vmem:[#allocation33_spill] sm:$0xff] }
  0xe1   : > { %5168 = vmatprep.mubr.f32.mxu0 %v7648_v47  ;;  %5554 = vmatpush3.bf16.msra.mxu0 %v5551_v30  ;;  %v2970_v30 = vrot.slane %v7159_v23, 2  ;;  %v1111_v34 = vrot.slane %v7655_v28, 4  ;;  %v4128_v47 = vld [vmem:[%s7523_s1 + $0x470] sm:$0xff]  ;;  %v2976_v38 = vsel %vm457_vm0, %v7662_v22, %v2975_v35  ;;  %v2985_v28 = vrot.slane %v7207_v27, 2  ;;  %v7669_v22 = vld [vmem:[#allocation4_spill] sm:$0xff] }
  0xe2   : > { %5556 = vmatprep.subr.bf16.mxu0 %v5555_v54 }
  0xe3   : > { %4796 = vmatmul.mubr.f32.gmra.mrb[24].mxu1 %v1102_v63  ;;  %v2971_v16 = vsel %vm457_vm0, %v7657_v55, %v2970_v30  ;;  %v1112_v45 = vsel %vm1037_vm1, %v7659_v41, %v1111_v34  ;;  %v7661_v63 = vld [vmem:[#allocation22_spill] sm:$0xff]  ;;  %v5878_v34 = vld [vmem:[#allocation2 + $0x30] sm:$0xff] }
  0xe4   : > { %5169 = vmatmul.mubr.f32.gmra.mrb[6].mxu0 %v2961_v17  ;;  %4798 = vmatprep.mubr.f32.mxu1 %v7653_v39  ;;  %v7658_v17 = vld [vmem:[#allocation45_spill] sm:$0xff]  ;;  %v7666_v55 = vld [vmem:[#allocation26_spill] sm:$0xff] }
  0xe5   : > { %5171 = vmatprep.mubr.f32.mxu0 %v7651_v3  ;;  %5558 = vmatpush3.bf16.msra.mxu0 %v5555_v54  ;;  %v7656_v54 = vld [vmem:[#allocation18_spill] sm:$0xff]  ;;  %v2980_v3 = vrot.slane %v7191_v49, 2 }
  0xe6   : > { %5560 = vmatprep.subr.bf16.mxu0 %v5559_v32 }
  0xe7   : > { %4799 = vmatmul.mubr.f32.gmra.mrb[26].mxu1 %v1107_v61  ;;  %v2981_v61 = vsel %vm457_vm0, %v7664_v25, %v2980_v3  ;;  %v5881_v3 = vld [vmem:[#allocation2 + $0x50] sm:$0xff] }
  0xe8   : > { %5172 = vmatmul.mubr.f32.gmra.mrb[8].mxu0 %v2966_v43  ;;  %4801 = vmatprep.mubr.f32.mxu1 %v7658_v17  ;;  %v5571_v43 = vpack.c.bf16 %v4129_v9, %v4128_v47  ;;  %v7222_v47 = vld [vmem:[#allocation2 + $0x160] sm:$0xf]  ;;  %v5879_v9 = vld [vmem:[#allocation2 + $0x38] sm:$0xff] }
  0xe9   : > { %5174 = vmatprep.mubr.f32.mxu0 %v7656_v54  ;;  %5562 = vmatpush3.bf16.msra.mxu0 %v5559_v32  ;;  %v7660_v32 = vld [vmem:[#allocation36_spill] sm:$0xff] }
  0xea   : > { %5564 = vmatprep.subr.bf16.mxu0 %v5563_v5  ;;  %v1116_v51 = vrot.slane %v7660_v32, 4  ;;  %v7665_v54 = vld [vmem:[#allocation28_spill] sm:$0xff]  ;;  %v7668_v32 = vld [vmem:[#allocation29_spill] sm:$0xff] }
  0xeb   : > { %4802 = vmatmul.mubr.f32.gmra.mrb[28].mxu1 %v1112_v45  ;;  %v7667_v45 = vld [vmem:[#allocation31_spill] sm:$0xff] }
  0xec   : > { %5175 = vmatmul.mubr.f32.gmra.mrb[10].mxu0 %v2971_v16  ;;  %4804 = vmatprep.mubr.f32.mxu1 %v6841_v13  ;;  %v1117_v30 = vsel %vm1037_vm1, %v6822_v1, %v1116_v51  ;;  %v2986_v16 = vsel %vm457_vm0, %v7666_v55, %v2985_v28  ;;  %v7239_v28 = vrot.slane %v6830_v11, 2  ;;  %v5883_v55 = vld [vmem:[#allocation2 + $0x68] sm:$0xff] }
  0xed   : > { %5177 = vmatprep.mubr.f32.mxu0 %v7661_v63  ;;  %5566 = vmatpush3.bf16.msra.mxu0 %v5563_v5  ;;  %v7216_v5 = vld [vmem:[#allocation2 + $0x148] sm:$0xf]  ;;  %v2995_v63 = vrot.slane %v7222_v47, 2 }
  0xee   : > { %5568 = vmatprep.subr.bf16.mxu0 %v5567_v0  ;;  %v2990_v35 = vrot.slane %v7216_v5, 2 }
  0xef   : > { %4805 = vmatmul.mubr.f32.gmra.mrb[30].mxu1 %v1117_v30  ;;  %v7670_v30 = vld [vmem:[#allocation34_spill] sm:$0xff] }
  0xf0   : > { %5178 = vmatmul.mubr.f32.gmra.mrb[12].mxu0 %v2976_v38  ;;  %4839 = vmatprep.mubr.f32.mxu1 %v5878_v34  ;;  %v2991_v51 = vsel %vm457_vm0, %v7668_v32, %v2990_v35  ;;  %v7230_v38 = vld [vmem:[#allocation2 + $0x178] sm:$0xf]  ;;  %v7672_v34 = vld [vmem:[#allocation5_spill] sm:$0xff]  ;;  %v7674_v35 = vld [vmem:[#allocation35_spill] sm:$0xff]  ;;  %v7252_v32 = vrot.slane %v6853_v36, 2 }
  0xf1   : > { %5180 = vmatprep.mubr.f32.mxu0 %v7663_v7  ;;  %5570 = vmatpush3.bf16.msra.mxu0 %v5567_v0  ;;  %v5880_v0 = vld [vmem:[#allocation2 + $0x48] sm:$0xff]  ;;  %v3000_v25 = vrot.slane %v7230_v38, 2 }
  0xf2   : > { %5572 = vmatprep.subr.bf16.mxu0 %v5571_v43 }
  0xf3   : > { %4840 = vmatmul.mubr.f32.vlgmr.msra.gmra.mrb[0].mxu1 %v5879_v9  ;;  %v3001_v9 = vsel %vm457_vm0, %v7674_v35, %v3000_v25  ;;  %v7271_v25 = vld [vmem:[#allocation2 + $0x1c0] sm:$0xf]  ;;  %v7279_v35 = vld [vmem:[#allocation2 + $0x1d8] sm:$0xf] }
  0xf4   : > { %5181 = vmatmul.mubr.f32.gmra.mrb[14].mxu0 %v2981_v61  ;;  %5583 = vmatpush3.bf16.msra.mxu1 %v7638_v37  ;;  %v7671_v37 = vld [vmem:[#allocation32_spill] sm:$0xff]  ;;  %v3002_v61 = vrot.slane %v6828_v4, 2 }
  0xf5   : > { %5183 = vmatprep.mubr.f32.mxu0 %v7665_v54  ;;  %5574 = vmatpush3.bf16.msra.mxu0 %v5571_v43  ;;  %v5882_v43 = vld [vmem:[#allocation2 + $0x60] sm:$0xff]  ;;  %v2996_v7 = vsel %vm457_vm0, %v7671_v37, %v2995_v63  ;;  %v7242_v54 = vld [vmem:[#allocation2 + $0x190] sm:$0xf]  ;;  %v7258_v63 = vld [vmem:[#allocation2 + $0x1a8] sm:$0xf]  ;;  %v3012_v37 = vrot.slane %v6751_v44, 2 }
  0xf6   : > { %4842 = vmatprep.mubr.f32.mxu1 %v5880_v0  ;;  %5576 = vmatprep.subr.bf16.mxu1 %v7669_v22  ;;  %v3005_v0 = vrot.slane %v7242_v54, 2  ;;  %v3015_v44 = vrot.slane %v7271_v25, 2 }
  0xf7   : > { %4843 = vmatmul.mubr.f32.gmra.mrb[2].mxu1 %v5881_v3  ;;  %v5885_v3 = vld [vmem:[#allocation2 + $0x90] sm:$0xff] }
  0xf8   : > { %5184 = vmatmul.mubr.f32.gmra.mrb[16].mxu0 %v2986_v16  ;;  %4845 = vmatprep.mubr.f32.mxu1 %v5882_v43  ;;  %v7673_v16 = vld [vmem:[#allocation37_spill] sm:$0xff]  ;;  %v3006_v43 = vsel %vm457_vm0, %v7239_v28, %v3005_v0 }
  0xf9   : > { %5186 = vmatprep.mubr.f32.mxu0 %v7667_v45  ;;  %5584 = vmatpush3.bf16.msra.mxu1 %v7669_v22  ;;  %v3007_v45 = vrot.slane %v6851_v21, 2  ;;  %v5884_v22 = vld [vmem:[#allocation2 + $0x80] sm:$0xff]  ;;  %v5888_v0 = vld [vmem:[#allocation2 + $0xb0] sm:$0xff] }
  0xfa   : > { %5577 = vmatprep.subr.bf16.mxu1 %v7672_v34 }
  0xfb   : > { %4846 = vmatmul.mubr.f32.gmra.mrb[4].mxu1 %v5883_v55  ;;  %v5887_v55 = vld [vmem:[#allocation2 + $0xa8] sm:$0xff] }
  0xfc   : > { %5187 = vmatmul.mubr.f32.gmra.mrb[18].mxu0 %v2991_v51  ;;  %4848 = vmatprep.mubr.f32.mxu1 %v6936_v33  ;;  %v7256_v51 = vsel %vm457_vm0, %v3002_v61, %v7239_v28  ;;  %v7675_v33 = vld [vmem:[#allocation6_spill] sm:$0xff]  ;;  %v7676_v61 = vld [vmem:[#allocation7_spill] sm:$0xff] }
  0xfd   : > { %5189 = vmatprep.mubr.f32.mxu0 %v7670_v30  ;;  %5585 = vmatpush3.bf16.msra.mxu1 %v7672_v34  ;;  %v3010_v30 = vrot.slane %v7258_v63, 2  ;;  %v5886_v34 = vld [vmem:[#allocation2 + $0x98] sm:$0xff] }
  0xfe   : > { %5578 = vmatprep.subr.bf16.mxu1 %v7675_v33 }
  0xff   : > { %4849 = vmatmul.mubr.f32.gmra.mrb[6].mxu1 %v5884_v22  ;;  %v3020_v22 = vrot.slane %v7279_v35, 2 }
 0x100   : > { %5190 = vmatmul.mubr.f32.gmra.mrb[20].mxu0 %v2996_v7  ;;  %4851 = vmatprep.mubr.f32.mxu1 %v5885_v3  ;;  %v7269_v7 = vsel %vm457_vm0, %v3007_v45, %v7252_v32  ;;  %v5889_v45 = vld [vmem:[#allocation2 + $0xc0] sm:$0xff]  ;;  %v7678_v3 = vld [vmem:[#allocation9_spill] sm:$0xff] }
 0x101   : > { %5192 = vmatprep.mubr.f32.mxu0 %v7673_v16  ;;  %5586 = vmatpush3.bf16.msra.mxu1 %v7675_v33  ;;  %v3011_v16 = vsel %vm457_vm0, %v7252_v32, %v3010_v30  ;;  %v3016_v33 = vsel %vm457_vm0, %v3012_v37, %v3015_v44  ;;  %v5891_v30 = vld [vmem:[#allocation2 + $0xd8] sm:$0xff]  ;;  %v7290_v44 = vld [vmem:[#allocation2 + $0xf0] sm:$0xff] }
 0x102   : > { %5579 = vmatprep.subr.bf16.mxu1 %v7676_v61 }
 0x103   : > { %4852 = vmatmul.mubr.f32.gmra.mrb[8].mxu1 %v5886_v34  ;;  %v3334_v34 = vrot.slane %v6939_v48, 4  ;;  %v7299_v48 = vld [vmem:[#allocation2 + $0xf8] sm:$0xff] }
 0x104   : > { %5193 = vmatmul.mubr.f32.gmra.mrb[22].mxu0 %v3001_v9  ;;  %4854 = vmatprep.mubr.f32.mxu1 %v5887_v55  ;;  %v7677_v9 = vld [vmem:[#allocation8_spill] sm:$0xff]  ;;  %v7679_v55 = vld [vmem:[#allocation10_spill] sm:$0xff] }
 0x105   : > { %5195 = vmatprep.mubr.f32.mxu0 %v7256_v51  ;;  %5587 = vmatpush3.bf16.msra.mxu1 %v7676_v61  ;;  %v3021_v61 = vsel %vm457_vm0, %v3012_v37, %v3020_v22  ;;  %v3346_v22 = vrot.slane %v7127_v59, 4 }
 0x106   : > { %5580 = vmatprep.subr.bf16.mxu1 %v7677_v9 }
 0x107   : > { %4855 = vmatmul.mubr.f32.gmra.mrb[10].mxu1 %v5888_v0 }
 0x108   : > { %5196 = vmatmul.mubr.f32.gmra.mrb[24].mxu0 %v3006_v43  ;;  %4857 = vmatprep.mubr.f32.mxu1 %v5889_v45  ;;  %v5890_v43 = vld [vmem:[#allocation2 + $0xc8] sm:$0xff] }
 0x109   : > { %5198 = vmatprep.mubr.f32.mxu0 %v7269_v7  ;;  %5588 = vmatpush3.bf16.msra.mxu1 %v7677_v9  ;;  %v3336_v9 = vrot.slane %v7093_v53, 4  ;;  %v7303_v45 = vld [vmem:[#allocation2 + $0x108] sm:$0xff]  ;;  %v3341_v53 = vrot.slane %v7111_v57, 4  ;;  %v7321_v57 = vld [vmem:[#allocation2 + $0x138] sm:$0xff] }
 0x10a   : > { %5581 = vmatprep.subr.bf16.mxu1 %v7678_v3 }
 0x10b   : > { %4858 = vmatmul.mubr.f32.gmra.mrb[12].mxu1 %v5890_v43  ;;  %v3347_v43 = vsel %vm1037_vm1, %v6620_v58, %v3346_v22  ;;  %v7341_v58 = vld [vmem:[#allocation2 + $0x168] sm:$0xff] }
 0x10c   : > { %5199 = vmatmul.mubr.f32.gmra.mrb[26].mxu0 %v3011_v16  ;;  %4860 = vmatprep.mubr.f32.mxu1 %v5891_v30  ;;  %v5892_v16 = vld [vmem:[#allocation2 + $0xe0] sm:$0xff] }
 0x10d   : > { %5201 = vmatprep.mubr.f32.mxu0 %v3012_v37  ;;  %5589 = vmatpush3.bf16.msra.mxu1 %v7678_v3  ;;  %v7318_v3 = vld [vmem:[#allocation2 + $0x128] sm:$0xff]  ;;  %v7328_v30 = vld [vmem:[#allocation2 + $0x140] sm:$0xff] }
 0x10e   : > { %5582 = vmatprep.subr.bf16.mxu1 %v7679_v55 }
 0x10f   : > { %4861 = vmatmul.mubr.f32.gmra.mrb[14].mxu1 %v5892_v16 }
 0x110   : > { %5202 = vmatmul.mubr.f32.gmra.mrb[28].mxu0 %v3016_v33  ;;  %4863 = vmatprep.mubr.f32.mxu1 %v7290_v44  ;;  %v7308_v33 = vld [vmem:[#allocation2 + $0x110] sm:$0xff] }
 0x111   : > { %5204 = vmatprep.mubr.f32.mxu0 %v3012_v37  ;;  %5590 = vmatpush3.bf16.msra.mxu1 %v7679_v55  ;;  %v7680_v37 = vrot.slane %v6221_v52, 4  ;;  %v7311_v52 = vld [vmem:[#allocation2 + $0x120] sm:$0xff]  ;;  %v1843_v16 = vrot.slane %v7308_v33, 2 }
 0x113   : > { %v3335_v0 = vsel %vm1037_vm1, %v7680_v37, %v3334_v34  ;;  %4864 = vmatmul.mubr.f32.gmra.mrb[16].mxu1 %v7299_v48  ;;  %v1848_v37 = vrot.slane %v7318_v3, 2 }
 0x114   : > { %5205 = vmatmul.mubr.f32.gmra.mrb[30].mxu0 %v3021_v61  ;;  %4866 = vmatprep.mubr.f32.mxu1 %v7303_v45  ;;  %v7338_v61 = vld [vmem:[#allocation2 + $0x158] sm:$0xff] }
 0x115   : > { %5239 = vmatprep.mubr.f32.mxu0 %v6921_v15  ;;  %v3337_v15 = vsel %vm1037_vm1, %v3334_v34, %v3336_v9  ;;  %v7348_v34 = vld [vmem:[#allocation2 + $0x170] sm:$0xff]  ;;  %v1847_v9 = vrot.slane %v7311_v52, 2  ;;  %v1858_v22 = vrot.slane %v7338_v61, 2 }
 0x117   : > { %4867 = vmatmul.mubr.f32.gmra.mrb[18].mxu1 %v7308_v33  ;;  %v5908_v33 = vld [vmem:[#allocation2 + $0x148] sm:$0xf] }
 0x118   : > { %5240 = vmatmul.mubr.f32.vlgmr.msra.gmra.mrb[0].mxu0 %v6931_v26  ;;  %4869 = vmatprep.mubr.f32.mxu1 %v7311_v52  ;;  %v3342_v26 = vsel %vm1037_vm1, %v6553_v10, %v3341_v53  ;;  %v7331_v10 = vld [vmem:[#allocation2 + $0x150] sm:$0xff]  ;;  %v1855_v52 = vrot.slane %v5908_v33, 2 }
 0x119   : > { %5242 = vmatprep.mubr.f32.mxu0 %v3335_v0 }
 0x11b   : > { %4870 = vmatmul.mubr.f32.gmra.mrb[20].mxu1 %v7318_v3 }
 0x11c   : > { %5243 = vmatmul.mubr.f32.gmra.mrb[2].mxu0 %v3337_v15  ;;  %4872 = vmatprep.mubr.f32.mxu1 %v7321_v57  ;;  %v1853_v15 = vrot.slane %v7328_v30, 2 }
 0x11d   : > { %5245 = vmatprep.mubr.f32.mxu0 %v6610_v56  ;;  %v3351_v56 = vrot.slane %v7143_v62, 4 }
 0x11e   : > { %v1856_v3 = vsel %vm457_vm0, %v1853_v15, %v1855_v52 }
 0x11f   : > { %4873 = vmatmul.mubr.f32.gmra.mrb[22].mxu1 %v7328_v30  ;;  %v3352_v59 = vsel %vm1037_vm1, %v6644_v20, %v3351_v56  ;;  %v3366_v20 = vrot.slane %v7191_v49, 4  ;;  %v1842_v49 = vrot.slane %v7303_v45, 2  ;;  %v1852_v45 = vrot.slane %v7321_v57, 2 }
 0x120   : > { %5246 = vmatmul.mubr.f32.gmra.mrb[4].mxu0 %v3342_v26  ;;  %4875 = vmatprep.mubr.f32.mxu1 %v7331_v10  ;;  %v1857_v26 = vrot.slane %v7331_v10, 2  ;;  %v1862_v56 = vrot.slane %v7341_v58, 2  ;;  %v1863_v30 = vrot.slane %v7348_v34, 2 }
 0x121   : > { %5248 = vmatprep.mubr.f32.mxu0 %v6659_v40  ;;  %v3356_v40 = vrot.slane %v7159_v23, 4 }
 0x123   : > { %4876 = vmatmul.mubr.f32.gmra.mrb[24].mxu1 %v7338_v61  ;;  %v3357_v62 = vsel %vm1037_vm1, %v6695_v46, %v3356_v40  ;;  %v1838_v46 = vrot.slane %v7299_v48, 2 }
 0x124   : > { %5249 = vmatmul.mubr.f32.gmra.mrb[6].mxu0 %v3347_v43  ;;  %4878 = vmatprep.mubr.f32.mxu1 %v7341_v58  ;;  %v5911_v58 = vld [vmem:[#allocation2 + $0x190] sm:$0xf] }
 0x125   : > { %5251 = vmatprep.mubr.f32.mxu0 %v6678_v31  ;;  %v3361_v31 = vrot.slane %v7175_v8, 4  ;;  %v5905_v8 = vld [vmem:[#allocation2 + $0x100] sm:$0xf] }
 0x126   : > { %v1840_v55 = vrot.slane %v5905_v8, 2 }
 0x127   : > { %4879 = vmatmul.mubr.f32.gmra.mrb[26].mxu1 %v7348_v34  ;;  %v3362_v23 = vsel %vm1037_vm1, %v7641_v19, %v3361_v31  ;;  %v3371_v19 = vrot.slane %v7207_v27, 4  ;;  %v1844_v27 = vsel %vm457_vm0, %v1842_v49, %v1843_v16  ;;  %v7681_v31 = vld [vmem:[#allocation48_spill] sm:$0xff]  ;;  %v7682_v34 = vld [vmem:[#allocation46_spill] sm:$0xff] }
 0x128   : > { %5252 = vmatmul.mubr.f32.gmra.mrb[8].mxu0 %v3352_v59  ;;  %4881 = vmatprep.mubr.f32.mxu1 %v6828_v4  ;;  %v3367_v4 = vsel %vm1037_vm1, %v7646_v2, %v3366_v20  ;;  %v3376_v2 = vrot.slane %v7216_v5, 4  ;;  %v5907_v5 = vld [vmem:[#allocation2 + $0x130] sm:$0xf]  ;;  %v5910_v59 = vld [vmem:[#allocation2 + $0x178] sm:$0xf] }
 0x129   : > { %5254 = vmatprep.mubr.f32.mxu0 %v6717_v6  ;;  %v1837_v6 = vrot.slane %v7290_v44, 2  ;;  %v1850_v48 = vrot.slane %v5907_v5, 2  ;;  %v1865_v40 = vrot.slane %v5910_v59, 2 }
 0x12a   : > { %v3377_v0 = vsel %vm1037_vm1, %v7654_v42, %v3376_v2  ;;  %v3386_v42 = vrot.slane %v7230_v38, 4  ;;  %v5909_v38 = vld [vmem:[#allocation2 + $0x160] sm:$0xf] }
 0x12b   : > { %4882 = vmatmul.mubr.f32.gmra.mrb[28].mxu1 %v6830_v11  ;;  %v1841_v11 = vsel %vm457_vm0, %v1838_v46, %v1840_v55  ;;  %v1851_v53 = vsel %vm457_vm0, %v1848_v37, %v1850_v48  ;;  %v1860_v43 = vrot.slane %v5909_v38, 2  ;;  %v1866_v61 = vsel %vm457_vm0, %v1863_v30, %v1865_v40 }
 0x12c   : > { %5255 = vmatmul.mubr.f32.gmra.mrb[10].mxu0 %v3357_v62  ;;  %4884 = vmatprep.mubr.f32.mxu1 %v6851_v21  ;;  %v5906_v21 = vld [vmem:[#allocation2 + $0x118] sm:$0xf]  ;;  %v3387_v57 = vsel %vm1037_vm1, %v6822_v1, %v3386_v42  ;;  %v1870_v62 = vrot.slane %v5911_v58, 2 }
 0x12d   : > { %5257 = vmatprep.mubr.f32.mxu0 %v7640_v18  ;;  %v1839_v18 = vsel %vm457_vm0, %v1837_v6, %v1838_v46  ;;  %v1845_v44 = vrot.slane %v5906_v21, 2  ;;  %v1861_v10 = vsel %vm457_vm0, %v1858_v22, %v1860_v43  ;;  %v3406_v46 = vrot.slane %v7279_v35, 4 }
 0x12f   : > { %4885 = vmatmul.mubr.f32.gmra.mrb[30].mxu1 %v6853_v36  ;;  %v1846_v36 = vsel %vm457_vm0, %v1843_v16, %v1845_v44 }
 0x130   : > { %5258 = vmatmul.mubr.f32.gmra.mrb[12].mxu0 %v3362_v23  ;;  %4943 = vmatprep.mubr.f32.mxu1 %v1839_v18 }
 0x131   : > { %5260 = vmatprep.mubr.f32.mxu0 %v7645_v12  ;;  %v3372_v12 = vsel %vm1037_vm1, %v6763_v14, %v3371_v19  ;;  %v1849_v14 = vsel %vm457_vm0, %v1847_v9, %v1848_v37 }
 0x133   : > { %4944 = vmatmul.mubr.f32.vlgmr.msra.gmra.mrb[16].mxu1 %v1841_v11 }
 0x134   : > { %5261 = vmatmul.mubr.f32.gmra.mrb[14].mxu0 %v3367_v4  ;;  %4946 = vmatprep.mubr.f32.mxu1 %v1844_v27  ;;  %v7436_v27 = vld [vmem:[%s7524_s2] ss:$0 sm:$0xff] }
 0x135   : > { %5263 = vmatprep.mubr.f32.mxu0 %v6780_v50  ;;  %v3381_v50 = vrot.slane %v7222_v47, 4  ;;  %v1854_v47 = vsel %vm457_vm0, %v1852_v45, %v1853_v15 }
 0x137   : > { %4947 = vmatmul.mubr.f32.gmra.mrb[18].mxu1 %v1846_v36 }
 0x138   : > { %5264 = vmatmul.mubr.f32.gmra.mrb[16].mxu0 %v3372_v12  ;;  %4949 = vmatprep.mubr.f32.mxu1 %v1849_v14 }
 0x139   : > { %5266 = vmatprep.mubr.f32.mxu0 %v7653_v39  ;;  %v3382_v39 = vsel %vm1037_vm1, %v7659_v41, %v3381_v50  ;;  %v3391_v41 = vrot.slane %v7242_v54, 4  ;;  %v3396_v54 = vrot.slane %v7258_v63, 4  ;;  %v7683_v63 = vld [vmem:[#allocation47_spill] sm:$0xff] }
 0x13a   : > { %v1875_v23 = vrot.slane %v7683_v63, 2 }
 0x13b   : > { %4950 = vmatmul.mubr.f32.gmra.mrb[20].mxu1 %v1851_v53  ;;  %v3392_v1 = vsel %vm1037_vm1, %v6845_v60, %v3391_v41  ;;  %v3397_v20 = vsel %vm1037_vm1, %v7682_v34, %v3396_v54  ;;  %v1871_v60 = vsel %vm457_vm0, %v7239_v28, %v1870_v62  ;;  %v3407_v28 = vsel %vm1037_vm1, %v6992_v24, %v3406_v46 }
 0x13c   : > { %5267 = vmatmul.mubr.f32.gmra.mrb[18].mxu0 %v3377_v0  ;;  %4952 = vmatprep.mubr.f32.mxu1 %v1854_v47 }
 0x13d   : > { %5269 = vmatprep.mubr.f32.mxu0 %v7658_v17  ;;  %v1859_v17 = vsel %vm457_vm0, %v1857_v26, %v1858_v22 }
 0x13f   : > { %4953 = vmatmul.mubr.f32.gmra.mrb[22].mxu1 %v1856_v3 }
 0x140   : > { %5270 = vmatmul.mubr.f32.gmra.mrb[20].mxu0 %v3382_v39  ;;  %4955 = vmatprep.mubr.f32.mxu1 %v1859_v17 }
 0x141   : > { %5272 = vmatprep.mubr.f32.mxu0 %v6841_v13  ;;  %v1864_v13 = vsel %vm457_vm0, %v1862_v56, %v1863_v30 }
 0x143   : > { %4956 = vmatmul.mubr.f32.gmra.mrb[24].mxu1 %v1861_v10 }
 0x144   : > { %5273 = vmatmul.mubr.f32.gmra.mrb[22].mxu0 %v3387_v57  ;;  %4958 = vmatprep.mubr.f32.mxu1 %v1864_v13 }
 0x145   : > { %5275 = vmatprep.mubr.f32.mxu0 %v6864_v29  ;;  %v3401_v29 = vrot.slane %v7271_v25, 4  ;;  %v1876_v25 = vsel %vm457_vm0, %v7252_v32, %v1875_v23 }
 0x147   : > { %4959 = vmatmul.mubr.f32.gmra.mrb[26].mxu1 %v1866_v61  ;;  %v3402_v6 = vsel %vm1037_vm1, %v6992_v24, %v3401_v29 }
 0x148   : > { %5276 = vmatmul.mubr.f32.gmra.mrb[24].mxu0 %v3392_v1  ;;  %4961 = vmatprep.mubr.f32.mxu1 %v7256_v51 }
 0x149   : > { %5278 = vmatprep.mubr.f32.mxu0 %v7681_v31 }
 0x14b   : > { %4962 = vmatmul.mubr.f32.gmra.mrb[28].mxu1 %v1871_v60 }
 0x14c   : > { %5279 = vmatmul.mubr.f32.gmra.mrb[26].mxu0 %v3397_v20  ;;  %4964 = vmatprep.mubr.f32.mxu1 %v7269_v7 }
 0x14d   : > { %5281 = vmatprep.mubr.f32.mxu0 %v6992_v24 }
 0x14f   : > { %4965 = vmatmul.mubr.f32.gmra.mrb[30].mxu1 %v1876_v25 }
 0x150   : > { %5282 = vmatmul.mubr.f32.gmra.mrb[28].mxu0 %v3402_v6 }
 0x151   : > { %5284 = vmatprep.mubr.f32.mxu0 %v6992_v24 }
 0x154   : > { %5285 = vmatmul.mubr.f32.gmra.mrb[30].mxu0 %v3407_v28 }
 0x1c6   : > { %v4841_v51 = vpop.f32.mrb[0].mxu1 }
 0x1c7   : > { %v1541_v8 = vpop.f32.mrb[1].mxu1 }
 0x1ca   : > { %v4844_v55 = vpop.f32.mrb[2].mxu1 }
 0x1cb   : > { %v1551_v4 = vpop.f32.mrb[3].mxu1 }
 0x1ce   : > { %v4847_v18 = vpop.f32.mrb[4].mxu1 }
 0x1cf   : > { %v1561_v35 = vpop.f32.mrb[5].mxu1 }
 0x1d2   : > { %v4850_v19 = vpop.f32.mrb[6].mxu1 }
 0x1d3   : > { %v1571_v49 = vpop.f32.mrb[7].mxu1 }
 0x1d6   : > { %v4853_v7 = vpop.f32.mrb[8].mxu1 }
 0x1d7   : > { %v1581_v16 = vpop.f32.mrb[9].mxu1 }
 0x1da   : > { %v4856_v11 = vpop.f32.mrb[10].mxu1 }
 0x1db   : > { %v1591_v32 = vpop.f32.mrb[11].mxu1 }
 0x1de   : > { %v7425_v21 = vpop.f32.mrb[12].mxu1 }
 0x1df   : > { %v7427_v44 = vpop.f32.mrb[13].mxu1 }
 0x1e2   : > { %v7429_v24 = vpop.f32.mrb[14].mxu1 }
 0x1e3   : > { %v7431_v2 = vpop.f32.mrb[15].mxu1 }
 0x1eb   : > { %v5241_v12 = vpop.f32.mrb[0].mxu0 }
 0x1ec   : > { %v5591_v9 = vadd.f32 %v5241_v12, %v4841_v51  ;;  %v3506_v37 = vpop.f32.mrb[1].mxu0 }
 0x1ed   : > { %v5592_v36 = vadd.f32 %v3506_v37, %v1541_v8 }
 0x1ee   : > { %v3705_v0 = vadd.f32 %v5591_v9, %v7436_v27 }
 0x1ef   : > { %v3704_v5 = vadd.f32 %v5592_v36, %v7436_v27  ;;  %v5244_v48 = vpop.f32.mrb[2].mxu0 }
 0x1f0   : > { %v3737_v14 = vmax.f32 %v3705_v0, 0.0  ;;  %v5593_v50 = vadd.f32 %v5244_v48, %v4844_v55  ;;  %v3516_v45 = vpop.f32.mrb[3].mxu0 }
 0x1f1   : > { %v3736_v15 = vmax.f32 %v3704_v5, 0.0  ;;  %v5594_v53 = vadd.f32 %v3516_v45, %v1551_v4 }
 0x1f2   : > { %3769 = vst [vmem:[%s7444_s29 + $0x8] sm:$0xff] %v3737_v14  ;;  %v3707_v33 = vadd.f32 %v5593_v50, %v7436_v27 }
 0x1f3   : > { %3768 = vst [vmem:[%s7444_s29] sm:$0xff] %v3736_v15  ;;  %v3706_v52 = vadd.f32 %v5594_v53, %v7436_v27  ;;  %v5247_v42 = vpop.f32.mrb[4].mxu0 }
 0x1f4   : > { %v3739_v39 = vmax.f32 %v3707_v33, 0.0  ;;  %v5595_v47 = vadd.f32 %v5247_v42, %v4847_v18  ;;  %v3526_v26 = vpop.f32.mrb[5].mxu0 }
 0x1f5   : > { %v3738_v22 = vmax.f32 %v3706_v52, 0.0  ;;  %v5596_v3 = vadd.f32 %v3526_v26, %v1561_v35 }
 0x1f6   : > { %3771 = vst [vmem:[%s7444_s29 + $0x18] sm:$0xff] %v3739_v39  ;;  %v3709_v57 = vadd.f32 %v5595_v47, %v7436_v27 }
 0x1f7   : > { %3770 = vst [vmem:[%s7444_s29 + $0x10] sm:$0xff] %v3738_v22  ;;  %v3708_v38 = vadd.f32 %v5596_v3, %v7436_v27  ;;  %v5250_v43 = vpop.f32.mrb[6].mxu0 }
 0x1f8   : > { %v3741_v17 = vmax.f32 %v3709_v57, 0.0  ;;  %v5597_v41 = vadd.f32 %v5250_v43, %v4850_v19  ;;  %v3536_v56 = vpop.f32.mrb[7].mxu0 }
 0x1f9   : > { %v3740_v30 = vmax.f32 %v3708_v38, 0.0  ;;  %v5598_v10 = vadd.f32 %v3536_v56, %v1571_v49 }
 0x1fa   : > { %3773 = vst [vmem:[%s7444_s29 + $0x28] sm:$0xff] %v3741_v17  ;;  %v3711_v59 = vadd.f32 %v5597_v41, %v7436_v27 }
 0x1fb   : > { %3772 = vst [vmem:[%s7444_s29 + $0x20] sm:$0xff] %v3740_v30  ;;  %v3710_v40 = vadd.f32 %v5598_v10, %v7436_v27  ;;  %v5253_v1 = vpop.f32.mrb[8].mxu0 }
 0x1fc   : > { %v3743_v13 = vmax.f32 %v3711_v59, 0.0  ;;  %v5599_v54 = vadd.f32 %v5253_v1, %v4853_v7  ;;  %v3546_v61 = vpop.f32.mrb[9].mxu0 }
 0x1fd   : > { %v3742_v58 = vmax.f32 %v3710_v40, 0.0  ;;  %v5600_v62 = vadd.f32 %v3546_v61, %v1581_v16 }
 0x1fe   : > { %3775 = vst [vmem:[%s7444_s29 + $0x38] sm:$0xff] %v3743_v13  ;;  %v3713_v31 = vadd.f32 %v5599_v54, %v7436_v27 }
 0x1ff   : > { %3774 = vst [vmem:[%s7444_s29 + $0x30] sm:$0xff] %v3742_v58  ;;  %v3712_v34 = vadd.f32 %v5600_v62, %v7436_v27  ;;  %v5256_v20 = vpop.f32.mrb[10].mxu0 }
 0x200   : > { %v3745_v29 = vmax.f32 %v3713_v31, 0.0  ;;  %v5601_v60 = vadd.f32 %v5256_v20, %v4856_v11  ;;  %v3556_v63 = vpop.f32.mrb[11].mxu0 }
 0x201   : > { %v3744_v23 = vmax.f32 %v3712_v34, 0.0  ;;  %v5602_v6 = vadd.f32 %v3556_v63, %v1591_v32 }
 0x202   : > { %3777 = vst [vmem:[%s7444_s29 + $0x48] sm:$0xff] %v3745_v29  ;;  %v3715_v46 = vadd.f32 %v5601_v60, %v7436_v27 }
 0x203   : > { %3776 = vst [vmem:[%s7444_s29 + $0x40] sm:$0xff] %v3744_v23  ;;  %v3714_v25 = vadd.f32 %v5602_v6, %v7436_v27  ;;  %v5259_v28 = vpop.f32.mrb[12].mxu0 }
 0x204   : > { %v3747_v51 = vmax.f32 %v3715_v46, 0.0  ;;  %v5603_v8 = vadd.f32 %v5259_v28, %v7425_v21  ;;  %v3566_v55 = vpop.f32.mrb[13].mxu0 }
 0x205   : > { %v3746_v4 = vmax.f32 %v3714_v25, 0.0  ;;  %v5604_v18 = vadd.f32 %v3566_v55, %v7427_v44 }
 0x206   : > { %3779 = vst [vmem:[%s7444_s29 + $0x58] sm:$0xff] %v3747_v51  ;;  %v3717_v35 = vadd.f32 %v5603_v8, %v7436_v27  ;;  %v4945_v44 = vpop.f32.mrb[16].mxu1 }
 0x207   : > { %3778 = vst [vmem:[%s7444_s29 + $0x50] sm:$0xff] %v3746_v4  ;;  %v3716_v19 = vadd.f32 %v5604_v18, %v7436_v27  ;;  %v5262_v49 = vpop.f32.mrb[14].mxu0  ;;  %v2055_v36 = vpop.f32.mrb[17].mxu1 }
 0x208   : > { %v3749_v7 = vmax.f32 %v3717_v35, 0.0  ;;  %v5605_v16 = vadd.f32 %v5262_v49, %v7429_v24  ;;  %v3576_v11 = vpop.f32.mrb[15].mxu0 }
 0x209   : > { %v3748_v32 = vmax.f32 %v3716_v19, 0.0  ;;  %v5606_v21 = vadd.f32 %v3576_v11, %v7431_v2 }
 0x20a   : > { %3781 = vst [vmem:[%s7444_s29 + $0x68] sm:$0xff] %v3749_v7  ;;  %v3719_v12 = vadd.f32 %v5605_v16, %v7436_v27  ;;  %v4948_v50 = vpop.f32.mrb[18].mxu1 }
 0x20b   : > { %3780 = vst [vmem:[%s7444_s29 + $0x60] sm:$0xff] %v3748_v32  ;;  %v3718_v9 = vadd.f32 %v5606_v21, %v7436_v27  ;;  %v5265_v37 = vpop.f32.mrb[16].mxu0  ;;  %v2065_v53 = vpop.f32.mrb[19].mxu1 }
 0x20c   : > { %v3751_v0 = vmax.f32 %v3719_v12, 0.0  ;;  %v5607_v5 = vadd.f32 %v5265_v37, %v4945_v44  ;;  %v3586_v48 = vpop.f32.mrb[17].mxu0 }
 0x20d   : > { %v3750_v24 = vmax.f32 %v3718_v9, 0.0  ;;  %v5608_v14 = vadd.f32 %v3586_v48, %v2055_v36 }
 0x20e   : > { %3783 = vst [vmem:[%s7444_s29 + $0x78] sm:$0xff] %v3751_v0  ;;  %v3721_v2 = vadd.f32 %v5607_v5, %v7436_v27  ;;  %v4951_v22 = vpop.f32.mrb[20].mxu1 }
 0x20f   : > { %3782 = vst [vmem:[%s7444_s29 + $0x70] sm:$0xff] %v3750_v24  ;;  %v3720_v45 = vadd.f32 %v5608_v14, %v7436_v27  ;;  %v5268_v15 = vpop.f32.mrb[18].mxu0  ;;  %v2075_v38 = vpop.f32.mrb[21].mxu1 }
 0x210   : > { %v3753_v33 = vmax.f32 %v3721_v2, 0.0  ;;  %v5609_v52 = vadd.f32 %v5268_v15, %v4948_v50  ;;  %v3596_v42 = vpop.f32.mrb[19].mxu0 }
 0x211   : > { %v3752_v39 = vmax.f32 %v3720_v45, 0.0  ;;  %v5610_v47 = vadd.f32 %v3596_v42, %v2065_v53 }
 0x212   : > { %3785 = vst [vmem:[%s7444_s29 + $0x88] sm:$0xff] %v3753_v33  ;;  %v3723_v26 = vadd.f32 %v5609_v52, %v7436_v27  ;;  %v4954_v59 = vpop.f32.mrb[22].mxu1 }
 0x213   : > { %3784 = vst [vmem:[%s7444_s29 + $0x80] sm:$0xff] %v3752_v39  ;;  %v3722_v3 = vadd.f32 %v5610_v47, %v7436_v27  ;;  %v5271_v57 = vpop.f32.mrb[20].mxu0  ;;  %v2085_v13 = vpop.f32.mrb[23].mxu1 }
 0x214   : > { %v3755_v43 = vmax.f32 %v3723_v26, 0.0  ;;  %v5611_v17 = vadd.f32 %v5271_v57, %v4951_v22  ;;  %v3606_v41 = vpop.f32.mrb[21].mxu0 }
 0x215   : > { %v3754_v56 = vmax.f32 %v3722_v3, 0.0  ;;  %v5612_v30 = vadd.f32 %v3606_v41, %v2075_v38 }
 0x216   : > { %3787 = vst [vmem:[%s7444_s29 + $0x98] sm:$0xff] %v3755_v43  ;;  %v3725_v10 = vadd.f32 %v5611_v17, %v7436_v27  ;;  %v4957_v20 = vpop.f32.mrb[24].mxu1 }
 0x217   : > { %3786 = vst [vmem:[%s7444_s29 + $0x90] sm:$0xff] %v3754_v56  ;;  %v3724_v40 = vadd.f32 %v5612_v30, %v7436_v27  ;;  %v5274_v1 = vpop.f32.mrb[22].mxu0  ;;  %v2095_v63 = vpop.f32.mrb[25].mxu1 }
 0x218   : > { %v3757_v54 = vmax.f32 %v3725_v10, 0.0  ;;  %v5613_v61 = vadd.f32 %v5274_v1, %v4954_v59  ;;  %v3616_v58 = vpop.f32.mrb[23].mxu0 }
 0x219   : > { %v3756_v62 = vmax.f32 %v3724_v40, 0.0  ;;  %v5614_v31 = vadd.f32 %v3616_v58, %v2085_v13 }
 0x21a   : > { %3789 = vst [vmem:[%s7444_s29 + $0xa8] sm:$0xff] %v3757_v54  ;;  %v3727_v34 = vadd.f32 %v5613_v61, %v7436_v27  ;;  %v4960_v8 = vpop.f32.mrb[26].mxu1 }
 0x21b   : > { %3788 = vst [vmem:[%s7444_s29 + $0xa0] sm:$0xff] %v3756_v62  ;;  %v3726_v29 = vadd.f32 %v5614_v31, %v7436_v27  ;;  %v5277_v60 = vpop.f32.mrb[24].mxu0  ;;  %v2105_v18 = vpop.f32.mrb[27].mxu1 }
 0x21c   : > { %v3759_v23 = vmax.f32 %v3727_v34, 0.0  ;;  %v5615_v6 = vadd.f32 %v5277_v60, %v4957_v20  ;;  %v3626_v46 = vpop.f32.mrb[25].mxu0 }
 0x21d   : > { %v3758_v25 = vmax.f32 %v3726_v29, 0.0  ;;  %v5616_v28 = vadd.f32 %v3626_v46, %v2095_v63 }
 0x21e   : > { %3791 = vst [vmem:[%s7444_s29 + $0xb8] sm:$0xff] %v3759_v23  ;;  %v3729_v51 = vadd.f32 %v5615_v6, %v7436_v27  ;;  %v4963_v32 = vpop.f32.mrb[28].mxu1 }
 0x21f   : > { %3790 = vst [vmem:[%s7444_s29 + $0xb0] sm:$0xff] %v3758_v25  ;;  %v3728_v55 = vadd.f32 %v5616_v28, %v7436_v27  ;;  %v5280_v4 = vpop.f32.mrb[26].mxu0  ;;  %v2115_v44 = vpop.f32.mrb[29].mxu1 }
 0x220   : > { %v3761_v35 = vmax.f32 %v3729_v51, 0.0  ;;  %v5617_v19 = vadd.f32 %v5280_v4, %v4960_v8  ;;  %v3636_v49 = vpop.f32.mrb[27].mxu0 }
 0x221   : > { %v3760_v7 = vmax.f32 %v3728_v55, 0.0  ;;  %v5618_v16 = vadd.f32 %v3636_v49, %v2105_v18 }
 0x222   : > { %3793 = vst [vmem:[%s7444_s29 + $0xc8] sm:$0xff] %v3761_v35  ;;  %v3731_v11 = vadd.f32 %v5617_v19, %v7436_v27  ;;  %v4966_v24 = vpop.f32.mrb[30].mxu1 }
 0x223   : > { %3792 = vst [vmem:[%s7444_s29 + $0xc0] sm:$0xff] %v3760_v7  ;;  %v3730_v21 = vadd.f32 %v5618_v16, %v7436_v27  ;;  %v5283_v12 = vpop.f32.mrb[28].mxu0  ;;  %v2125_v50 = vpop.f32.mrb[31].mxu1 }
 0x224   : > { %v3763_v9 = vmax.f32 %v3731_v11, 0.0  ;;  %v5619_v37 = vadd.f32 %v5283_v12, %v4963_v32  ;;  %v3646_v36 = vpop.f32.mrb[29].mxu0 }
 0x225   : > { %v3762_v0 = vmax.f32 %v3730_v21, 0.0  ;;  %v5620_v5 = vadd.f32 %v3646_v36, %v2115_v44 }
 0x226   : > { %3795 = vst [vmem:[%s7444_s29 + $0xd8] sm:$0xff] %v3763_v9  ;;  %v3733_v48 = vadd.f32 %v5619_v37, %v7436_v27 }
 0x227   : > { %3794 = vst [vmem:[%s7444_s29 + $0xd0] sm:$0xff] %v3762_v0  ;;  %v3732_v14 = vadd.f32 %v5620_v5, %v7436_v27  ;;  %v5286_v2 = vpop.f32.mrb[30].mxu0 }
 0x228   : > { %v3765_v45 = vmax.f32 %v3733_v48, 0.0  ;;  %v5621_v15 = vadd.f32 %v5286_v2, %v4966_v24  ;;  %v3656_v53 = vpop.f32.mrb[31].mxu0 }
 0x229   : > { %v3764_v33 = vmax.f32 %v3732_v14, 0.0  ;;  %v5622_v52 = vadd.f32 %v3656_v53, %v2125_v50 }
 0x22a   : > { %3797 = vst [vmem:[%s7444_s29 + $0xe8] sm:$0xff] %v3765_v45  ;;  %v3735_v42 = vadd.f32 %v5621_v15, %v7436_v27 }
 0x22b   : > { %3796 = vst [vmem:[%s7444_s29 + $0xe0] sm:$0xff] %v3764_v33  ;;  %v3734_v39 = vadd.f32 %v5622_v52, %v7436_v27 }
 0x22c   : > { %v3767_v47 = vmax.f32 %v3735_v42, 0.0 }
 0x22d   : > { %v3766_v26 = vmax.f32 %v3734_v39, 0.0 }
 0x22e   : > { %3799 = vst [vmem:[%s7444_s29 + $0xf8] sm:$0xff] %v3767_v47 }
 0x22f   : > { %3798 = vst [vmem:[%s7444_s29 + $0xf0] sm:$0xff] %v3766_v26 }
 0x230 PF: > { %s13_s14 = sadd.s32 1, %s5934_s14   ;;  %s7684_s12 = smov %s5930_s13 }
 0x231   : > { %p10_p5 = scmp.ge.s32.totalorder %s13_s14, 4   ;;  %s7685_s13 = smov %s7687_s15 }
 0x233   :  { %12 = sbr.rel (!%p10_p5) target bundleno = 2 (0x2), region = 78 }

</bundles_post_ra>
